<compile_context>
chip_gen: v5e
topology: v5e:2x2
jax: 0.10.0
libtpu: 0.0.40
codegen_flags: <defaults>
</compile_context>

<pallas_src>
import functools

import jax
import jax.numpy as jnp
from jax.experimental import pallas as pl
from jax.experimental.pallas import tpu as pltpu


def _encoder_layer_kernel(x_ref, wqkv_ref, bqkv_ref, wo_ref, bo_ref,
                          g1_ref, be1_ref, w1_ref, b1_ref,
                          w2_ref, b2_ref, g2_ref, be2_ref, o_ref,
                          *, heads, eps=1e-5):
    B, C, S = x_ref.shape
    D = C
    hd = D // heads
    T = B * S
    scale = 1.0 / float(hd) ** 0.5

    # ---- (B, C, S) channel-major input -> token-major (T, D), in-VMEM ----
    x_cs = x_ref[...]                                             # (B, C, S) f32
    x = jnp.concatenate([x_cs[b].T for b in range(B)], axis=0)    # (T, D) f32

    # ---- QKV projection: one (T, D) @ (D, 3D) matmul, bf16 operands ----
    qkv = jnp.dot(x.astype(jnp.bfloat16), wqkv_ref[...],
                  preferred_element_type=jnp.float32) + bqkv_ref[...]
    q = qkv[:, 0 * D:1 * D] * scale
    k = qkv[:, 1 * D:2 * D]
    v = qkv[:, 2 * D:3 * D]

    # head-major relayout: (T, D) -> (heads*B, S, hd); pure data movement
    # (lane slices + leading-dim stack/merge only — no mixed-dim transposes).
    def to_heads(a):
        a3 = a.reshape(B, S, D)
        a4 = jnp.stack([a3[:, :, h * hd:(h + 1) * hd] for h in range(heads)],
                       axis=0)                                    # (H, B, S, hd)
        return a4.reshape(heads * B, S, hd)

    qh = to_heads(q)
    kh = to_heads(k)
    vh = to_heads(v)

    # ---- batched attention over n = head*B (softmax in f32) ----
    s_l = jnp.einsum('nqd,nkd->nqk', qh, kh,
                     preferred_element_type=jnp.float32)          # (H*B, S, S)
    s_l = s_l - jnp.max(s_l, axis=-1, keepdims=True)
    p = jnp.exp(s_l)
    p = p * pl.reciprocal(jnp.sum(p, axis=-1, keepdims=True), approx=True)
    ctx = jnp.einsum('nqk,nkd->nqd', p, vh,
                     preferred_element_type=jnp.float32)          # (H*B, S, hd)

    # back to (T, D): leading split + lane concat + leading merge
    ctx4 = ctx.reshape(heads, B, S, hd)
    ctx_td = jnp.concatenate([ctx4[h] for h in range(heads)], axis=-1)  # (B,S,D)
    ctx_td = ctx_td.reshape(T, D)

    attn = jnp.dot(ctx_td.astype(jnp.bfloat16), wo_ref[...],
                   preferred_element_type=jnp.float32) + bo_ref[...]

    # ---- residual + LayerNorm1 (post-norm), f32 VPU math ----
    y = x + attn
    mu = jnp.mean(y, axis=-1, keepdims=True)
    var = jnp.mean(jnp.square(y - mu), axis=-1, keepdims=True)
    y = (y - mu) * jax.lax.rsqrt(var + eps) * g1_ref[...] + be1_ref[...]

    # ---- feed-forward (Linear -> ReLU -> Linear), dropout = identity ----
    h1 = jnp.dot(y.astype(jnp.bfloat16), w1_ref[...],
                 preferred_element_type=jnp.float32) + b1_ref[...]
    h1 = jnp.maximum(h1, 0.0)
    ff = jnp.dot(h1.astype(jnp.bfloat16), w2_ref[...],
                 preferred_element_type=jnp.float32) + b2_ref[...]

    # ---- residual + LayerNorm2 ----
    z = y + ff
    mu2 = jnp.mean(z, axis=-1, keepdims=True)
    var2 = jnp.mean(jnp.square(z - mu2), axis=-1, keepdims=True)
    z = (z - mu2) * jax.lax.rsqrt(var2 + eps) * g2_ref[...] + be2_ref[...]

    # ---- (T, D) -> (B, C, S) so the wrapper epilogue is a free reshape ----
    o_ref[...] = jnp.stack([z[b * S:(b + 1) * S, :].T for b in range(B)], axis=0)


def init_params(key, dim, dff):
    """Deterministic synthetic weights for one TransformerEncoderLayer.

    Matmul weights (wqkv, wo, w1, w2) are stored bf16 (MXU operands);
    biases and LayerNorm parameters stay f32.
    """
    keys = jax.random.split(key, 8)

    def w(k, shape, scale=0.05):
        return jax.random.normal(k, shape, jnp.float32) * scale

    wqkv = w(keys[0], (dim, 3 * dim)).astype(jnp.bfloat16)   # in_proj_weight.T
    bqkv = w(keys[1], (1, 3 * dim), 0.01)                    # in_proj_bias
    wo = w(keys[2], (dim, dim)).astype(jnp.bfloat16)         # out_proj.weight.T
    bo = w(keys[3], (1, dim), 0.01)
    g1 = jnp.ones((1, dim), jnp.float32)                     # norm1.weight
    be1 = jnp.zeros((1, dim), jnp.float32)                   # norm1.bias
    w1 = w(keys[4], (dim, dff)).astype(jnp.bfloat16)         # linear1.weight.T
    b1 = w(keys[5], (1, dff), 0.01)
    w2 = w(keys[6], (dff, dim)).astype(jnp.bfloat16)         # linear2.weight.T
    b2 = w(keys[7], (1, dim), 0.01)
    g2 = jnp.ones((1, dim), jnp.float32)                     # norm2.weight
    be2 = jnp.zeros((1, dim), jnp.float32)                   # norm2.bias
    return [wqkv, bqkv, wo, bo, g1, be1, w1, b1, w2, b2, g2, be2]


def transformer_block(x, params, heads=4):
    """x: (B, C, H, W) float32 -> (B, C, H, W) float32."""
    B, C, H, W = x.shape
    S = H * W
    # flatten(2) only — the C<->S swap happens inside the kernel (no HBM
    # relayout pass in the wrapper; these reshapes are free).
    x_cs = x.reshape(B, C, S)

    def full_spec(shape):
        return pl.BlockSpec(shape, lambda i, n=len(shape): (0,) * n)

    kernel = functools.partial(_encoder_layer_kernel, heads=heads)
    out = pl.pallas_call(
        kernel,
        out_shape=jax.ShapeDtypeStruct((B, C, S), jnp.float32),
        grid=(1,),
        in_specs=[full_spec((B, C, S))] + [full_spec(p.shape) for p in params],
        out_specs=full_spec((B, C, S)),
        compiler_params=pltpu.CompilerParams(
            dimension_semantics=("arbitrary",)),
    )(x_cs, *params)

    return out.reshape(B, C, H, W)


if __name__ == "__main__":
    # Small shapes consistent with the module: dim (=C) divisible by heads=4.
    B, C, H, W = 2, 32, 8, 8          # -> seq len S = 64, d_model = 32
    HEADS = 4
    DFF = 2048                        # PyTorch TransformerEncoderLayer default

    key = jax.random.PRNGKey(0)
    kx, kp = jax.random.split(key)
    x = jax.random.normal(kx, (B, C, H, W), jnp.float32)
    params = init_params(kp, C, DFF)

    y = transformer_block(x, params, heads=HEADS)
    y = jax.block_until_ready(y)
    assert y.shape == (B, C, H, W)
    assert bool(jnp.all(jnp.isfinite(y)))
    print("KERNEL_OK")
</pallas_src>

<mosaic_0001>
module attributes {stable_mosaic.version = 11 : i64} {
  func.func @_encoder_layer_kernel(%arg0: i32, %arg1: memref<2x32x64xf32, #tpu.memory_space<vmem>>, %arg2: memref<32x96xbf16, #tpu.memory_space<vmem>>, %arg3: memref<1x96xf32, #tpu.memory_space<vmem>>, %arg4: memref<32x32xbf16, #tpu.memory_space<vmem>>, %arg5: memref<1x32xf32, #tpu.memory_space<vmem>>, %arg6: memref<1x32xf32, #tpu.memory_space<vmem>>, %arg7: memref<1x32xf32, #tpu.memory_space<vmem>>, %arg8: memref<32x2048xbf16, #tpu.memory_space<vmem>>, %arg9: memref<1x2048xf32, #tpu.memory_space<vmem>>, %arg10: memref<2048x32xbf16, #tpu.memory_space<vmem>>, %arg11: memref<1x32xf32, #tpu.memory_space<vmem>>, %arg12: memref<1x32xf32, #tpu.memory_space<vmem>>, %arg13: memref<1x32xf32, #tpu.memory_space<vmem>>, %arg14: memref<2x32x64xf32, #tpu.memory_space<vmem>>) attributes {dimension_semantics = [#tpu.dimension_semantics<arbitrary>], iteration_bounds = array<i64: 1>, scalar_prefetch = 0 : i64, scratch_operands = 0 : i64, tpu.core_type = #tpu.core_type<tc>, window_params = [{pipeline_mode = #tpu.pipeline_mode<synchronous>, transform_indices = @transform_0, window_bounds = array<i64: 2, 32, 64>}, {pipeline_mode = #tpu.pipeline_mode<synchronous>, transform_indices = @transform_1, window_bounds = array<i64: 32, 96>}, {pipeline_mode = #tpu.pipeline_mode<synchronous>, transform_indices = @transform_2, window_bounds = array<i64: 1, 96>}, {pipeline_mode = #tpu.pipeline_mode<synchronous>, transform_indices = @transform_3, window_bounds = array<i64: 32, 32>}, {pipeline_mode = #tpu.pipeline_mode<synchronous>, transform_indices = @transform_4, window_bounds = array<i64: 1, 32>}, {pipeline_mode = #tpu.pipeline_mode<synchronous>, transform_indices = @transform_5, window_bounds = array<i64: 1, 32>}, {pipeline_mode = #tpu.pipeline_mode<synchronous>, transform_indices = @transform_6, window_bounds = array<i64: 1, 32>}, {pipeline_mode = #tpu.pipeline_mode<synchronous>, transform_indices = @transform_7, window_bounds = array<i64: 32, 2048>}, {pipeline_mode = #tpu.pipeline_mode<synchronous>, transform_indices = @transform_8, window_bounds = array<i64: 1, 2048>}, {pipeline_mode = #tpu.pipeline_mode<synchronous>, transform_indices = @transform_9, window_bounds = array<i64: 2048, 32>}, {pipeline_mode = #tpu.pipeline_mode<synchronous>, transform_indices = @transform_10, window_bounds = array<i64: 1, 32>}, {pipeline_mode = #tpu.pipeline_mode<synchronous>, transform_indices = @transform_11, window_bounds = array<i64: 1, 32>}, {pipeline_mode = #tpu.pipeline_mode<synchronous>, transform_indices = @transform_12, window_bounds = array<i64: 1, 32>}, {pipeline_mode = #tpu.pipeline_mode<synchronous>, transform_indices = @transform_13, window_bounds = array<i64: 2, 32, 64>}]} {
    %c0 = arith.constant 0 : index
    %c0_0 = arith.constant 0 : index
    %c0_1 = arith.constant 0 : index
    %0 = vector.load %arg1[%c0, %c0_0, %c0_1] : memref<2x32x64xf32, #tpu.memory_space<vmem>>, vector<2x32x64xf32>
    %1 = vector.extract_strided_slice %0 {offsets = [0, 0, 0], sizes = [1, 32, 64], strides = [1, 1, 1]} : vector<2x32x64xf32> to vector<1x32x64xf32>
    %2 = vector.shape_cast %1 : vector<1x32x64xf32> to vector<32x64xf32>
    %3 = tpu.transpose %2, [1, 0] : vector<32x64xf32> -> vector<64x32xf32>
    %4 = vector.extract_strided_slice %0 {offsets = [1, 0, 0], sizes = [1, 32, 64], strides = [1, 1, 1]} : vector<2x32x64xf32> to vector<1x32x64xf32>
    %5 = vector.shape_cast %4 : vector<1x32x64xf32> to vector<32x64xf32>
    %6 = tpu.transpose %5, [1, 0] : vector<32x64xf32> -> vector<64x32xf32>
    %7 = tpu.concatenate %3, %6 in 0 : vector<64x32xf32>, vector<64x32xf32> -> vector<128x32xf32>
    %8 = arith.truncf %7 : vector<128x32xf32> to vector<128x32xbf16>
    %c0_2 = arith.constant 0 : index
    %c0_3 = arith.constant 0 : index
    %9 = vector.load %arg2[%c0_2, %c0_3] : memref<32x96xbf16, #tpu.memory_space<vmem>>, vector<32x96xbf16>
    %cst = arith.constant dense<0.000000e+00> : vector<128x96xf32>
    %10 = tpu.matmul %8, %9, %cst {dimension_numbers = #tpu.dot_dimension_numbers<[1], [0], [0], [1], [0, 0, 1, 1], [], []>} : vector<128x32xbf16>, vector<32x96xbf16>, vector<128x96xf32> -> vector<128x96xf32>
    %c0_4 = arith.constant 0 : index
    %c0_5 = arith.constant 0 : index
    %11 = vector.load %arg3[%c0_4, %c0_5] : memref<1x96xf32, #tpu.memory_space<vmem>>, vector<1x96xf32>
    %12 = vector.broadcast %11 : vector<1x96xf32> to vector<128x96xf32>
    %13 = arith.addf %10, %12 : vector<128x96xf32>
    %14 = vector.extract_strided_slice %13 {offsets = [0, 0], sizes = [128, 32], strides = [1, 1]} : vector<128x96xf32> to vector<128x32xf32>
    %cst_6 = arith.constant 0.353553385 : f32
    %15 = vector.broadcast %cst_6 : f32 to vector<128x32xf32>
    %16 = arith.mulf %14, %15 : vector<128x32xf32>
    %17 = vector.extract_strided_slice %13 {offsets = [0, 32], sizes = [128, 32], strides = [1, 1]} : vector<128x96xf32> to vector<128x32xf32>
    %18 = vector.extract_strided_slice %13 {offsets = [0, 64], sizes = [128, 32], strides = [1, 1]} : vector<128x96xf32> to vector<128x32xf32>
    %19 = vector.shape_cast %16 : vector<128x32xf32> to vector<2x64x32xf32>
    %20 = vector.extract_strided_slice %19 {offsets = [0, 0, 0], sizes = [2, 64, 8], strides = [1, 1, 1]} : vector<2x64x32xf32> to vector<2x64x8xf32>
    %21 = vector.extract_strided_slice %19 {offsets = [0, 0, 8], sizes = [2, 64, 8], strides = [1, 1, 1]} : vector<2x64x32xf32> to vector<2x64x8xf32>
    %22 = vector.extract_strided_slice %19 {offsets = [0, 0, 16], sizes = [2, 64, 8], strides = [1, 1, 1]} : vector<2x64x32xf32> to vector<2x64x8xf32>
    %23 = vector.extract_strided_slice %19 {offsets = [0, 0, 24], sizes = [2, 64, 8], strides = [1, 1, 1]} : vector<2x64x32xf32> to vector<2x64x8xf32>
    %24 = vector.shape_cast %20 : vector<2x64x8xf32> to vector<1x2x64x8xf32>
    %25 = vector.shape_cast %21 : vector<2x64x8xf32> to vector<1x2x64x8xf32>
    %26 = vector.shape_cast %22 : vector<2x64x8xf32> to vector<1x2x64x8xf32>
    %27 = vector.shape_cast %23 : vector<2x64x8xf32> to vector<1x2x64x8xf32>
    %28 = tpu.concatenate %24, %25, %26, %27 in 0 : vector<1x2x64x8xf32>, vector<1x2x64x8xf32>, vector<1x2x64x8xf32>, vector<1x2x64x8xf32> -> vector<4x2x64x8xf32>
    %29 = vector.shape_cast %28 : vector<4x2x64x8xf32> to vector<8x64x8xf32>
    %30 = vector.shape_cast %17 : vector<128x32xf32> to vector<2x64x32xf32>
    %31 = vector.extract_strided_slice %30 {offsets = [0, 0, 0], sizes = [2, 64, 8], strides = [1, 1, 1]} : vector<2x64x32xf32> to vector<2x64x8xf32>
    %32 = vector.extract_strided_slice %30 {offsets = [0, 0, 8], sizes = [2, 64, 8], strides = [1, 1, 1]} : vector<2x64x32xf32> to vector<2x64x8xf32>
    %33 = vector.extract_strided_slice %30 {offsets = [0, 0, 16], sizes = [2, 64, 8], strides = [1, 1, 1]} : vector<2x64x32xf32> to vector<2x64x8xf32>
    %34 = vector.extract_strided_slice %30 {offsets = [0, 0, 24], sizes = [2, 64, 8], strides = [1, 1, 1]} : vector<2x64x32xf32> to vector<2x64x8xf32>
    %35 = vector.shape_cast %31 : vector<2x64x8xf32> to vector<1x2x64x8xf32>
    %36 = vector.shape_cast %32 : vector<2x64x8xf32> to vector<1x2x64x8xf32>
    %37 = vector.shape_cast %33 : vector<2x64x8xf32> to vector<1x2x64x8xf32>
    %38 = vector.shape_cast %34 : vector<2x64x8xf32> to vector<1x2x64x8xf32>
    %39 = tpu.concatenate %35, %36, %37, %38 in 0 : vector<1x2x64x8xf32>, vector<1x2x64x8xf32>, vector<1x2x64x8xf32>, vector<1x2x64x8xf32> -> vector<4x2x64x8xf32>
    %40 = vector.shape_cast %39 : vector<4x2x64x8xf32> to vector<8x64x8xf32>
    %41 = vector.shape_cast %18 : vector<128x32xf32> to vector<2x64x32xf32>
    %42 = vector.extract_strided_slice %41 {offsets = [0, 0, 0], sizes = [2, 64, 8], strides = [1, 1, 1]} : vector<2x64x32xf32> to vector<2x64x8xf32>
    %43 = vector.extract_strided_slice %41 {offsets = [0, 0, 8], sizes = [2, 64, 8], strides = [1, 1, 1]} : vector<2x64x32xf32> to vector<2x64x8xf32>
    %44 = vector.extract_strided_slice %41 {offsets = [0, 0, 16], sizes = [2, 64, 8], strides = [1, 1, 1]} : vector<2x64x32xf32> to vector<2x64x8xf32>
    %45 = vector.extract_strided_slice %41 {offsets = [0, 0, 24], sizes = [2, 64, 8], strides = [1, 1, 1]} : vector<2x64x32xf32> to vector<2x64x8xf32>
    %46 = vector.shape_cast %42 : vector<2x64x8xf32> to vector<1x2x64x8xf32>
    %47 = vector.shape_cast %43 : vector<2x64x8xf32> to vector<1x2x64x8xf32>
    %48 = vector.shape_cast %44 : vector<2x64x8xf32> to vector<1x2x64x8xf32>
    %49 = vector.shape_cast %45 : vector<2x64x8xf32> to vector<1x2x64x8xf32>
    %50 = tpu.concatenate %46, %47, %48, %49 in 0 : vector<1x2x64x8xf32>, vector<1x2x64x8xf32>, vector<1x2x64x8xf32>, vector<1x2x64x8xf32> -> vector<4x2x64x8xf32>
    %51 = vector.shape_cast %50 : vector<4x2x64x8xf32> to vector<8x64x8xf32>
    "tpu.trace_start"() <{level = 10 : i32, message = "nqd,nkd->nqk"}> : () -> ()
    %cst_7 = arith.constant dense<0.000000e+00> : vector<8x64x64xf32>
    %52 = tpu.matmul %29, %40, %cst_7 {dimension_numbers = #tpu.dot_dimension_numbers<[2], [2], [1], [1], [0, 0, 0, 1, 1, 1], [0], [0]>} : vector<8x64x8xf32>, vector<8x64x8xf32>, vector<8x64x64xf32> -> vector<8x64x64xf32>
    "tpu.trace_stop"() : () -> ()
    %cst_8 = arith.constant dense<0xFF800000> : vector<8x64xf32>
    %53 = vector.multi_reduction <maximumf>, %52, %cst_8 [2] : vector<8x64x64xf32> to vector<8x64xf32>
    %54 = vector.shape_cast %53 : vector<8x64xf32> to vector<8x64x1xf32>
    %55 = vector.broadcast %54 : vector<8x64x1xf32> to vector<8x64x64xf32>
    %56 = arith.subf %52, %55 : vector<8x64x64xf32>
    %57 = math.exp %56 : vector<8x64x64xf32>
    %cst_9 = arith.constant dense<0.000000e+00> : vector<8x64xf32>
    %58 = vector.multi_reduction <add>, %57, %cst_9 [2] : vector<8x64x64xf32> to vector<8x64xf32>
    %59 = vector.shape_cast %58 : vector<8x64xf32> to vector<8x64x1xf32>
    %60 = tpu.reciprocal %59 {approx = true} : vector<8x64x1xf32> -> vector<8x64x1xf32>
    %61 = vector.broadcast %60 : vector<8x64x1xf32> to vector<8x64x64xf32>
    %62 = arith.mulf %57, %61 : vector<8x64x64xf32>
    "tpu.trace_start"() <{level = 10 : i32, message = "nqk,nkd->nqd"}> : () -> ()
    %cst_10 = arith.constant dense<0.000000e+00> : vector<8x64x8xf32>
    %63 = tpu.matmul %62, %51, %cst_10 {dimension_numbers = #tpu.dot_dimension_numbers<[2], [1], [1], [2], [0, 0, 0, 1, 1, 2], [0], [0]>} : vector<8x64x64xf32>, vector<8x64x8xf32>, vector<8x64x8xf32> -> vector<8x64x8xf32>
    "tpu.trace_stop"() : () -> ()
    %64 = vector.shape_cast %63 : vector<8x64x8xf32> to vector<4x2x64x8xf32>
    %65 = vector.extract_strided_slice %64 {offsets = [0, 0, 0, 0], sizes = [1, 2, 64, 8], strides = [1, 1, 1, 1]} : vector<4x2x64x8xf32> to vector<1x2x64x8xf32>
    %66 = vector.shape_cast %65 : vector<1x2x64x8xf32> to vector<2x64x8xf32>
    %67 = vector.extract_strided_slice %64 {offsets = [1, 0, 0, 0], sizes = [1, 2, 64, 8], strides = [1, 1, 1, 1]} : vector<4x2x64x8xf32> to vector<1x2x64x8xf32>
    %68 = vector.shape_cast %67 : vector<1x2x64x8xf32> to vector<2x64x8xf32>
    %69 = vector.extract_strided_slice %64 {offsets = [2, 0, 0, 0], sizes = [1, 2, 64, 8], strides = [1, 1, 1, 1]} : vector<4x2x64x8xf32> to vector<1x2x64x8xf32>
    %70 = vector.shape_cast %69 : vector<1x2x64x8xf32> to vector<2x64x8xf32>
    %71 = vector.extract_strided_slice %64 {offsets = [3, 0, 0, 0], sizes = [1, 2, 64, 8], strides = [1, 1, 1, 1]} : vector<4x2x64x8xf32> to vector<1x2x64x8xf32>
    %72 = vector.shape_cast %71 : vector<1x2x64x8xf32> to vector<2x64x8xf32>
    %73 = tpu.concatenate %66, %68, %70, %72 in 2 : vector<2x64x8xf32>, vector<2x64x8xf32>, vector<2x64x8xf32>, vector<2x64x8xf32> -> vector<2x64x32xf32>
    %74 = vector.shape_cast %73 : vector<2x64x32xf32> to vector<128x32xf32>
    %75 = arith.truncf %74 : vector<128x32xf32> to vector<128x32xbf16>
    %c0_11 = arith.constant 0 : index
    %c0_12 = arith.constant 0 : index
    %76 = vector.load %arg4[%c0_11, %c0_12] : memref<32x32xbf16, #tpu.memory_space<vmem>>, vector<32x32xbf16>
    %cst_13 = arith.constant dense<0.000000e+00> : vector<128x32xf32>
    %77 = tpu.matmul %75, %76, %cst_13 {dimension_numbers = #tpu.dot_dimension_numbers<[1], [0], [0], [1], [0, 0, 1, 1], [], []>} : vector<128x32xbf16>, vector<32x32xbf16>, vector<128x32xf32> -> vector<128x32xf32>
    %c0_14 = arith.constant 0 : index
    %c0_15 = arith.constant 0 : index
    %78 = vector.load %arg5[%c0_14, %c0_15] : memref<1x32xf32, #tpu.memory_space<vmem>>, vector<1x32xf32>
    %79 = vector.broadcast %78 : vector<1x32xf32> to vector<128x32xf32>
    %80 = arith.addf %77, %79 : vector<128x32xf32>
    %81 = arith.addf %7, %80 : vector<128x32xf32>
    %cst_16 = arith.constant dense<0.000000e+00> : vector<128xf32>
    %82 = vector.multi_reduction <add>, %81, %cst_16 [1] : vector<128x32xf32> to vector<128xf32>
    %83 = vector.shape_cast %82 : vector<128xf32> to vector<128x1xf32>
    %cst_17 = arith.constant 3.200000e+01 : f32
    %84 = vector.broadcast %cst_17 : f32 to vector<128x1xf32>
    %85 = arith.divf %83, %84 : vector<128x1xf32>
    %86 = vector.broadcast %85 : vector<128x1xf32> to vector<128x32xf32>
    %87 = arith.subf %81, %86 : vector<128x32xf32>
    %88 = arith.mulf %87, %87 : vector<128x32xf32>
    %cst_18 = arith.constant dense<0.000000e+00> : vector<128xf32>
    %89 = vector.multi_reduction <add>, %88, %cst_18 [1] : vector<128x32xf32> to vector<128xf32>
    %90 = vector.shape_cast %89 : vector<128xf32> to vector<128x1xf32>
    %cst_19 = arith.constant 3.200000e+01 : f32
    %91 = vector.broadcast %cst_19 : f32 to vector<128x1xf32>
    %92 = arith.divf %90, %91 : vector<128x1xf32>
    %93 = vector.broadcast %85 : vector<128x1xf32> to vector<128x32xf32>
    %94 = arith.subf %81, %93 : vector<128x32xf32>
    %cst_20 = arith.constant 9.99999974E-6 : f32
    %95 = vector.broadcast %cst_20 : f32 to vector<128x1xf32>
    %96 = arith.addf %92, %95 : vector<128x1xf32>
    %97 = math.rsqrt %96 : vector<128x1xf32>
    %98 = vector.broadcast %97 : vector<128x1xf32> to vector<128x32xf32>
    %99 = arith.mulf %94, %98 : vector<128x32xf32>
    %c0_21 = arith.constant 0 : index
    %c0_22 = arith.constant 0 : index
    %100 = vector.load %arg6[%c0_21, %c0_22] : memref<1x32xf32, #tpu.memory_space<vmem>>, vector<1x32xf32>
    %101 = vector.broadcast %100 : vector<1x32xf32> to vector<128x32xf32>
    %102 = arith.mulf %99, %101 : vector<128x32xf32>
    %c0_23 = arith.constant 0 : index
    %c0_24 = arith.constant 0 : index
    %103 = vector.load %arg7[%c0_23, %c0_24] : memref<1x32xf32, #tpu.memory_space<vmem>>, vector<1x32xf32>
    %104 = vector.broadcast %103 : vector<1x32xf32> to vector<128x32xf32>
    %105 = arith.addf %102, %104 : vector<128x32xf32>
    %106 = arith.truncf %105 : vector<128x32xf32> to vector<128x32xbf16>
    %c0_25 = arith.constant 0 : index
    %c0_26 = arith.constant 0 : index
    %107 = vector.load %arg8[%c0_25, %c0_26] : memref<32x2048xbf16, #tpu.memory_space<vmem>>, vector<32x2048xbf16>
    %cst_27 = arith.constant dense<0.000000e+00> : vector<128x2048xf32>
    %108 = tpu.matmul %106, %107, %cst_27 {dimension_numbers = #tpu.dot_dimension_numbers<[1], [0], [0], [1], [0, 0, 1, 1], [], []>} : vector<128x32xbf16>, vector<32x2048xbf16>, vector<128x2048xf32> -> vector<128x2048xf32>
    %c0_28 = arith.constant 0 : index
    %c0_29 = arith.constant 0 : index
    %109 = vector.load %arg9[%c0_28, %c0_29] : memref<1x2048xf32, #tpu.memory_space<vmem>>, vector<1x2048xf32>
    %110 = vector.broadcast %109 : vector<1x2048xf32> to vector<128x2048xf32>
    %111 = arith.addf %108, %110 : vector<128x2048xf32>
    %cst_30 = arith.constant 0.000000e+00 : f32
    %112 = vector.broadcast %cst_30 : f32 to vector<128x2048xf32>
    %113 = arith.maximumf %111, %112 : vector<128x2048xf32>
    %114 = arith.truncf %113 : vector<128x2048xf32> to vector<128x2048xbf16>
    %c0_31 = arith.constant 0 : index
    %c0_32 = arith.constant 0 : index
    %115 = vector.load %arg10[%c0_31, %c0_32] : memref<2048x32xbf16, #tpu.memory_space<vmem>>, vector<2048x32xbf16>
    %cst_33 = arith.constant dense<0.000000e+00> : vector<128x32xf32>
    %116 = tpu.matmul %114, %115, %cst_33 {dimension_numbers = #tpu.dot_dimension_numbers<[1], [0], [0], [1], [0, 0, 1, 1], [], []>} : vector<128x2048xbf16>, vector<2048x32xbf16>, vector<128x32xf32> -> vector<128x32xf32>
    %c0_34 = arith.constant 0 : index
    %c0_35 = arith.constant 0 : index
    %117 = vector.load %arg11[%c0_34, %c0_35] : memref<1x32xf32, #tpu.memory_space<vmem>>, vector<1x32xf32>
    %118 = vector.broadcast %117 : vector<1x32xf32> to vector<128x32xf32>
    %119 = arith.addf %116, %118 : vector<128x32xf32>
    %120 = arith.addf %105, %119 : vector<128x32xf32>
    %cst_36 = arith.constant dense<0.000000e+00> : vector<128xf32>
    %121 = vector.multi_reduction <add>, %120, %cst_36 [1] : vector<128x32xf32> to vector<128xf32>
    %122 = vector.shape_cast %121 : vector<128xf32> to vector<128x1xf32>
    %cst_37 = arith.constant 3.200000e+01 : f32
    %123 = vector.broadcast %cst_37 : f32 to vector<128x1xf32>
    %124 = arith.divf %122, %123 : vector<128x1xf32>
    %125 = vector.broadcast %124 : vector<128x1xf32> to vector<128x32xf32>
    %126 = arith.subf %120, %125 : vector<128x32xf32>
    %127 = arith.mulf %126, %126 : vector<128x32xf32>
    %cst_38 = arith.constant dense<0.000000e+00> : vector<128xf32>
    %128 = vector.multi_reduction <add>, %127, %cst_38 [1] : vector<128x32xf32> to vector<128xf32>
    %129 = vector.shape_cast %128 : vector<128xf32> to vector<128x1xf32>
    %cst_39 = arith.constant 3.200000e+01 : f32
    %130 = vector.broadcast %cst_39 : f32 to vector<128x1xf32>
    %131 = arith.divf %129, %130 : vector<128x1xf32>
    %132 = vector.broadcast %124 : vector<128x1xf32> to vector<128x32xf32>
    %133 = arith.subf %120, %132 : vector<128x32xf32>
    %cst_40 = arith.constant 9.99999974E-6 : f32
    %134 = vector.broadcast %cst_40 : f32 to vector<128x1xf32>
    %135 = arith.addf %131, %134 : vector<128x1xf32>
    %136 = math.rsqrt %135 : vector<128x1xf32>
    %137 = vector.broadcast %136 : vector<128x1xf32> to vector<128x32xf32>
    %138 = arith.mulf %133, %137 : vector<128x32xf32>
    %c0_41 = arith.constant 0 : index
    %c0_42 = arith.constant 0 : index
    %139 = vector.load %arg12[%c0_41, %c0_42] : memref<1x32xf32, #tpu.memory_space<vmem>>, vector<1x32xf32>
    %140 = vector.broadcast %139 : vector<1x32xf32> to vector<128x32xf32>
    %141 = arith.mulf %138, %140 : vector<128x32xf32>
    %c0_43 = arith.constant 0 : index
    %c0_44 = arith.constant 0 : index
    %142 = vector.load %arg13[%c0_43, %c0_44] : memref<1x32xf32, #tpu.memory_space<vmem>>, vector<1x32xf32>
    %143 = vector.broadcast %142 : vector<1x32xf32> to vector<128x32xf32>
    %144 = arith.addf %141, %143 : vector<128x32xf32>
    %145 = vector.extract_strided_slice %144 {offsets = [0, 0], sizes = [64, 32], strides = [1, 1]} : vector<128x32xf32> to vector<64x32xf32>
    %146 = tpu.transpose %145, [1, 0] : vector<64x32xf32> -> vector<32x64xf32>
    %147 = vector.extract_strided_slice %144 {offsets = [64, 0], sizes = [64, 32], strides = [1, 1]} : vector<128x32xf32> to vector<64x32xf32>
    %148 = tpu.transpose %147, [1, 0] : vector<64x32xf32> -> vector<32x64xf32>
    %149 = vector.shape_cast %146 : vector<32x64xf32> to vector<1x32x64xf32>
    %150 = vector.shape_cast %148 : vector<32x64xf32> to vector<1x32x64xf32>
    %151 = tpu.concatenate %149, %150 in 0 : vector<1x32x64xf32>, vector<1x32x64xf32> -> vector<2x32x64xf32>
    %c0_45 = arith.constant 0 : index
    %c0_46 = arith.constant 0 : index
    %c0_47 = arith.constant 0 : index
    %152 = vector.load %arg14[%c0_45, %c0_46, %c0_47] : memref<2x32x64xf32, #tpu.memory_space<vmem>>, vector<2x32x64xf32>
    tpu.vector_store %arg14[%c0_45, %c0_46, %c0_47], %151 {strides = array<i32>} : memref<2x32x64xf32, #tpu.memory_space<vmem>>, vector<2x32x64xf32>,
    return
  }
  func.func @transform_0(%arg0: i32) -> (i32, i32, i32) {
    %c0_i32 = arith.constant 0 : i32
    %c0_i32_0 = arith.constant 0 : i32
    %c0_i32_1 = arith.constant 0 : i32
    %c0_i32_2 = arith.constant 0 : i32
    return %c0_i32, %c0_i32_0, %c0_i32_1 : i32, i32, i32
  }
  func.func @transform_1(%arg0: i32) -> (i32, i32) {
    %c0_i32 = arith.constant 0 : i32
    %c0_i32_0 = arith.constant 0 : i32
    %c0_i32_1 = arith.constant 0 : i32
    return %c0_i32, %c0_i32_0 : i32, i32
  }
  func.func @transform_2(%arg0: i32) -> (i32, i32) {
    %c0_i32 = arith.constant 0 : i32
    %c0_i32_0 = arith.constant 0 : i32
    %c0_i32_1 = arith.constant 0 : i32
    return %c0_i32, %c0_i32_0 : i32, i32
  }
  func.func @transform_3(%arg0: i32) -> (i32, i32) {
    %c0_i32 = arith.constant 0 : i32
    %c0_i32_0 = arith.constant 0 : i32
    %c0_i32_1 = arith.constant 0 : i32
    return %c0_i32, %c0_i32_0 : i32, i32
  }
  func.func @transform_4(%arg0: i32) -> (i32, i32) {
    %c0_i32 = arith.constant 0 : i32
    %c0_i32_0 = arith.constant 0 : i32
    %c0_i32_1 = arith.constant 0 : i32
    return %c0_i32, %c0_i32_0 : i32, i32
  }
  func.func @transform_5(%arg0: i32) -> (i32, i32) {
    %c0_i32 = arith.constant 0 : i32
    %c0_i32_0 = arith.constant 0 : i32
    %c0_i32_1 = arith.constant 0 : i32
    return %c0_i32, %c0_i32_0 : i32, i32
  }
  func.func @transform_6(%arg0: i32) -> (i32, i32) {
    %c0_i32 = arith.constant 0 : i32
    %c0_i32_0 = arith.constant 0 : i32
    %c0_i32_1 = arith.constant 0 : i32
    return %c0_i32, %c0_i32_0 : i32, i32
  }
  func.func @transform_7(%arg0: i32) -> (i32, i32) {
    %c0_i32 = arith.constant 0 : i32
    %c0_i32_0 = arith.constant 0 : i32
    %c0_i32_1 = arith.constant 0 : i32
    return %c0_i32, %c0_i32_0 : i32, i32
  }
  func.func @transform_8(%arg0: i32) -> (i32, i32) {
    %c0_i32 = arith.constant 0 : i32
    %c0_i32_0 = arith.constant 0 : i32
    %c0_i32_1 = arith.constant 0 : i32
    return %c0_i32, %c0_i32_0 : i32, i32
  }
  func.func @transform_9(%arg0: i32) -> (i32, i32) {
    %c0_i32 = arith.constant 0 : i32
    %c0_i32_0 = arith.constant 0 : i32
    %c0_i32_1 = arith.constant 0 : i32
    return %c0_i32, %c0_i32_0 : i32, i32
  }
  func.func @transform_10(%arg0: i32) -> (i32, i32) {
    %c0_i32 = arith.constant 0 : i32
    %c0_i32_0 = arith.constant 0 : i32
    %c0_i32_1 = arith.constant 0 : i32
    return %c0_i32, %c0_i32_0 : i32, i32
  }
  func.func @transform_11(%arg0: i32) -> (i32, i32) {
    %c0_i32 = arith.constant 0 : i32
    %c0_i32_0 = arith.constant 0 : i32
    %c0_i32_1 = arith.constant 0 : i32
    return %c0_i32, %c0_i32_0 : i32, i32
  }
  func.func @transform_12(%arg0: i32) -> (i32, i32) {
    %c0_i32 = arith.constant 0 : i32
    %c0_i32_0 = arith.constant 0 : i32
    %c0_i32_1 = arith.constant 0 : i32
    return %c0_i32, %c0_i32_0 : i32, i32
  }
  func.func @transform_13(%arg0: i32) -> (i32, i32, i32) {
    %c0_i32 = arith.constant 0 : i32
    %c0_i32_0 = arith.constant 0 : i32
    %c0_i32_1 = arith.constant 0 : i32
    %c0_i32_2 = arith.constant 0 : i32
    return %c0_i32, %c0_i32_0, %c0_i32_1 : i32, i32, i32
  }
}

</mosaic_0001>

<bundles_post_ra>
// kernel: tpu_custom_call.1
= control target key start
LH: loop header
LB: loop body
LE: loop exit
PB: predicated region body
PF: predicated region fallthrough
CT: control target
= control target key end

     0   :  { %s13496_s0 = inlined_call_operand.vmem [shape: f32[2,32,64], index: 0, kind: input, shape index: {}]   ;;  %s13497_s1 = inlined_call_operand.vmem [shape: bf16[32,96], index: 1, kind: input, shape index: {}]   ;;  %s13498_s2 = inlined_call_operand.vmem [shape: f32[1,96], index: 2, kind: input, shape index: {}]   ;;  %s13499_s3 = inlined_call_operand.vmem [shape: bf16[32,32], index: 3, kind: input, shape index: {}]   ;;  %s13500_s4 = inlined_call_operand.vmem [shape: f32[1,32], index: 4, kind: input, shape index: {}]   ;;  %s13501_s5 = inlined_call_operand.vmem [shape: f32[1,32], index: 5, kind: input, shape index: {}]   ;;  %s13502_s6 = inlined_call_operand.vmem [shape: f32[1,32], index: 6, kind: input, shape index: {}]   ;;  %s13503_s7 = inlined_call_operand.vmem [shape: bf16[32,2048], index: 7, kind: input, shape index: {}]   ;;  %s13504_s8 = inlined_call_operand.vmem [shape: f32[1,2048], index: 8, kind: input, shape index: {}]   ;;  %s13505_s9 = inlined_call_operand.vmem [shape: bf16[2048,32], index: 9, kind: input, shape index: {}]   ;;  %s13506_s10 = inlined_call_operand.vmem [shape: f32[1,32], index: 10, kind: input, shape index: {}]   ;;  %s13507_s11 = inlined_call_operand.vmem [shape: f32[1,32], index: 11, kind: input, shape index: {}]   ;;  %s13508_s12 = inlined_call_operand.vmem [shape: f32[1,32], index: 12, kind: input, shape index: {}]   ;;  %s13509_s13 = inlined_call_operand.hbm [shape: f32[2,32,64], index: 13, kind: output, shape index: {}]  }
   0x1   :  { %v46_v0 = vld [vmem:[%s13496_s0] sm:$0xff] }
   0x2   :  { %54 = vxpose.xlu0.b32.start [1/4] (short) (narrow) %v46_v0, 64  ;;  %v50_v1 = vld [vmem:[%s13496_s0 + $0x20] sm:$0xff] }
   0x3   :  { %86 = vxpose.xlu1.b32.start [1/4] (short) (narrow) %v50_v1, 64 }
   0x4   :  { %18 = vsyncpa [#allocation3], 0  ;;  %v47_v2 = vld [vmem:[%s13496_s0 + $0x8] sm:$0xff]  ;;  %v48_v4 = vld [vmem:[%s13496_s0 + $0x10] sm:$0xff]  ;;  %vm146_vm0 = vcmask 261120   ;;  %s8889_s28 = smov 96  }
   0x5   :  { %v51_v3 = vld [vmem:[%s13496_s0 + $0x28] sm:$0xff]  ;;  %v52_v5 = vld [vmem:[%s13496_s0 + $0x30] sm:$0xff]  ;;  %v49_v6 = vld [vmem:[%s13496_s0 + $0x18] sm:$0xff]  ;;  %s8890_s29 = smov 120   ;;  %s8891_s30 = smov 104   ;;  %vm476_vm1 = vcmask 64512  }
   0x6   :  { %v53_v7 = vld [vmem:[%s13496_s0 + $0x38] sm:$0xff]  ;;  %v8079_v8 = vld [vmem:[%s13497_s1 + $0x8] sm:$0xff]  ;;  %v8078_v9 = vld [vmem:[%s13497_s1] sm:$0xff]  ;;  %vm1173_vm2 = vcmask 523264   ;;  %s8893_s14 = smov 64   ;;  %s8894_s15 = smov 8  }
   0x7   :  { %177 = vmatpush.bf16.msra.mxu0 %v8079_v8  ;;  %v9059_v34 = vld [vmem:[%s13498_s2] ss:$0 sm:$0xff]  ;;  %s8892_s2 = smov 112   ;;  %s8895_s16 = smov 24   ;;  %vm2798_vm3 = vcmask 130048   ;;  %vm2815_vm4 = vcmask 195584  }
   0x8   :  { %s8896_s17 = smov 16   ;;  %s7074_s27 = sshll.u32 %s13509_s13, 4  ;;  %s7075_s27 = int_to_ptr.hbm [resolvable:$true] %s7074_s27 }
   0x9   :  { %s8898_s0 = smov [#allocation2]  }
   0xa   :  { %55 = vxpose.xlu0.b32.cont [2/4] (short) (narrow) %v47_v2, 64  ;;  %s7072_s1 = sshll.u32 %s8898_s0, 4  ;;  %s7073_s1 = int_to_ptr.vmem [resolvable:$true] %s7072_s1 }
   0xb   :  { %87 = vxpose.xlu1.b32.cont [2/4] (short) (narrow) %v51_v3, 64  ;;  %178 = vmatpush.bf16.msra.mxu0 %v8078_v9 }
  0x12   :  { %56 = vxpose.xlu0.b32.cont [3/4] (short) (narrow) %v48_v4, 64 }
  0x13   :  { %88 = vxpose.xlu1.b32.cont [3/4] (short) (narrow) %v52_v5, 64 }
  0x1a   :  { %57 = vxpose.xlu0.b32.end [4/4] (short) (narrow) %v49_v6, 64 }
  0x1b   :  { %89 = vxpose.xlu1.b32.end [4/4] (short) (narrow) %v53_v7, 64 }
  0xa6   :  { %v9000_v10 = vpop.trf.xlu0 }
  0xa7   :  { %13615 = vst [vmem:[#allocation5_spill] sm:$0xff] %v9000_v10  ;;  %v9021_v19 = vpop.trf.xlu1 }
  0xa8   :  { %13621 = vst [vmem:[#allocation11_spill] sm:$0xff] %v9021_v19 }
  0xae   :  { %v9002_v11 = vpop.trf.xlu0 }
  0xaf   :  { %13616 = vst [vmem:[#allocation6_spill] sm:$0xff] %v9002_v11  ;;  %v118_v12 = vpack.c.bf16 %v9002_v11, %v9000_v10  ;;  %v9027_v22 = vpop.trf.xlu1 }
  0xb0   :  { %13624 = vst [vmem:[#allocation14_spill] sm:$0xff] %v9027_v22  ;;  %v122_v25 = vpack.c.bf16 %v9027_v22, %v9021_v19 }
  0xb1   :  { %7094 = vmatmul.msk.bf16.vlgmr.msra.gmra.mxu0 %vm146_vm0, %v118_v12 }
  0xb6   :  { %v9007_v13 = vpop.trf.xlu0 }
  0xb7   :  { %13617 = vst [vmem:[#allocation7_spill] sm:$0xff] %v9007_v13  ;;  %v9032_v24 = vpop.trf.xlu1 }
  0xb8   :  { %13625 = vst [vmem:[#allocation15_spill] sm:$0xff] %v9032_v24 }
  0xbe   :  { %v9009_v14 = vpop.trf.xlu0 }
  0xbf   :  { %13618 = vst [vmem:[#allocation8_spill] sm:$0xff] %v9009_v14  ;;  %v119_v15 = vpack.c.bf16 %v9009_v14, %v9007_v13  ;;  %v9037_v26 = vpop.trf.xlu1 }
  0xc0   :  { %13626 = vst [vmem:[#allocation16_spill] sm:$0xff] %v9037_v26  ;;  %v123_v28 = vpack.c.bf16 %v9037_v26, %v9032_v24 }
  0xc1   :  { %7095 = vmatmul.msk.bf16.gmra.mxu0 %vm146_vm0, %v119_v15 }
  0xc6   :  { %v9014_v16 = vpop.trf.xlu0 }
  0xc7   :  { %13619 = vst [vmem:[#allocation9_spill] sm:$0xff] %v9014_v16  ;;  %v9039_v27 = vpop.trf.xlu1 }
  0xc8   :  { %13627 = vst [vmem:[#allocation17_spill] sm:$0xff] %v9039_v27 }
  0xce   :  { %v9016_v17 = vpop.trf.xlu0 }
  0xcf   :  { %13620 = vst [vmem:[#allocation10_spill] sm:$0xff] %v9016_v17  ;;  %v120_v18 = vpack.c.bf16 %v9016_v17, %v9014_v16  ;;  %v9044_v29 = vpop.trf.xlu1 }
  0xd0   :  { %13628 = vst [vmem:[#allocation18_spill] sm:$0xff] %v9044_v29  ;;  %v124_v30 = vpack.c.bf16 %v9044_v29, %v9039_v27 }
  0xd1   :  { %7096 = vmatmul.msk.bf16.gmra.mxu0 %vm146_vm0, %v120_v18 }
  0xd6   :  { %v9023_v20 = vpop.trf.xlu0 }
  0xd7   :  { %13622 = vst [vmem:[#allocation12_spill] sm:$0xff] %v9023_v20  ;;  %v9048_v31 = vpop.trf.xlu1 }
  0xd8   :  { %13629 = vst [vmem:[#allocation19_spill] sm:$0xff] %v9048_v31 }
  0xde   :  { %v9025_v21 = vpop.trf.xlu0 }
  0xdf   :  { %13623 = vst [vmem:[#allocation13_spill] sm:$0xff] %v9025_v21  ;;  %v121_v23 = vpack.c.bf16 %v9025_v21, %v9023_v20  ;;  %v9051_v32 = vpop.trf.xlu1 }
  0xe0   :  { %13630 = vst [vmem:[#allocation20_spill] sm:$0xff] %v9051_v32  ;;  %v125_v33 = vpack.c.bf16 %v9051_v32, %v9048_v31 }
  0xe1   :  { %7097 = vmatmul.msk.bf16.gmra.mxu0 %vm146_vm0, %v121_v23 }
  0xf1   :  { %7098 = vmatmul.msk.bf16.gmra.mxu0 %vm146_vm0, %v122_v25 }
 0x101   :  { %7099 = vmatmul.msk.bf16.gmra.mxu0 %vm146_vm0, %v123_v28 }
 0x111   :  { %7100 = vmatmul.msk.bf16.gmra.mxu0 %vm146_vm0, %v124_v30 }
 0x121   :  { %7101 = vmatmul.msk.bf16.gmra.mxu0 %vm146_vm0, %v125_v33 }
 0x12e   :  { %v180_v35 = vpop.f32.mrf.mxu0 }
 0x12f   :  { %v9062_v36 = vadd.f32 %v9059_v34, %v180_v35 }
 0x131   :  { %13631 = vst [vmem:[#allocation21_spill] sm:$0xff] %v9062_v36  ;;  %460 = vrot.lane.b32.xlu0 %v9062_v36, %s8889_s28  ;;  %364 = vrot.lane.b32.xlu2 %v9062_v36, %s8890_s29  ;;  %v9069_v37 = vmul.f32 0.35355338, %v9062_v36 }
 0x133   :  { %316 = vrot.lane.b32.xlu1 %v9069_v37, %s8891_s30 }
 0x136   :  { %v182_v38 = vpop.f32.mrf.mxu0 }
 0x137   :  { %v9074_v39 = vadd.f32 %v9059_v34, %v182_v38 }
 0x139   :  { %13632 = vst [vmem:[#allocation22_spill] sm:$0xff] %v9074_v39  ;;  %428 = vrot.lane.b32.xlu0 %v9062_v36, %s8891_s30  ;;  %396 = vrot.lane.b32.xlu2 %v9062_v36, %s8892_s2  ;;  %v9081_v40 = vmul.f32 0.35355338, %v9074_v39 }
 0x13b   :  { %286 = vrot.lane.b32.xlu1 %v9081_v40, %s8892_s2 }
 0x13e   :  { %v185_v41 = vpop.f32.mrf.mxu0 }
 0x13f   :  { %v9086_v42 = vadd.f32 %v9059_v34, %v185_v41 }
 0x141   :  { %13633 = vst [vmem:[#allocation23_spill] sm:$0xff] %v9086_v42  ;;  %366 = vrot.lane.b32.xlu2 %v9074_v39, %s8890_s29  ;;  %252 = vrot.lane.b32.xlu0 %v9069_v37, %s8890_s29  ;;  %v9093_v43 = vmul.f32 0.35355338, %v9086_v42 }
 0x143   :  { %256 = vrot.lane.b32.xlu1 %v9093_v43, %s8890_s29 }
 0x146   :  { %v187_v44 = vpop.f32.mrf.mxu0 }
 0x147   :  { %v9098_v45 = vadd.f32 %v9059_v34, %v187_v44 }
 0x149   :  { %398 = vrot.lane.b32.xlu2 %v9074_v39, %s8892_s2  ;;  %284 = vrot.lane.b32.xlu0 %v9069_v37, %s8892_s2  ;;  %v9145_v55 = vmul.f32 0.35355338, %v9098_v45 }
 0x14b   :  { %466 = vrot.lane.b32.xlu1 %v9098_v45, %s8889_s28 }
 0x14e   :  { %v190_v46 = vpop.f32.mrf.mxu0 }
 0x14f   :  { %v9107_v47 = vadd.f32 %v9059_v34, %v190_v46 }
 0x151   :  { %13634 = vst [vmem:[#allocation24_spill] sm:$0xff] %v9107_v47  ;;  %254 = vrot.lane.b32.xlu2 %v9081_v40, %s8890_s29  ;;  %462 = vrot.lane.b32.xlu0 %v9074_v39, %s8889_s28  ;;  %v9127_v51 = vmul.f32 0.35355338, %v9107_v47 }
 0x153   :  { %468 = vrot.lane.b32.xlu1 %v9107_v47, %s8889_s28 }
 0x156   :  { %v192_v48 = vpop.f32.mrf.mxu0 }
 0x157   :  { %v9116_v49 = vadd.f32 %v9059_v34, %v192_v48 }
 0x159   :  { %13635 = vst [vmem:[#allocation25_spill] sm:$0xff] %v9116_v49  ;;  %430 = vrot.lane.b32.xlu0 %v9074_v39, %s8891_s30  ;;  %368 = vrot.lane.b32.xlu2 %v9086_v42, %s8890_s29  ;;  %v9185_v0 = vmul.f32 0.35355338, %v9116_v49 }
 0x15b   :  { %404 = vrot.lane.b32.xlu1 %v9107_v47, %s8892_s2 }
 0x15e   :  { %v195_v52 = vpop.f32.mrf.mxu0 }
 0x15f   :  { %v9142_v54 = vadd.f32 %v9059_v34, %v195_v52 }
 0x161   :  { %464 = vrot.lane.b32.xlu0 %v9086_v42, %s8889_s28  ;;  %370 = vrot.lane.b32.xlu2 %v9098_v45, %s8890_s29  ;;  %v9165_v59 = vmul.f32 0.35355338, %v9142_v54 }
 0x163   :  { %260 = vrot.lane.b32.xlu1 %v9127_v51, %s8890_s29 }
 0x166   :  { %v197_v53 = vpop.f32.mrf.mxu0 }
 0x167   :  { %v9148_v56 = vadd.f32 %v9059_v34, %v197_v53 }
 0x169   :  { %400 = vrot.lane.b32.xlu0 %v9086_v42, %s8892_s2  ;;  %434 = vrot.lane.b32.xlu2 %v9098_v45, %s8891_s30  ;;  %v9203_v4 = vmul.f32 0.35355338, %v9148_v56 }
 0x16b   :  { %406 = vrot.lane.b32.xlu1 %v9116_v49, %s8892_s2 }
 0x16e   :  { %v200_v58 = vpop.f32.mrf.mxu0 }
 0x16f   :  { %v9213_v8 = vadd.f32 %v9059_v34, %v200_v58 }
 0x171   :  { %432 = vrot.lane.b32.xlu0 %v9086_v42, %s8891_s30  ;;  %258 = vrot.lane.b32.xlu2 %v9145_v55, %s8890_s29  ;;  %13642 = vst [vmem:[#allocation32_spill] sm:$0xff] %v9213_v8  ;;  %v9267_v52 = vmul.f32 0.35355338, %v9213_v8 }
 0x173   :  { %408 = vrot.lane.b32.xlu1 %v9142_v54, %s8892_s2 }
 0x176   :  { %v202_v60 = vpop.f32.mrf.mxu0 }
 0x177   :  { %v9182_v63 = vadd.f32 %v9059_v34, %v202_v60 }
 0x179   :  { %402 = vrot.lane.b32.xlu0 %v9098_v45, %s8892_s2  ;;  %372 = vrot.lane.b32.xlu2 %v9107_v47, %s8890_s29  ;;  %13637 = vst [vmem:[#allocation27_spill] sm:$0xff] %v9182_v63  ;;  %v9334_v19 = vmul.f32 0.35355338, %v9182_v63 }
 0x17b   :  { %440 = vrot.lane.b32.xlu1 %v9142_v54, %s8891_s30 }
 0x17e   :  { %v205_v61 = vpop.f32.mrf.mxu0 }
 0x17f   :  { %v9196_v3 = vadd.f32 %v9059_v34, %v205_v61 }
 0x181   :  { %436 = vrot.lane.b32.xlu0 %v9107_v47, %s8891_s30  ;;  %374 = vrot.lane.b32.xlu2 %v9116_v49, %s8890_s29  ;;  %13639 = vst [vmem:[#allocation29_spill] sm:$0xff] %v9196_v3 }
 0x183   :  { %264 = vrot.lane.b32.xlu1 %v9165_v59, %s8890_s29 }
 0x186   :  { %v207_v2 = vpop.f32.mrf.mxu0 }
 0x187   :  { %v9210_v6 = vadd.f32 %v9059_v34, %v207_v2 }
 0x189   :  { %438 = vrot.lane.b32.xlu0 %v9116_v49, %s8891_s30  ;;  %470 = vrot.lane.b32.xlu2 %v9116_v49, %s8889_s28  ;;  %13641 = vst [vmem:[#allocation31_spill] sm:$0xff] %v9210_v6 }
 0x18b   :  { %v9177_v62 = vpop.permute.xlu2 %364  ;;  %410 = vrot.lane.b32.xlu1 %v9148_v56, %s8892_s2 }
 0x18c   :  { %13636 = vst [vmem:[#allocation26_spill] sm:$0xff] %v9177_v62 }
 0x18e   :  { %v210_v7 = vpop.f32.mrf.mxu0 }
 0x18f   :  { %v9282_v61 = vadd.f32 %v9059_v34, %v210_v7 }
 0x191   :  { %262 = vrot.lane.b32.xlu2 %v9185_v0, %s8890_s29  ;;  %414 = vrot.lane.b32.xlu0 %v9182_v63, %s8892_s2  ;;  %13649 = vst [vmem:[#allocation39_spill] sm:$0xff] %v9282_v61 }
 0x193   :  { %v9191_v1 = vpop.permute.xlu2 %396  ;;  %442 = vrot.lane.b32.xlu1 %v9148_v56, %s8891_s30 }
 0x194   :  { %13638 = vst [vmem:[#allocation28_spill] sm:$0xff] %v9191_v1 }
 0x196   :  { %v212_v18 = vpop.f32.mrf.mxu0 }
 0x197   :  { %v9297_v57 = vadd.f32 %v9059_v34, %v212_v18 }
 0x199   :  { %416 = vrot.lane.b32.xlu0 %v9196_v3, %s8892_s2  ;;  %376 = vrot.lane.b32.xlu2 %v9142_v54, %s8890_s29  ;;  %13652 = vst [vmem:[#allocation42_spill] sm:$0xff] %v9297_v57 }
 0x19b   :  { %v9205_v5 = vpop.permute.xlu2 %366  ;;  %266 = vrot.lane.b32.xlu1 %v9203_v4, %s8890_s29 }
 0x19c   :  { %13640 = vst [vmem:[#allocation30_spill] sm:$0xff] %v9205_v5 }
 0x19e   :  { %v215_v30 = vpop.f32.mrf.mxu0 }
 0x19f   :  { %v9252_v41 = vadd.f32 %v9059_v34, %v215_v30 }
 0x1a1   :  { %556 = vrot.lane.b32.xlu0 %v9210_v6, %s8889_s28  ;;  %472 = vrot.lane.b32.xlu2 %v9142_v54, %s8889_s28  ;;  %13646 = vst [vmem:[#allocation36_spill] sm:$0xff] %v9252_v41 }
 0x1a3   :  { %v9219_v9 = vpop.permute.xlu2 %398  ;;  %380 = vrot.lane.b32.xlu1 %v9213_v8, %s8890_s29  ;;  %v9223_v12 = vpop.permute.xlu0 %460 }
 0x1a4   :  { %13643 = vst [vmem:[#allocation33_spill] sm:$0xff] %v9219_v9 }
 0x1a5   :  { %v9225_v15 = vpop.permute.xlu1 %316 }
 0x1a9   :  { %386 = vrot.lane.b32.xlu0 %v9210_v6, %s8890_s29  ;;  %378 = vrot.lane.b32.xlu2 %v9148_v56, %s8890_s29 }
 0x1ab   :  { %v9231_v23 = vpop.permute.xlu2 %254  ;;  %382 = vrot.lane.b32.xlu1 %v9182_v63, %s8890_s29  ;;  %v9235_v25 = vpop.permute.xlu0 %428 }
 0x1ac   :  { %13644 = vst [vmem:[#allocation34_spill] sm:$0xff] %v9235_v25 }
 0x1ad   :  { %v9237_v28 = vpop.permute.xlu1 %286 }
 0x1b1   :  { %418 = vrot.lane.b32.xlu0 %v9210_v6, %s8892_s2  ;;  %474 = vrot.lane.b32.xlu2 %v9148_v56, %s8889_s28 }
 0x1b3   :  { %v9243_v33 = vpop.permute.xlu2 %368  ;;  %554 = vrot.lane.b32.xlu1 %v9196_v3, %s8889_s28  ;;  %v9247_v35 = vpop.permute.xlu0 %252 }
 0x1b4   :  { %13645 = vst [vmem:[#allocation35_spill] sm:$0xff] %v9243_v33 }
 0x1b5   :  { %v9249_v38 = vpop.permute.xlu1 %256 }
 0x1b9   :  { %456 = vrot.lane.b32.xlu0 %v9252_v41, %s8891_s30  ;;  %550 = vrot.lane.b32.xlu2 %v9213_v8, %s8889_s28 }
 0x1bb   :  { %v9258_v44 = vpop.permute.xlu2 %370  ;;  %384 = vrot.lane.b32.xlu1 %v9196_v3, %s8890_s29  ;;  %v9262_v46 = vpop.permute.xlu0 %284 }
 0x1bc   :  { %13647 = vst [vmem:[#allocation37_spill] sm:$0xff] %v9258_v44 }
 0x1bd   :  { %v9264_v48 = vpop.permute.xlu1 %466 }
 0x1c1   :  { %318 = vrot.lane.b32.xlu0 %v9081_v40, %s8891_s30  ;;  %268 = vrot.lane.b32.xlu2 %v9267_v52, %s8890_s29 }
 0x1c3   :  { %v9273_v53 = vpop.permute.xlu2 %434  ;;  %288 = vrot.lane.b32.xlu1 %v9093_v43, %s8892_s2  ;;  %v9277_v58 = vpop.permute.xlu0 %462 }
 0x1c4   :  { %13648 = vst [vmem:[#allocation38_spill] sm:$0xff] %v9273_v53 }
 0x1c5   :  { %v9279_v60 = vpop.permute.xlu1 %468 }
 0x1c9   :  { %819 = vrot.lane.b32.xlu0 %v9219_v9, %s8889_s28  ;;  %552 = vrot.lane.b32.xlu2 %v9182_v63, %s8889_s28 }
 0x1cb   :  { %v9288_v2 = vpop.permute.xlu2 %258  ;;  %388 = vrot.lane.b32.xlu1 %v9282_v61, %s8890_s29  ;;  %v9292_v30 = vpop.permute.xlu0 %430 }
 0x1cc   :  { %13650 = vst [vmem:[#allocation40_spill] sm:$0xff] %v9292_v30 }
 0x1cd   :  { %v9294_v50 = vpop.permute.xlu1 %404 }
 0x1ce   :  { %13651 = vst [vmem:[#allocation41_spill] sm:$0xff] %v9294_v50 }
 0x1d1   :  { %558 = vrot.lane.b32.xlu2 %v9282_v61, %s8889_s28  ;;  %997 = vrot.lane.b32.xlu0 %v9292_v30, %s8889_s28 }
 0x1d3   :  { %v9303_v7 = vpop.permute.xlu2 %372  ;;  %390 = vrot.lane.b32.xlu1 %v9297_v57, %s8890_s29  ;;  %v9307_v32 = vpop.permute.xlu0 %464 }
 0x1d4   :  { %13653 = vst [vmem:[#allocation43_spill] sm:$0xff] %v9303_v7 }
 0x1d5   :  { %v9309_v31 = vpop.permute.xlu1 %260 }
 0x1d9   :  { %420 = vrot.lane.b32.xlu2 %v9282_v61, %s8892_s2 }
 0x1db   :  { %v9313_v18 = vpop.permute.xlu2 %374  ;;  %424 = vrot.lane.b32.xlu1 %v9252_v41, %s8892_s2  ;;  %v9317_v29 = vpop.permute.xlu0 %400 }
 0x1dc   :  { %13654 = vst [vmem:[#allocation44_spill] sm:$0xff] %v9313_v18 }
 0x1dd   :  { %13655 = vst [vmem:[#allocation45_spill] sm:$0xff] %v9317_v29  ;;  %v9319_v27 = vpop.permute.xlu1 %406 }
 0x1de   :  { %13656 = vst [vmem:[#allocation46_spill] sm:$0xff] %v9319_v27 }
 0x1e1   :  { %452 = vrot.lane.b32.xlu2 %v9282_v61, %s8891_s30 }
 0x1e3   :  { %v471_v26 = vpop.permute.xlu2 %470  ;;  %995 = vrot.lane.b32.xlu1 %v9235_v25, %s8889_s28  ;;  %v9325_v24 = vpop.permute.xlu0 %432 }
 0x1e4   :  { %13657 = vst [vmem:[#allocation47_spill] sm:$0xff] %v9325_v24  ;;  %999 = vrot.lane.b32.xlu0 %v9325_v24, %s8889_s28 }
 0x1e5   :  { %v9329_v22 = vpop.permute.xlu1 %408 }
 0x1e6   :  { %13658 = vst [vmem:[#allocation48_spill] sm:$0xff] %v9329_v22 }
 0x1e9   :  { %560 = vrot.lane.b32.xlu2 %v9297_v57, %s8889_s28 }
 0x1eb   :  { %v9336_v21 = vpop.permute.xlu2 %262  ;;  %270 = vrot.lane.b32.xlu1 %v9334_v19, %s8890_s29  ;;  %v9340_v20 = vpop.permute.xlu0 %402 }
 0x1ec   :  { %13659 = vst [vmem:[#allocation49_spill] sm:$0xff] %v9336_v21  ;;  %290 = vrot.lane.b32.xlu0 %v9145_v55, %s8892_s2 }
 0x1ed   :  { %13660 = vst [vmem:[#allocation50_spill] sm:$0xff] %v9340_v20  ;;  %v9344_v17 = vpop.permute.xlu1 %440 }
 0x1ee   :  { %13661 = vst [vmem:[#allocation51_spill] sm:$0xff] %v9344_v17 }
 0x1f1   :  { %422 = vrot.lane.b32.xlu2 %v9297_v57, %s8892_s2 }
 0x1f3   :  { %v9348_v16 = vpop.permute.xlu2 %376  ;;  %821 = vrot.lane.b32.xlu1 %v9317_v29, %s8889_s28  ;;  %v9352_v14 = vpop.permute.xlu0 %436 }
 0x1f4   :  { %13662 = vst [vmem:[#allocation52_spill] sm:$0xff] %v9348_v16  ;;  %1003 = vrot.lane.b32.xlu0 %v9352_v14, %s8889_s28 }
 0x1f5   :  { %13663 = vst [vmem:[#allocation53_spill] sm:$0xff] %v9352_v14  ;;  %v9356_v13 = vpop.permute.xlu1 %264  ;;  %v9383_v14 = vmul.f32 0.35355338, %v9196_v3 }
 0x1f6   :  { %13664 = vst [vmem:[#allocation54_spill] sm:$0xff] %v9356_v13 }
 0x1f9   :  { %454 = vrot.lane.b32.xlu2 %v9297_v57, %s8891_s30 }
 0x1fb   :  { %v473_v11 = vpop.permute.xlu2 %472  ;;  %823 = vrot.lane.b32.xlu1 %v9340_v20, %s8889_s28  ;;  %v9362_v10 = vpop.permute.xlu0 %438 }
 0x1fc   :  { %13665 = vst [vmem:[#allocation55_spill] sm:$0xff] %v9362_v10  ;;  %827 = vrot.lane.b32.xlu0 %v9319_v27, %s8889_s28 }
 0x1fd   :  { %v9366_v24 = vpop.permute.xlu1 %410 }
 0x1fe   :  { %13666 = vst [vmem:[#allocation56_spill] sm:$0xff] %v9366_v24 }
 0x201   :  { %562 = vrot.lane.b32.xlu2 %v9252_v41, %s8889_s28 }
 0x203   :  { %v9370_v25 = vpop.permute.xlu2 %378  ;;  %450 = vrot.lane.b32.xlu1 %v9210_v6, %s8891_s30  ;;  %v9374_v30 = vpop.permute.xlu0 %414 }
 0x204   :  { %13667 = vst [vmem:[#allocation57_spill] sm:$0xff] %v9374_v30 }
 0x205   :  { %v9376_v9 = vpop.permute.xlu1 %442 }
 0x206   :  { %13668 = vst [vmem:[#allocation58_spill] sm:$0xff] %v9376_v9  ;;  %1009 = vrot.lane.b32.xlu0 %v9376_v9, %s8889_s28 }
 0x209   :  { %392 = vrot.lane.b32.xlu2 %v9252_v41, %s8890_s29 }
 0x20b   :  { %v475_v29 = vpop.permute.xlu2 %474  ;;  %272 = vrot.lane.b32.xlu1 %v9383_v14, %s8890_s29  ;;  %v9387_v20 = vpop.permute.xlu0 %416 }
 0x20c   :  { %13669 = vst [vmem:[#allocation59_spill] sm:$0xff] %v9387_v20  ;;  %7102 = vmatpush.xpose.msk.msra.mxu1 %vm476_vm1, %v475_v29 }
 0x20d   :  { %v9390_v27 = vpop.permute.xlu1 %266 }
 0x20e   :  { %13670 = vst [vmem:[#allocation60_spill] sm:$0xff] %v9390_v27  ;;  %320 = vrot.lane.b32.xlu0 %v9093_v43, %s8891_s30 }
 0x210   :  { %7103 = vmatpush.xpose.msk.msra.mxu1 %vm476_vm1, %v473_v11  ;;  %v9413_v11 = vmul.f32 0.35355338, %v9210_v6 }
 0x211   :  { %639 = vrot.lane.b32.xlu2 %v9177_v62, %s8889_s28 }
 0x213   :  { %v9397_v9 = vpop.permute.xlu2 %550  ;;  %292 = vrot.lane.b32.xlu1 %v9127_v51, %s8892_s2  ;;  %v9401_v39 = vpop.permute.xlu0 %556 }
 0x214   :  { %7104 = vmatpush.xpose.msk.msra.mxu1 %vm476_vm1, %v471_v26 }
 0x215   :  { %v9404_v29 = vpop.permute.xlu1 %380 }
 0x216   :  { %13671 = vst [vmem:[#allocation61_spill] sm:$0xff] %v9404_v29  ;;  %322 = vrot.lane.b32.xlu0 %v9145_v55, %s8891_s30 }
 0x218   :  { %7105 = vmatpush.xpose.msk.msra.mxu1 %vm476_vm1, %v9279_v60 }
 0x219   :  { %817 = vrot.lane.b32.xlu2 %v9191_v1, %s8889_s28  ;;  %v217_v1 = vpop.f32.mrf.mxu0 }
 0x21b   :  { %v9415_v62 = vpop.permute.xlu2 %268  ;;  %274 = vrot.lane.b32.xlu1 %v9413_v11, %s8890_s29  ;;  %v9419_v26 = vpop.permute.xlu0 %386 }
 0x21c   :  { %13672 = vst [vmem:[#allocation62_spill] sm:$0xff] %v9419_v26  ;;  %7106 = vmatpush.xpose.msk.msra.mxu1 %vm476_vm1, %v9264_v48 }
 0x21d   :  { %v9423_v49 = vpop.permute.xlu1 %382 }
 0x21e   :  { %13673 = vst [vmem:[#allocation63_spill] sm:$0xff] %v9423_v49  ;;  %734 = vrot.lane.b32.xlu0 %v9419_v26, %s8889_s28 }
 0x220   :  { %7107 = vmatpush.xpose.msk.msra.mxu1 %vm476_vm1, %v9307_v32  ;;  %v9444_v32 = vadd.f32 %v9059_v34, %v217_v1 }
 0x221   :  { %412 = vrot.lane.b32.xlu2 %v9213_v8, %s8892_s2 }
 0x222   :  { %13675 = vst [vmem:[#allocation65_spill] sm:$0xff] %v9444_v32 }
 0x223   :  { %v9431_v60 = vpop.permute.xlu2 %552  ;;  %294 = vrot.lane.b32.xlu1 %v9185_v0, %s8892_s2  ;;  %v9437_v48 = vpop.permute.xlu0 %418 }
 0x224   :  { %7108 = vmatpush.xpose.msk.msra.mxu1 %vm476_vm1, %v9277_v58  ;;  %13674 = vst [vmem:[#allocation64_spill] sm:$0xff] %v9437_v48 }
 0x225   :  { %v9439_v6 = vpop.permute.xlu1 %554 }
 0x226   :  { %912 = vrot.lane.b32.xlu0 %v9437_v48, %s8889_s28 }
 0x228   :  { %7109 = vmatpush.xpose.msk.msra.mxu1 %vm476_vm1, %v9223_v12 }
 0x229   :  { %564 = vrot.lane.b32.xlu2 %v9444_v32, %s8889_s28 }
 0x22b   :  { %v9450_v26 = vpop.permute.xlu2 %558  ;;  %7110 = vmatmul.msk.f32.vlgmr.msra.gmra.mxu1 %vm476_vm1, %v9069_v37  ;;  %730 = vrot.lane.b32.xlu1 %v9423_v49, %s8889_s28  ;;  %v9458_v48 = vpop.permute.xlu0 %456 }
 0x22c   :  { %13677 = vst [vmem:[#allocation67_spill] sm:$0xff] %v9458_v48 }
 0x22d   :  { %v9456_v58 = vpop.permute.xlu1 %384 }
 0x22e   :  { %13676 = vst [vmem:[#allocation66_spill] sm:$0xff] %v9456_v58 }
 0x231   :  { %394 = vrot.lane.b32.xlu2 %v9444_v32, %s8890_s29 }
 0x233   :  { %v9462_v34 = vpop.permute.xlu2 %420  ;;  %7111 = vmatmul.msk.f32.gmra.mxu1 %vm476_vm1, %v9081_v40  ;;  %732 = vrot.lane.b32.xlu1 %v9456_v58, %s8889_s28  ;;  %v9474_v1 = vpop.permute.xlu0 %318 }
 0x234   :  { %13678 = vst [vmem:[#allocation68_spill] sm:$0xff] %v9462_v34  ;;  %914 = vrot.lane.b32.xlu0 %v9462_v34, %s8889_s28 }
 0x235   :  { %v9470_v37 = vpop.permute.xlu1 %288 }
 0x239   :  { %426 = vrot.lane.b32.xlu2 %v9444_v32, %s8892_s2 }
 0x23b   :  { %v9476_v12 = vpop.permute.xlu2 %452  ;;  %7112 = vmatmul.msk.f32.gmra.mxu1 %vm476_vm1, %v9093_v43  ;;  %324 = vrot.lane.b32.xlu1 %v9127_v51, %s8891_s30  ;;  %v9490_v58 = vpop.permute.xlu0 %819 }
 0x23c   :  { %13679 = vst [vmem:[#allocation69_spill] sm:$0xff] %v9476_v12 }
 0x23d   :  { %v9482_v40 = vpop.permute.xlu1 %388 }
 0x23e   :  { %13680 = vst [vmem:[#allocation70_spill] sm:$0xff] %v9482_v40 }
 0x241   :  { %458 = vrot.lane.b32.xlu2 %v9444_v32, %s8891_s30 }
 0x243   :  { %v561_v34 = vpop.permute.xlu2 %560  ;;  %7113 = vmatmul.msk.f32.gmra.mxu1 %vm476_vm1, %v9145_v55  ;;  %736 = vrot.lane.b32.xlu1 %v9482_v40, %s8889_s28  ;;  %v9504_v55 = vpop.permute.xlu0 %997 }
 0x245   :  { %v9492_v49 = vpop.permute.xlu1 %390 }
 0x246   :  { %13681 = vst [vmem:[#allocation71_spill] sm:$0xff] %v9492_v49  ;;  %738 = vrot.lane.b32.xlu0 %v9492_v49, %s8889_s28  ;;  %v9511_v49 = vmul.f32 0.35355338, %v9297_v57 }
 0x248   :  { %13683 = vst [vmem:[#allocation73_spill] sm:$0xff] %v9511_v49 }
 0x249   :  { %641 = vrot.lane.b32.xlu2 %v9205_v5, %s8889_s28 }
 0x24b   :  { %v9498_v43 = vpop.permute.xlu2 %422  ;;  %7114 = vmatmul.msk.f32.gmra.mxu1 %vm476_vm1, %v9127_v51  ;;  %296 = vrot.lane.b32.xlu1 %v9165_v59, %s8892_s2 }
 0x24c   :  { %13682 = vst [vmem:[#allocation72_spill] sm:$0xff] %v9498_v43 }
 0x24d   :  { %v9527_v57 = vpop.permute.xlu1 %424 }
 0x24e   :  { %916 = vrot.lane.b32.xlu0 %v9498_v43, %s8889_s28  ;;  %13685 = vst [vmem:[#allocation75_spill] sm:$0xff] %v9527_v57 }
 0x251   :  { %643 = vrot.lane.b32.xlu2 %v9243_v33, %s8889_s28 }
 0x253   :  { %v9513_v40 = vpop.permute.xlu2 %454  ;;  %7115 = vmatmul.msk.f32.gmra.mxu1 %vm476_vm1, %v9185_v0  ;;  %278 = vrot.lane.b32.xlu1 %v9511_v49, %s8890_s29 }
 0x254   :  { %13684 = vst [vmem:[#allocation74_spill] sm:$0xff] %v9513_v40 }
 0x255   :  { %v9541_v47 = vpop.permute.xlu1 %995 }
 0x256   :  { %v9519_v51 = vpop.permute.xlu0 %999 }
 0x259   :  { %645 = vrot.lane.b32.xlu2 %v9258_v44, %s8889_s28 }
 0x25b   :  { %v563_v43 = vpop.permute.xlu2 %562  ;;  %7116 = vmatmul.msk.f32.gmra.mxu1 %vm476_vm1, %v9165_v59 }
 0x25d   :  { %v9551_v27 = vpop.permute.xlu1 %270 }
 0x25e   :  { %v9525_v5 = vpop.permute.xlu0 %290 }
 0x261   :  { %1001 = vrot.lane.b32.xlu2 %v9273_v53, %s8889_s28 }
 0x263   :  { %v9531_v33 = vpop.permute.xlu2 %392  ;;  %7117 = vmatmul.msk.f32.gmra.mxu1 %vm476_vm1, %v9203_v4 }
 0x264   :  { %13686 = vst [vmem:[#allocation76_spill] sm:$0xff] %v9531_v33  ;;  %740 = vrot.lane.b32.xlu0 %v9531_v33, %s8889_s28 }
 0x266   :  { %v9537_v44 = vpop.permute.xlu0 %1003 }
 0x269   :  { %647 = vrot.lane.b32.xlu2 %v9303_v7, %s8889_s28  ;;  %v9558_v7 = vpop.permute.xlu1 %821 }
 0x26b   :  { %v9543_v42 = vpop.permute.xlu2 %639 }
 0x26e   :  { %v9545_v36 = vpop.permute.xlu0 %827 }
 0x271   :  { %825 = vrot.lane.b32.xlu2 %v9294_v50, %s8889_s28  ;;  %v9563_v50 = vpop.permute.xlu1 %823 }
 0x273   :  { %v9549_v53 = vpop.permute.xlu2 %817 }
 0x278   :  { %v1010_v13 = vpop.permute.xlu0 %1009 }
 0x279   :  { %649 = vrot.lane.b32.xlu2 %v9313_v18, %s8889_s28  ;;  %7198 = vmatpush.xpose.msk.msrb.mxu0 %vm476_vm1, %v1010_v13  ;;  %v9577_v13 = vpop.permute.xlu1 %450 }
 0x27a   :  { %13689 = vst [vmem:[#allocation79_spill] sm:$0xff] %v9577_v13 }
 0x27b   :  { %v9556_v33 = vpop.permute.xlu2 %412 }
 0x27c   :  { %13687 = vst [vmem:[#allocation77_spill] sm:$0xff] %v9556_v33 }
 0x281   :  { %1005 = vrot.lane.b32.xlu2 %v9362_v10, %s8889_s28 }
 0x283   :  { %v565_v21 = vpop.permute.xlu2 %564 }
 0x284   :  { %7118 = vmatpush.xpose.msk.msra.mxu3 %vm476_vm1, %v565_v21 }
 0x288   :  { %7119 = vmatpush.xpose.msk.msra.mxu3 %vm476_vm1, %v563_v43 }
 0x289   :  { %651 = vrot.lane.b32.xlu2 %v9348_v16, %s8889_s28 }
 0x28b   :  { %v9568_v18 = vpop.permute.xlu2 %394 }
 0x28c   :  { %13688 = vst [vmem:[#allocation78_spill] sm:$0xff] %v9568_v18  ;;  %7120 = vmatpush.xpose.msk.msra.mxu3 %vm476_vm1, %v561_v34  ;;  %742 = vrot.lane.b32.xlu1 %v9568_v18, %s8889_s28  ;;  %v9593_v34 = vpop.permute.xlu1 %272 }
 0x290   :  { %7121 = vmatpush.xpose.msk.msra.mxu3 %vm476_vm1, %v9450_v26 }
 0x291   :  { %829 = vrot.lane.b32.xlu2 %v9329_v22, %s8889_s28 }
 0x293   :  { %v9579_v21 = vpop.permute.xlu2 %426 }
 0x294   :  { %13690 = vst [vmem:[#allocation80_spill] sm:$0xff] %v9579_v21  ;;  %1094 = vrot.lane.b32.xlu1 %v9513_v40, %s8889_s28  ;;  %7122 = vmatpush.xpose.msk.msra.mxu3 %vm476_vm1, %v9401_v39  ;;  %v9643_v40 = vmul.f32 0.35355338, %v9444_v32 }
 0x295   :  { %920 = vrot.lane.b32.xlu0 %v9579_v21, %s8889_s28  ;;  %v9652_v21 = vpop.permute.xlu0 %320 }
 0x296   :  { %13694 = vst [vmem:[#allocation84_spill] sm:$0xff] %v9643_v40 }
 0x298   :  { %7123 = vmatpush.xpose.msk.msra.mxu3 %vm476_vm1, %v9439_v6  ;;  %v9613_v6 = vpop.permute.xlu1 %292 }
 0x299   :  { %1007 = vrot.lane.b32.xlu2 %v9344_v17, %s8889_s28 }
 0x29b   :  { %v9591_v26 = vpop.permute.xlu2 %458 }
 0x29c   :  { %13691 = vst [vmem:[#allocation81_spill] sm:$0xff] %v9591_v26  ;;  %1092 = vrot.lane.b32.xlu1 %v9476_v12, %s8889_s28  ;;  %7124 = vmatpush.xpose.msk.msra.mxu3 %vm476_vm1, %v9431_v60 }
 0x29d   :  { %326 = vrot.lane.b32.xlu0 %v9185_v0, %s8891_s30 }
 0x2a0   :  { %7125 = vmatpush.xpose.msk.msra.mxu3 %vm476_vm1, %v9397_v9  ;;  %v9622_v9 = vmul.f32 0.35355338, %v9252_v41  ;;  %v9626_v60 = vpop.permute.xlu1 %274 }
 0x2a1   :  { %653 = vrot.lane.b32.xlu2 %v9370_v25, %s8889_s28 }
 0x2a2   :  { %13692 = vst [vmem:[#allocation82_spill] sm:$0xff] %v9622_v9 }
 0x2a3   :  { %v9605_v39 = vpop.permute.xlu2 %641  ;;  %7126 = vmatmul.msk.f32.vlgmr.msra.gmra.mxu3 %vm476_vm1, %v9267_v52 }
 0x2a4   :  { %906 = vrot.lane.b32.xlu1 %v9556_v33, %s8889_s28 }
 0x2a5   :  { %298 = vrot.lane.b32.xlu0 %v9203_v4, %s8892_s2 }
 0x2a8   :  { %v9638_v33 = vpop.permute.xlu1 %294 }
 0x2a9   :  { %831 = vrot.lane.b32.xlu2 %v9366_v24, %s8889_s28  ;;  %13693 = vst [vmem:[#allocation83_spill] sm:$0xff] %v9638_v33 }
 0x2ab   :  { %v9617_v0 = vpop.permute.xlu2 %643  ;;  %7127 = vmatmul.msk.f32.gmra.mxu3 %vm476_vm1, %v9334_v19 }
 0x2ad   :  { %280 = vrot.lane.b32.xlu0 %v9622_v9, %s8890_s29 }
 0x2b0   :  { %v9656_v10 = vpop.permute.xlu1 %730 }
 0x2b1   :  { %728 = vrot.lane.b32.xlu2 %v9404_v29, %s8889_s28 }
 0x2b3   :  { %v9630_v43 = vpop.permute.xlu2 %645  ;;  %7128 = vmatmul.msk.f32.gmra.mxu3 %vm476_vm1, %v9383_v14 }
 0x2b5   :  { %1090 = vrot.lane.b32.xlu0 %v9577_v13, %s8889_s28  ;;  %v9650_v13 = vmul.f32 0.35355338, %v9282_v61 }
 0x2b8   :  { %v9670_v18 = vpop.permute.xlu1 %732 }
 0x2b9   :  { %448 = vrot.lane.b32.xlu2 %v9196_v3, %s8891_s30 }
 0x2bb   :  { %v1002_v12 = vpop.permute.xlu2 %1001  ;;  %7129 = vmatmul.msk.f32.gmra.mxu3 %vm476_vm1, %v9413_v11 }
 0x2bd   :  { %282 = vrot.lane.b32.xlu0 %v9643_v40, %s8890_s29 }
 0x2c0   :  { %v9678_v41 = vpop.permute.xlu1 %324 }
 0x2c1   :  { %446 = vrot.lane.b32.xlu2 %v9182_v63, %s8891_s30  ;;  %v9666_v63 = vpop.permute.xlu0 %322 }
 0x2c3   :  { %v648_v29 = vpop.permute.xlu2 %647  ;;  %7130 = vmatmul.msk.f32.gmra.mxu3 %vm476_vm1, %v9650_v13 }
 0x2c5   :  { %302 = vrot.lane.b32.xlu0 %v9334_v19, %s8892_s2 }
 0x2c8   :  { %v737_v24 = vpop.permute.xlu1 %736 }
 0x2c9   :  { %444 = vrot.lane.b32.xlu2 %v9213_v8, %s8891_s30  ;;  %v735_v8 = vpop.permute.xlu0 %734 }
 0x2cb   :  { %v9662_v3 = vpop.permute.xlu2 %825  ;;  %7131 = vmatmul.msk.f32.gmra.mxu3 %vm476_vm1, %v9511_v49 }
 0x2cd   :  { %304 = vrot.lane.b32.xlu0 %v9383_v14, %s8892_s2 }
 0x2d0   :  { %v9698_v33 = vpop.permute.xlu1 %296 }
 0x2d1   :  { %276 = vrot.lane.b32.xlu2 %v9650_v13, %s8890_s29  ;;  %v9686_v61 = vpop.permute.xlu0 %912  ;;  %13696 = vst [vmem:[#allocation86_spill] sm:$0xff] %v9698_v33 }
 0x2d3   :  { %v650_v22 = vpop.permute.xlu2 %649  ;;  %7132 = vmatmul.msk.f32.gmra.mxu3 %vm476_vm1, %v9622_v9 }
 0x2d5   :  { %336 = vrot.lane.b32.xlu0 %v9383_v14, %s8891_s30 }
 0x2d9   :  { %918 = vrot.lane.b32.xlu2 %v9527_v57, %s8889_s28  ;;  %v9692_v14 = vpop.permute.xlu0 %914  ;;  %v9694_v57 = vpop.f32.mrf.mxu1 }
 0x2da   :  { %13695 = vst [vmem:[#allocation85_spill] sm:$0xff] %v9694_v57 }
 0x2db   :  { %v1006_v17 = vpop.permute.xlu2 %1005  ;;  %7133 = vmatmul.msk.f32.gmra.mxu3 %vm476_vm1, %v9643_v40 }
 0x2dd   :  { %310 = vrot.lane.b32.xlu0 %v9511_v49, %s8892_s2 }
 0x2e1   :  { %1096 = vrot.lane.b32.xlu2 %v9458_v48, %s8889_s28  ;;  %v739_v49 = vpop.permute.xlu0 %738  ;;  %v9702_v48 = vpop.f32.mrf.mxu1 }
 0x2e3   :  { %v652_v32 = vpop.permute.xlu2 %651 }
 0x2e5   :  { %312 = vrot.lane.b32.xlu0 %v9622_v9, %s8892_s2  ;;  %v9705_v9 = vpop.permute.xlu1 %278 }
 0x2e9   :  { %1098 = vrot.lane.b32.xlu2 %v9591_v26, %s8889_s28  ;;  %v9710_v26 = vpop.permute.xlu0 %916 }
 0x2eb   :  { %v830_v16 = vpop.permute.xlu2 %829 }
 0x2f1   :  { %910 = vrot.lane.b32.xlu2 %v9387_v20, %s8889_s28  ;;  %v9715_v20 = vpop.f32.mrf.mxu1 }
 0x2f3   :  { %v1008_v40 = vpop.permute.xlu2 %1007 }
 0x2f4   :  { %7199 = vmatpush.xpose.msk.msrb.mxu0 %vm476_vm1, %v1008_v40 }
 0x2f8   :  { %7200 = vmatpush.xpose.msk.msrb.mxu0 %vm476_vm1, %v1006_v17  ;;  %v741_v17 = vpop.permute.xlu0 %740 }
 0x2f9   :  { %908 = vrot.lane.b32.xlu2 %v9374_v30, %s8889_s28 }
 0x2fb   :  { %v654_v57 = vpop.permute.xlu2 %653 }
 0x2fc   :  { %7134 = vmatpush.xpose.msk.msrb.mxu3 %vm476_vm1, %v654_v57  ;;  %7201 = vmatpush.xpose.msk.msrb.mxu0 %vm476_vm1, %v9537_v44  ;;  %v9727_v57 = vpop.f32.mrf.mxu1 }
 0x2fe   :  { %v743_v33 = vpop.permute.xlu1 %742 }
 0x2ff   :  { %7150 = vmatpush.xpose.msk.msrb.mxu1 %vm476_vm1, %v743_v33 }
 0x300   :  { %7135 = vmatpush.xpose.msk.msrb.mxu3 %vm476_vm1, %v652_v32  ;;  %7202 = vmatpush.xpose.msk.msrb.mxu0 %vm476_vm1, %v1002_v12 }
 0x301   :  { %328 = vrot.lane.b32.xlu2 %v9165_v59, %s8891_s30 }
 0x303   :  { %v832_v40 = vpop.permute.xlu2 %831  ;;  %7151 = vmatpush.xpose.msk.msrb.mxu1 %vm476_vm1, %v741_v17 }
 0x304   :  { %7136 = vmatpush.xpose.msk.msrb.mxu3 %vm476_vm1, %v650_v22  ;;  %7166 = vmatpush.xpose.msk.msra.mxu2 %vm476_vm1, %v832_v40 }
 0x305   :  { %7203 = vmatpush.xpose.msk.msrb.mxu0 %vm476_vm1, %v9519_v51 }
 0x307   :  { %7152 = vmatpush.xpose.msk.msrb.mxu1 %vm476_vm1, %v739_v49  ;;  %v921_v49 = vpop.permute.xlu0 %920 }
 0x308   :  { %7137 = vmatpush.xpose.msk.msrb.mxu3 %vm476_vm1, %v648_v29  ;;  %7167 = vmatpush.xpose.msk.msra.mxu2 %vm476_vm1, %v830_v16  ;;  %v1177_v16 = vsel %vm1173_vm2, %v9702_v48, -inf }
 0x309   :  { %7204 = vmatpush.xpose.msk.msrb.mxu0 %vm476_vm1, %v9504_v55  ;;  %300 = vrot.lane.b32.xlu2 %v9267_v52, %s8892_s2 }
 0x30b   :  { %v729_v22 = vpop.permute.xlu2 %728  ;;  %7153 = vmatpush.xpose.msk.msrb.mxu1 %vm476_vm1, %v737_v24  ;;  %v9750_v24 = vpop.f32.mrf.mxu1 }
 0x30c   :  { %7138 = vmatpush.xpose.msk.msrb.mxu3 %vm476_vm1, %v9630_v43  ;;  %7168 = vmatpush.xpose.msk.msra.mxu2 %vm476_vm1, %v9545_v36 }
 0x30d   :  { %7205 = vmatpush.xpose.msk.msrb.mxu0 %vm476_vm1, %v9541_v47  ;;  %v1180_v47 = vsel %vm1173_vm2, %v9715_v20, -inf }
 0x30f   :  { %1178 = vmax.xlane.f32.xlu0 %v1177_v16  ;;  %7154 = vmatpush.xpose.msk.msrb.mxu1 %vm476_vm1, %v735_v8  ;;  %v13701_v8 = vld [vmem:[#allocation49_spill] sm:$0xff]  ;;  %v13715_v16 = vld [vmem:[#allocation23_spill] sm:$0xff] }
 0x310   :  { %7206 = vmatmul.msk.f32.vlgmr.msrb.gmra.mxu0 %vm476_vm1, %v9225_v15  ;;  %7139 = vmatpush.xpose.msk.msrb.mxu3 %vm476_vm1, %v9617_v0 }
 0x311   :  { %7169 = vmatpush.xpose.msk.msra.mxu2 %vm476_vm1, %v9662_v3  ;;  %330 = vrot.lane.b32.xlu2 %v9203_v4, %s8891_s30 }
 0x313   :  { %v9756_v36 = vpop.permute.xlu2 %448  ;;  %7155 = vmatpush.xpose.msk.msrb.mxu1 %vm476_vm1, %v9670_v18  ;;  %v13707_v18 = vld [vmem:[#allocation85_spill] sm:$0xff] }
 0x314   :  { %13697 = vst [vmem:[#allocation87_spill] sm:$0xff] %v9756_v36  ;;  %1088 = vrot.lane.b32.xlu1 %v9756_v36, %s8889_s28  ;;  %7140 = vmatpush.xpose.msk.msrb.mxu3 %vm476_vm1, %v9605_v39  ;;  %v1174_v29 = vsel %vm1173_vm2, %v13707_v18, -inf  ;;  %v13735_v36 = vld [vmem:[#allocation51_spill] sm:$0xff] }
 0x315   :  { %7170 = vmatpush.xpose.msk.msra.mxu2 %vm476_vm1, %v9563_v50  ;;  %v9777_v50 = vpop.f32.mrf.mxu1 }
 0x317   :  { %1181 = vmax.xlane.f32.xlu0 %v1180_v47  ;;  %7156 = vmatpush.xpose.msk.msrb.mxu1 %vm476_vm1, %v9656_v10  ;;  %v1189_v10 = vsel %vm1173_vm2, %v9777_v50, -inf }
 0x318   :  { %7207 = vmatmul.msk.f32.gmra.mxu0 %vm476_vm1, %v9474_v1  ;;  %7141 = vmatpush.xpose.msk.msrb.mxu3 %vm476_vm1, %v9543_v42 }
 0x319   :  { %7171 = vmatpush.xpose.msk.msra.mxu2 %vm476_vm1, %v9558_v7 }
 0x31b   :  { %v9779_v59 = vpop.permute.xlu2 %446  ;;  %7142 = vmatmul.msk.f32.vlgmr.msrb.gmra.mxu3 %vm476_vm1, %v9247_v35  ;;  %7157 = vmatpush.xpose.msk.msrb.mxu1 %vm476_vm1, %v729_v22  ;;  %v13714_v22 = vld [vmem:[#allocation52_spill] sm:$0xff] }
 0x31c   :  { %7182 = vmatpush.xpose.msk.msra.mxu3 %vm476_vm1, %v921_v49  ;;  %13698 = vst [vmem:[#allocation88_spill] sm:$0xff] %v9779_v59  ;;  %1086 = vrot.lane.b32.xlu1 %v9779_v59, %s8889_s28  ;;  %v8269_v47 = vpack.i.bf16 %v13715_v16, %v13714_v22  ;;  %v13723_v22 = vld [vmem:[#allocation35_spill] sm:$0xff]  ;;  %v13734_v59 = vld [vmem:[#allocation76_spill] sm:$0xff] }
 0x31d   :  { %7172 = vmatpush.xpose.msk.msra.mxu2 %vm476_vm1, %v9490_v58 }
 0x31e   :  { %7158 = vmatmul.msk.f32.vlgmr.msrb.gmra.mxu1 %vm476_vm1, %v9415_v62  ;;  %v327_v62 = vpop.permute.xlu0 %326 }
 0x31f   :  { %1190 = vmax.xlane.f32.xlu0 %v1189_v10 }
 0x320   :  { %7208 = vmatmul.msk.f32.gmra.mxu0 %vm476_vm1, %v9652_v21  ;;  %v13708_v21 = vld [vmem:[#allocation73_spill] sm:$0xff] }
 0x321   :  { %7173 = vmatpush.xpose.msk.msra.mxu2 %vm476_vm1, %v9549_v53 }
 0x323   :  { %v9796_v42 = vpop.permute.xlu2 %444  ;;  %7143 = vmatmul.msk.f32.gmra.mxu3 %vm476_vm1, %v9231_v23  ;;  %v13703_v23 = vld [vmem:[#allocation54_spill] sm:$0xff] }
 0x324   :  { %13699 = vst [vmem:[#allocation89_spill] sm:$0xff] %v9796_v42  ;;  %7174 = vmatmul.msk.f32.vlgmr.msra.gmra.mxu2 %vm476_vm1, %v9262_v46  ;;  %332 = vrot.lane.b32.xlu1 %v9267_v52, %s8891_s30  ;;  %v13706_v46 = vld [vmem:[#allocation86_spill] sm:$0xff]  ;;  %v9883_v52 = vpop.f32.mrf.mxu1 }
 0x325   :  { %1084 = vrot.lane.b32.xlu2 %v9796_v42, %s8889_s28  ;;  %s8899_s28 = smov 128  }
 0x326   :  { %7159 = vmatmul.msk.f32.gmra.mxu1 %vm476_vm1, %v9551_v27  ;;  %v299_v27 = vpop.permute.xlu0 %298 }
 0x328   :  { %7209 = vmatmul.msk.f32.gmra.mxu0 %vm476_vm1, %v9666_v63  ;;  %v13700_v63 = vpack.i.bf16 %v9142_v54, %v9148_v56 }
 0x32b   :  { %v277_v3 = vpop.permute.xlu2 %276  ;;  %7144 = vmatmul.msk.f32.gmra.mxu3 %vm476_vm1, %v9249_v38  ;;  %v9873_v38 = vpop.f32.mrf.mxu3 }
 0x32c   :  { %7175 = vmatmul.msk.f32.gmra.mxu2 %vm476_vm1, %v9237_v28  ;;  %306 = vrot.lane.b32.xlu1 %v9413_v11, %s8892_s2  ;;  %v13704_v28 = vld [vmem:[#allocation83_spill] sm:$0xff] }
 0x32d   :  { %334 = vrot.lane.b32.xlu2 %v9334_v19, %s8891_s30  ;;  %v8264_v19 = vpack.i.bf16 %v9098_v45, %v9370_v25  ;;  %v1095_v45 = vpop.permute.xlu1 %1094 }
 0x32e   :  { %7160 = vmatmul.msk.f32.gmra.mxu1 %vm476_vm1, %v9593_v34  ;;  %v281_v54 = vpop.permute.xlu0 %280  ;;  %v13710_v34 = vld [vmem:[#allocation21_spill] sm:$0xff] }
 0x330   :  { %7210 = vmatmul.msk.f32.gmra.mxu0 %vm476_vm1, %v9678_v41  ;;  %v13705_v41 = vld [vmem:[#allocation60_spill] sm:$0xff] }
 0x333   :  { %8255 = vrot.lane.b32.xlu0 %v13700_v63, %s8893_s14  ;;  %v919_v4 = vpop.permute.xlu2 %918  ;;  %7145 = vmatmul.msk.f32.gmra.mxu3 %vm476_vm1, %v9288_v2  ;;  %v9886_v2 = vpop.f32.mrf.mxu3 }
 0x334   :  { %7176 = vmatmul.msk.f32.gmra.mxu2 %vm476_vm1, %v9470_v37  ;;  %338 = vrot.lane.b32.xlu1 %v9413_v11, %s8891_s30  ;;  %v9892_v11 = vpop.f32.mrf.mxu1 }
 0x335   :  { %308 = vrot.lane.b32.xlu2 %v9650_v13, %s8892_s2  ;;  %7183 = vmatpush.xpose.msk.msra.mxu3 %vm476_vm1, %v919_v4  ;;  %v1093_v33 = vpop.permute.xlu1 %1092  ;;  %v1195_v1 = vsel %vm1173_vm2, %v9892_v11, -inf }
 0x336   :  { %7161 = vmatmul.msk.f32.gmra.mxu1 %vm476_vm1, %v9626_v60  ;;  %v1091_v15 = vpop.permute.xlu0 %1090 }
 0x338   :  { %7211 = vmatmul.msk.f32.gmra.mxu0 %vm476_vm1, %v327_v62 }
 0x339   :  { %7184 = vmatpush.xpose.msk.msra.mxu3 %vm476_vm1, %v9710_v26  ;;  %v13709_v26 = vld [vmem:[#allocation43_spill] sm:$0xff] }
 0x33a   :  { %v8279_v39 = vpack.i.bf16 %v13710_v34, %v13709_v26  ;;  %v13721_v26 = vld [vmem:[#allocation22_spill] sm:$0xff] }
 0x33b   :  { %8265 = vrot.lane.b32.xlu0 %v8264_v19, %s8893_s14  ;;  %7146 = vmatmul.msk.f32.gmra.mxu3 %vm476_vm1, %v9309_v31  ;;  %v1097_v56 = vpop.permute.xlu2 %1096  ;;  %v9894_v37 = vpop.f32.mrf.mxu3 }
 0x33c   :  { %7177 = vmatmul.msk.f32.gmra.mxu2 %vm476_vm1, %v9525_v5  ;;  %340 = vrot.lane.b32.xlu1 %v9650_v13, %s8891_s30  ;;  %v13702_v5 = vld [vmem:[#allocation84_spill] sm:$0xff]  ;;  %v1186_v13 = vsel %vm1173_vm2, %v9750_v24, -inf }
 0x33d   :  { %7185 = vmatpush.xpose.msk.msra.mxu3 %vm476_vm1, %v9692_v14  ;;  %v907_v53 = vpop.permute.xlu1 %906 }
 0x33e   :  { %7162 = vmatmul.msk.f32.gmra.mxu1 %vm476_vm1, %v277_v3  ;;  %v283_v35 = vpop.permute.xlu0 %282 }
 0x341   :  { %7186 = vmatpush.xpose.msk.msra.mxu3 %vm476_vm1, %v9686_v61 }
 0x343   :  { %7147 = vmatmul.msk.f32.gmra.mxu3 %vm476_vm1, %v13701_v8  ;;  %v1099_v31 = vpop.permute.xlu2 %1098  ;;  %v9901_v51 = vpop.f32.mrf.mxu3 }
 0x344   :  { %7178 = vmatmul.msk.f32.gmra.mxu2 %vm476_vm1, %v9613_v6  ;;  %314 = vrot.lane.b32.xlu1 %v13702_v5, %s8892_s2 }
 0x345   :  { %7214 = vmatpush.xpose.msk.msra.mxu1 %vm476_vm1, %v1099_v31  ;;  %v1183_v31 = vsel %vm1173_vm2, %v9727_v57, -inf }
 0x346   :  { %7163 = vmatmul.msk.f32.gmra.mxu1 %vm476_vm1, %v9705_v9  ;;  %v303_v61 = vpop.permute.xlu0 %302  ;;  %v13711_v9 = vld [vmem:[#allocation82_spill] sm:$0xff] }
 0x349   :  { %7215 = vmatpush.xpose.msk.msra.mxu1 %vm476_vm1, %v1097_v56 }
 0x34b   :  { %7148 = vmatmul.msk.f32.gmra.mxu3 %vm476_vm1, %v13703_v23  ;;  %v911_v25 = vpop.permute.xlu2 %910  ;;  %v9910_v0 = vpop.f32.mrf.mxu3 }
 0x34c   :  { %7179 = vmatmul.msk.f32.gmra.mxu2 %vm476_vm1, %v13704_v28  ;;  %346 = vrot.lane.b32.xlu1 %v13702_v5, %s8891_s30 }
 0x34d   :  { %7187 = vmatpush.xpose.msk.msra.mxu3 %vm476_vm1, %v911_v25  ;;  %7216 = vmatpush.xpose.msk.msra.mxu1 %vm476_vm1, %v1095_v45 }
 0x34e   :  { %7164 = vmatmul.msk.f32.gmra.mxu1 %vm476_vm1, %v281_v54  ;;  %v305_v32 = vpop.permute.xlu0 %304 }
 0x351   :  { %7217 = vmatpush.xpose.msk.msra.mxu1 %vm476_vm1, %v1093_v33 }
 0x353   :  { %7149 = vmatmul.msk.f32.gmra.mxu3 %vm476_vm1, %v13705_v41  ;;  %v909_v44 = vpop.permute.xlu2 %908  ;;  %v9915_v43 = vpop.f32.mrf.mxu3  ;;  %v1192_v41 = vsel %vm1173_vm2, %v9883_v52, -inf }
 0x354   :  { %7180 = vmatmul.msk.f32.gmra.mxu2 %vm476_vm1, %v13706_v46  ;;  %7188 = vmatpush.xpose.msk.msra.mxu3 %vm476_vm1, %v909_v44  ;;  %13712 = vst [vmem:[#allocation49_spill] sm:$0xff] %v9915_v43 }
 0x355   :  { %7218 = vmatpush.xpose.msk.msra.mxu1 %vm476_vm1, %v1091_v15 }
 0x356   :  { %7165 = vmatmul.msk.f32.gmra.mxu1 %vm476_vm1, %v283_v35  ;;  %v337_v55 = vpop.permute.xlu0 %336 }
 0x358   :  { %7189 = vmatpush.xpose.msk.msra.mxu3 %vm476_vm1, %v907_v53 }
 0x35b   :  { %v329_v7 = vpop.permute.xlu2 %328  ;;  %v9920_v40 = vpop.f32.mrf.mxu3 }
 0x35c   :  { %7181 = vmatmul.msk.f32.gmra.mxu2 %vm476_vm1, %v299_v27  ;;  %7212 = vmatmul.msk.f32.gmra.mxu0 %vm476_vm1, %v329_v7  ;;  %13713 = vst [vmem:[#allocation84_spill] sm:$0xff] %v9920_v40 }
 0x35e   :  { %1175 = vmax.xlane.f32.xlu2 %v1174_v29  ;;  %v311_v6 = vpop.permute.xlu0 %310 }
 0x363   :  { %v301_v58 = vpop.permute.xlu2 %300  ;;  %v9929_v3 = vpop.f32.mrf.mxu3 }
 0x364   :  { %7190 = vmatmul.msk.f32.vlgmr.msra.gmra.mxu3 %vm476_vm1, %v301_v58  ;;  %13716 = vst [vmem:[#allocation54_spill] sm:$0xff] %v9929_v3 }
 0x365   :  { %1196 = vmax.xlane.f32.xlu0 %v1195_v1  ;;  %v13717_v1 = vld [vmem:[#allocation24_spill] sm:$0xff] }
 0x366   :  { %v313_v60 = vpop.permute.xlu0 %312 }
 0x36b   :  { %v331_v12 = vpop.permute.xlu2 %330 }
 0x36c   :  { %7191 = vmatmul.msk.f32.gmra.mxu3 %vm476_vm1, %v303_v61  ;;  %7213 = vmatmul.msk.f32.gmra.mxu0 %vm476_vm1, %v331_v12  ;;  %v13718_v12 = vld [vmem:[#allocation25_spill] sm:$0xff] }
 0x374   :  { %7192 = vmatmul.msk.f32.gmra.mxu3 %vm476_vm1, %v305_v32 }
 0x376   :  { %342 = vrot.lane.b32.xlu2 %v13708_v21, %s8891_s30  ;;  %1187 = vmax.xlane.f32.xlu1 %v1186_v13  ;;  %v13720_v21 = vld [vmem:[#allocation44_spill] sm:$0xff] }
 0x377   :  { %v8274_v34 = vpack.i.bf16 %v13721_v26, %v13720_v21 }
 0x379   :  { %8280 = vrot.lane.b32.xlu0 %v8279_v39, %s8893_s14 }
 0x37e   :  { %344 = vrot.lane.b32.xlu2 %v13711_v9, %s8891_s30 }
 0x37f   :  { %v1085_v10 = vpop.permute.xlu2 %1084 }
 0x382   :  { %v9918_v17 = vpop.xlane.xlu0 %1178 }
 0x386   :  { %v1089_v14 = vpop.permute.xlu1 %1088 }
 0x387   :  { %7219 = vmatpush.xpose.msk.msra.mxu1 %vm476_vm1, %v1089_v14  ;;  %v335_v63 = vpop.permute.xlu2 %334  ;;  %v13722_v14 = vld [vmem:[#allocation37_spill] sm:$0xff] }
 0x388   :  { %v8284_v16 = vpack.i.bf16 %v13723_v22, %v13722_v14 }
 0x38a   :  { %v9926_v62 = vpop.xlane.xlu0 %1181 }
 0x38e   :  { %v1087_v49 = vpop.permute.xlu1 %1086 }
 0x38f   :  { %8270 = vrot.lane.b32.xlu1 %v8269_v47, %s8893_s14  ;;  %7220 = vmatpush.xpose.msk.msra.mxu1 %vm476_vm1, %v1087_v49  ;;  %v309_v45 = vpop.permute.xlu2 %308 }
 0x392   :  { %v9932_v4 = vpop.xlane.xlu0 %1190 }
 0x393   :  { %7221 = vmatpush.xpose.msk.msra.mxu1 %vm476_vm1, %v1085_v10 }
 0x396   :  { %v333_v27 = vpop.permute.xlu1 %332 }
 0x397   :  { %7222 = vmatmul.msk.f32.vlgmr.msra.gmra.mxu1 %vm476_vm1, %v333_v27 }
 0x39b   :  { %v9989_v27 = vpop.f32.mrf.mxu1 }
 0x39e   :  { %v307_v19 = vpop.permute.xlu1 %306  ;;  %v9934_v54 = vpop.f32.mrf.mxu3 }
 0x39f   :  { %7193 = vmatmul.msk.f32.gmra.mxu3 %vm476_vm1, %v307_v19  ;;  %7223 = vmatmul.msk.f32.gmra.mxu1 %vm476_vm1, %v335_v63  ;;  %v13724_v19 = vld [vmem:[#allocation30_spill] sm:$0xff] }
 0x3a5   :  { %v8256_v56 = vpop.permute.xlu0 %8255 }
 0x3a6   :  { %v9938_v8 = vpop.f32.mrf.mxu3  ;;  %v8257_v5 = vunpack.i.l.bf16 %v8256_v56  ;;  %v8258_v23 = vunpack.i.h.bf16 %v8256_v56  ;;  %v339_v25 = vpop.permute.xlu1 %338  ;;  %v13725_v56 = vld [vmem:[#allocation26_spill] sm:$0xff] }
 0x3a7   :  { %1184 = vmax.xlane.f32.xlu2 %v1183_v31  ;;  %7194 = vmatmul.msk.f32.gmra.mxu3 %vm476_vm1, %v309_v45  ;;  %v1225_v15 = vsel %vm1173_vm2, %v9938_v8, -inf  ;;  %v8289_v45 = vpack.i.bf16 %v13725_v56, %v13724_v19  ;;  %v10028_v21 = vpop.f32.mrf.mxu2  ;;  %v1210_v56 = vsel %vm1173_vm2, %v9910_v0, -inf }
 0x3a8   :  { %7224 = vmatmul.msk.f32.gmra.mxu1 %vm476_vm1, %v337_v55  ;;  %1934 = vmatpush.msrb.mxu2 %v8257_v5  ;;  %v13719_v55 = vpack.i.bf16 %v13717_v1, %v13718_v12  ;;  %v1201_v5 = vsel %vm1173_vm2, %v9886_v2, -inf  ;;  %v1368_v12 = vsub.f32 %v9715_v20, %v9926_v62  ;;  %v1207_v20 = vsel %vm1173_vm2, %v9901_v51, -inf }
 0x3a9   :  { %1226 = vmax.xlane.f32.xlu0 %v1225_v15  ;;  %v1270_v14 = vsel %vm1173_vm2, %v10028_v21, -inf }
 0x3aa   :  { %1935 = vmatpush.msrb.mxu2 %v8258_v23  ;;  %v1434_v26 = vmul.f32 1.442695, %v1368_v12 }
 0x3ad   :  { %v9946_v28 = vpop.permute.xlu0 %8265 }
 0x3ae   :  { %v8267_v33 = vunpack.i.l.bf16 %v9946_v28  ;;  %v9949_v35 = vpop.f32.mrf.mxu3  ;;  %v341_v46 = vpop.permute.xlu1 %340 }
 0x3af   :  { %1193 = vmax.xlane.f32.xlu2 %v1192_v41  ;;  %7195 = vmatmul.msk.f32.gmra.mxu3 %vm476_vm1, %v311_v6  ;;  %v1228_v44 = vsel %vm1173_vm2, %v9949_v35, -inf  ;;  %v10036_v62 = vpop.f32.mrf.mxu2 }
 0x3b0   :  { %7225 = vmatmul.msk.f32.gmra.mxu1 %vm476_vm1, %v339_v25  ;;  %2112 = vmatpush.msra.mxu0 %v8267_v33 }
 0x3b1   :  { %1229 = vmax.xlane.f32.xlu0 %v1228_v44 }
 0x3b6   :  { %v9957_v53 = vpop.f32.mrf.mxu3  ;;  %v315_v7 = vpop.permute.xlu1 %314 }
 0x3b7   :  { %7196 = vmatmul.msk.f32.gmra.mxu3 %vm476_vm1, %v313_v60  ;;  %v1231_v61 = vsel %vm1173_vm2, %v9957_v53, -inf }
 0x3b8   :  { %7226 = vmatmul.msk.f32.gmra.mxu1 %vm476_vm1, %v341_v46 }
 0x3b9   :  { %1232 = vmax.xlane.f32.xlu0 %v1231_v61 }
 0x3be   :  { %v9963_v29 = vpop.f32.mrf.mxu3  ;;  %v347_v23 = vpop.permute.xlu1 %346 }
 0x3bf   :  { %7197 = vmatmul.msk.f32.gmra.mxu3 %vm476_vm1, %v315_v7  ;;  %v1234_v32 = vsel %vm1173_vm2, %v9963_v29, -inf }
 0x3c1   :  { %1235 = vmax.xlane.f32.xlu0 %v1234_v32  ;;  %v1204_v32 = vsel %vm1173_vm2, %v9894_v37, -inf }
 0x3c6   :  { %v9968_v58 = vpop.f32.mrf.mxu3 }
 0x3c7   :  { %8260 = vrot.lane.b32.xlu2 %v13719_v55, %s8893_s14  ;;  %v1237_v13 = vsel %vm1173_vm2, %v9968_v58, -inf  ;;  %v1371_v55 = vsub.f32 %v9777_v50, %v9932_v4 }
 0x3c9   :  { %1238 = vmax.xlane.f32.xlu0 %v1237_v13 }
 0x3ce   :  { %v9978_v39 = vpop.f32.mrf.mxu3 }
 0x3cf   :  { %8275 = vrot.lane.b32.xlu2 %v8274_v34, %s8893_s14  ;;  %v1440_v34 = vmul.f32 1.442695, %v1371_v55 }
 0x3d1   :  { %v1176_v6 = vpop.xlane.xlu2 %1175 }
 0x3d2   :  { %v1366_v9 = vsub.f32 %v13707_v18, %v1176_v6  ;;  %v1367_v18 = vsub.f32 %v9702_v48, %v9918_v17  ;;  %v10004_v48 = vpop.f32.mrf.mxu1  ;;  %v1222_v17 = vsel %vm1173_vm2, %v9934_v54, -inf  ;;  %v1198_v6 = vsel %vm1173_vm2, %v9873_v38, -inf }
 0x3d3   :  { %v1249_v33 = vsel %vm1173_vm2, %v10004_v48, -inf }
 0x3d4   :  { %v1430_v60 = vmul.f32 1.442695, %v1366_v9  ;;  %v1432_v15 = vmul.f32 1.442695, %v1367_v18  ;;  %v1246_v18 = vsel %vm1173_vm2, %v9989_v27, -inf }
 0x3d6   :  { %8541 = vpow2.f32 %v1430_v60  ;;  %v9984_v47 = vpop.f32.mrf.mxu3 }
 0x3d7   :  { %8285 = vrot.lane.b32.xlu2 %v8284_v16, %s8893_s14  ;;  %v1243_v49 = vsel %vm1173_vm2, %v9984_v47, -inf  ;;  %8543 = vpow2.f32 %v1432_v15 }
 0x3d8   :  { %1244 = vmax.xlane.f32.xlu0 %v1243_v49  ;;  %v10049_v49 = vpop.f32.mrf.mxu2 }
 0x3d9   :  { %v343_v10 = vpop.permute.xlu2 %342  ;;  %v1276_v19 = vsel %vm1173_vm2, %v10049_v49, -inf }
 0x3da   :  { %7227 = vmatmul.msk.f32.gmra.mxu1 %vm476_vm1, %v343_v10  ;;  %v10051_v10 = vpop.xlane.xlu0 %1196 }
 0x3dc   :  { %v9992_v63 = vpop.eup %8541 }
 0x3dd   :  { %v1558_v31 = vsel %vm1173_vm2, %v9992_v63, 0.0  ;;  %v10010_v44 = vpop.eup %8543 }
 0x3de   :  { %1559 = vadd.xlane.f32.xlu1 %v1558_v31  ;;  %v1561_v7 = vsel %vm1173_vm2, %v10010_v44, 0.0  ;;  %v10061_v31 = vpop.f32.mrf.mxu1 }
 0x3df   :  { %8290 = vrot.lane.b32.xlu2 %v8289_v45, %s8893_s14  ;;  %v10059_v45 = vpop.f32.mrf.mxu0 }
 0x3e0   :  { %1202 = vmax.xlane.f32.xlu0 %v1201_v5  ;;  %v1318_v15 = vsel %vm1173_vm2, %v10059_v45, -inf }
 0x3e1   :  { %v345_v25 = vpop.permute.xlu2 %344 }
 0x3e2   :  { %7228 = vmatmul.msk.f32.gmra.mxu1 %vm476_vm1, %v345_v25 }
 0x3e6   :  { %1223 = vmax.xlane.f32.xlu1 %v1222_v17 }
 0x3e8   :  { %1250 = vmax.xlane.f32.xlu0 %v1249_v33  ;;  %v10068_v33 = vpop.f32.mrf.mxu2 }
 0x3e9   :  { %v1188_v41 = vpop.xlane.xlu1 %1187 }
 0x3ea   :  { %v1370_v46 = vsub.f32 %v9750_v24, %v1188_v41  ;;  %7229 = vmatmul.msk.f32.gmra.mxu1 %vm476_vm1, %v347_v23  ;;  %v1240_v24 = vsel %vm1173_vm2, %v9978_v39, -inf  ;;  %v1252_v23 = vsel %vm1173_vm2, %v10061_v31, -inf }
 0x3eb   :  { %v8281_v5 = vpop.permute.xlu0 %8280 }
 0x3ec   :  { %v1438_v61 = vmul.f32 1.442695, %v1370_v46 }
 0x3ee   :  { %8545 = vpow2.f32 %v1438_v61  ;;  %1562 = vadd.xlane.f32.xlu1 %v1561_v7  ;;  %v1273_v61 = vsel %vm1173_vm2, %v10036_v62, -inf  ;;  %v1279_v7 = vsel %vm1173_vm2, %v10068_v33, -inf }
 0x3ef   :  { %8547 = vpow2.f32 %v1434_v26 }
 0x3f0   :  { %1205 = vmax.xlane.f32.xlu0 %v1204_v32  ;;  %8549 = vpow2.f32 %v1440_v34 }
 0x3f4   :  { %v10018_v1 = vpop.eup %8545 }
 0x3f5   :  { %v1570_v13 = vsel %vm1173_vm2, %v10018_v1, 0.0  ;;  %v10039_v9 = vpop.eup %8547 }
 0x3f6   :  { %1241 = vmax.xlane.f32.xlu1 %v1240_v24  ;;  %v10041_v60 = vpop.eup %8549  ;;  %v1564_v22 = vsel %vm1173_vm2, %v10039_v9, 0.0 }
 0x3f7   :  { %v1573_v16 = vsel %vm1173_vm2, %v10041_v60, 0.0 }
 0x3f8   :  { %1571 = vadd.xlane.f32.xlu0 %v1570_v13  ;;  %v10079_v13 = vpop.f32.mrf.mxu0 }
 0x3fe   :  { %1199 = vmax.xlane.f32.xlu1 %v1198_v6 }
 0x400   :  { %1208 = vmax.xlane.f32.xlu0 %v1207_v20 }
 0x401   :  { %v10034_v50 = vpop.permute.xlu1 %8270 }
 0x402   :  { %v8272_v4 = vunpack.i.l.bf16 %v10034_v50 }
 0x404   :  { %2113 = vmatpush.msra.mxu0 %v8272_v4 }
 0x406   :  { %1271 = vmax.xlane.f32.xlu1 %v1270_v14 }
 0x408   :  { %1565 = vadd.xlane.f32.xlu2 %v1564_v22  ;;  %1574 = vadd.xlane.f32.xlu0 %v1573_v16  ;;  %v1321_v22 = vsel %vm1173_vm2, %v10079_v13, -inf }
 0x40e   :  { %1247 = vmax.xlane.f32.xlu1 %v1246_v18  ;;  %v10089_v18 = vpop.f32.mrf.mxu0 }
 0x410   :  { %1277 = vmax.xlane.f32.xlu2 %v1276_v19  ;;  %1211 = vmax.xlane.f32.xlu0 %v1210_v56  ;;  %v8273_v19 = vunpack.i.h.bf16 %v10034_v50 }
 0x416   :  { %1319 = vmax.xlane.f32.xlu1 %v1318_v15 }
 0x418   :  { %1253 = vmax.xlane.f32.xlu2 %v1252_v23 }
 0x41a   :  { %v1185_v25 = vpop.xlane.xlu2 %1184 }
 0x41b   :  { %v1369_v17 = vsub.f32 %v9727_v57, %v1185_v25 }
 0x41c   :  { %v1227_v41 = vpop.xlane.xlu0 %1226 }
 0x41d   :  { %v1436_v46 = vmul.f32 1.442695, %v1369_v17  ;;  %v1383_v17 = vsub.f32 %v9938_v8, %v1227_v41  ;;  %v10101_v41 = vpop.f32.mrf.mxu0 }
 0x41e   :  { %1274 = vmax.xlane.f32.xlu1 %v1273_v61  ;;  %v1324_v61 = vsel %vm1173_vm2, %v10089_v18, -inf }
 0x41f   :  { %8551 = vpow2.f32 %v1436_v46  ;;  %v8282_v46 = vunpack.i.l.bf16 %v8281_v5 }
 0x420   :  { %1280 = vmax.xlane.f32.xlu2 %v1279_v7  ;;  %v1373_v7 = vsub.f32 %v9892_v11, %v10051_v10  ;;  %v1327_v11 = vsel %vm1173_vm2, %v10101_v41, -inf  ;;  %v1213_v10 = vsel %vm1173_vm2, %v9915_v43, -inf  ;;  %v13750_v43 = vld [vmem:[#allocation38_spill] sm:$0xff] }
 0x422   :  { %v1194_v32 = vpop.xlane.xlu2 %1193 }
 0x423   :  { %v1372_v26 = vsub.f32 %v9883_v52, %v1194_v32  ;;  %v1464_v32 = vmul.f32 1.442695, %v1383_v17 }
 0x424   :  { %v1230_v12 = vpop.xlane.xlu0 %1229 }
 0x425   :  { %v10074_v24 = vpop.eup %8551  ;;  %v1384_v55 = vsub.f32 %v9949_v35, %v1230_v12  ;;  %v1442_v20 = vmul.f32 1.442695, %v1372_v26  ;;  %v8268_v35 = vunpack.i.h.bf16 %v9946_v28  ;;  %v8283_v28 = vunpack.i.h.bf16 %v8281_v5 }
 0x426   :  { %v1567_v57 = vsel %vm1173_vm2, %v10074_v24, 0.0 }
 0x427   :  { %v1466_v34 = vmul.f32 1.442695, %v1384_v55  ;;  %1568 = vadd.xlane.f32.xlu1 %v1567_v57  ;;  %v1444_v55 = vmul.f32 1.442695, %v1373_v7 }
 0x429   :  { %8553 = vpow2.f32 %v1466_v34 }
 0x42a   :  { %v8261_v6 = vpop.permute.xlu2 %8260  ;;  %8555 = vpow2.f32 %v1442_v20 }
 0x42b   :  { %v8262_v4 = vunpack.i.l.bf16 %v8261_v6  ;;  %v8263_v14 = vunpack.i.h.bf16 %v8261_v6  ;;  %8557 = vpow2.f32 %v1464_v32 }
 0x42c   :  { %v1233_v12 = vpop.xlane.xlu0 %1232  ;;  %8559 = vpow2.f32 %v1444_v55 }
 0x42d   :  { %1936 = vmatpush.msrb.mxu2 %v8262_v4 }
 0x42f   :  { %v10084_v16 = vpop.eup %8553  ;;  %1322 = vmax.xlane.f32.xlu1 %v1321_v22  ;;  %1937 = vmatpush.msrb.mxu2 %v8263_v14 }
 0x430   :  { %v1612_v52 = vsel %vm1173_vm2, %v10084_v16, 0.0  ;;  %v10092_v25 = vpop.eup %8555 }
 0x431   :  { %1613 = vadd.xlane.f32.xlu0 %v1612_v52  ;;  %1938 = vmatpush.msrb.mxu2 %v8268_v35  ;;  %v1576_v50 = vsel %vm1173_vm2, %v10092_v25, 0.0  ;;  %v10107_v34 = vpop.eup %8557  ;;  %v10115_v52 = vpop.f32.mrf.mxu0 }
 0x432   :  { %v8276_v56 = vpop.permute.xlu2 %8275  ;;  %v10109_v4 = vpop.eup %8559  ;;  %v1609_v22 = vsel %vm1173_vm2, %v10107_v34, 0.0 }
 0x433   :  { %v8277_v15 = vunpack.i.l.bf16 %v8276_v56  ;;  %1939 = vmatpush.msrb.mxu2 %v8273_v19  ;;  %v8278_v23 = vunpack.i.h.bf16 %v8276_v56  ;;  %v1579_v35 = vsel %vm1173_vm2, %v10109_v4, 0.0  ;;  %v1385_v19 = vsub.f32 %v9957_v53, %v1233_v12 }
 0x434   :  { %v1236_v20 = vpop.xlane.xlu0 %1235 }
 0x435   :  { %1940 = vmatpush.msrb.mxu2 %v8278_v23  ;;  %2114 = vmatpush.msra.mxu0 %v8277_v15  ;;  %v1330_v15 = vsel %vm1173_vm2, %v10115_v52, -inf  ;;  %v1468_v23 = vmul.f32 1.442695, %v1385_v19 }
 0x437   :  { %1325 = vmax.xlane.f32.xlu1 %v1324_v61  ;;  %1941 = vmatpush.msrb.mxu2 %v8283_v28 }
 0x438   :  { %2115 = vmatpush.msra.mxu0 %v8282_v46  ;;  %v1386_v46 = vsub.f32 %v9963_v29, %v1236_v20 }
 0x439   :  { %1577 = vadd.xlane.f32.xlu0 %v1576_v50  ;;  %v10120_v28 = vpop.f32.mrf.mxu0 }
 0x43a   :  { %v8286_v8 = vpop.permute.xlu2 %8285  ;;  %v1333_v7 = vsel %vm1173_vm2, %v10120_v28, -inf  ;;  %v1470_v53 = vmul.f32 1.442695, %v1386_v46 }
 0x43b   :  { %v8287_v5 = vunpack.i.l.bf16 %v8286_v8  ;;  %v8288_v57 = vunpack.i.h.bf16 %v8286_v8 }
 0x43c   :  { %v1239_v56 = vpop.xlane.xlu0 %1238 }
 0x43d   :  { %2116 = vmatpush.msra.mxu0 %v8287_v5  ;;  %v13726_v5 = vld [vmem:[#allocation65_spill] sm:$0xff] }
 0x43f   :  { %1328 = vmax.xlane.f32.xlu1 %v1327_v11  ;;  %2117 = vmatpush.msra.mxu0 %v8288_v57  ;;  %v13727_v57 = vld [vmem:[#allocation56_spill] sm:$0xff] }
 0x440   :  { %v8294_v11 = vpack.i.bf16 %v13727_v57, %v13726_v5 }
 0x441   :  { %1214 = vmax.xlane.f32.xlu0 %v1213_v10  ;;  %v1387_v10 = vsub.f32 %v9968_v58, %v1239_v56 }
 0x442   :  { %v8291_v26 = vpop.permute.xlu2 %8290 }
 0x443   :  { %v8292_v6 = vunpack.i.l.bf16 %v8291_v26  ;;  %v8293_v14 = vunpack.i.h.bf16 %v8291_v26 }
 0x445   :  { %2118 = vmatpush.msra.mxu0 %v8292_v6 }
 0x447   :  { %1610 = vadd.xlane.f32.xlu1 %v1609_v22  ;;  %2119 = vmatpush.msra.mxu0 %v8293_v14  ;;  %v13728_v14 = vld [vmem:[#allocation42_spill] sm:$0xff] }
 0x448   :  { %v13729_v22 = vld [vmem:[#allocation46_spill] sm:$0xff] }
 0x449   :  { %1580 = vadd.xlane.f32.xlu0 %v1579_v35  ;;  %v8304_v35 = vpack.i.bf16 %v13729_v22, %v13728_v14 }
 0x44b   :  { %v1245_v61 = vpop.xlane.xlu0 %1244 }
 0x44f   :  { %1331 = vmax.xlane.f32.xlu1 %v1330_v15  ;;  %v10149_v15 = vpop.f32.mrf.mxu2 }
 0x451   :  { %v1560_v17 = vpop.xlane.xlu1 %1559 }
 0x452   :  { %8561 = vrcp.f32 %v1560_v17 }
 0x453   :  { %8563 = vpow2.f32 %v1468_v23 }
 0x454   :  { %8565 = vpow2.f32 %v1470_v53 }
 0x457   :  { %1334 = vmax.xlane.f32.xlu1 %v1333_v7  ;;  %v10152_v7 = vpop.f32.mrf.mxu1 }
 0x458   :  { %v8562_v50 = vpop.eup %8561 }
 0x459   :  { %v1224_v32 = vpop.xlane.xlu1 %1223  ;;  %v1814_v12 = vmul.f32 %v8562_v50, %v9992_v63  ;;  %v10127_v55 = vpop.eup %8563 }
 0x45a   :  { %v1382_v8 = vsub.f32 %v9934_v54, %v1224_v32  ;;  %v1615_v26 = vsel %vm1173_vm2, %v10127_v55, 0.0  ;;  %v10136_v63 = vpop.xlane.xlu0 %1202  ;;  %v1472_v54 = vmul.f32 1.442695, %v1387_v10  ;;  %v10138_v20 = vpop.eup %8565  ;;  %v1282_v10 = vsel %vm1173_vm2, %v10149_v15, -inf }
 0x45b   :  { %7230 = vmatmul.msk.f32.vlgmr.msrb.gmra.mxu2 %vm1173_vm2, %v1814_v12  ;;  %v1618_v56 = vsel %vm1173_vm2, %v10138_v20, 0.0 }
 0x45c   :  { %v1462_v29 = vmul.f32 1.442695, %v1382_v8  ;;  %v1255_v8 = vsel %vm1173_vm2, %v10152_v7, -inf }
 0x45d   :  { %8295 = vrot.lane.b32.xlu0 %v8294_v11, %s8893_s14 }
 0x45e   :  { %8567 = vpow2.f32 %v1462_v29  ;;  %v1389_v29 = vsub.f32 %v9984_v47, %v1245_v61 }
 0x45f   :  { %1616 = vadd.xlane.f32.xlu1 %v1615_v26  ;;  %v10175_v14 = vpop.f32.mrf.mxu1 }
 0x460   :  { %v1258_v61 = vsel %vm1173_vm2, %v10175_v14, -inf }
 0x461   :  { %v1563_v6 = vpop.xlane.xlu1 %1562 }
 0x462   :  { %8569 = vrcp.f32 %v1563_v6  ;;  %v10154_v50 = vpop.xlane.xlu0 %1250 }
 0x463   :  { %8571 = vpow2.f32 %v1472_v54  ;;  %v1476_v54 = vmul.f32 1.442695, %v1389_v29 }
 0x464   :  { %v10142_v19 = vpop.eup %8567 }
 0x465   :  { %8305 = vrot.lane.b32.xlu0 %v8304_v35, %s8893_s14  ;;  %v1606_v58 = vsel %vm1173_vm2, %v10142_v19, 0.0 }
 0x466   :  { %1607 = vadd.xlane.f32.xlu2 %v1606_v58 }
 0x467   :  { %1619 = vadd.xlane.f32.xlu1 %v1618_v56 }
 0x468   :  { %v8570_v23 = vpop.eup %8569 }
 0x469   :  { %v1242_v17 = vpop.xlane.xlu1 %1241  ;;  %v1815_v46 = vmul.f32 %v8570_v23, %v10010_v44  ;;  %v10157_v32 = vpop.eup %8571 }
 0x46a   :  { %v1388_v53 = vsub.f32 %v9978_v39, %v1242_v17  ;;  %v1621_v5 = vsel %vm1173_vm2, %v10157_v32, 0.0  ;;  %v10164_v44 = vpop.f32.mrf.mxu2  ;;  %v10168_v39 = vpop.xlane.xlu0 %1205 }
 0x46b   :  { %7231 = vmatmul.msk.f32.gmra.mxu2 %vm1173_vm2, %v1815_v46 }
 0x46c   :  { %v1474_v12 = vmul.f32 1.442695, %v1388_v53 }
 0x46e   :  { %8573 = vpow2.f32 %v1474_v12  ;;  %1256 = vmax.xlane.f32.xlu2 %v1255_v8 }
 0x46f   :  { %1622 = vadd.xlane.f32.xlu1 %v1621_v5 }
 0x471   :  { %v1200_v57 = vpop.xlane.xlu1 %1199 }
 0x472   :  { %v10177_v22 = vpop.f32.mrf.mxu2  ;;  %v1374_v58 = vsub.f32 %v9873_v38, %v1200_v57  ;;  %v1572_v56 = vpop.xlane.xlu0 %1571 }
 0x473   :  { %v1288_v23 = vsel %vm1173_vm2, %v10177_v22, -inf }
 0x474   :  { %v10166_v11 = vpop.eup %8573  ;;  %v1446_v17 = vmul.f32 1.442695, %v1374_v58 }
 0x475   :  { %v1624_v26 = vsel %vm1173_vm2, %v10166_v11, 0.0 }
 0x476   :  { %1283 = vmax.xlane.f32.xlu2 %v1282_v10 }
 0x477   :  { %1625 = vadd.xlane.f32.xlu1 %v1624_v26  ;;  %v10201_v26 = vpop.f32.mrf.mxu1 }
 0x479   :  { %v1272_v6 = vpop.xlane.xlu1 %1271 }
 0x47a   :  { %v1398_v47 = vsub.f32 %v10028_v21, %v1272_v6  ;;  %v1285_v21 = vsel %vm1173_vm2, %v10164_v44, -inf  ;;  %v10195_v57 = vpop.xlane.xlu0 %1208 }
 0x47b   :  { %v1566_v35 = vpop.xlane.xlu2 %1565 }
 0x47c   :  { %8575 = vrcp.f32 %v1566_v35  ;;  %v1494_v46 = vmul.f32 1.442695, %v1398_v47 }
 0x47d   :  { %8577 = vpow2.f32 %v1476_v54  ;;  %v1261_v54 = vsel %vm1173_vm2, %v10201_v26, -inf }
 0x47e   :  { %1259 = vmax.xlane.f32.xlu2 %v1258_v61  ;;  %8579 = vpow2.f32 %v1446_v17  ;;  %v1216_v61 = vsel %vm1173_vm2, %v9920_v40, -inf }
 0x47f   :  { %1289 = vmax.xlane.f32.xlu1 %v1288_v23  ;;  %8581 = vpow2.f32 %v1494_v46 }
 0x481   :  { %v10185_v53 = vpop.xlane.xlu1 %1247 }
 0x482   :  { %v8576_v12 = vpop.eup %8575  ;;  %v1575_v47 = vpop.xlane.xlu0 %1574 }
 0x483   :  { %v10187_v8 = vpop.eup %8577  ;;  %v1816_v38 = vmul.f32 %v8576_v12, %v10039_v9  ;;  %v13730_v12 = vld [vmem:[#allocation31_spill] sm:$0xff] }
 0x484   :  { %v1627_v5 = vsel %vm1173_vm2, %v10187_v8, 0.0  ;;  %v10199_v10 = vpop.eup %8579 }
 0x485   :  { %7232 = vmatmul.msk.f32.gmra.mxu2 %vm1173_vm2, %v1816_v38  ;;  %v10203_v9 = vpop.eup %8581  ;;  %v1582_v35 = vsel %vm1173_vm2, %v10199_v10, 0.0  ;;  %v13731_v38 = vld [vmem:[#allocation50_spill] sm:$0xff] }
 0x486   :  { %1286 = vmax.xlane.f32.xlu2 %v1285_v21  ;;  %v1654_v6 = vsel %vm1173_vm2, %v10203_v9, 0.0  ;;  %v8319_v21 = vpack.i.bf16 %v13731_v38, %v13730_v12  ;;  %v8324_v12 = vpack.i.bf16 %v13735_v36, %v13734_v59  ;;  %v13737_v38 = vld [vmem:[#allocation48_spill] sm:$0xff]  ;;  %v13738_v59 = vld [vmem:[#allocation78_spill] sm:$0xff] }
 0x487   :  { %1628 = vadd.xlane.f32.xlu1 %v1627_v5 }
 0x489   :  { %v10197_v29 = vpop.xlane.xlu1 %1319 }
 0x48a   :  { %v10213_v17 = vpop.xlane.xlu0 %1211 }
 0x48e   :  { %1262 = vmax.xlane.f32.xlu2 %v1261_v54 }
 0x48f   :  { %1655 = vadd.xlane.f32.xlu0 %v1654_v6  ;;  %1583 = vadd.xlane.f32.xlu1 %v1582_v35  ;;  %v13732_v35 = vld [vmem:[#allocation39_spill] sm:$0xff] }
 0x491   :  { %v1275_v58 = vpop.xlane.xlu1 %1274 }
 0x496   :  { %1217 = vmax.xlane.f32.xlu2 %v1216_v61  ;;  %v13733_v61 = vld [vmem:[#allocation41_spill] sm:$0xff] }
 0x49a   :  { %v1569_v23 = vpop.xlane.xlu1 %1568 }
 0x49b   :  { %8583 = vrcp.f32 %v1569_v23  ;;  %v8309_v23 = vpack.i.bf16 %v13733_v61, %v13732_v35 }
 0x49c   :  { %8585 = vrcp.f32 %v1572_v56 }
 0x49d   :  { %8587 = vrcp.f32 %v1575_v47  ;;  %v13739_v47 = vld [vmem:[#allocation58_spill] sm:$0xff] }
 0x4a1   :  { %v8584_v46 = vpop.eup %8583 }
 0x4a2   :  { %v10217_v5 = vpop.xlane.xlu1 %1322  ;;  %v1817_v54 = vmul.f32 %v8584_v46, %v10074_v24  ;;  %v8586_v42 = vpop.eup %8585  ;;  %v13736_v46 = vld [vmem:[#allocation36_spill] sm:$0xff] }
 0x4a3   :  { %8320 = vrot.lane.b32.xlu0 %v8319_v21, %s8893_s14  ;;  %v1818_v24 = vmul.f32 %v8586_v42, %v10018_v1  ;;  %v8299_v21 = vpack.i.bf16 %v13737_v38, %v13736_v46  ;;  %v8588_v35 = vpop.eup %8587  ;;  %v10248_v38 = vpop.xlane.xlu2 %1277 }
 0x4a4   :  { %v10221_v6 = vpop.xlane.xlu0 %1613  ;;  %7233 = vmatmul.msk.f32.gmra.mxu2 %vm1173_vm2, %v1817_v54  ;;  %v1819_v36 = vmul.f32 %v8588_v35, %v10041_v60 }
 0x4a8   :  { %8310 = vrot.lane.b32.xlu1 %v8309_v23, %s8893_s14  ;;  %v8314_v23 = vpack.i.bf16 %v13739_v47, %v13738_v59 }
 0x4aa   :  { %v10229_v56 = vpop.xlane.xlu1 %1325 }
 0x4ab   :  { %8325 = vrot.lane.b32.xlu0 %v8324_v12, %s8893_s14  ;;  %v10256_v59 = vpop.xlane.xlu2 %1253 }
 0x4ac   :  { %v1578_v54 = vpop.xlane.xlu0 %1577  ;;  %7234 = vmatmul.msk.f32.gmra.mxu2 %vm1173_vm2, %v1818_v24 }
 0x4ad   :  { %8589 = vrcp.f32 %v1578_v54  ;;  %v1390_v54 = vsub.f32 %v9989_v27, %v10185_v53 }
 0x4ae   :  { %8300 = vrot.lane.b32.xlu2 %v8299_v21, %s8893_s14 }
 0x4b2   :  { %v10237_v61 = vpop.xlane.xlu1 %1328 }
 0x4b3   :  { %v8590_v1 = vpop.eup %8589  ;;  %v10265_v27 = vpop.xlane.xlu2 %1280 }
 0x4b4   :  { %v10242_v42 = vpop.xlane.xlu0 %1214  ;;  %7235 = vmatmul.msk.f32.gmra.mxu2 %vm1173_vm2, %v1819_v36  ;;  %v1820_v24 = vmul.f32 %v8590_v1, %v10092_v25  ;;  %v1478_v36 = vmul.f32 1.442695, %v1390_v54  ;;  %v1399_v25 = vsub.f32 %v10036_v62, %v1275_v58  ;;  %v10273_v54 = vpop.f32.mrf.mxu1 }
 0x4b6   :  { %8315 = vrot.lane.b32.xlu2 %v8314_v23, %s8893_s14  ;;  %v10261_v23 = vpop.f32.mrf.mxu0  ;;  %v1496_v1 = vmul.f32 1.442695, %v1399_v25 }
 0x4ba   :  { %v1611_v12 = vpop.xlane.xlu1 %1610 }
 0x4bc   :  { %v1581_v46 = vpop.xlane.xlu0 %1580  ;;  %7236 = vmatmul.msk.f32.gmra.mxu2 %vm1173_vm2, %v1820_v24 }
 0x4bd   :  { %8591 = vrcp.f32 %v1581_v46 }
 0x4be   :  { %8593 = vpow2.f32 %v1478_v36 }
 0x4bf   :  { %8595 = vpow2.f32 %v1496_v1 }
 0x4c2   :  { %v10250_v60 = vpop.xlane.xlu1 %1331 }
 0x4c3   :  { %v8592_v21 = vpop.eup %8591 }
 0x4c4   :  { %v1821_v35 = vmul.f32 %v8592_v21, %v10109_v4  ;;  %v10263_v40 = vpop.eup %8593  ;;  %v1336_v4 = vsel %vm1173_vm2, %v10261_v23, -inf }
 0x4c5   :  { %13740 = vst [vmem:[#allocation83_spill] sm:$0xff] %v10263_v40  ;;  %v1630_v62 = vsel %vm1173_vm2, %v10263_v40, 0.0  ;;  %v10271_v58 = vpop.eup %8595 }
 0x4c6   :  { %7237 = vmatmul.msk.f32.gmra.mxu2 %vm1173_vm2, %v1821_v35  ;;  %13741 = vst [vmem:[#allocation60_spill] sm:$0xff] %v10271_v58  ;;  %v1657_v35 = vsel %vm1173_vm2, %v10271_v58, 0.0 }
 0x4ca   :  { %v10259_v47 = vpop.xlane.xlu1 %1334 }
 0x4cf   :  { %v8296_v24 = vpop.permute.xlu0 %8295 }
 0x4d0   :  { %v8298_v46 = vunpack.i.h.bf16 %v8296_v24  ;;  %v8297_v30 = vunpack.i.l.bf16 %v8296_v24 }
 0x4d2   :  { %1337 = vmax.xlane.f32.xlu1 %v1336_v4  ;;  %2023 = vmatpush.msrb.mxu3 %v8297_v30  ;;  %v1617_v53 = vpop.xlane.xlu1 %1616  ;;  %v1264_v30 = vsel %vm1173_vm2, %v10273_v54, -inf  ;;  %v1219_v4 = vsel %vm1173_vm2, %v9929_v3, -inf }
 0x4d3   :  { %2290 = vmatpush.msra.mxu2 %v8298_v46 }
 0x4d5   :  { %1631 = vadd.xlane.f32.xlu0 %v1630_v62  ;;  %v13742_v62 = vld [vmem:[#allocation29_spill] sm:$0xff] }
 0x4d9   :  { %v1608_v21 = vpop.xlane.xlu2 %1607 }
 0x4da   :  { %8597 = vrcp.f32 %v1608_v21  ;;  %v1620_v25 = vpop.xlane.xlu1 %1619  ;;  %v13743_v21 = vld [vmem:[#allocation45_spill] sm:$0xff] }
 0x4db   :  { %8599 = vrcp.f32 %v1611_v12 }
 0x4dc   :  { %8601 = vrcp.f32 %v10221_v6  ;;  %v13746_v6 = vld [vmem:[#allocation53_spill] sm:$0xff] }
 0x4dd   :  { %1658 = vadd.xlane.f32.xlu0 %v1657_v35  ;;  %v8329_v35 = vpack.i.bf16 %v13743_v21, %v13742_v62  ;;  %8603 = vrcp.f32 %v1617_v53  ;;  %v13747_v62 = vld [vmem:[#allocation27_spill] sm:$0xff]  ;;  %v13748_v21 = vld [vmem:[#allocation33_spill] sm:$0xff] }
 0x4de   :  { %v8339_v58 = vpack.i.bf16 %v13748_v21, %v13747_v62  ;;  %8605 = vrcp.f32 %v1620_v25  ;;  %v13752_v25 = vld [vmem:[#allocation55_spill] sm:$0xff] }
 0x4df   :  { %1265 = vmax.xlane.f32.xlu2 %v1264_v30 }
 0x4e0   :  { %v8598_v36 = vpop.eup %8597 }
 0x4e1   :  { %v1830_v1 = vmul.f32 %v8598_v36, %v10142_v19  ;;  %v10280_v24 = vpop.xlane.xlu2 %1256  ;;  %v8600_v46 = vpop.eup %8599 }
 0x4e2   :  { %v1831_v12 = vmul.f32 %v8600_v46, %v10107_v34  ;;  %v1623_v40 = vpop.xlane.xlu1 %1622  ;;  %v10291_v19 = vpop.f32.mrf.mxu2 }
 0x4e3   :  { %7246 = vmatmul.msk.f32.vlgmr.msra.gmra.mxu0 %vm1173_vm2, %v1830_v1  ;;  %13744 = vst [vmem:[#allocation86_spill] sm:$0xff] %v10291_v19  ;;  %v8602_v36 = vpop.eup %8601  ;;  %v1291_v1 = vsel %vm1173_vm2, %v10291_v19, -inf  ;;  %v13749_v19 = vld [vmem:[#allocation62_spill] sm:$0xff]  ;;  %8607 = vrcp.f32 %v1623_v40  ;;  %v1375_v40 = vsub.f32 %v9886_v2, %v10136_v63 }
 0x4e4   :  { %v1832_v46 = vmul.f32 %v8602_v36, %v10084_v16 }
 0x4e7   :  { %1220 = vmax.xlane.f32.xlu2 %v1219_v4  ;;  %v13745_v4 = vld [vmem:[#allocation70_spill] sm:$0xff] }
 0x4e8   :  { %v8344_v3 = vpack.i.bf16 %v13746_v6, %v13745_v4  ;;  %v8354_v4 = vpack.i.bf16 %v13750_v43, %v13749_v19  ;;  %v13751_v43 = vld [vmem:[#allocation71_spill] sm:$0xff]  ;;  %v8306_v6 = vpop.permute.xlu0 %8305 }
 0x4e9   :  { %v10288_v30 = vpop.xlane.xlu2 %1283  ;;  %v8334_v19 = vpack.i.bf16 %v13752_v25, %v13751_v43  ;;  %v8307_v25 = vunpack.i.l.bf16 %v8306_v6 }
 0x4eb   :  { %8330 = vrot.lane.b32.xlu1 %v8329_v35, %s8893_s14  ;;  %7247 = vmatmul.msk.f32.gmra.mxu0 %vm1173_vm2, %v1831_v12  ;;  %v1626_v35 = vpop.xlane.xlu1 %1625  ;;  %v8604_v12 = vpop.eup %8603 }
 0x4ec   :  { %8609 = vrcp.f32 %v1626_v35 }
 0x4ef   :  { %1292 = vmax.xlane.f32.xlu2 %v1291_v1  ;;  %v1833_v1 = vmul.f32 %v8604_v12, %v10127_v55 }
 0x4f1   :  { %v10301_v34 = vpop.xlane.xlu2 %1259  ;;  %8345 = vrot.lane.b32.xlu0 %v8344_v3, %s8893_s14  ;;  %v8606_v3 = vpop.eup %8605 }
 0x4f2   :  { %v1834_v36 = vmul.f32 %v8606_v3, %v10138_v20  ;;  %v8608_v62 = vpop.eup %8607 }
 0x4f3   :  { %8340 = vrot.lane.b32.xlu1 %v8339_v58, %s8893_s14  ;;  %7248 = vmatmul.msk.f32.gmra.mxu0 %vm1173_vm2, %v1832_v46  ;;  %v10314_v16 = vpop.xlane.xlu1 %1289  ;;  %v1835_v46 = vmul.f32 %v8608_v62, %v10157_v32  ;;  %v8610_v12 = vpop.eup %8609  ;;  %v8308_v32 = vunpack.i.h.bf16 %v8306_v6 }
 0x4f4   :  { %v1836_v3 = vmul.f32 %v8610_v12, %v10166_v11  ;;  %v1376_v11 = vsub.f32 %v9894_v37, %v10168_v39  ;;  %v1414_v37 = vsub.f32 %v10059_v45, %v10197_v29 }
 0x4f9   :  { %v10309_v53 = vpop.xlane.xlu2 %1286  ;;  %8355 = vrot.lane.b32.xlu0 %v8354_v4, %s8893_s14  ;;  %v1448_v4 = vmul.f32 1.442695, %v1375_v40 }
 0x4fb   :  { %7249 = vmatmul.msk.f32.gmra.mxu0 %vm1173_vm2, %v1833_v1  ;;  %v1629_v55 = vpop.xlane.xlu1 %1628 }
 0x4fc   :  { %8611 = vrcp.f32 %v1629_v55 }
 0x4fd   :  { %8613 = vpow2.f32 %v1448_v4 }
 0x501   :  { %v10316_v58 = vpop.xlane.xlu2 %1262 }
 0x502   :  { %v10329_v20 = vpop.xlane.xlu0 %1655  ;;  %v8612_v63 = vpop.eup %8611 }
 0x503   :  { %7250 = vmatmul.msk.f32.gmra.mxu0 %vm1173_vm2, %v1834_v36  ;;  %v10332_v36 = vpop.xlane.xlu1 %1583  ;;  %v1837_v55 = vmul.f32 %v8612_v63, %v10187_v8  ;;  %v10347_v63 = vpop.f32.mrf.mxu1 }
 0x504   :  { %v1267_v29 = vsel %vm1173_vm2, %v10347_v63, -inf }
 0x507   :  { %8335 = vrot.lane.b32.xlu2 %v8334_v19, %s8893_s14  ;;  %v10335_v19 = vpop.eup %8613 }
 0x508   :  { %v1585_v6 = vsel %vm1173_vm2, %v10335_v19, 0.0 }
 0x509   :  { %v10323_v21 = vpop.xlane.xlu2 %1217 }
 0x50b   :  { %7251 = vmatmul.msk.f32.gmra.mxu0 %vm1173_vm2, %v1835_v46 }
 0x511   :  { %v8301_v1 = vpop.permute.xlu2 %8300 }
 0x512   :  { %v8303_v35 = vunpack.i.h.bf16 %v8301_v1  ;;  %v8302_v43 = vunpack.i.l.bf16 %v8301_v1 }
 0x513   :  { %7252 = vmatmul.msk.f32.gmra.mxu0 %vm1173_vm2, %v1836_v3  ;;  %v1450_v3 = vmul.f32 1.442695, %v1376_v11  ;;  %v1400_v11 = vsub.f32 %v10049_v49, %v10248_v38 }
 0x514   :  { %2024 = vmatpush.msrb.mxu3 %v8302_v43  ;;  %2291 = vmatpush.msra.mxu2 %v8303_v35 }
 0x515   :  { %v8321_v2 = vpop.permute.xlu0 %8320  ;;  %8615 = vpow2.f32 %v1450_v3  ;;  %v13754_v3 = vld [vmem:[#allocation40_spill] sm:$0xff] }
 0x516   :  { %2025 = vmatpush.msrb.mxu3 %v8307_v25  ;;  %2292 = vmatpush.msra.mxu2 %v8308_v32  ;;  %v8322_v35 = vunpack.i.l.bf16 %v8321_v2  ;;  %v8323_v39 = vunpack.i.h.bf16 %v8321_v2  ;;  %v10345_v25 = vpop.f32.mrf.mxu0  ;;  %v1498_v2 = vmul.f32 1.442695, %v1400_v11 }
 0x517   :  { %v1339_v45 = vsel %vm1173_vm2, %v10345_v25, -inf }
 0x519   :  { %v8316_v62 = vpop.permute.xlu2 %8315 }
 0x51a   :  { %v8318_v46 = vunpack.i.h.bf16 %v8316_v62  ;;  %v8317_v40 = vunpack.i.l.bf16 %v8316_v62  ;;  %v8311_v12 = vpop.permute.xlu1 %8310  ;;  %v1526_v62 = vmul.f32 1.442695, %v1414_v37  ;;  %v13756_v37 = vld [vmem:[#allocation34_spill] sm:$0xff] }
 0x51b   :  { %v8313_v4 = vunpack.i.h.bf16 %v8311_v12  ;;  %v8312_v1 = vunpack.i.l.bf16 %v8311_v12  ;;  %7253 = vmatmul.msk.f32.gmra.mxu0 %vm1173_vm2, %v1837_v55  ;;  %v10355_v55 = vpop.eup %8615 }
 0x51c   :  { %2201 = vmatpush.msrb.mxu1 %v8317_v40  ;;  %2468 = vmatpush.msrb.mxu0 %v8318_v46  ;;  %8617 = vpow2.f32 %v1526_v62  ;;  %v10357_v46 = vpop.f32.mrf.mxu3  ;;  %v1588_v49 = vsel %vm1173_vm2, %v10355_v55, 0.0  ;;  %v13759_v62 = vld [vmem:[#allocation66_spill] sm:$0xff] }
 0x51d   :  { %1586 = vadd.xlane.f32.xlu1 %v1585_v6  ;;  %v8326_v43 = vpop.permute.xlu0 %8325  ;;  %2026 = vmatpush.msrb.mxu3 %v8312_v1  ;;  %8619 = vpow2.f32 %v1498_v2  ;;  %v1294_v40 = vsel %vm1173_vm2, %v10357_v46, -inf  ;;  %v13753_v6 = vld [vmem:[#allocation63_spill] sm:$0xff] }
 0x51e   :  { %v8328_v8 = vunpack.i.h.bf16 %v8326_v43  ;;  %v8327_v32 = vunpack.i.l.bf16 %v8326_v43  ;;  %2293 = vmatpush.msra.mxu2 %v8313_v4  ;;  %v13755_v43 = vld [vmem:[#allocation61_spill] sm:$0xff] }
 0x51f   :  { %2027 = vmatpush.msrb.mxu3 %v8322_v35  ;;  %v8364_v35 = vpack.i.bf16 %v13754_v3, %v13753_v6  ;;  %v1415_v3 = vsub.f32 %v10079_v13, %v10217_v5  ;;  %v1377_v13 = vsub.f32 %v9901_v51, %v10195_v57 }
 0x520   :  { %2294 = vmatpush.msra.mxu2 %v8323_v39  ;;  %2202 = vmatpush.msrb.mxu1 %v8327_v32  ;;  %v8369_v39 = vpack.i.bf16 %v13756_v37, %v13755_v43  ;;  %v13758_v32 = vld [vmem:[#allocation28_spill] sm:$0xff]  ;;  %v10395_v37 = vpop.f32.mrf.mxu1 }
 0x521   :  { %2469 = vmatpush.msrb.mxu0 %v8328_v8  ;;  %v13757_v8 = vld [vmem:[#allocation32_spill] sm:$0xff] }
 0x522   :  { %v10361_v38 = vpop.eup %8617  ;;  %v8349_v11 = vpack.i.bf16 %v13758_v32, %v13757_v8  ;;  %v1528_v8 = vmul.f32 1.442695, %v1415_v3 }
 0x523   :  { %1340 = vmax.xlane.f32.xlu0 %v1339_v45  ;;  %v10365_v12 = vpop.eup %8619  ;;  %v1702_v4 = vsel %vm1173_vm2, %v10361_v38, 0.0  ;;  %v13760_v45 = vld [vmem:[#allocation47_spill] sm:$0xff] }
 0x524   :  { %v1660_v1 = vsel %vm1173_vm2, %v10365_v12, 0.0  ;;  %8621 = vpow2.f32 %v1528_v8 }
 0x525   :  { %1268 = vmax.xlane.f32.xlu1 %v1267_v29  ;;  %v8359_v29 = vpack.i.bf16 %v13760_v45, %v13759_v62  ;;  %v1391_v45 = vsub.f32 %v10004_v48, %v10154_v50 }
 0x527   :  { %v1480_v3 = vmul.f32 1.442695, %v1391_v45 }
 0x52b   :  { %1589 = vadd.xlane.f32.xlu0 %v1588_v49 }
 0x52d   :  { %1295 = vmax.xlane.f32.xlu1 %v1294_v40 }
 0x530   :  { %1703 = vadd.xlane.f32.xlu2 %v1702_v4 }
 0x533   :  { %1661 = vadd.xlane.f32.xlu0 %v1660_v1 }
 0x545   :  { %v10387_v40 = vpop.xlane.xlu1 %1337 }
 0x546   :  { %8365 = vrot.lane.b32.xlu1 %v8364_v35, %s8893_s14 }
 0x547   :  { %8370 = vrot.lane.b32.xlu0 %v8369_v39, %s8893_s14  ;;  %v1416_v39 = vsub.f32 %v10089_v18, %v10229_v56  ;;  %v1418_v18 = vsub.f32 %v10115_v52, %v10250_v60  ;;  %v10407_v56 = vpop.f32.mrf.mxu1 }
 0x548   :  { %8350 = vrot.lane.b32.xlu2 %v8349_v11, %s8893_s14  ;;  %v10383_v2 = vpop.xlane.xlu0 %1631 }
 0x549   :  { %v1530_v11 = vmul.f32 1.442695, %v1416_v39  ;;  %v1534_v39 = vmul.f32 1.442695, %v1418_v18  ;;  %v1393_v18 = vsub.f32 %v10152_v7, %v10280_v24  ;;  %v1378_v7 = vsub.f32 %v9910_v0, %v10213_v17 }
 0x54a   :  { %v1342_v24 = vsel %vm1173_vm2, %v10395_v37, -inf }
 0x54b   :  { %8623 = vpow2.f32 %v1530_v11 }
 0x54c   :  { %8625 = vpow2.f32 %v1480_v3  ;;  %v1419_v3 = vsub.f32 %v10120_v28, %v10259_v47  ;;  %v1392_v28 = vsub.f32 %v10061_v31, %v10256_v59  ;;  %v1345_v47 = vsel %vm1173_vm2, %v10407_v56, -inf  ;;  %v10451_v31 = vpop.f32.mrf.mxu3 }
 0x54d   :  { %v1401_v59 = vsub.f32 %v10068_v33, %v10265_v27 }
 0x550   :  { %8360 = vrot.lane.b32.xlu2 %v8359_v29, %s8893_s14  ;;  %v10391_v1 = vpop.xlane.xlu0 %1658 }
 0x552   :  { %v10385_v49 = vpop.xlane.xlu2 %1265 }
 0x55a   :  { %v10389_v4 = vpop.xlane.xlu2 %1220 }
 0x55b   :  { %13761 = vst [vmem:[#allocation85_spill] sm:$0xff] %v10389_v4  ;;  %v10409_v4 = vpop.eup %8621 }
 0x55c   :  { %v10411_v57 = vpop.eup %8623  ;;  %v1705_v60 = vsel %vm1173_vm2, %v10409_v4, 0.0 }
 0x55d   :  { %v8331_v6 = vpop.permute.xlu1 %8330 }
 0x55e   :  { %v8333_v35 = vunpack.i.h.bf16 %v8331_v6  ;;  %v8332_v43 = vunpack.i.l.bf16 %v8331_v6 }
 0x560   :  { %2028 = vmatpush.msrb.mxu3 %v8332_v43  ;;  %2295 = vmatpush.msra.mxu2 %v8333_v35  ;;  %v1452_v35 = vmul.f32 1.442695, %v1377_v13  ;;  %v10417_v13 = vpop.eup %8625 }
 0x562   :  { %v10399_v32 = vpop.xlane.xlu2 %1292  ;;  %8627 = vpow2.f32 %v1452_v35 }
 0x563   :  { %v8346_v62 = vpop.permute.xlu0 %8345  ;;  %8629 = vpow2.f32 %v1534_v39 }
 0x564   :  { %v8348_v8 = vunpack.i.h.bf16 %v8346_v62  ;;  %v8347_v11 = vunpack.i.l.bf16 %v8346_v62  ;;  %v10419_v62 = vpop.f32.mrf.mxu1 }
 0x565   :  { %v8341_v29 = vpop.permute.xlu1 %8340 }
 0x566   :  { %v8343_v5 = vunpack.i.h.bf16 %v8341_v29  ;;  %v8342_v6 = vunpack.i.l.bf16 %v8341_v29  ;;  %v1708_v29 = vsel %vm1173_vm2, %v10411_v57, 0.0 }
 0x568   :  { %2029 = vmatpush.msrb.mxu3 %v8342_v6  ;;  %2296 = vmatpush.msra.mxu2 %v8343_v5  ;;  %v10421_v5 = vpop.eup %8627 }
 0x569   :  { %v10423_v6 = vpop.eup %8629  ;;  %v1591_v35 = vsel %vm1173_vm2, %v10421_v5, 0.0 }
 0x56a   :  { %v8336_v43 = vpop.permute.xlu2 %8335  ;;  %v1714_v39 = vsel %vm1173_vm2, %v10423_v6, 0.0 }
 0x56b   :  { %v8338_v48 = vunpack.i.h.bf16 %v8336_v43  ;;  %v8337_v50 = vunpack.i.l.bf16 %v8336_v43  ;;  %v8356_v51 = vpop.permute.xlu0 %8355  ;;  %v1633_v43 = vsel %vm1173_vm2, %v10417_v13, 0.0 }
 0x56c   :  { %v8357_v52 = vunpack.i.l.bf16 %v8356_v51  ;;  %v8358_v45 = vunpack.i.h.bf16 %v8356_v51  ;;  %v10435_v51 = vpop.f32.mrf.mxu1 }
 0x56d   :  { %2203 = vmatpush.msrb.mxu1 %v8337_v50  ;;  %2470 = vmatpush.msrb.mxu0 %v8338_v48  ;;  %v1484_v48 = vmul.f32 1.442695, %v1393_v18  ;;  %v1536_v50 = vmul.f32 1.442695, %v1419_v3  ;;  %v1500_v3 = vmul.f32 1.442695, %v1401_v59 }
 0x56f   :  { %2204 = vmatpush.msrb.mxu1 %v8347_v11  ;;  %2471 = vmatpush.msrb.mxu0 %v8348_v8  ;;  %8631 = vpow2.f32 %v1484_v48  ;;  %v1351_v8 = vsel %vm1173_vm2, %v10435_v51, -inf  ;;  %v1454_v11 = vmul.f32 1.442695, %v1378_v7 }
 0x570   :  { %1706 = vadd.xlane.f32.xlu1 %v1705_v60  ;;  %8633 = vpow2.f32 %v1536_v50  ;;  %v1420_v60 = vsub.f32 %v10261_v23, %v10387_v40  ;;  %v1394_v23 = vsub.f32 %v10175_v14, %v10301_v34  ;;  %v1417_v14 = vsub.f32 %v10101_v41, %v10237_v61 }
 0x571   :  { %1709 = vadd.xlane.f32.xlu0 %v1708_v29  ;;  %2205 = vmatpush.msrb.mxu1 %v8357_v52  ;;  %v1482_v52 = vmul.f32 1.442695, %v1392_v28  ;;  %8635 = vpow2.f32 %v1454_v11  ;;  %v1297_v29 = vsel %vm1173_vm2, %v10451_v31, -inf  ;;  %v1403_v34 = vsub.f32 %v10164_v44, %v10309_v53  ;;  %v10494_v44 = vpop.f32.mrf.mxu3 }
 0x572   :  { %2472 = vmatpush.msrb.mxu0 %v8358_v45  ;;  %v1486_v7 = vmul.f32 1.442695, %v1394_v23  ;;  %v1532_v59 = vmul.f32 1.442695, %v1417_v14 }
 0x573   :  { %8637 = vpow2.f32 %v1482_v52  ;;  %v1504_v41 = vmul.f32 1.442695, %v1403_v34 }
 0x574   :  { %v10467_v27 = vpop.f32.mrf.mxu1  ;;  %8639 = vpow2.f32 %v1500_v3 }
 0x575   :  { %v10447_v0 = vpop.eup %8631  ;;  %v1354_v50 = vsel %vm1173_vm2, %v10467_v27, -inf }
 0x576   :  { %v10449_v17 = vpop.eup %8633  ;;  %v1639_v45 = vsel %vm1173_vm2, %v10447_v0, 0.0 }
 0x577   :  { %v1717_v18 = vsel %vm1173_vm2, %v10449_v17, 0.0 }
 0x578   :  { %1592 = vadd.xlane.f32.xlu1 %v1591_v35  ;;  %v1538_v35 = vmul.f32 1.442695, %v1420_v60 }
 0x579   :  { %1634 = vadd.xlane.f32.xlu2 %v1633_v43  ;;  %1715 = vadd.xlane.f32.xlu0 %v1714_v39  ;;  %v10463_v43 = vpop.eup %8635 }
 0x57a   :  { %v10465_v33 = vpop.eup %8637  ;;  %8641 = vpow2.f32 %v1538_v35  ;;  %v1594_v40 = vsel %vm1173_vm2, %v10463_v43, 0.0  ;;  %v1300_v35 = vsel %vm1173_vm2, %v10494_v44, -inf }
 0x57b   :  { %v1636_v48 = vsel %vm1173_vm2, %v10465_v33, 0.0  ;;  %v10477_v28 = vpop.eup %8639  ;;  %8643 = vpow2.f32 %v1486_v7 }
 0x57c   :  { %v1663_v11 = vsel %vm1173_vm2, %v10477_v28, 0.0  ;;  %v10496_v53 = vpop.f32.mrf.mxu1  ;;  %8645 = vpow2.f32 %v1532_v59 }
 0x57d   :  { %8647 = vpow2.f32 %v1504_v41  ;;  %v1357_v23 = vsel %vm1173_vm2, %v10496_v53, -inf }
 0x580   :  { %1346 = vmax.xlane.f32.xlu1 %v1345_v47  ;;  %v10479_v47 = vpop.eup %8641 }
 0x581   :  { %1343 = vmax.xlane.f32.xlu2 %v1342_v24  ;;  %1352 = vmax.xlane.f32.xlu0 %v1351_v8  ;;  %v1348_v24 = vsel %vm1173_vm2, %v10419_v62, -inf  ;;  %v1720_v52 = vsel %vm1173_vm2, %v10479_v47, 0.0 }
 0x588   :  { %1640 = vadd.xlane.f32.xlu1 %v1639_v45  ;;  %v10492_v45 = vpop.eup %8643 }
 0x589   :  { %1298 = vmax.xlane.f32.xlu2 %v1297_v29  ;;  %1718 = vadd.xlane.f32.xlu0 %v1717_v18  ;;  %v1395_v18 = vsub.f32 %v10201_v26, %v10316_v58  ;;  %v1642_v3 = vsel %vm1173_vm2, %v10492_v45, 0.0 }
 0x590   :  { %v1587_v39 = vpop.xlane.xlu1 %1586  ;;  %1595 = vadd.xlane.f32.xlu1 %v1594_v40  ;;  %v1488_v40 = vmul.f32 1.442695, %v1395_v18  ;;  %v1396_v18 = vsub.f32 %v10273_v54, %v10385_v49 }
 0x591   :  { %1637 = vadd.xlane.f32.xlu2 %v1636_v48  ;;  %1355 = vmax.xlane.f32.xlu0 %v1354_v50  ;;  %v10510_v48 = vpop.eup %8645  ;;  %v1404_v50 = vsub.f32 %v10177_v22, %v10314_v16 }
 0x596   :  { %v10498_v29 = vpop.xlane.xlu0 %1340 }
 0x598   :  { %v1269_v8 = vpop.xlane.xlu1 %1268  ;;  %1349 = vmax.xlane.f32.xlu1 %v1348_v24 }
 0x599   :  { %v1397_v60 = vsub.f32 %v10347_v63, %v1269_v8  ;;  %1664 = vadd.xlane.f32.xlu2 %v1663_v11  ;;  %1721 = vadd.xlane.f32.xlu0 %v1720_v52  ;;  %v1402_v63 = vsub.f32 %v10149_v15, %v10288_v30  ;;  %v10513_v30 = vpop.eup %8647  ;;  %v1506_v8 = vmul.f32 1.442695, %v1404_v50 }
 0x59a   :  { %v1669_v14 = vsel %vm1173_vm2, %v10513_v30, 0.0 }
 0x59b   :  { %v1492_v61 = vmul.f32 1.442695, %v1397_v60  ;;  %v1502_v26 = vmul.f32 1.442695, %v1402_v63 }
 0x59d   :  { %8649 = vpow2.f32 %v1492_v61  ;;  %v10533_v61 = vpop.f32.mrf.mxu3 }
 0x59e   :  { %8651 = vrcp.f32 %v10332_v36  ;;  %v1590_v7 = vpop.xlane.xlu0 %1589  ;;  %v1711_v36 = vsel %vm1173_vm2, %v10510_v48, 0.0 }
 0x59f   :  { %8653 = vrcp.f32 %v10329_v20 }
 0x5a0   :  { %1643 = vadd.xlane.f32.xlu1 %v1642_v3  ;;  %8655 = vpow2.f32 %v1488_v40 }
 0x5a1   :  { %1301 = vmax.xlane.f32.xlu2 %v1300_v35  ;;  %1358 = vmax.xlane.f32.xlu0 %v1357_v23  ;;  %8657 = vpow2.f32 %v1502_v26 }
 0x5a2   :  { %8659 = vrcp.f32 %v10391_v1  ;;  %v13762_v1 = vld [vmem:[#allocation49_spill] sm:$0xff] }
 0x5a3   :  { %v1704_v15 = vpop.xlane.xlu2 %1703  ;;  %v10516_v58 = vpop.eup %8649  ;;  %8661 = vrcp.f32 %v1587_v39  ;;  %v1379_v63 = vsub.f32 %v13762_v1, %v10242_v42  ;;  %v1490_v42 = vmul.f32 1.442695, %v1396_v18 }
 0x5a4   :  { %v1651_v34 = vsel %vm1173_vm2, %v10516_v58, 0.0  ;;  %v8652_v24 = vpop.eup %8651  ;;  %8663 = vpow2.f32 %v1506_v8  ;;  %v10543_v39 = vpop.xlane.xlu1 %1295  ;;  %v1303_v8 = vsel %vm1173_vm2, %v10533_v61, -inf }
 0x5a5   :  { %v8654_v20 = vpop.eup %8653  ;;  %v1822_v60 = vmul.f32 %v8652_v24, %v10199_v10  ;;  %8665 = vrcp.f32 %v10383_v2  ;;  %v1456_v35 = vmul.f32 1.442695, %v1379_v63  ;;  %v13764_v24 = vld [vmem:[#allocation86_spill] sm:$0xff] }
 0x5a6   :  { %v10527_v16 = vpop.eup %8655  ;;  %v1846_v41 = vmul.f32 %v8654_v20, %v10203_v9  ;;  %v1662_v54 = vpop.xlane.xlu0 %1661  ;;  %8667 = vrcp.f32 %v1590_v7  ;;  %v1405_v20 = vsub.f32 %v13764_v24, %v10399_v32  ;;  %v13770_v24 = vld [vmem:[#allocation59_spill] sm:$0xff] }
 0x5a7   :  { %v10529_v59 = vpop.eup %8657  ;;  %v1645_v10 = vsel %vm1173_vm2, %v10527_v16, 0.0  ;;  %8669 = vrcp.f32 %v1704_v15  ;;  %v10558_v7 = vpop.f32.mrf.mxu3 }
 0x5a8   :  { %1670 = vadd.xlane.f32.xlu1 %v1669_v14  ;;  %v1666_v9 = vsel %vm1173_vm2, %v10529_v59, 0.0  ;;  %v8660_v3 = vpop.eup %8659  ;;  %8671 = vrcp.f32 %v1662_v54 }
 0x5a9   :  { %1712 = vadd.xlane.f32.xlu2 %v1711_v36  ;;  %1652 = vadd.xlane.f32.xlu0 %v1651_v34  ;;  %v8662_v49 = vpop.eup %8661  ;;  %v13763_v36 = vld [vmem:[#allocation60_spill] sm:$0xff]  ;;  %8673 = vpow2.f32 %v1490_v42 }
 0x5aa   :  { %v10548_v40 = vpop.eup %8663  ;;  %v1823_v14 = vmul.f32 %v8662_v49, %v10335_v19  ;;  %v1847_v34 = vmul.f32 %v8660_v3, %v13763_v36  ;;  %8675 = vpow2.f32 %v1456_v35  ;;  %v13767_v49 = vld [vmem:[#allocation83_spill] sm:$0xff] }
 0x5ab   :  { %v8351_v22 = vpop.permute.xlu2 %8350  ;;  %v1672_v2 = vsel %vm1173_vm2, %v10548_v40, 0.0  ;;  %v8666_v15 = vpop.eup %8665 }
 0x5ac   :  { %v8353_v11 = vunpack.i.h.bf16 %v8351_v22  ;;  %v8352_v52 = vunpack.i.l.bf16 %v8351_v22  ;;  %v8668_v22 = vpop.eup %8667  ;;  %v1838_v42 = vmul.f32 %v8666_v15, %v13767_v49  ;;  %v1421_v15 = vsub.f32 %v10345_v25, %v10498_v29  ;;  %v13772_v25 = vld [vmem:[#allocation54_spill] sm:$0xff] }
 0x5ae   :  { %2030 = vmatpush.msrb.mxu3 %v8352_v52  ;;  %2297 = vmatpush.msra.mxu2 %v8353_v11 }
 0x5af   :  { %7238 = vmatmul.msk.f32.vlgmr.msrb.gmra.mxu3 %vm1173_vm2, %v1822_v60  ;;  %7262 = vmatmul.msk.f32.vlgmr.msra.gmra.mxu2 %vm1173_vm2, %v1846_v41  ;;  %v8670_v60 = vpop.eup %8669  ;;  %v1508_v41 = vmul.f32 1.442695, %v1405_v20 }
 0x5b0   :  { %1646 = vadd.xlane.f32.xlu1 %v1645_v10  ;;  %v8672_v63 = vpop.eup %8671  ;;  %v13765_v10 = vld [vmem:[#allocation72_spill] sm:$0xff] }
 0x5b1   :  { %1667 = vadd.xlane.f32.xlu2 %v1666_v9  ;;  %v13766_v9 = vld [vmem:[#allocation68_spill] sm:$0xff]  ;;  %v10564_v54 = vpop.eup %8673  ;;  %8677 = vpow2.f32 %v1508_v41 }
 0x5b2   :  { %v8379_v3 = vpack.i.bf16 %v13766_v9, %v13765_v10  ;;  %v10567_v35 = vpop.eup %8675 }
 0x5b3   :  { %v8361_v23 = vpop.permute.xlu2 %8360 }
 0x5b4   :  { %v8363_v26 = vunpack.i.h.bf16 %v8361_v23  ;;  %v8362_v50 = vunpack.i.l.bf16 %v8361_v23  ;;  %v1862_v23 = vmul.f32 %v8670_v60, %v10361_v38  ;;  %v1648_v38 = vsel %vm1173_vm2, %v10564_v54, 0.0  ;;  %v13771_v60 = vld [vmem:[#allocation85_spill] sm:$0xff] }
 0x5b5   :  { %v1381_v29 = vsub.f32 %v13772_v25, %v13771_v60  ;;  %v13774_v25 = vld [vmem:[#allocation75_spill] sm:$0xff] }
 0x5b6   :  { %2206 = vmatpush.msrb.mxu1 %v8362_v50  ;;  %2473 = vmatpush.msrb.mxu0 %v8363_v26  ;;  %v1824_v26 = vmul.f32 %v8668_v22, %v10355_v55  ;;  %v1848_v50 = vmul.f32 %v8672_v63, %v10365_v12  ;;  %v1597_v55 = vsel %vm1173_vm2, %v10567_v35, 0.0  ;;  %v13769_v12 = vld [vmem:[#allocation67_spill] sm:$0xff]  ;;  %v1540_v22 = vmul.f32 1.442695, %v1421_v15 }
 0x5b7   :  { %7239 = vmatmul.msk.f32.gmra.mxu3 %vm1173_vm2, %v1823_v14  ;;  %7263 = vmatmul.msk.f32.gmra.mxu2 %vm1173_vm2, %v1847_v34  ;;  %v13768_v14 = vld [vmem:[#allocation84_spill] sm:$0xff]  ;;  %v10583_v34 = vpop.f32.mrf.mxu3  ;;  %v8389_v20 = vpack.i.bf16 %v13770_v24, %v13769_v12  ;;  %v1460_v63 = vmul.f32 1.442695, %v1381_v29 }
 0x5b8   :  { %v8366_v19 = vpop.permute.xlu1 %8365  ;;  %1673 = vadd.xlane.f32.xlu1 %v1672_v2  ;;  %v1380_v36 = vsub.f32 %v13768_v14, %v10323_v21  ;;  %v10587_v2 = vpop.eup %8677 }
 0x5b9   :  { %v8368_v32 = vunpack.i.h.bf16 %v8366_v19  ;;  %v8367_v11 = vunpack.i.l.bf16 %v8366_v19  ;;  %1304 = vmax.xlane.f32.xlu2 %v1303_v8  ;;  %v8371_v52 = vpop.permute.xlu0 %8370  ;;  %v1675_v19 = vsel %vm1173_vm2, %v10587_v2, 0.0  ;;  %v1306_v8 = vsel %vm1173_vm2, %v10558_v7, -inf }
 0x5ba   :  { %v8373_v18 = vunpack.i.h.bf16 %v8371_v52  ;;  %v8372_v1 = vunpack.i.l.bf16 %v8371_v52  ;;  %v1458_v21 = vmul.f32 1.442695, %v1380_v36  ;;  %v1406_v52 = vsub.f32 %v10357_v46, %v10543_v39 }
 0x5bb   :  { %2207 = vmatpush.msrb.mxu1 %v8367_v11  ;;  %2474 = vmatpush.msrb.mxu0 %v8368_v32  ;;  %v1309_v39 = vsel %vm1173_vm2, %v10583_v34, -inf }
 0x5bc   :  { %8679 = vpow2.f32 %v1458_v21 }
 0x5bd   :  { %8380 = vrot.lane.b32.xlu0 %v8379_v3, %s8893_s14  ;;  %2208 = vmatpush.msrb.mxu1 %v8372_v1  ;;  %8681 = vpow2.f32 %v1540_v22  ;;  %v1510_v1 = vmul.f32 1.442695, %v1406_v52 }
 0x5be   :  { %2475 = vmatpush.msrb.mxu0 %v8373_v18  ;;  %7254 = vmatmul.msk.f32.vlgmr.msrb.gmra.mxu1 %vm1173_vm2, %v1838_v42 }
 0x5bf   :  { %7278 = vmatmul.msk.f32.vlgmr.msrb.gmra.mxu0 %vm1173_vm2, %v1862_v23  ;;  %7240 = vmatmul.msk.f32.gmra.mxu3 %vm1173_vm2, %v1824_v26  ;;  %v10596_v32 = vpop.f32.mrf.mxu3  ;;  %8683 = vpow2.f32 %v1510_v1  ;;  %v10622_v26 = vpop.f32.mrf.mxu1 }
 0x5c0   :  { %7264 = vmatmul.msk.f32.gmra.mxu2 %vm1173_vm2, %v1848_v50  ;;  %1649 = vadd.xlane.f32.xlu1 %v1648_v38  ;;  %v1312_v41 = vsel %vm1173_vm2, %v10596_v32, -inf  ;;  %8685 = vpow2.f32 %v1460_v63  ;;  %v1360_v14 = vsel %vm1173_vm2, %v10622_v26, -inf }
 0x5c1   :  { %1598 = vadd.xlane.f32.xlu2 %v1597_v55 }
 0x5c2   :  { %v10598_v11 = vpop.eup %8679 }
 0x5c3   :  { %v1600_v18 = vsel %vm1173_vm2, %v10598_v11, 0.0  ;;  %v10608_v10 = vpop.eup %8681 }
 0x5c4   :  { %v1723_v46 = vsel %vm1173_vm2, %v10608_v10, 0.0 }
 0x5c5   :  { %8390 = vrot.lane.b32.xlu0 %v8389_v20, %s8893_s14  ;;  %v10614_v9 = vpop.eup %8683 }
 0x5c6   :  { %v10616_v3 = vpop.eup %8685  ;;  %v1678_v49 = vsel %vm1173_vm2, %v10614_v9, 0.0 }
 0x5c7   :  { %v1603_v42 = vsel %vm1173_vm2, %v10616_v3, 0.0 }
 0x5c8   :  { %1676 = vadd.xlane.f32.xlu1 %v1675_v19 }
 0x5c9   :  { %1307 = vmax.xlane.f32.xlu2 %v1306_v8 }
 0x5d0   :  { %1313 = vmax.xlane.f32.xlu1 %v1312_v41 }
 0x5d1   :  { %1601 = vadd.xlane.f32.xlu2 %v1600_v18 }
 0x5d8   :  { %1724 = vadd.xlane.f32.xlu1 %v1723_v46  ;;  %v13777_v46 = vld [vmem:[#allocation74_spill] sm:$0xff] }
 0x5d9   :  { %1310 = vmax.xlane.f32.xlu2 %v1309_v39  ;;  %v13778_v39 = vld [vmem:[#allocation57_spill] sm:$0xff] }
 0x5e0   :  { %1679 = vadd.xlane.f32.xlu1 %v1678_v49  ;;  %v8394_v49 = vpack.i.bf16 %v13778_v39, %v13777_v46 }
 0x5e1   :  { %1604 = vadd.xlane.f32.xlu2 %v1603_v42 }
 0x5e3   :  { %v1707_v23 = vpop.xlane.xlu1 %1706 }
 0x5e4   :  { %8687 = vrcp.f32 %v1707_v23  ;;  %v1710_v50 = vpop.xlane.xlu0 %1709 }
 0x5e5   :  { %8689 = vrcp.f32 %v1710_v50 }
 0x5e8   :  { %1361 = vmax.xlane.f32.xlu1 %v1360_v14 }
 0x5ea   :  { %v8688_v36 = vpop.eup %8687 }
 0x5eb   :  { %v1593_v38 = vpop.xlane.xlu1 %1592  ;;  %v1863_v55 = vmul.f32 %v8688_v36, %v10409_v4  ;;  %v8690_v24 = vpop.eup %8689  ;;  %v13773_v4 = vld [vmem:[#allocation80_spill] sm:$0xff] }
 0x5ec   :  { %8691 = vrcp.f32 %v1593_v38  ;;  %v1635_v12 = vpop.xlane.xlu2 %1634  ;;  %v1864_v8 = vmul.f32 %v8690_v24, %v10411_v57  ;;  %v8374_v29 = vpack.i.bf16 %v13774_v25, %v13773_v4 }
 0x5ed   :  { %8693 = vrcp.f32 %v1635_v12  ;;  %7279 = vmatmul.msk.f32.gmra.mxu0 %vm1173_vm2, %v1863_v55 }
 0x5f2   :  { %v8692_v20 = vpop.eup %8691 }
 0x5f3   :  { %v8694_v21 = vpop.eup %8693  ;;  %v10628_v15 = vpop.xlane.xlu1 %1346  ;;  %v1825_v19 = vmul.f32 %v8692_v20, %v10421_v5 }
 0x5f4   :  { %v1344_v22 = vpop.xlane.xlu2 %1343  ;;  %v1839_v52 = vmul.f32 %v8694_v21, %v10417_v13  ;;  %v1716_v5 = vpop.xlane.xlu0 %1715  ;;  %v13775_v13 = vld [vmem:[#allocation81_spill] sm:$0xff] }
 0x5f5   :  { %v1422_v60 = vsub.f32 %v10395_v37, %v1344_v22  ;;  %7241 = vmatmul.msk.f32.gmra.mxu3 %vm1173_vm2, %v1825_v19  ;;  %7280 = vmatmul.msk.f32.gmra.mxu0 %vm1173_vm2, %v1864_v8  ;;  %v13776_v37 = vld [vmem:[#allocation64_spill] sm:$0xff]  ;;  %v13779_v22 = vld [vmem:[#allocation79_spill] sm:$0xff] }
 0x5f6   :  { %7255 = vmatmul.msk.f32.gmra.mxu1 %vm1173_vm2, %v1839_v52  ;;  %v8384_v63 = vpack.i.bf16 %v13776_v37, %v13775_v13  ;;  %v13780_v52 = vld [vmem:[#allocation87_spill] sm:$0xff]  ;;  %v13781_v13 = vld [vmem:[#allocation88_spill] sm:$0xff]  ;;  %v13782_v37 = vld [vmem:[#allocation89_spill] sm:$0xff] }
 0x5f7   :  { %v1542_v41 = vmul.f32 1.442695, %v1422_v60  ;;  %v8404_v60 = vpack.i.bf16 %v13780_v52, %v13779_v22 }
 0x5f9   :  { %8695 = vpow2.f32 %v1542_v41  ;;  %8375 = vrot.lane.b32.xlu2 %v8374_v29, %s8893_s14 }
 0x5fb   :  { %v1641_v57 = vpop.xlane.xlu1 %1640 }
 0x5fc   :  { %v1299_v18 = vpop.xlane.xlu2 %1298  ;;  %v10650_v50 = vpop.xlane.xlu0 %1352 }
 0x5ff   :  { %v10640_v1 = vpop.eup %8695 }
 0x600   :  { %v1726_v42 = vsel %vm1173_vm2, %v10640_v1, 0.0 }
 0x601   :  { %1727 = vadd.xlane.f32.xlu0 %v1726_v42  ;;  %8385 = vrot.lane.b32.xlu2 %v8384_v63, %s8893_s14  ;;  %v8409_v63 = vpack.i.bf16 %v13782_v37, %v13781_v13 }
 0x602   :  { %8395 = vrot.lane.b32.xlu1 %v8394_v49, %s8893_s14  ;;  %v1423_v49 = vsub.f32 %v10407_v56, %v10628_v15 }
 0x603   :  { %v1596_v23 = vpop.xlane.xlu1 %1595 }
 0x604   :  { %8697 = vrcp.f32 %v1596_v23  ;;  %v1638_v14 = vpop.xlane.xlu2 %1637  ;;  %v1719_v21 = vpop.xlane.xlu0 %1718 }
 0x605   :  { %8699 = vrcp.f32 %v1638_v14 }
 0x606   :  { %8701 = vrcp.f32 %v1641_v57  ;;  %v1407_v57 = vsub.f32 %v10451_v31, %v1299_v18 }
 0x60a   :  { %v8698_v36 = vpop.eup %8697 }
 0x60b   :  { %v8700_v38 = vpop.eup %8699  ;;  %v1350_v55 = vpop.xlane.xlu1 %1349  ;;  %v1826_v12 = vmul.f32 %v8698_v36, %v10463_v43 }
 0x60c   :  { %v1665_v24 = vpop.xlane.xlu2 %1664  ;;  %v1840_v20 = vmul.f32 %v8700_v38, %v10465_v33  ;;  %v8702_v19 = vpop.eup %8701 }
 0x60d   :  { %8703 = vrcp.f32 %v1665_v24  ;;  %7242 = vmatmul.msk.f32.gmra.mxu3 %vm1173_vm2, %v1826_v12  ;;  %v1841_v43 = vmul.f32 %v8702_v19, %v10447_v0  ;;  %v10665_v33 = vpop.xlane.xlu0 %1355  ;;  %v10676_v36 = vpop.f32.mrf.mxu3 }
 0x60e   :  { %7256 = vmatmul.msk.f32.gmra.mxu1 %vm1173_vm2, %v1840_v20  ;;  %v1315_v56 = vsel %vm1173_vm2, %v10676_v36, -inf }
 0x613   :  { %v8704_v8 = vpop.eup %8703  ;;  %v1644_v4 = vpop.xlane.xlu1 %1643 }
 0x614   :  { %8705 = vrcp.f32 %v1644_v4  ;;  %v10658_v25 = vpop.xlane.xlu2 %1301  ;;  %v1849_v29 = vmul.f32 %v8704_v8, %v10477_v28  ;;  %v1512_v28 = vmul.f32 1.442695, %v1407_v57 }
 0x615   :  { %8405 = vrot.lane.b32.xlu0 %v8404_v60, %s8893_s14  ;;  %v1722_v42 = vpop.xlane.xlu0 %1721  ;;  %v1408_v57 = vsub.f32 %v10494_v44, %v10658_v25  ;;  %v10709_v44 = vpop.f32.mrf.mxu0 }
 0x616   :  { %7257 = vmatmul.msk.f32.gmra.mxu1 %vm1173_vm2, %v1841_v43  ;;  %7265 = vmatmul.msk.f32.gmra.mxu2 %vm1173_vm2, %v1849_v29 }
 0x61a   :  { %v8706_v41 = vpop.eup %8705 }
 0x61b   :  { %v1671_v46 = vpop.xlane.xlu1 %1670  ;;  %v1842_v39 = vmul.f32 %v8706_v41, %v10492_v45  ;;  %v1544_v45 = vmul.f32 1.442695, %v1423_v49 }
 0x61c   :  { %v1713_v0 = vpop.xlane.xlu2 %1712 }
 0x61d   :  { %8707 = vrcp.f32 %v1713_v0  ;;  %8410 = vrot.lane.b32.xlu0 %v8409_v63, %s8893_s14  ;;  %v10687_v8 = vpop.xlane.xlu0 %1358 }
 0x61e   :  { %7258 = vmatmul.msk.f32.gmra.mxu1 %vm1173_vm2, %v1842_v39  ;;  %8709 = vpow2.f32 %v1512_v28  ;;  %v1514_v39 = vmul.f32 1.442695, %v1408_v57 }
 0x61f   :  { %8711 = vrcp.f32 %v1716_v5  ;;  %v1424_v5 = vsub.f32 %v10419_v62, %v1350_v55 }
 0x621   :  { %v1546_v62 = vmul.f32 1.442695, %v1424_v5 }
 0x623   :  { %v8708_v23 = vpop.eup %8707  ;;  %v1647_v31 = vpop.xlane.xlu1 %1646 }
 0x624   :  { %8713 = vrcp.f32 %v1647_v31  ;;  %v1668_v18 = vpop.xlane.xlu2 %1667  ;;  %v1865_v14 = vmul.f32 %v8708_v23, %v10510_v48  ;;  %v10679_v38 = vpop.eup %8709 }
 0x625   :  { %8715 = vrcp.f32 %v1668_v18  ;;  %v8712_v12 = vpop.eup %8711  ;;  %v1681_v20 = vsel %vm1173_vm2, %v10679_v38, 0.0  ;;  %v1653_v13 = vpop.xlane.xlu0 %1652 }
 0x626   :  { %7281 = vmatmul.msk.f32.gmra.mxu0 %vm1173_vm2, %v1865_v14  ;;  %8717 = vpow2.f32 %v1544_v45  ;;  %v1866_v60 = vmul.f32 %v8712_v12, %v10423_v6  ;;  %v13783_v14 = vld [vmem:[#allocation69_spill] sm:$0xff] }
 0x627   :  { %8719 = vrcp.f32 %v1719_v21  ;;  %v13784_v45 = vld [vmem:[#allocation77_spill] sm:$0xff] }
 0x628   :  { %8721 = vrcp.f32 %v1671_v46 }
 0x629   :  { %8723 = vrcp.f32 %v1722_v42 }
 0x62a   :  { %v8714_v15 = vpop.eup %8713  ;;  %1316 = vmax.xlane.f32.xlu2 %v1315_v56  ;;  %8725 = vpow2.f32 %v1546_v62 }
 0x62b   :  { %v8716_v24 = vpop.eup %8715  ;;  %v1674_v48 = vpop.xlane.xlu1 %1673  ;;  %v1843_v19 = vmul.f32 %v8714_v15, %v10527_v16 }
 0x62c   :  { %1682 = vadd.xlane.f32.xlu1 %v1681_v20  ;;  %v1305_v22 = vpop.xlane.xlu2 %1304  ;;  %v1850_v52 = vmul.f32 %v8716_v24, %v10529_v59  ;;  %v10694_v55 = vpop.eup %8717  ;;  %8727 = vrcp.f32 %v1674_v48 }
 0x62d   :  { %7259 = vmatmul.msk.f32.gmra.mxu1 %vm1173_vm2, %v1843_v19  ;;  %v8720_v21 = vpop.eup %8719  ;;  %v1409_v16 = vsub.f32 %v10533_v61, %v1305_v22  ;;  %v1729_v6 = vsel %vm1173_vm2, %v10694_v55, 0.0  ;;  %v10733_v20 = vpop.f32.mrf.mxu0 }
 0x62e   :  { %7266 = vmatmul.msk.f32.gmra.mxu2 %vm1173_vm2, %v1850_v52  ;;  %7282 = vmatmul.msk.f32.gmra.mxu0 %vm1173_vm2, %v1866_v60  ;;  %v8722_v4 = vpop.eup %8721  ;;  %v1867_v41 = vmul.f32 %v8720_v21, %v10449_v17  ;;  %v1425_v17 = vsub.f32 %v10435_v51, %v10650_v50  ;;  %v10744_v21 = vpop.f32.mrf.mxu2 }
 0x62f   :  { %v1851_v29 = vmul.f32 %v8722_v4, %v10513_v30  ;;  %v1516_v37 = vmul.f32 1.442695, %v1409_v16  ;;  %v8724_v61 = vpop.eup %8723 }
 0x630   :  { %v10705_v63 = vpop.eup %8725  ;;  %v1868_v51 = vmul.f32 %v8724_v61, %v10479_v47  ;;  %v1548_v50 = vmul.f32 1.442695, %v1425_v17 }
 0x631   :  { %v1732_v28 = vsel %vm1173_vm2, %v10705_v63, 0.0 }
 0x632   :  { %v8728_v46 = vpop.eup %8727 }
 0x633   :  { %v1650_v43 = vpop.xlane.xlu1 %1649  ;;  %v1852_v31 = vmul.f32 %v8728_v46, %v10548_v40 }
 0x634   :  { %8729 = vrcp.f32 %v1650_v43  ;;  %1730 = vadd.xlane.f32.xlu1 %v1729_v6  ;;  %v1599_v59 = vpop.xlane.xlu2 %1598 }
 0x635   :  { %8731 = vrcp.f32 %v1599_v59  ;;  %v10748_v16 = vpop.f32.mrf.mxu0 }
 0x636   :  { %7267 = vmatmul.msk.f32.gmra.mxu2 %vm1173_vm2, %v1851_v29  ;;  %7283 = vmatmul.msk.f32.gmra.mxu0 %vm1173_vm2, %v1867_v41  ;;  %8733 = vrcp.f32 %v1653_v13  ;;  %v10758_v13 = vpop.f32.mrf.mxu2 }
 0x637   :  { %8735 = vpow2.f32 %v1516_v37 }
 0x63a   :  { %v8730_v0 = vpop.eup %8729 }
 0x63b   :  { %v8732_v30 = vpop.eup %8731  ;;  %v1677_v25 = vpop.xlane.xlu1 %1676  ;;  %v1844_v49 = vmul.f32 %v8730_v0, %v10564_v54 }
 0x63c   :  { %8737 = vrcp.f32 %v1677_v25  ;;  %1733 = vadd.xlane.f32.xlu1 %v1732_v28  ;;  %v1308_v42 = vpop.xlane.xlu2 %1307  ;;  %v1827_v23 = vmul.f32 %v8732_v30, %v10567_v35  ;;  %v8734_v18 = vpop.eup %8733  ;;  %v8399_v35 = vpack.i.bf16 %v13784_v45, %v13783_v14 }
 0x63d   :  { %8739 = vpow2.f32 %v1514_v39  ;;  %7260 = vmatmul.msk.f32.gmra.mxu1 %vm1173_vm2, %v1844_v49  ;;  %v10721_v54 = vpop.eup %8735  ;;  %v1410_v40 = vsub.f32 %v10558_v7, %v1308_v42  ;;  %v1845_v5 = vmul.f32 %v8734_v18, %v10516_v58  ;;  %v10763_v46 = vpop.f32.mrf.mxu0 }
 0x63e   :  { %7243 = vmatmul.msk.f32.gmra.mxu3 %vm1173_vm2, %v1827_v23  ;;  %7268 = vmatmul.msk.f32.gmra.mxu2 %vm1173_vm2, %v1852_v31  ;;  %8741 = vpow2.f32 %v1548_v50  ;;  %v1687_v15 = vsel %vm1173_vm2, %v10721_v54, 0.0  ;;  %v10769_v28 = vpop.f32.mrf.mxu2 }
 0x63f   :  { %7284 = vmatmul.msk.f32.gmra.mxu0 %vm1173_vm2, %v1868_v51  ;;  %v1518_v7 = vmul.f32 1.442695, %v1410_v40  ;;  %v1426_v51 = vsub.f32 %v10467_v27, %v10665_v33  ;;  %v10784_v27 = vpop.f32.mrf.mxu1 }
 0x642   :  { %v8738_v12 = vpop.eup %8737  ;;  %8400 = vrot.lane.b32.xlu2 %v8399_v35, %s8893_s14 }
 0x643   :  { %v10727_v47 = vpop.eup %8739  ;;  %v1314_v56 = vpop.xlane.xlu1 %1313  ;;  %v1853_v24 = vmul.f32 %v8738_v12, %v10587_v2  ;;  %v1550_v12 = vmul.f32 1.442695, %v1426_v51 }
 0x644   :  { %1688 = vadd.xlane.f32.xlu1 %v1687_v15  ;;  %v1602_v48 = vpop.xlane.xlu2 %1601  ;;  %v1684_v19 = vsel %vm1173_vm2, %v10727_v47, 0.0  ;;  %v10739_v22 = vpop.eup %8741  ;;  %v1412_v29 = vsub.f32 %v10596_v32, %v1314_v56 }
 0x645   :  { %8743 = vrcp.f32 %v1602_v48  ;;  %7261 = vmatmul.msk.f32.gmra.mxu1 %vm1173_vm2, %v1845_v5  ;;  %v1735_v2 = vsel %vm1173_vm2, %v10739_v22, 0.0  ;;  %v8381_v32 = vpop.permute.xlu0 %8380  ;;  %v1427_v48 = vsub.f32 %v10496_v53, %v10687_v8 }
 0x646   :  { %7269 = vmatmul.msk.f32.gmra.mxu2 %vm1173_vm2, %v1853_v24  ;;  %8745 = vpow2.f32 %v1518_v7  ;;  %v1522_v37 = vmul.f32 1.442695, %v1412_v29  ;;  %v8382_v50 = vunpack.i.l.bf16 %v8381_v32  ;;  %v8383_v18 = vunpack.i.h.bf16 %v8381_v32  ;;  %v10780_v35 = vpop.f32.mrf.mxu2 }
 0x647   :  { %1685 = vadd.xlane.f32.xlu0 %v1684_v19  ;;  %v1363_v7 = vsel %vm1173_vm2, %v10784_v27, -inf  ;;  %v8414_v29 = vpack.i.bf16 %v10733_v20, %v10709_v44 }
 0x64b   :  { %v8744_v58 = vpop.eup %8743  ;;  %v1725_v52 = vpop.xlane.xlu1 %1724 }
 0x64c   :  { %8747 = vrcp.f32 %v1725_v52  ;;  %1736 = vadd.xlane.f32.xlu1 %v1735_v2  ;;  %v1311_v60 = vpop.xlane.xlu2 %1310  ;;  %v1828_v62 = vmul.f32 %v8744_v58, %v10598_v11  ;;  %v10750_v6 = vpop.eup %8745  ;;  %v1552_v58 = vmul.f32 1.442695, %v1427_v48 }
 0x64d   :  { %v1411_v4 = vsub.f32 %v10583_v34, %v1311_v60  ;;  %v1690_v11 = vsel %vm1173_vm2, %v10750_v6, 0.0  ;;  %v8391_v14 = vpop.permute.xlu0 %8390 }
 0x64e   :  { %7244 = vmatmul.msk.f32.gmra.mxu3 %vm1173_vm2, %v1828_v62  ;;  %v8393_v33 = vunpack.i.h.bf16 %v8391_v14  ;;  %v8392_v5 = vunpack.i.l.bf16 %v8391_v14  ;;  %v10796_v2 = vpop.f32.mrf.mxu2 }
 0x64f   :  { %v1520_v43 = vmul.f32 1.442695, %v1411_v4 }
 0x651   :  { %8749 = vpow2.f32 %v1520_v43 }
 0x652   :  { %v8748_v59 = vpop.eup %8747 }
 0x653   :  { %v10753_v41 = vpop.xlane.xlu1 %1679  ;;  %v1869_v57 = vmul.f32 %v8748_v59, %v10608_v10 }
 0x654   :  { %1691 = vadd.xlane.f32.xlu1 %v1690_v11  ;;  %v1605_v34 = vpop.xlane.xlu2 %1604 }
 0x655   :  { %8751 = vrcp.f32 %v1605_v34  ;;  %7285 = vmatmul.msk.f32.gmra.mxu0 %vm1173_vm2, %v1869_v57  ;;  %v8429_v34 = vpack.i.bf16 %v10763_v46, %v10748_v16 }
 0x656   :  { %8753 = vpow2.f32 %v1522_v37  ;;  %v10804_v59 = vpop.f32.mrf.mxu2 }
 0x657   :  { %v10761_v61 = vpop.eup %8749 }
 0x658   :  { %v1693_v17 = vsel %vm1173_vm2, %v10761_v61, 0.0 }
 0x65b   :  { %v8752_v39 = vpop.eup %8751  ;;  %v1362_v0 = vpop.xlane.xlu1 %1361 }
 0x65c   :  { %v1428_v10 = vsub.f32 %v10622_v26, %v1362_v0  ;;  %1694 = vadd.xlane.f32.xlu1 %v1693_v17  ;;  %v8376_v30 = vpop.permute.xlu2 %8375  ;;  %v1829_v25 = vmul.f32 %v8752_v39, %v10616_v3  ;;  %v10772_v31 = vpop.eup %8753 }
 0x65d   :  { %v8377_v49 = vunpack.i.l.bf16 %v8376_v30  ;;  %v8378_v23 = vunpack.i.h.bf16 %v8376_v30  ;;  %v10776_v26 = vpop.f32.mrf.mxu0  ;;  %v1696_v3 = vsel %vm1173_vm2, %v10772_v31, 0.0 }
 0x65e   :  { %v1554_v42 = vmul.f32 1.442695, %v1428_v10  ;;  %7245 = vmatmul.msk.f32.gmra.mxu3 %vm1173_vm2, %v1829_v25  ;;  %v10815_v37 = vpop.f32.mrf.mxu2 }
 0x65f   :  { %2379 = vmatpush.msra.mxu3 %v8377_v49 }
 0x660   :  { %8755 = vpow2.f32 %v1554_v42 }
 0x661   :  { %2380 = vmatpush.msra.mxu3 %v8378_v23  ;;  %8757 = vpow2.f32 %v1550_v12 }
 0x662   :  { %8759 = vpow2.f32 %v1552_v58 }
 0x663   :  { %2381 = vmatpush.msra.mxu3 %v8382_v50  ;;  %8761 = vrcp.f32 %v10753_v41 }
 0x664   :  { %1697 = vadd.xlane.f32.xlu1 %v1696_v3  ;;  %v8386_v45 = vpop.permute.xlu2 %8385 }
 0x665   :  { %v8388_v40 = vunpack.i.h.bf16 %v8386_v45  ;;  %v8387_v56 = vunpack.i.l.bf16 %v8386_v45  ;;  %2382 = vmatpush.msra.mxu3 %v8383_v18  ;;  %v10792_v19 = vpop.f32.mrf.mxu0 }
 0x666   :  { %v10782_v15 = vpop.eup %8755  ;;  %v10820_v39 = vpop.f32.mrf.mxu2 }
 0x667   :  { %2383 = vmatpush.msra.mxu3 %v8388_v40  ;;  %2557 = vmatpush.msra.mxu1 %v8387_v56  ;;  %v1744_v24 = vsel %vm1173_vm2, %v10782_v15, 0.0  ;;  %v10794_v52 = vpop.eup %8757 }
 0x668   :  { %1745 = vadd.xlane.f32.xlu0 %v1744_v24  ;;  %v1738_v60 = vsel %vm1173_vm2, %v10794_v52, 0.0  ;;  %v10800_v4 = vpop.eup %8759 }
 0x669   :  { %2384 = vmatpush.msra.mxu3 %v8393_v33  ;;  %2558 = vmatpush.msra.mxu1 %v8392_v5  ;;  %v1741_v11 = vsel %vm1173_vm2, %v10800_v4, 0.0  ;;  %v8762_v23 = vpop.eup %8761 }
 0x66a   :  { %v1854_v41 = vmul.f32 %v8762_v23, %v10614_v9 }
 0x66b   :  { %1364 = vmax.xlane.f32.xlu2 %v1363_v7 }
 0x66d   :  { %v10802_v43 = vpop.f32.mrf.mxu0 }
 0x66e   :  { %v10824_v20 = vpop.f32.mrf.mxu2 }
 0x673   :  { %1739 = vadd.xlane.f32.xlu2 %v1738_v60 }
 0x674   :  { %v8396_v62 = vpop.permute.xlu1 %8395  ;;  %v1728_v0 = vpop.xlane.xlu0 %1727 }
 0x675   :  { %v8398_v53 = vunpack.i.h.bf16 %v8396_v62  ;;  %v8397_v8 = vunpack.i.l.bf16 %v8396_v62  ;;  %v10811_v57 = vpop.f32.mrf.mxu0 }
 0x676   :  { %v10826_v10 = vpop.f32.mrf.mxu2 }
 0x677   :  { %2385 = vmatpush.msra.mxu3 %v8398_v53  ;;  %2559 = vmatpush.msra.mxu1 %v8397_v8 }
 0x67b   :  { %1742 = vadd.xlane.f32.xlu2 %v1741_v11 }
 0x67c   :  { %8415 = vrot.lane.b32.xlu0 %v8414_v29, %s8894_s15 }
 0x67d   :  { %v10818_v32 = vpop.f32.mrf.mxu0 }
 0x67e   :  { %v2305_v14 = vpop.f32.mrf.mxu2 }
 0x684   :  { %8430 = vrot.lane.b32.xlu0 %v8429_v34, %s8894_s15 }
 0x685   :  { %v10822_v44 = vpop.f32.mrf.mxu0 }
 0x687   :  { %v8406_v46 = vpop.permute.xlu0 %8405 }
 0x688   :  { %v8407_v12 = vunpack.i.l.bf16 %v8406_v46  ;;  %v8408_v33 = vunpack.i.h.bf16 %v8406_v46  ;;  %v8419_v46 = vpack.i.bf16 %v10826_v10, %v10824_v20 }
 0x68d   :  { %v2483_v17 = vpop.f32.mrf.mxu0 }
 0x68f   :  { %v8411_v40 = vpop.permute.xlu0 %8410 }
 0x690   :  { %v8412_v7 = vunpack.i.l.bf16 %v8411_v40  ;;  %v8413_v9 = vunpack.i.h.bf16 %v8411_v40 }
 0x699   :  { %v2308_v60 = vpop.f32.mrf.mxu2 }
 0x69d   :  { %v1317_v30 = vpop.xlane.xlu2 %1316 }
 0x69e   :  { %v1413_v16 = vsub.f32 %v10676_v36, %v1317_v30 }
 0x69f   :  { %v1683_v25 = vpop.xlane.xlu1 %1682 }
 0x6a0   :  { %v1524_v49 = vmul.f32 1.442695, %v1413_v16 }
 0x6a2   :  { %8763 = vpow2.f32 %v1524_v49 }
 0x6a3   :  { %v2486_v42 = vpop.f32.mrf.mxu0  ;;  %8765 = vrcp.f32 %v1728_v0 }
 0x6a4   :  { %v8439_v51 = vpack.i.bf16 %v2486_v42, %v2483_v17  ;;  %8767 = vrcp.f32 %v1683_v25 }
 0x6a5   :  { %v8401_v50 = vpop.permute.xlu2 %8400 }
 0x6a6   :  { %v8403_v18 = vunpack.i.h.bf16 %v8401_v50  ;;  %v8402_v3 = vunpack.i.l.bf16 %v8401_v50  ;;  %8440 = vrot.lane.b32.xlu0 %v8439_v51, %s8895_s16  ;;  %v8434_v50 = vpack.i.bf16 %v2308_v60, %v2305_v14  ;;  %v2210_v60 = vpop.f32.mrf.mxu1 }
 0x6a7   :  { %v1731_v45 = vpop.xlane.xlu1 %1730 }
 0x6a8   :  { %v10832_v36 = vpop.eup %8763  ;;  %2386 = vmatpush.msra.mxu3 %v8403_v18  ;;  %2560 = vmatpush.msra.mxu1 %v8402_v3  ;;  %8769 = vrcp.f32 %v1731_v45 }
 0x6a9   :  { %7270 = vmatmul.msk.f32.vlgmr.msra.gmra.mxu3 %vm1173_vm2, %v1854_v41  ;;  %v1699_v56 = vsel %vm1173_vm2, %v10832_v36, 0.0  ;;  %v8766_v5 = vpop.eup %8765 }
 0x6aa   :  { %1700 = vadd.xlane.f32.xlu2 %v1699_v56  ;;  %2561 = vmatpush.msra.mxu1 %v8407_v12  ;;  %v8768_v48 = vpop.eup %8767  ;;  %v1870_v58 = vmul.f32 %v8766_v5, %v10640_v1 }
 0x6ab   :  { %v2489_v24 = vpop.f32.mrf.mxu0  ;;  %v1855_v53 = vmul.f32 %v8768_v48, %v10679_v38 }
 0x6ac   :  { %2562 = vmatpush.msra.mxu1 %v8408_v33 }
 0x6ae   :  { %2563 = vmatpush.msra.mxu1 %v8412_v7  ;;  %v8770_v29 = vpop.eup %8769 }
 0x6af   :  { %v1734_v62 = vpop.xlane.xlu1 %1733  ;;  %v1871_v17 = vmul.f32 %v8770_v29, %v10694_v55 }
 0x6b0   :  { %2564 = vmatpush.msra.mxu1 %v8413_v9  ;;  %8771 = vrcp.f32 %v1734_v62 }
 0x6b1   :  { %7271 = vmatmul.msk.f32.gmra.mxu3 %vm1173_vm2, %v1855_v53  ;;  %7286 = vmatmul.msk.f32.vlgmr.msra.gmra.mxu1 %vm1173_vm2, %v1870_v58  ;;  %v2311_v34 = vpop.f32.mrf.mxu2  ;;  %v10866_v58 = vpop.f32.mrf.mxu3 }
 0x6b3   :  { %v2492_v8 = vpop.f32.mrf.mxu0 }
 0x6b4   :  { %v8454_v11 = vpack.i.bf16 %v2492_v8, %v2489_v24 }
 0x6b6   :  { %8455 = vrot.lane.b32.xlu0 %v8454_v11, %s8895_s16  ;;  %v8772_v38 = vpop.eup %8771 }
 0x6b7   :  { %v1689_v0 = vpop.xlane.xlu1 %1688  ;;  %v1872_v16 = vmul.f32 %v8772_v38, %v10705_v63 }
 0x6b9   :  { %7287 = vmatmul.msk.f32.gmra.mxu1 %vm1173_vm2, %v1871_v17  ;;  %v2314_v49 = vpop.f32.mrf.mxu2  ;;  %v10874_v29 = vpop.f32.mrf.mxu3 }
 0x6ba   :  { %v1686_v1 = vpop.xlane.xlu0 %1685  ;;  %v8449_v41 = vpack.i.bf16 %v2314_v49, %v2311_v34 }
 0x6bb   :  { %8773 = vrcp.f32 %v1686_v1 }
 0x6bc   :  { %v2495_v20 = vpop.f32.mrf.mxu0 }
 0x6bf   :  { %v1737_v30 = vpop.xlane.xlu1 %1736 }
 0x6c0   :  { %8775 = vrcp.f32 %v1737_v30 }
 0x6c1   :  { %v8774_v25 = vpop.eup %8773  ;;  %8777 = vrcp.f32 %v1689_v0  ;;  %7288 = vmatmul.msk.f32.gmra.mxu1 %vm1173_vm2, %v1872_v16  ;;  %v2317_v18 = vpop.f32.mrf.mxu2 }
 0x6c2   :  { %8420 = vrot.lane.b32.xlu2 %v8419_v46, %s8896_s17  ;;  %v1856_v55 = vmul.f32 %v8774_v25, %v10727_v47  ;;  %v10878_v38 = vpop.f32.mrf.mxu3 }
 0x6c4   :  { %7272 = vmatmul.msk.f32.gmra.mxu3 %vm1173_vm2, %v1856_v55 }
 0x6c6   :  { %v8776_v42 = vpop.eup %8775 }
 0x6c7   :  { %v8778_v23 = vpop.eup %8777  ;;  %v1692_v51 = vpop.xlane.xlu1 %1691  ;;  %v1873_v63 = vmul.f32 %v8776_v42, %v10739_v22 }
 0x6c8   :  { %8779 = vrcp.f32 %v1692_v51  ;;  %v1857_v10 = vmul.f32 %v8778_v23, %v10721_v54 }
 0x6c9   :  { %7289 = vmatmul.msk.f32.gmra.mxu1 %vm1173_vm2, %v1873_v63  ;;  %v2320_v12 = vpop.f32.mrf.mxu2 }
 0x6ca   :  { %8435 = vrot.lane.b32.xlu2 %v8434_v50, %s8896_s17  ;;  %v8464_v56 = vpack.i.bf16 %v2320_v12, %v2317_v18  ;;  %v10884_v46 = vpop.f32.mrf.mxu3 }
 0x6cc   :  { %7273 = vmatmul.msk.f32.gmra.mxu3 %vm1173_vm2, %v1857_v10 }
 0x6ce   :  { %v8780_v47 = vpop.eup %8779 }
 0x6cf   :  { %v1695_v3 = vpop.xlane.xlu1 %1694  ;;  %v1858_v22 = vmul.f32 %v8780_v47, %v10750_v6 }
 0x6d0   :  { %8781 = vrcp.f32 %v1695_v3 }
 0x6d2   :  { %v2498_v45 = vpop.f32.mrf.mxu0  ;;  %8450 = vrot.lane.b32.xlu2 %v8449_v41, %s8896_s17  ;;  %v10889_v25 = vpop.f32.mrf.mxu3 }
 0x6d3   :  { %v8469_v14 = vpack.i.bf16 %v2498_v45, %v2495_v20 }
 0x6d4   :  { %7274 = vmatmul.msk.f32.gmra.mxu3 %vm1173_vm2, %v1858_v22 }
 0x6d5   :  { %8470 = vrot.lane.b32.xlu0 %v8469_v14, %s8895_s16 }
 0x6d6   :  { %v8782_v40 = vpop.eup %8781 }
 0x6d7   :  { %v1698_v54 = vpop.xlane.xlu1 %1697  ;;  %v1859_v33 = vmul.f32 %v8782_v40, %v10761_v61 }
 0x6d8   :  { %8783 = vrcp.f32 %v1698_v54 }
 0x6da   :  { %8465 = vrot.lane.b32.xlu2 %v8464_v56, %s8896_s17  ;;  %v10894_v42 = vpop.f32.mrf.mxu3 }
 0x6db   :  { %v1746_v11 = vpop.xlane.xlu0 %1745 }
 0x6dc   :  { %7275 = vmatmul.msk.f32.gmra.mxu3 %vm1173_vm2, %v1859_v33 }
 0x6de   :  { %v1365_v5 = vpop.xlane.xlu2 %1364  ;;  %v8784_v24 = vpop.eup %8783 }
 0x6df   :  { %v1429_v6 = vsub.f32 %v10784_v27, %v1365_v5  ;;  %v1860_v7 = vmul.f32 %v8784_v24, %v10772_v31  ;;  %v2213_v31 = vpop.f32.mrf.mxu1 }
 0x6e1   :  { %v1556_v48 = vmul.f32 1.442695, %v1429_v6 }
 0x6e3   :  { %8785 = vpow2.f32 %v1556_v48 }
 0x6e4   :  { %7276 = vmatmul.msk.f32.gmra.mxu3 %vm1173_vm2, %v1860_v7 }
 0x6e6   :  { %v1740_v9 = vpop.xlane.xlu2 %1739 }
 0x6e7   :  { %8787 = vrcp.f32 %v1740_v9  ;;  %v2216_v17 = vpop.f32.mrf.mxu1 }
 0x6e9   :  { %v10868_v62 = vpop.eup %8785 }
 0x6ea   :  { %v1747_v61 = vsel %vm1173_vm2, %v10868_v62, 0.0 }
 0x6eb   :  { %1748 = vadd.xlane.f32.xlu1 %v1747_v61 }
 0x6ed   :  { %v8788_v53 = vpop.eup %8787 }
 0x6ee   :  { %v1743_v8 = vpop.xlane.xlu2 %1742  ;;  %v1874_v27 = vmul.f32 %v8788_v53, %v10794_v52  ;;  %v8424_v52 = vpack.i.bf16 %v10822_v44, %v10818_v32  ;;  %v8081_v32 = vld [vmem:[%s13499_s3 + $0x8] sm:$0xff]  ;;  %v8474_v44 = vpack.i.bf16 %v2213_v31, %v2210_v60  ;;  %v8416_v61 = vpop.permute.xlu0 %8415 }
 0x6ef   :  { %8789 = vrcp.f32 %v1743_v8  ;;  %v2219_v16 = vpop.f32.mrf.mxu1  ;;  %2890 = vmatpush.bf16.msrb.mxu2 %v8081_v32  ;;  %v8418_v8 = vunpack.i.h.bf16 %v8416_v61 }
 0x6f0   :  { %7290 = vmatmul.msk.f32.gmra.mxu1 %vm1173_vm2, %v1874_v27  ;;  %8791 = vrcp.f32 %v1746_v11  ;;  %v8489_v51 = vpack.i.bf16 %v2219_v16, %v2216_v17  ;;  %v8417_v27 = vunpack.i.l.bf16 %v8416_v61 }
 0x6f5   :  { %v8790_v34 = vpop.eup %8789 }
 0x6f6   :  { %v1875_v0 = vmul.f32 %v8790_v34, %v10800_v4  ;;  %v8792_v1 = vpop.eup %8791  ;;  %v8444_v4 = vpack.i.bf16 %v10792_v19, %v10776_v26  ;;  %v10900_v19 = vpop.f32.mrf.mxu3 }
 0x6f7   :  { %v1876_v30 = vmul.f32 %v8792_v1, %v10782_v15  ;;  %v2222_v49 = vpop.f32.mrf.mxu1  ;;  %v8459_v15 = vpack.i.bf16 %v10811_v57, %v10802_v43  ;;  %v2782_v1 = vsel %vm476_vm1, %v10744_v21, %v8417_v27 }
 0x6f8   :  { %7291 = vmatmul.msk.f32.gmra.mxu1 %vm1173_vm2, %v1875_v0 }
 0x6fe   :  { %v10903_v57 = vpop.f32.mrf.mxu3 }
 0x6ff   :  { %v2225_v55 = vpop.f32.mrf.mxu1 }
 0x700   :  { %7292 = vmatmul.msk.f32.gmra.mxu1 %vm1173_vm2, %v1876_v30  ;;  %v8504_v20 = vpack.i.bf16 %v2225_v55, %v2222_v49  ;;  %v2783_v30 = vsel %vm476_vm1, %v10758_v13, %v8418_v8  ;;  %v8431_v55 = vpop.permute.xlu0 %8430 }
 0x701   :  { %v8432_v13 = vunpack.i.l.bf16 %v8431_v55 }
 0x704   :  { %8425 = vrot.lane.b32.xlu1 %v8424_v52, %s8895_s16 }
 0x707   :  { %v2228_v26 = vpop.f32.mrf.mxu1 }
 0x70c   :  { %8445 = vrot.lane.b32.xlu1 %v8444_v4, %s8894_s15 }
 0x70f   :  { %v2231_v50 = vpop.f32.mrf.mxu1 }
 0x710   :  { %v8519_v47 = vpack.i.bf16 %v2231_v50, %v2228_v26 }
 0x714   :  { %8460 = vrot.lane.b32.xlu1 %v8459_v15, %s8894_s15 }
 0x71c   :  { %8475 = vrot.lane.b32.xlu1 %v8474_v44, %s8894_s15  ;;  %v8433_v44 = vunpack.i.h.bf16 %v8431_v55 }
 0x71d   :  { %v1701_v23 = vpop.xlane.xlu2 %1700 }
 0x71e   :  { %8793 = vrcp.f32 %v1701_v23 }
 0x724   :  { %v8794_v43 = vpop.eup %8793  ;;  %8490 = vrot.lane.b32.xlu1 %v8489_v51, %s8894_s15  ;;  %v8441_v51 = vpop.permute.xlu0 %8440 }
 0x725   :  { %v1861_v63 = vmul.f32 %v8794_v43, %v10832_v36  ;;  %v8080_v36 = vld [vmem:[%s13499_s3] sm:$0xff]  ;;  %v8421_v53 = vpop.permute.xlu2 %8420  ;;  %v2784_v43 = vsel %vm476_vm1, %v10769_v28, %v8432_v13 }
 0x726   :  { %2891 = vmatpush.bf16.msrb.mxu2 %v8080_v36  ;;  %v8423_v31 = vunpack.i.h.bf16 %v8421_v53  ;;  %v8422_v11 = vunpack.i.l.bf16 %v8421_v53 }
 0x727   :  { %7277 = vmatmul.msk.f32.gmra.mxu3 %vm1173_vm2, %v1861_v63  ;;  %v2785_v63 = vsel %vm476_vm1, %v10780_v35, %v8433_v44 }
 0x728   :  { %v2800_v16 = vsel %vm2798_vm3, %v2783_v30, %v8423_v31  ;;  %v2799_v4 = vsel %vm2798_vm3, %v2782_v1, %v8422_v11 }
 0x72c   :  { %v2388_v10 = vpop.f32.mrf.mxu3  ;;  %8505 = vrot.lane.b32.xlu1 %v8504_v20, %s8894_s15 }
 0x72d   :  { %v8436_v21 = vpop.permute.xlu2 %8435 }
 0x72e   :  { %v2566_v18 = vpop.f32.mrf.mxu1  ;;  %v8438_v26 = vunpack.i.h.bf16 %v8436_v21  ;;  %v8437_v23 = vunpack.i.l.bf16 %v8436_v21 }
 0x730   :  { %v2802_v50 = vsel %vm2798_vm3, %v2785_v63, %v8438_v26  ;;  %v2801_v20 = vsel %vm2798_vm3, %v2784_v43, %v8437_v23 }
 0x734   :  { %v2391_v3 = vpop.f32.mrf.mxu3  ;;  %8520 = vrot.lane.b32.xlu1 %v8519_v47, %s8894_s15 }
 0x735   :  { %v8479_v41 = vpack.i.bf16 %v2391_v3, %v2388_v10  ;;  %v8443_v10 = vunpack.i.h.bf16 %v8441_v51  ;;  %v8451_v28 = vpop.permute.xlu2 %8450 }
 0x736   :  { %v2569_v45 = vpop.f32.mrf.mxu1 }
 0x737   :  { %v8484_v22 = vpack.i.bf16 %v2569_v45, %v2566_v18  ;;  %8480 = vrot.lane.b32.xlu2 %v8479_v41, %s8896_s17  ;;  %v8442_v18 = vunpack.i.l.bf16 %v8441_v51  ;;  %v2819_v3 = vsel %vm2815_vm4, %v2802_v50, %v8443_v10 }
 0x739   :  { %8485 = vrot.lane.b32.xlu0 %v8484_v22, %s8895_s16  ;;  %v2818_v47 = vsel %vm2815_vm4, %v2801_v20, %v8442_v18 }
 0x73a   :  { %v2833_v45 = vpack.c.bf16 %v2819_v3, %v2818_v47 }
 0x73e   :  { %v2572_v14 = vpop.f32.mrf.mxu1 }
 0x746   :  { %v2575_v12 = vpop.f32.mrf.mxu1 }
 0x747   :  { %v8499_v40 = vpack.i.bf16 %v2575_v12, %v2572_v14  ;;  %v2394_v54 = vpop.f32.mrf.mxu3  ;;  %v8456_v12 = vpop.permute.xlu0 %8455 }
 0x749   :  { %8500 = vrot.lane.b32.xlu0 %v8499_v40, %s8895_s16  ;;  %v8453_v40 = vunpack.i.h.bf16 %v8451_v28 }
 0x74f   :  { %v2397_v56 = vpop.f32.mrf.mxu3  ;;  %v8471_v31 = vpop.permute.xlu0 %8470 }
 0x750   :  { %v8494_v33 = vpack.i.bf16 %v2397_v56, %v2394_v54  ;;  %v8452_v54 = vunpack.i.l.bf16 %v8451_v28  ;;  %v8472_v1 = vunpack.i.l.bf16 %v8471_v31 }
 0x752   :  { %8495 = vrot.lane.b32.xlu2 %v8494_v33, %s8896_s17 }
 0x757   :  { %v2400_v5 = vpop.f32.mrf.mxu3 }
 0x75e   :  { %v1749_v24 = vpop.xlane.xlu1 %1748 }
 0x75f   :  { %8795 = vrcp.f32 %v1749_v24  ;;  %v2403_v6 = vpop.f32.mrf.mxu3  ;;  %v8457_v24 = vunpack.i.l.bf16 %v8456_v12 }
 0x760   :  { %v8509_v48 = vpack.i.bf16 %v2403_v6, %v2400_v5  ;;  %v8458_v5 = vunpack.i.h.bf16 %v8456_v12 }
 0x762   :  { %8510 = vrot.lane.b32.xlu2 %v8509_v48, %s8896_s17 }
 0x765   :  { %v8796_v7 = vpop.eup %8795 }
 0x766   :  { %v1877_v9 = vmul.f32 %v8796_v7, %v10868_v62 }
 0x767   :  { %v2406_v11 = vpop.f32.mrf.mxu3 }
 0x768   :  { %7293 = vmatmul.msk.f32.gmra.mxu1 %vm1173_vm2, %v1877_v9 }
 0x76d   :  { %v2578_v60 = vpop.f32.mrf.mxu1 }
 0x775   :  { %v2581_v34 = vpop.f32.mrf.mxu1 }
 0x776   :  { %v8514_v0 = vpack.i.bf16 %v2581_v34, %v2578_v60  ;;  %v8426_v17 = vpop.permute.xlu1 %8425 }
 0x777   :  { %v8428_v62 = vunpack.i.h.bf16 %v8426_v17  ;;  %v8427_v52 = vunpack.i.l.bf16 %v8426_v17  ;;  %v8473_v17 = vunpack.i.h.bf16 %v8471_v31 }
 0x778   :  { %8515 = vrot.lane.b32.xlu0 %v8514_v0, %s8895_s16 }
 0x779   :  { %v2816_v49 = vsel %vm2815_vm4, %v2799_v4, %v8427_v52  ;;  %v2817_v15 = vsel %vm2815_vm4, %v2800_v16, %v8428_v62 }
 0x77a   :  { %v2832_v32 = vpack.c.bf16 %v2817_v15, %v2816_v49 }
 0x77c   :  { %7302 = vmatmul.msk.bf16.vlgmr.msrb.gmra.mxu2 %vm146_vm0, %v2832_v32 }
 0x77e   :  { %v8446_v41 = vpop.permute.xlu1 %8445 }
 0x77f   :  { %v8448_v22 = vunpack.i.h.bf16 %v8446_v41  ;;  %v8447_v36 = vunpack.i.l.bf16 %v8446_v41 }
 0x781   :  { %v2786_v35 = vsel %vm476_vm1, %v10796_v2, %v8447_v36  ;;  %v2787_v14 = vsel %vm476_vm1, %v10804_v59, %v8448_v22  ;;  %v8466_v59 = vpop.permute.xlu2 %8465 }
 0x782   :  { %v2803_v56 = vsel %vm2798_vm3, %v2786_v35, %v8452_v54  ;;  %v2804_v33 = vsel %vm2798_vm3, %v2787_v14, %v8453_v40  ;;  %v8468_v8 = vunpack.i.h.bf16 %v8466_v59  ;;  %v8467_v27 = vunpack.i.l.bf16 %v8466_v59 }
 0x783   :  { %v2820_v6 = vsel %vm2815_vm4, %v2803_v56, %v8457_v24  ;;  %v2821_v48 = vsel %vm2815_vm4, %v2804_v33, %v8458_v5  ;;  %v2584_v56 = vpop.f32.mrf.mxu1 }
 0x784   :  { %v2834_v9 = vpack.c.bf16 %v2821_v48, %v2820_v6 }
 0x786   :  { %v8461_v7 = vpop.permute.xlu1 %8460 }
 0x787   :  { %v8463_v2 = vunpack.i.h.bf16 %v8461_v7  ;;  %v8462_v60 = vunpack.i.l.bf16 %v8461_v7 }
 0x789   :  { %v2788_v61 = vsel %vm476_vm1, %v10815_v37, %v8462_v60  ;;  %v2789_v53 = vsel %vm476_vm1, %v10820_v39, %v8463_v2 }
 0x78a   :  { %v2805_v34 = vsel %vm2798_vm3, %v2788_v61, %v8467_v27  ;;  %v2806_v0 = vsel %vm2798_vm3, %v2789_v53, %v8468_v8 }
 0x78b   :  { %v2822_v30 = vsel %vm2815_vm4, %v2805_v34, %v8472_v1  ;;  %v2823_v62 = vsel %vm2815_vm4, %v2806_v0, %v8473_v17  ;;  %v13785_v0 = vld [vmem:[#allocation5_spill] sm:$0xff] }
 0x78c   :  { %7303 = vmatmul.msk.bf16.gmra.mxu2 %vm146_vm0, %v2833_v45  ;;  %v2835_v16 = vpack.c.bf16 %v2823_v62, %v2822_v30 }
 0x78e   :  { %v8476_v39 = vpop.permute.xlu1 %8475 }
 0x78f   :  { %v8478_v15 = vunpack.i.h.bf16 %v8476_v39  ;;  %v8477_v55 = vunpack.i.l.bf16 %v8476_v39 }
 0x791   :  { %v8481_v4 = vpop.permute.xlu2 %8480  ;;  %v2791_v26 = vsel %vm476_vm1, %v10874_v29, %v8478_v15  ;;  %v2790_v23 = vsel %vm476_vm1, %v10866_v58, %v8477_v55 }
 0x792   :  { %v8483_v32 = vunpack.i.h.bf16 %v8481_v4  ;;  %v8482_v21 = vunpack.i.l.bf16 %v8481_v4 }
 0x794   :  { %v2808_v51 = vsel %vm2798_vm3, %v2791_v26, %v8483_v32  ;;  %v2807_v43 = vsel %vm2798_vm3, %v2790_v23, %v8482_v21 }
 0x796   :  { %v8491_v10 = vpop.permute.xlu1 %8490 }
 0x797   :  { %v8493_v3 = vunpack.i.h.bf16 %v8491_v10  ;;  %v8492_v41 = vunpack.i.l.bf16 %v8491_v10 }
 0x799   :  { %v2793_v36 = vsel %vm476_vm1, %v10884_v46, %v8493_v3  ;;  %v2792_v28 = vsel %vm476_vm1, %v10878_v38, %v8492_v41 }
 0x79c   :  { %7304 = vmatmul.msk.bf16.gmra.mxu2 %vm146_vm0, %v2834_v9 }
 0x79e   :  { %v8506_v33 = vpop.permute.xlu1 %8505 }
 0x79f   :  { %v8508_v46 = vunpack.i.h.bf16 %v8506_v33  ;;  %v8507_v48 = vunpack.i.l.bf16 %v8506_v33 }
 0x7a1   :  { %v2795_v2 = vsel %vm476_vm1, %v10894_v42, %v8508_v46  ;;  %v2794_v60 = vsel %vm476_vm1, %v10889_v25, %v8507_v48  ;;  %v10989_v42 = vld [vmem:[%s13500_s4] ss:$0 sm:$0xff] }
 0x7aa   :  { %v2409_v52 = vpop.f32.mrf.mxu3 }
 0x7ab   :  { %v8524_v37 = vpack.i.bf16 %v2409_v52, %v2406_v11  ;;  %v8486_v49 = vpop.permute.xlu0 %8485  ;;  %v13786_v52 = vld [vmem:[#allocation6_spill] sm:$0xff] }
 0x7ac   :  { %7305 = vmatmul.msk.bf16.gmra.mxu2 %vm146_vm0, %v2835_v16  ;;  %v8488_v44 = vunpack.i.h.bf16 %v8486_v49  ;;  %v8487_v13 = vunpack.i.l.bf16 %v8486_v49  ;;  %v8496_v18 = vpop.permute.xlu2 %8495  ;;  %v13787_v49 = vld [vmem:[#allocation7_spill] sm:$0xff] }
 0x7ad   :  { %8525 = vrot.lane.b32.xlu2 %v8524_v37, %s8896_s17  ;;  %v8498_v29 = vunpack.i.h.bf16 %v8496_v18  ;;  %v8497_v45 = vunpack.i.l.bf16 %v8496_v18  ;;  %v13790_v18 = vld [vmem:[#allocation10_spill] sm:$0xff] }
 0x7ae   :  { %v2824_v63 = vsel %vm2815_vm4, %v2807_v43, %v8487_v13  ;;  %v2825_v50 = vsel %vm2815_vm4, %v2808_v51, %v8488_v44  ;;  %v13788_v44 = vld [vmem:[#allocation8_spill] sm:$0xff]  ;;  %v13789_v43 = vld [vmem:[#allocation9_spill] sm:$0xff] }
 0x7af   :  { %v2836_v20 = vpack.c.bf16 %v2825_v50, %v2824_v63  ;;  %v2810_v35 = vsel %vm2798_vm3, %v2793_v36, %v8498_v29  ;;  %v2809_v14 = vsel %vm2798_vm3, %v2792_v28, %v8497_v45  ;;  %v13791_v45 = vld [vmem:[#allocation12_spill] sm:$0xff]  ;;  %v8521_v36 = vpop.permute.xlu1 %8520 }
 0x7bb   :  { %v8501_v47 = vpop.permute.xlu0 %8500 }
 0x7bc   :  { %7306 = vmatmul.msk.bf16.gmra.mxu2 %vm146_vm0, %v2836_v20  ;;  %v8503_v22 = vunpack.i.h.bf16 %v8501_v47  ;;  %v8502_v58 = vunpack.i.l.bf16 %v8501_v47  ;;  %v8511_v5 = vpop.permute.xlu2 %8510 }
 0x7bd   :  { %v8513_v7 = vunpack.i.h.bf16 %v8511_v5  ;;  %v8512_v38 = vunpack.i.l.bf16 %v8511_v5 }
 0x7be   :  { %v2826_v12 = vsel %vm2815_vm4, %v2809_v14, %v8502_v58  ;;  %v2827_v40 = vsel %vm2815_vm4, %v2810_v35, %v8503_v22  ;;  %v8523_v35 = vunpack.i.h.bf16 %v8521_v36  ;;  %v8522_v14 = vunpack.i.l.bf16 %v8521_v36 }
 0x7bf   :  { %v2837_v54 = vpack.c.bf16 %v2827_v40, %v2826_v12  ;;  %v2812_v53 = vsel %vm2798_vm3, %v2795_v2, %v8513_v7  ;;  %v2811_v8 = vsel %vm2798_vm3, %v2794_v60, %v8512_v38  ;;  %v8897_v38 = vmov 32.0  }
 0x7c0   :  { %v2796_v33 = vsel %vm476_vm1, %v10900_v19, %v8522_v14  ;;  %8797 = vrcp.f32 %v8897_v38  ;;  %v13796_v14 = vld [vmem:[#allocation15_spill] sm:$0xff] }
 0x7c6   :  { %v8798_v2 = vpop.eup %8797 }
 0x7c7   :  { %vm3002_vm5 = vweird.f32 %v8798_v2 }
 0x7cc   :  { %7307 = vmatmul.msk.bf16.gmra.mxu2 %vm146_vm0, %v2837_v54 }
 0x7e5   :  { %v2587_v24 = vpop.f32.mrf.mxu1 }
 0x7e6   :  { %v8529_v6 = vpack.i.bf16 %v2587_v24, %v2584_v56  ;;  %v2797_v56 = vsel %vm476_vm1, %v10903_v57, %v8523_v35  ;;  %v2998_v57 = vmul.f32 32.0, %v8798_v2 }
 0x7e8   :  { %8530 = vrot.lane.b32.xlu0 %v8529_v6, %s8895_s16  ;;  %v2999_v60 = vsub.f32 1.0, %v2998_v57 }
 0x7ea   :  { %v8516_v9 = vpop.permute.xlu0 %8515 }
 0x7eb   :  { %v8518_v59 = vunpack.i.h.bf16 %v8516_v9  ;;  %v8517_v61 = vunpack.i.l.bf16 %v8516_v9 }
 0x7ed   :  { %v2828_v27 = vsel %vm2815_vm4, %v2811_v8, %v8517_v61  ;;  %v2829_v31 = vsel %vm2815_vm4, %v2812_v53, %v8518_v59  ;;  %v3000_v59 = vmul.f32 %v8798_v2, %v2999_v60 }
 0x7ee   :  { %v2838_v11 = vpack.c.bf16 %v2829_v31, %v2828_v27 }
 0x7ef   :  { %v3001_v61 = vadd.f32 %v8798_v2, %v3000_v59 }
 0x7f0   :  { %7308 = vmatmul.msk.bf16.gmra.mxu2 %vm146_vm0, %v2838_v11 }
 0x7f1   :  { %v11039_v53 = vsel %vm3002_vm5, %v8798_v2, %v3001_v61 }
 0x7f2   :  { %13792 = vst [vmem:[#allocation73_spill] sm:$0xff] %v11039_v53 }
 0x7ff   :  { %v2893_v34 = vpop.f32.mrf.mxu2 }
 0x800   :  { %v2894_v25 = vadd.f32 %v10989_v42, %v2893_v34 }
 0x802   :  { %v2933_v17 = vadd.f32 %v2894_v25, %v13785_v0 }
 0x804   :  { %v2949_v1 = vsel %vm146_vm0, %v2933_v17, 0.0 }
 0x805   :  { %2950 = vadd.xlane.f32.xlu1 %v2949_v1 }
 0x807   :  { %v2895_v30 = vpop.f32.mrf.mxu2  ;;  %v8526_v28 = vpop.permute.xlu2 %8525 }
 0x808   :  { %v2896_v62 = vadd.f32 %v10989_v42, %v2895_v30  ;;  %v8528_v12 = vunpack.i.h.bf16 %v8526_v28  ;;  %v8527_v40 = vunpack.i.l.bf16 %v8526_v28 }
 0x80a   :  { %v10996_v16 = vadd.f32 %v2896_v62, %v13786_v52  ;;  %v2814_v6 = vsel %vm2798_vm3, %v2797_v56, %v8528_v12  ;;  %v2813_v46 = vsel %vm2798_vm3, %v2796_v33, %v8527_v40  ;;  %v13793_v52 = vld [vmem:[#allocation13_spill] sm:$0xff] }
 0x80c   :  { %v2952_v37 = vsel %vm146_vm0, %v10996_v16, 0.0 }
 0x80d   :  { %2953 = vadd.xlane.f32.xlu2 %v2952_v37 }
 0x80f   :  { %v2898_v39 = vpop.f32.mrf.mxu2 }
 0x810   :  { %v2899_v4 = vadd.f32 %v10989_v42, %v2898_v39 }
 0x812   :  { %v11002_v15 = vadd.f32 %v2899_v4, %v13787_v49 }
 0x814   :  { %v2955_v55 = vsel %vm146_vm0, %v11002_v15, 0.0 }
 0x815   :  { %2956 = vadd.xlane.f32.xlu0 %v2955_v55 }
 0x817   :  { %v2900_v32 = vpop.f32.mrf.mxu2 }
 0x818   :  { %v2901_v21 = vadd.f32 %v10989_v42, %v2900_v32 }
 0x81a   :  { %v11008_v13 = vadd.f32 %v2901_v21, %v13788_v44  ;;  %v13794_v21 = vld [vmem:[#allocation11_spill] sm:$0xff] }
 0x81c   :  { %v2958_v26 = vsel %vm146_vm0, %v11008_v13, 0.0 }
 0x81d   :  { %2959 = vadd.xlane.f32.xlu1 %v2958_v26 }
 0x81f   :  { %v2903_v23 = vpop.f32.mrf.mxu2 }
 0x820   :  { %v2904_v51 = vadd.f32 %v10989_v42, %v2903_v23 }
 0x822   :  { %v11014_v63 = vadd.f32 %v2904_v51, %v13789_v43 }
 0x824   :  { %v2961_v50 = vsel %vm146_vm0, %v11014_v63, 0.0 }
 0x825   :  { %2962 = vadd.xlane.f32.xlu2 %v2961_v50 }
 0x827   :  { %v2905_v20 = vpop.f32.mrf.mxu2 }
 0x828   :  { %v2906_v10 = vadd.f32 %v10989_v42, %v2905_v20 }
 0x82a   :  { %v11020_v47 = vadd.f32 %v2906_v10, %v13790_v18 }
 0x82c   :  { %v2964_v3 = vsel %vm146_vm0, %v11020_v47, 0.0 }
 0x82d   :  { %2965 = vadd.xlane.f32.xlu0 %v2964_v3 }
 0x82f   :  { %v2908_v41 = vpop.f32.mrf.mxu2 }
 0x830   :  { %v2909_v29 = vadd.f32 %v10989_v42, %v2908_v41 }
 0x832   :  { %v11026_v22 = vadd.f32 %v2909_v29, %v13791_v45 }
 0x834   :  { %v2967_v58 = vsel %vm146_vm0, %v11026_v22, 0.0 }
 0x835   :  { %2968 = vadd.xlane.f32.xlu0 %v2967_v58 }
 0x837   :  { %v2910_v19 = vpop.f32.mrf.mxu2 }
 0x838   :  { %v2911_v25 = vadd.f32 %v10989_v42, %v2910_v19 }
 0x83a   :  { %v11053_v37 = vadd.f32 %v2911_v25, %v13793_v52 }
 0x83c   :  { %v2970_v55 = vsel %vm146_vm0, %v11053_v37, 0.0 }
 0x83f   :  { %v2913_v11 = vpop.f32.mrf.mxu2 }
 0x840   :  { %v2914_v4 = vadd.f32 %v10989_v42, %v2913_v11 }
 0x842   :  { %v11063_v44 = vadd.f32 %v2914_v4, %v13794_v21  ;;  %v7378_v21 = vld [vmem:[%s13503_s7 + $0xc0] sm:$0xf0] }
 0x844   :  { %v2973_v50 = vsel %vm146_vm0, %v11063_v44, 0.0 }
 0x847   :  { %v2915_v39 = vpop.f32.mrf.mxu2 }
 0x848   :  { %v2916_v51 = vadd.f32 %v10989_v42, %v2915_v39 }
 0x84f   :  { %v2918_v20 = vpop.f32.mrf.mxu2 }
 0x850   :  { %v2919_v45 = vadd.f32 %v10989_v42, %v2918_v20 }
 0x852   :  { %v11089_v12 = vadd.f32 %v2919_v45, %v13796_v14  ;;  %v7312_v45 = vld [vmem:[%s13503_s7] sm:$0xf]  ;;  %v7320_v14 = vld [vmem:[%s13503_s7 + $0x8] sm:$0xf] }
 0x854   :  { %v2979_v33 = vsel %vm146_vm0, %v11089_v12, 0.0 }
 0x85a   :  { %v8531_v54 = vpop.permute.xlu0 %8530 }
 0x85b   :  { %v8533_v5 = vunpack.i.h.bf16 %v8531_v54  ;;  %v8532_v24 = vunpack.i.l.bf16 %v8531_v54 }
 0x85d   :  { %v2830_v48 = vsel %vm2815_vm4, %v2813_v46, %v8532_v24  ;;  %v2831_v7 = vsel %vm2815_vm4, %v2814_v6, %v8533_v5 }
 0x85e   :  { %v2839_v9 = vpack.c.bf16 %v2831_v7, %v2830_v48 }
 0x860   :  { %7309 = vmatmul.msk.bf16.gmra.mxu2 %vm146_vm0, %v2839_v9 }
 0x878   :  { %v2951_v8 = vpop.xlane.xlu1 %2950 }
 0x879   :  { %v3004_v27 = vmul.f32 %v11039_v53, %v2951_v8 }
 0x87b   :  { %v11042_v31 = vsub.f32 %v2933_v17, %v3004_v27 }
 0x87d   :  { %v3036_v34 = vmul.f32 %v11042_v31, %v11042_v31 }
 0x87f   :  { %v3052_v0 = vsel %vm146_vm0, %v3036_v34, 0.0 }
 0x880   :  { %v2954_v1 = vpop.xlane.xlu2 %2953  ;;  %3053 = vadd.xlane.f32.xlu1 %v3052_v0  ;;  %v13799_v0 = vld [vmem:[#allocation18_spill] sm:$0xff] }
 0x881   :  { %v3005_v30 = vmul.f32 %v11039_v53, %v2954_v1 }
 0x883   :  { %v11050_v62 = vsub.f32 %v10996_v16, %v3005_v30 }
 0x885   :  { %v3037_v17 = vmul.f32 %v11050_v62, %v11050_v62 }
 0x887   :  { %v3055_v49 = vsel %vm146_vm0, %v3037_v17, 0.0  ;;  %v13800_v17 = vld [vmem:[#allocation19_spill] sm:$0xff] }
 0x888   :  { %v2957_v32 = vpop.xlane.xlu0 %2956  ;;  %3056 = vadd.xlane.f32.xlu2 %v3055_v49  ;;  %2971 = vadd.xlane.f32.xlu1 %v2970_v55  ;;  %v7376_v49 = vld [vmem:[%s13503_s7 + $0x80] sm:$0xf] }
 0x889   :  { %v3006_v16 = vmul.f32 %v11039_v53, %v2957_v32  ;;  %v8106_v55 = vld [vmem:[%s13503_s7 + $0xbc] sm:$0xf0]  ;;  %v8098_v32 = vld [vmem:[%s13503_s7 + $0x84] sm:$0xf] }
 0x88b   :  { %v11066_v26 = vsub.f32 %v11002_v15, %v3006_v16  ;;  %v13795_v15 = vld [vmem:[#allocation14_spill] sm:$0xff]  ;;  %v7377_v16 = vor.u32 %v8106_v55, %v7376_v49 }
 0x88c   :  { %v11079_v41 = vadd.f32 %v2916_v51, %v13795_v15  ;;  %v8107_v51 = vld [vmem:[%s13503_s7 + $0xc4] sm:$0xf0] }
 0x88d   :  { %v3038_v23 = vmul.f32 %v11066_v26, %v11066_v26  ;;  %3614 = vmatpush.bf16.msrb.mxu3 %v7377_v16 }
 0x88e   :  { %v2976_v58 = vsel %vm146_vm0, %v11079_v41, 0.0 }
 0x88f   :  { %v3058_v43 = vsel %vm146_vm0, %v3038_v23, 0.0  ;;  %v7384_v23 = vld [vmem:[%s13503_s7 + $0x88] sm:$0xf] }
 0x890   :  { %3059 = vadd.xlane.f32.xlu2 %v3058_v43  ;;  %2974 = vadd.xlane.f32.xlu1 %v2973_v50  ;;  %v2960_v10 = vpop.xlane.xlu1 %2959  ;;  %v7381_v50 = vor.u32 %v8098_v32, %v7378_v21  ;;  %v7385_v20 = vor.u32 %v8107_v51, %v7384_v23 }
 0x891   :  { %v3007_v18 = vmul.f32 %v11039_v53, %v2960_v10  ;;  %v8099_v10 = vld [vmem:[%s13503_s7 + $0x8c] sm:$0xf] }
 0x892   :  { %3663 = vmatpush.bf16.msra.mxu0 %v7381_v50  ;;  %3712 = vmatpush.bf16.msrb.mxu1 %v7385_v20 }
 0x893   :  { %v11076_v3 = vsub.f32 %v11008_v13, %v3007_v18  ;;  %v2920_v13 = vpop.f32.mrf.mxu2  ;;  %v7386_v18 = vld [vmem:[%s13503_s7 + $0xc8] sm:$0xf0] }
 0x894   :  { %v2921_v56 = vadd.f32 %v10989_v42, %v2920_v13  ;;  %v7314_v13 = vld [vmem:[%s13503_s7 + $0x40] sm:$0xf0] }
 0x895   :  { %v3039_v29 = vmul.f32 %v11076_v3, %v11076_v3 }
 0x897   :  { %v3061_v36 = vsel %vm146_vm0, %v3039_v29, 0.0  ;;  %v7389_v29 = vor.u32 %v8099_v10, %v7386_v18 }
 0x898   :  { %2977 = vadd.xlane.f32.xlu2 %v2976_v58  ;;  %v2963_v28 = vpop.xlane.xlu2 %2962  ;;  %3062 = vadd.xlane.f32.xlu0 %v3061_v36  ;;  %v8090_v58 = vld [vmem:[%s13503_s7 + $0x3c] sm:$0xf0]  ;;  %v8082_v36 = vld [vmem:[%s13503_s7 + $0x4] sm:$0xf] }
 0x899   :  { %v3008_v35 = vmul.f32 %v11039_v53, %v2963_v28  ;;  %3761 = vmatpush.bf16.msra.mxu2 %v7389_v29  ;;  %v11211_v29 = vld [vmem:[%s13501_s5] ss:$0 sm:$0xff] }
 0x89b   :  { %v11092_v40 = vsub.f32 %v11014_v63, %v3008_v35  ;;  %v2923_v46 = vpop.f32.mrf.mxu2  ;;  %v13797_v63 = vld [vmem:[#allocation16_spill] sm:$0xff]  ;;  %v7313_v35 = vor.u32 %v8090_v58, %v7312_v45 }
 0x89c   :  { %v11105_v7 = vadd.f32 %v2921_v56, %v13797_v63  ;;  %v2924_v9 = vadd.f32 %v10989_v42, %v2923_v46  ;;  %v8091_v56 = vld [vmem:[%s13503_s7 + $0x44] sm:$0xf0] }
 0x89d   :  { %v3040_v54 = vmul.f32 %v11092_v40, %v11092_v40  ;;  %3615 = vmatpush.bf16.msrb.mxu3 %v7313_v35 }
 0x89e   :  { %v2982_v57 = vsel %vm146_vm0, %v11105_v7, 0.0 }
 0x89f   :  { %v3064_v5 = vsel %vm146_vm0, %v3040_v54, 0.0  ;;  %v7317_v54 = vor.u32 %v8082_v36, %v7314_v13  ;;  %v13801_v36 = vld [vmem:[#allocation20_spill] sm:$0xff] }
 0x8a0   :  { %v2966_v24 = vpop.xlane.xlu0 %2965  ;;  %2980 = vadd.xlane.f32.xlu2 %v2979_v33  ;;  %3065 = vadd.xlane.f32.xlu0 %v3064_v5  ;;  %v8083_v33 = vld [vmem:[%s13503_s7 + $0xc] sm:$0xf] }
 0x8a1   :  { %v3009_v6 = vmul.f32 %v11039_v53, %v2966_v24  ;;  %v7322_v5 = vld [vmem:[%s13503_s7 + $0x48] sm:$0xf0]  ;;  %v7321_v24 = vor.u32 %v8091_v56, %v7320_v14  ;;  %3664 = vmatpush.bf16.msra.mxu0 %v7317_v54 }
 0x8a3   :  { %v11102_v48 = vsub.f32 %v11020_v47, %v3009_v6  ;;  %v13798_v47 = vld [vmem:[#allocation17_spill] sm:$0xff]  ;;  %v2925_v8 = vpop.f32.mrf.mxu2  ;;  %v7325_v6 = vor.u32 %v8083_v33, %v7322_v5  ;;  %3713 = vmatpush.bf16.msrb.mxu1 %v7321_v24 }
 0x8a4   :  { %v11115_v19 = vadd.f32 %v2924_v9, %v13798_v47  ;;  %v2926_v11 = vadd.f32 %v10989_v42, %v2925_v8 }
 0x8a5   :  { %v3041_v38 = vmul.f32 %v11102_v48, %v11102_v48  ;;  %3762 = vmatpush.bf16.msra.mxu2 %v7325_v6 }
 0x8a6   :  { %v2985_v25 = vsel %vm146_vm0, %v11115_v19, 0.0  ;;  %v11127_v1 = vadd.f32 %v2926_v11, %v13799_v0 }
 0x8a7   :  { %v3067_v2 = vsel %vm146_vm0, %v3041_v38, 0.0 }
 0x8a8   :  { %v2969_v60 = vpop.xlane.xlu0 %2968  ;;  %3068 = vadd.xlane.f32.xlu1 %v3067_v2  ;;  %2983 = vadd.xlane.f32.xlu0 %v2982_v57 }
 0x8a9   :  { %v3010_v59 = vmul.f32 %v11039_v53, %v2969_v60 }
 0x8ab   :  { %v11118_v61 = vsub.f32 %v11026_v22, %v3010_v59  ;;  %v2988_v22 = vsel %vm146_vm0, %v11127_v1, 0.0 }
 0x8ad   :  { %v3042_v27 = vmul.f32 %v11118_v61, %v11118_v61 }
 0x8af   :  { %v3070_v34 = vsel %vm146_vm0, %v3042_v27, 0.0 }
 0x8b0   :  { %3071 = vadd.xlane.f32.xlu1 %v3070_v34  ;;  %2986 = vadd.xlane.f32.xlu0 %v2985_v25 }
 0x8b8   :  { %2989 = vadd.xlane.f32.xlu1 %v2988_v22 }
 0x8e3   :  { %v2928_v30 = vpop.f32.mrf.mxu2 }
 0x8e4   :  { %v2929_v52 = vadd.f32 %v10989_v42, %v2928_v30 }
 0x8e6   :  { %v11133_v39 = vadd.f32 %v2929_v52, %v13800_v17 }
 0x8e8   :  { %v2991_v4 = vsel %vm146_vm0, %v11133_v39, 0.0 }
 0x8e9   :  { %2992 = vadd.xlane.f32.xlu1 %v2991_v4 }
 0x8eb   :  { %v2930_v4 = vpop.f32.mrf.mxu2 }
 0x8ec   :  { %v2931_v21 = vadd.f32 %v10989_v42, %v2930_v4 }
 0x8f3   :  { %v3054_v43 = vpop.xlane.xlu1 %3053 }
 0x8f4   :  { %v3100_v15 = vmul.f32 %v3054_v43, %v11039_v53 }
 0x8f6   :  { %v3116_v28 = vadd.f32 1e-05, %v3100_v15 }
 0x8f8   :  { %8799 = vrsqrt.f32 %v3116_v28  ;;  %vm3138_vm7 = vweird.f32 %v3116_v28 }
 0x8fb   :  { %v3057_v46 = vpop.xlane.xlu2 %3056  ;;  %v2972_v63 = vpop.xlane.xlu1 %2971 }
 0x8fc   :  { %v3101_v38 = vmul.f32 %v3057_v46, %v11039_v53  ;;  %v3011_v9 = vmul.f32 %v11039_v53, %v2972_v63 }
 0x8fe   :  { %v8800_v2 = vpop.eup %8799  ;;  %v3117_v57 = vadd.f32 1e-05, %v3101_v38  ;;  %v11189_v60 = vsub.f32 %v11053_v37, %v3011_v9 }
 0x8ff   :  { %v3133_v59 = vmul.f32 %v8800_v2, %v3116_v28  ;;  %vm3139_vm6 = vweird.f32 %v8800_v2  ;;  %v11218_v28 = vadd.f32 %v2931_v21, %v13801_v36 }
 0x900   :  { %8801 = vrsqrt.f32 %v3117_v57  ;;  %v3043_v47 = vmul.f32 %v11189_v60, %v11189_v60  ;;  %vm3140_vm8 = vmor %vm3138_vm7, %vm3139_vm6  ;;  %vm3148_vm10 = vweird.f32 %v3117_v57 }
 0x901   :  { %v3134_v8 = vmul.f32 %v8800_v2, %v3133_v59  ;;  %v2994_v24 = vsel %vm146_vm0, %v11218_v28, 0.0 }
 0x902   :  { %v3073_v27 = vsel %vm146_vm0, %v3043_v47, 0.0 }
 0x903   :  { %v3135_v11 = vmul.f32 0.5, %v3134_v8  ;;  %v3060_v34 = vpop.xlane.xlu2 %3059  ;;  %3074 = vadd.xlane.f32.xlu2 %v3073_v27  ;;  %v2975_v25 = vpop.xlane.xlu1 %2974 }
 0x904   :  { %v3102_v0 = vmul.f32 %v3060_v34, %v11039_v53  ;;  %v3012_v22 = vmul.f32 %v11039_v53, %v2975_v25 }
 0x905   :  { %v3136_v30 = vsub.f32 1.5, %v3135_v11 }
 0x906   :  { %v8802_v52 = vpop.eup %8801  ;;  %v11196_v37 = vadd.f32 1e-05, %v3102_v0  ;;  %v11199_v17 = vsub.f32 %v11063_v44, %v3012_v22 }
 0x907   :  { %v3137_v49 = vmul.f32 %v8800_v2, %v3136_v30  ;;  %v3143_v55 = vmul.f32 %v8802_v52, %v3117_v57  ;;  %vm3149_vm9 = vweird.f32 %v8802_v52 }
 0x908   :  { %8803 = vrsqrt.f32 %v11196_v37  ;;  %v3044_v32 = vmul.f32 %v11199_v17, %v11199_v17  ;;  %vm3150_vm11 = vmor %vm3148_vm10, %vm3149_vm9  ;;  %vm3158_vm13 = vweird.f32 %v11196_v37 }
 0x909   :  { %v3144_v16 = vmul.f32 %v8802_v52, %v3143_v55  ;;  %v3141_v51 = vsel %vm3140_vm8, %v8800_v2, %v3137_v49 }
 0x90a   :  { %v3076_v23 = vsel %vm146_vm0, %v3044_v32, 0.0  ;;  %v3292_v42 = vmul.f32 %v3141_v51, %v11042_v31  ;;  %v11226_v31 = vld [vmem:[%s13502_s6] ss:$0 sm:$0xff] }
 0x90b   :  { %v3145_v43 = vmul.f32 0.5, %v3144_v16  ;;  %v2978_v44 = vpop.xlane.xlu2 %2977  ;;  %v3063_v50 = vpop.xlane.xlu0 %3062  ;;  %3077 = vadd.xlane.f32.xlu2 %v3076_v23 }
 0x90c   :  { %v3013_v20 = vmul.f32 %v11039_v53, %v2978_v44  ;;  %v3103_v10 = vmul.f32 %v3063_v50, %v11039_v53 }
 0x90d   :  { %v3146_v18 = vsub.f32 1.5, %v3145_v43 }
 0x90e   :  { %v8804_v15 = vpop.eup %8803  ;;  %v11215_v45 = vsub.f32 %v11079_v41, %v3013_v20  ;;  %v3119_v58 = vadd.f32 1e-05, %v3103_v10  ;;  %v3312_v41 = vmul.f32 %v11211_v29, %v3292_v42 }
 0x90f   :  { %v3147_v35 = vmul.f32 %v8802_v52, %v3146_v18  ;;  %v3153_v13 = vmul.f32 %v8804_v15, %v11196_v37  ;;  %vm3159_vm12 = vweird.f32 %v8804_v15 }
 0x910   :  { %8805 = vrsqrt.f32 %v3119_v58  ;;  %v3045_v14 = vmul.f32 %v11215_v45, %v11215_v45  ;;  %vm11252_vm14 = vmor %vm3158_vm13, %vm3159_vm12  ;;  %vm3168_vm1 = vweird.f32 %v3119_v58 }
 0x911   :  { %v3151_v54 = vsel %vm3150_vm11, %v8802_v52, %v3147_v35  ;;  %v3154_v56 = vmul.f32 %v8804_v15, %v3153_v13 }
 0x912   :  { %v3293_v33 = vmul.f32 %v3151_v54, %v11050_v62  ;;  %v3079_v5 = vsel %vm146_vm0, %v3045_v14, 0.0  ;;  %v11237_v62 = vadd.f32 %v11226_v31, %v3312_v41 }
 0x913   :  { %v3155_v6 = vmul.f32 0.5, %v3154_v56  ;;  %v2981_v46 = vpop.xlane.xlu2 %2980  ;;  %3080 = vadd.xlane.f32.xlu0 %v3079_v5  ;;  %v3066_v63 = vpop.xlane.xlu0 %3065  ;;  %2995 = vadd.xlane.f32.xlu2 %v2994_v24 }
 0x914   :  { %v3313_v38 = vmul.f32 %v11211_v29, %v3293_v33  ;;  %v3014_v9 = vmul.f32 %v11039_v53, %v2981_v46  ;;  %v3104_v2 = vmul.f32 %v3066_v63, %v11039_v53  ;;  %13802 = vst [vmem:[#allocation43_spill] sm:$0xff] %v11237_v62 }
 0x915   :  { %v3156_v57 = vsub.f32 1.5, %v3155_v6 }
 0x916   :  { %v8806_v59 = vpop.eup %8805  ;;  %v11240_v47 = vadd.f32 %v11226_v31, %v3313_v38  ;;  %v11243_v8 = vsub.f32 %v11089_v12, %v3014_v9  ;;  %v3120_v27 = vadd.f32 1e-05, %v3104_v2 }
 0x917   :  { %v3157_v11 = vmul.f32 %v8804_v15, %v3156_v57  ;;  %v3163_v34 = vmul.f32 %v8806_v59, %v3119_v58  ;;  %vm3169_vm15 = vweird.f32 %v8806_v59 }
 0x918   :  { %13803 = vst [vmem:[#allocation21_spill] sm:$0xff] %v11240_v47  ;;  %v11247_v25 = vpack.c.bf16 %v11240_v47, %v11237_v62  ;;  %8807 = vrsqrt.f32 %v3120_v27  ;;  %v3046_v0 = vmul.f32 %v11243_v8, %v11243_v8  ;;  %vm3170_vm3 = vmor %vm3168_vm1, %vm3169_vm15  ;;  %vm3178_vm5 = vweird.f32 %v3120_v27 }
 0x919   :  { %v3164_v22 = vmul.f32 %v8806_v59, %v3163_v34  ;;  %v3161_v52 = vsel %vm11252_vm14, %v8804_v15, %v3157_v11 }
 0x91a   :  { %7438 = vmatmul.msk.bf16.vlgmr.msrb.gmra.mxu3 %vm146_vm0, %v11247_v25  ;;  %7446 = vmatmul.msk.bf16.vlgmr.msra.gmra.mxu0 %vm146_vm0, %v11247_v25  ;;  %v3082_v12 = vsel %vm146_vm0, %v3046_v0, 0.0  ;;  %v3294_v23 = vmul.f32 %v3161_v52, %v11066_v26 }
 0x91b   :  { %v3165_v4 = vmul.f32 0.5, %v3164_v22  ;;  %7454 = vmatmul.msk.bf16.vlgmr.msrb.gmra.mxu1 %vm146_vm0, %v11247_v25  ;;  %7462 = vmatmul.msk.bf16.vlgmr.msra.gmra.mxu2 %vm146_vm0, %v11247_v25  ;;  %v2984_v37 = vpop.xlane.xlu0 %2983  ;;  %v3069_v49 = vpop.xlane.xlu1 %3068 }
 0x91c   :  { %3083 = vadd.xlane.f32.xlu0 %v3082_v12  ;;  %v3015_v55 = vmul.f32 %v11039_v53, %v2984_v37  ;;  %v3105_v32 = vmul.f32 %v3069_v49, %v11039_v53  ;;  %v3314_v15 = vmul.f32 %v11211_v29, %v3294_v23 }
 0x91d   :  { %v3166_v16 = vsub.f32 1.5, %v3165_v4 }
 0x91e   :  { %v8808_v21 = vpop.eup %8807  ;;  %v11271_v51 = vsub.f32 %v11105_v7, %v3015_v55  ;;  %v3121_v43 = vadd.f32 1e-05, %v3105_v32  ;;  %v11281_v56 = vadd.f32 %v11226_v31, %v3314_v15 }
 0x91f   :  { %v3167_v44 = vmul.f32 %v8806_v59, %v3166_v16  ;;  %v3173_v50 = vmul.f32 %v8808_v21, %v3120_v27  ;;  %vm3179_vm4 = vweird.f32 %v8808_v21 }
 0x920   :  { %8809 = vrsqrt.f32 %v3121_v43  ;;  %v3047_v20 = vmul.f32 %v11271_v51, %v11271_v51  ;;  %13806 = vst [vmem:[#allocation82_spill] sm:$0xff] %v11281_v56  ;;  %vm3180_vm6 = vmor %vm3178_vm5, %vm3179_vm4  ;;  %vm3188_vm8 = vweird.f32 %v3121_v43 }
 0x921   :  { %v3171_v10 = vsel %vm3170_vm3, %v8806_v59, %v3167_v44  ;;  %v3174_v18 = vmul.f32 %v8808_v21, %v3173_v50 }
 0x922   :  { %v3295_v42 = vmul.f32 %v3171_v10, %v11076_v3  ;;  %v3085_v26 = vsel %vm146_vm0, %v3047_v20, 0.0 }
 0x923   :  { %v3175_v36 = vmul.f32 0.5, %v3174_v18  ;;  %3086 = vadd.xlane.f32.xlu1 %v3085_v26  ;;  %v2987_v7 = vpop.xlane.xlu0 %2986  ;;  %v3072_v35 = vpop.xlane.xlu1 %3071 }
 0x924   :  { %v3315_v58 = vmul.f32 %v11211_v29, %v3295_v42  ;;  %v3016_v13 = vmul.f32 %v11039_v53, %v2987_v7  ;;  %v3106_v55 = vmul.f32 %v3072_v35, %v11039_v53 }
 0x925   :  { %v3176_v14 = vsub.f32 1.5, %v3175_v36 }
 0x926   :  { %v8810_v54 = vpop.eup %8809  ;;  %v11284_v41 = vadd.f32 %v11226_v31, %v3315_v58  ;;  %v11287_v3 = vsub.f32 %v11115_v19, %v3016_v13 }
 0x927   :  { %v3177_v33 = vmul.f32 %v8808_v21, %v3176_v14  ;;  %v3183_v5 = vmul.f32 %v8810_v54, %v3121_v43  ;;  %vm3189_vm7 = vweird.f32 %v8810_v54 }
 0x928   :  { %13807 = vst [vmem:[#allocation52_spill] sm:$0xff] %v11284_v41  ;;  %v11291_v24 = vpack.c.bf16 %v11284_v41, %v11281_v56  ;;  %v3048_v6 = vmul.f32 %v11287_v3, %v11287_v3  ;;  %vm3190_vm9 = vmor %vm3188_vm8, %vm3189_vm7  ;;  %v8112_v41 = vld [vmem:[%s13503_s7 + $0xec] sm:$0xf0] }
 0x929   :  { %v3184_v46 = vmul.f32 %v8810_v54, %v3183_v5  ;;  %v3181_v63 = vsel %vm3180_vm6, %v8808_v21, %v3177_v33  ;;  %v3122_v21 = vadd.f32 1e-05, %v3106_v55 }
 0x92a   :  { %7439 = vmatmul.msk.bf16.gmra.mxu3 %vm146_vm0, %v11291_v24  ;;  %7447 = vmatmul.msk.bf16.gmra.mxu0 %vm146_vm0, %v11291_v24  ;;  %v3088_v19 = vsel %vm146_vm0, %v3048_v6, 0.0  ;;  %v3296_v59 = vmul.f32 %v3181_v63, %v11092_v40 }
 0x92b   :  { %v3185_v38 = vmul.f32 0.5, %v3184_v46  ;;  %7455 = vmatmul.msk.bf16.gmra.mxu1 %vm146_vm0, %v11291_v24  ;;  %7463 = vmatmul.msk.bf16.gmra.mxu2 %vm146_vm0, %v11291_v24  ;;  %v2990_v9 = vpop.xlane.xlu1 %2989  ;;  %8811 = vrsqrt.f32 %v3122_v21  ;;  %vm3198_vm11 = vweird.f32 %v3122_v21 }
 0x92c   :  { %3089 = vadd.xlane.f32.xlu2 %v3088_v19  ;;  %v3017_v2 = vmul.f32 %v11039_v53, %v2990_v9  ;;  %v3316_v22 = vmul.f32 %v11211_v29, %v3296_v59 }
 0x92d   :  { %v3186_v57 = vsub.f32 1.5, %v3185_v38 }
 0x92e   :  { %v11307_v27 = vsub.f32 %v11127_v1, %v3017_v2  ;;  %v11316_v40 = vadd.f32 %v11226_v31, %v3316_v22 }
 0x92f   :  { %v3187_v11 = vmul.f32 %v8810_v54, %v3186_v57 }
 0x930   :  { %v3049_v34 = vmul.f32 %v11307_v27, %v11307_v27  ;;  %13808 = vst [vmem:[#allocation23_spill] sm:$0xff] %v11316_v40 }
 0x931   :  { %v3191_v0 = vsel %vm3190_vm9, %v8810_v54, %v3187_v11  ;;  %v8812_v23 = vpop.eup %8811 }
 0x932   :  { %v3297_v30 = vmul.f32 %v3191_v0, %v11102_v48  ;;  %v3091_v12 = vsel %vm146_vm0, %v3049_v34, 0.0  ;;  %v3193_v43 = vmul.f32 %v8812_v23, %v3122_v21  ;;  %vm3199_vm10 = vweird.f32 %v8812_v23 }
 0x933   :  { %3092 = vadd.xlane.f32.xlu0 %v3091_v12  ;;  %vm3200_vm12 = vmor %vm3198_vm11, %vm3199_vm10 }
 0x934   :  { %v3317_v52 = vmul.f32 %v11211_v29, %v3297_v30  ;;  %v3194_v44 = vmul.f32 %v8812_v23, %v3193_v43 }
 0x936   :  { %v11319_v1 = vadd.f32 %v11226_v31, %v3317_v52  ;;  %v3195_v18 = vmul.f32 0.5, %v3194_v44 }
 0x938   :  { %13809 = vst [vmem:[#allocation24_spill] sm:$0xff] %v11319_v1  ;;  %v11323_v4 = vpack.c.bf16 %v11319_v1, %v11316_v40  ;;  %v7424_v40 = vld [vmem:[%s13503_s7 + $0xb0] sm:$0xf] }
 0x939   :  { %v7425_v47 = vor.u32 %v8112_v41, %v7424_v40  ;;  %v7426_v40 = vld [vmem:[%s13503_s7 + $0xf0] sm:$0xf0] }
 0x93a   :  { %7440 = vmatmul.msk.bf16.gmra.mxu3 %vm146_vm0, %v11323_v4  ;;  %7448 = vmatmul.msk.bf16.gmra.mxu0 %vm146_vm0, %v11323_v4 }
 0x93b   :  { %7456 = vmatmul.msk.bf16.gmra.mxu1 %vm146_vm0, %v11323_v4  ;;  %7464 = vmatmul.msk.bf16.gmra.mxu2 %vm146_vm0, %v11323_v4 }
 0x95c   :  { %v2993_v48 = vpop.xlane.xlu1 %2992 }
 0x95d   :  { %v3018_v37 = vmul.f32 %v11039_v53, %v2993_v48 }
 0x95f   :  { %v11335_v49 = vsub.f32 %v11133_v39, %v3018_v37  ;;  %v3196_v39 = vsub.f32 1.5, %v3195_v18 }
 0x961   :  { %v3050_v32 = vmul.f32 %v11335_v49, %v11335_v49  ;;  %v3197_v7 = vmul.f32 %v8812_v23, %v3196_v39 }
 0x963   :  { %v3094_v16 = vsel %vm146_vm0, %v3050_v32, 0.0  ;;  %v3201_v13 = vsel %vm3200_vm12, %v8812_v23, %v3197_v7 }
 0x964   :  { %3095 = vadd.xlane.f32.xlu1 %v3094_v16  ;;  %v3298_v63 = vmul.f32 %v3201_v13, %v11118_v61 }
 0x966   :  { %v3318_v0 = vmul.f32 %v11211_v29, %v3298_v63 }
 0x968   :  { %v11357_v55 = vadd.f32 %v11226_v31, %v3318_v0  ;;  %v8101_v0 = vld [vmem:[%s13503_s7 + $0x9c] sm:$0xf] }
 0x96a   :  { %13810 = vst [vmem:[#allocation25_spill] sm:$0xff] %v11357_v55 }
 0x976   :  { %v3075_v50 = vpop.xlane.xlu2 %3074 }
 0x977   :  { %v3107_v20 = vmul.f32 %v3075_v50, %v11039_v53 }
 0x979   :  { %v3123_v10 = vadd.f32 1e-05, %v3107_v20 }
 0x97b   :  { %8813 = vrsqrt.f32 %v3123_v10  ;;  %vm3208_vm14 = vweird.f32 %v3123_v10 }
 0x97e   :  { %v3078_v15 = vpop.xlane.xlu2 %3077 }
 0x97f   :  { %v3108_v42 = vmul.f32 %v3078_v15, %v11039_v53 }
 0x981   :  { %v8814_v26 = vpop.eup %8813  ;;  %v3124_v36 = vadd.f32 1e-05, %v3108_v42 }
 0x982   :  { %v3203_v35 = vmul.f32 %v8814_v26, %v3123_v10  ;;  %vm3209_vm13 = vweird.f32 %v8814_v26 }
 0x983   :  { %8815 = vrsqrt.f32 %v3124_v36  ;;  %vm3210_vm15 = vmor %vm3208_vm14, %vm3209_vm13  ;;  %vm3218_vm3 = vweird.f32 %v3124_v36 }
 0x984   :  { %v3204_v58 = vmul.f32 %v8814_v26, %v3203_v35 }
 0x986   :  { %v3205_v14 = vmul.f32 0.5, %v3204_v58  ;;  %v3081_v54 = vpop.xlane.xlu0 %3080  ;;  %v2996_v33 = vpop.xlane.xlu2 %2995 }
 0x987   :  { %v3109_v5 = vmul.f32 %v3081_v54, %v11039_v53  ;;  %v3019_v6 = vmul.f32 %v11039_v53, %v2996_v33 }
 0x988   :  { %v3206_v46 = vsub.f32 1.5, %v3205_v14 }
 0x989   :  { %v8816_v19 = vpop.eup %8815  ;;  %v3125_v38 = vadd.f32 1e-05, %v3109_v5  ;;  %v11347_v9 = vsub.f32 %v11218_v28, %v3019_v6 }
 0x98a   :  { %v3207_v2 = vmul.f32 %v8814_v26, %v3206_v46  ;;  %v3213_v57 = vmul.f32 %v8816_v19, %v3124_v36  ;;  %vm3219_vm1 = vweird.f32 %v8816_v19 }
 0x98b   :  { %8817 = vrsqrt.f32 %v3125_v38  ;;  %v3051_v59 = vmul.f32 %v11347_v9, %v11347_v9  ;;  %vm3220_vm4 = vmor %vm3218_vm3, %vm3219_vm1  ;;  %vm3228_vm6 = vweird.f32 %v3125_v38 }
 0x98c   :  { %v3211_v11 = vsel %vm3210_vm15, %v8814_v26, %v3207_v2  ;;  %v3214_v34 = vmul.f32 %v8816_v19, %v3213_v57 }
 0x98d   :  { %v3299_v22 = vmul.f32 %v3211_v11, %v11189_v60  ;;  %v3097_v61 = vsel %vm146_vm0, %v3051_v59, 0.0  ;;  %v7392_v59 = vld [vmem:[%s13503_s7 + $0x90] sm:$0xf] }
 0x98e   :  { %v3215_v30 = vmul.f32 0.5, %v3214_v34  ;;  %3098 = vadd.xlane.f32.xlu2 %v3097_v61  ;;  %v8108_v11 = vld [vmem:[%s13503_s7 + $0xcc] sm:$0xf0]  ;;  %v8100_v61 = vld [vmem:[%s13503_s7 + $0x94] sm:$0xf] }
 0x98f   :  { %v3319_v28 = vmul.f32 %v11211_v29, %v3299_v22  ;;  %v3084_v12 = vpop.xlane.xlu0 %3083  ;;  %v7402_v22 = vld [vmem:[%s13503_s7 + $0xd8] sm:$0xf0] }
 0x990   :  { %v3216_v52 = vsub.f32 1.5, %v3215_v30  ;;  %v3110_v48 = vmul.f32 %v3084_v12, %v11039_v53  ;;  %v7393_v30 = vor.u32 %v8108_v11, %v7392_v59  ;;  %v7400_v12 = vld [vmem:[%s13503_s7 + $0x98] sm:$0xf] }
 0x991   :  { %v8818_v37 = vpop.eup %8817  ;;  %v11360_v32 = vadd.f32 %v11226_v31, %v3319_v28  ;;  %v7394_v28 = vld [vmem:[%s13503_s7 + $0xd0] sm:$0xf0] }
 0x992   :  { %v3217_v16 = vmul.f32 %v8816_v19, %v3216_v52  ;;  %v3223_v60 = vmul.f32 %v8818_v37, %v3125_v38  ;;  %v3126_v21 = vadd.f32 1e-05, %v3110_v48  ;;  %vm3229_vm5 = vweird.f32 %v8818_v37  ;;  %v8109_v52 = vld [vmem:[%s13503_s7 + $0xd4] sm:$0xf0]  ;;  %3810 = vmatpush.bf16.msra.mxu3 %v7393_v30 }
 0x993   :  { %13811 = vst [vmem:[#allocation44_spill] sm:$0xff] %v11360_v32  ;;  %v11364_v23 = vpack.c.bf16 %v11360_v32, %v11357_v55  ;;  %vm3230_vm7 = vmor %vm3228_vm6, %vm3229_vm5 }
 0x994   :  { %v3224_v43 = vmul.f32 %v8818_v37, %v3223_v60  ;;  %8819 = vrsqrt.f32 %v3126_v21  ;;  %v3221_v44 = vsel %vm3220_vm4, %v8816_v19, %v3217_v16  ;;  %vm3238_vm9 = vweird.f32 %v3126_v21 }
 0x995   :  { %7441 = vmatmul.msk.bf16.gmra.mxu3 %vm146_vm0, %v11364_v23  ;;  %7449 = vmatmul.msk.bf16.gmra.mxu0 %vm146_vm0, %v11364_v23  ;;  %v3300_v39 = vmul.f32 %v3221_v44, %v11199_v17  ;;  %v7405_v60 = vor.u32 %v8101_v0, %v7402_v22  ;;  %v7401_v44 = vor.u32 %v8109_v52, %v7400_v12  ;;  %v7338_v52 = vld [vmem:[%s13503_s7 + $0x58] sm:$0xf0] }
 0x996   :  { %v3225_v50 = vmul.f32 0.5, %v3224_v43  ;;  %7457 = vmatmul.msk.bf16.gmra.mxu1 %vm146_vm0, %v11364_v23  ;;  %7465 = vmatmul.msk.bf16.gmra.mxu2 %vm146_vm0, %v11364_v23  ;;  %v3087_v20 = vpop.xlane.xlu1 %3086  ;;  %v7397_v43 = vor.u32 %v8100_v61, %v7394_v28  ;;  %v8085_v28 = vld [vmem:[%s13503_s7 + $0x1c] sm:$0xf] }
 0x997   :  { %v3111_v10 = vmul.f32 %v3087_v20, %v11039_v53  ;;  %v3320_v35 = vmul.f32 %v11211_v29, %v3300_v39  ;;  %3957 = vmatpush.bf16.msrb.mxu2 %v7405_v60  ;;  %3908 = vmatpush.bf16.msra.mxu1 %v7401_v44 }
 0x998   :  { %v3226_v18 = vsub.f32 1.5, %v3225_v50  ;;  %3859 = vmatpush.bf16.msrb.mxu0 %v7397_v43  ;;  %v8093_v43 = vld [vmem:[%s13503_s7 + $0x54] sm:$0xf0] }
 0x999   :  { %v3127_v15 = vadd.f32 1e-05, %v3111_v10  ;;  %v11381_v6 = vadd.f32 %v11226_v31, %v3320_v35 }
 0x99a   :  { %v8820_v42 = vpop.eup %8819  ;;  %v3227_v26 = vmul.f32 %v8818_v37, %v3226_v18 }
 0x99b   :  { %v3233_v36 = vmul.f32 %v8820_v42, %v3126_v21  ;;  %8821 = vrsqrt.f32 %v3127_v15  ;;  %vm3239_vm8 = vweird.f32 %v8820_v42  ;;  %13812 = vst [vmem:[#allocation22_spill] sm:$0xff] %v11381_v6  ;;  %vm3248_vm12 = vweird.f32 %v3127_v15 }
 0x99c   :  { %v3231_v7 = vsel %vm3230_vm7, %v8818_v37, %v3227_v26  ;;  %vm11390_vm10 = vmor %vm3238_vm9, %vm3239_vm8 }
 0x99d   :  { %v3301_v58 = vmul.f32 %v3231_v7, %v11215_v45  ;;  %v3234_v13 = vmul.f32 %v8820_v42, %v3233_v36 }
 0x99f   :  { %v3321_v14 = vmul.f32 %v11211_v29, %v3301_v58  ;;  %v3235_v54 = vmul.f32 0.5, %v3234_v13  ;;  %v3090_v33 = vpop.xlane.xlu2 %3089 }
 0x9a0   :  { %v3112_v17 = vmul.f32 %v3090_v33, %v11039_v53 }
 0x9a1   :  { %v8822_v5 = vpop.eup %8821  ;;  %v11384_v46 = vadd.f32 %v11226_v31, %v3321_v14  ;;  %v3236_v19 = vsub.f32 1.5, %v3235_v54 }
 0x9a2   :  { %v3243_v63 = vmul.f32 %v8822_v5, %v3127_v15  ;;  %v3128_v38 = vadd.f32 1e-05, %v3112_v17  ;;  %vm3249_vm11 = vweird.f32 %v8822_v5 }
 0x9a3   :  { %13813 = vst [vmem:[#allocation37_spill] sm:$0xff] %v11384_v46  ;;  %v11388_v45 = vpack.c.bf16 %v11384_v46, %v11381_v6  ;;  %v3237_v2 = vmul.f32 %v8820_v42, %v3236_v19  ;;  %vm3250_vm13 = vmor %vm3248_vm12, %vm3249_vm11 }
 0x9a4   :  { %v3244_v34 = vmul.f32 %v8822_v5, %v3243_v63  ;;  %8823 = vrsqrt.f32 %v3128_v38  ;;  %vm3258_vm15 = vweird.f32 %v3128_v38 }
 0x9a5   :  { %7442 = vmatmul.msk.bf16.gmra.mxu3 %vm146_vm0, %v11388_v45  ;;  %7450 = vmatmul.msk.bf16.gmra.mxu0 %vm146_vm0, %v11388_v45  ;;  %v3241_v48 = vsel %vm11390_vm10, %v8820_v42, %v3237_v2 }
 0x9a6   :  { %v3245_v37 = vmul.f32 0.5, %v3244_v34  ;;  %7458 = vmatmul.msk.bf16.gmra.mxu1 %vm146_vm0, %v11388_v45  ;;  %7466 = vmatmul.msk.bf16.gmra.mxu2 %vm146_vm0, %v11388_v45  ;;  %v3093_v16 = vpop.xlane.xlu0 %3092  ;;  %v3302_v20 = vmul.f32 %v3241_v48, %v11243_v8  ;;  %v8084_v48 = vld [vmem:[%s13503_s7 + $0x14] sm:$0xf] }
 0x9a7   :  { %v3113_v21 = vmul.f32 %v3093_v16, %v11039_v53  ;;  %v7341_v16 = vor.u32 %v8085_v28, %v7338_v52 }
 0x9a8   :  { %v3246_v50 = vsub.f32 1.5, %v3245_v37  ;;  %v3322_v36 = vmul.f32 %v11211_v29, %v3302_v20  ;;  %v7330_v37 = vld [vmem:[%s13503_s7 + $0x50] sm:$0xf0] }
 0x9a9   :  { %v3129_v10 = vadd.f32 1e-05, %v3113_v21  ;;  %v7333_v60 = vor.u32 %v8084_v48, %v7330_v37  ;;  %v7336_v21 = vld [vmem:[%s13503_s7 + $0x18] sm:$0xf]  ;;  %3958 = vmatpush.bf16.msrb.mxu2 %v7341_v16  ;;  %v11519_v48 = vpop.f32.mrf.mxu3  ;;  %v11521_v37 = vpop.f32.mrf.mxu2 }
 0x9aa   :  { %v8824_v18 = vpop.eup %8823  ;;  %v3247_v39 = vmul.f32 %v8822_v5, %v3246_v50  ;;  %v11434_v8 = vadd.f32 %v11226_v31, %v3322_v36  ;;  %v7337_v44 = vor.u32 %v8093_v43, %v7336_v21  ;;  %v8102_v21 = vld [vmem:[%s13503_s7 + $0xa4] sm:$0xf] }
 0x9ab   :  { %v3253_v42 = vmul.f32 %v8824_v18, %v3128_v38  ;;  %8825 = vrsqrt.f32 %v3129_v10  ;;  %vm3259_vm14 = vweird.f32 %v8824_v18  ;;  %vm3268_vm4 = vweird.f32 %v3129_v10  ;;  %3860 = vmatpush.bf16.msrb.mxu0 %v7333_v60 }
 0x9ac   :  { %v3251_v26 = vsel %vm3250_vm13, %v8822_v5, %v3247_v39  ;;  %13816 = vst [vmem:[#allocation35_spill] sm:$0xff] %v11434_v8  ;;  %vm3260_vm1 = vmor %vm3258_vm15, %vm3259_vm14  ;;  %3909 = vmatpush.bf16.msra.mxu1 %v7337_v44  ;;  %v7416_v44 = vld [vmem:[%s13503_s7 + $0xa8] sm:$0xf] }
 0x9ad   :  { %v3303_v7 = vmul.f32 %v3251_v26, %v11271_v51  ;;  %v3254_v35 = vmul.f32 %v8824_v18, %v3253_v42 }
 0x9af   :  { %v3323_v58 = vmul.f32 %v11211_v29, %v3303_v7  ;;  %v3255_v13 = vmul.f32 0.5, %v3254_v35 }
 0x9b1   :  { %v8826_v14 = vpop.eup %8825  ;;  %v11437_v54 = vadd.f32 %v11226_v31, %v3323_v58  ;;  %v3256_v15 = vsub.f32 1.5, %v3255_v13 }
 0x9b2   :  { %v3263_v33 = vmul.f32 %v8826_v14, %v3129_v10  ;;  %vm3269_vm3 = vweird.f32 %v8826_v14 }
 0x9b3   :  { %13817 = vst [vmem:[#allocation30_spill] sm:$0xff] %v11437_v54  ;;  %v11441_v17 = vpack.c.bf16 %v11437_v54, %v11434_v8  ;;  %v3257_v5 = vmul.f32 %v8824_v18, %v3256_v15  ;;  %vm3270_vm5 = vmor %vm3268_vm4, %vm3269_vm3 }
 0x9b4   :  { %v3264_v51 = vmul.f32 %v8826_v14, %v3263_v33 }
 0x9b5   :  { %7443 = vmatmul.msk.bf16.gmra.mxu3 %vm146_vm0, %v11441_v17  ;;  %7451 = vmatmul.msk.bf16.gmra.mxu0 %vm146_vm0, %v11441_v17  ;;  %v3261_v19 = vsel %vm3260_vm1, %v8824_v18, %v3257_v5 }
 0x9b6   :  { %v3265_v63 = vmul.f32 0.5, %v3264_v51  ;;  %7459 = vmatmul.msk.bf16.gmra.mxu1 %vm146_vm0, %v11441_v17  ;;  %7467 = vmatmul.msk.bf16.gmra.mxu2 %vm146_vm0, %v11441_v17  ;;  %v3304_v38 = vmul.f32 %v3261_v19, %v11287_v3  ;;  %v7328_v3 = vld [vmem:[%s13503_s7 + $0x10] sm:$0xf] }
 0x9b8   :  { %v3266_v2 = vsub.f32 1.5, %v3265_v63  ;;  %v3324_v11 = vmul.f32 %v11211_v29, %v3304_v38  ;;  %v8110_v38 = vld [vmem:[%s13503_s7 + $0xdc] sm:$0xf0] }
 0x9ba   :  { %v3267_v57 = vmul.f32 %v8826_v14, %v3266_v2  ;;  %v11456_v22 = vadd.f32 %v11226_v31, %v3324_v11  ;;  %v7408_v2 = vld [vmem:[%s13503_s7 + $0xa0] sm:$0xf] }
 0x9bb   :  { %v7409_v11 = vor.u32 %v8110_v38, %v7408_v2 }
 0x9bc   :  { %v3271_v59 = vsel %vm3270_vm5, %v8826_v14, %v3267_v57  ;;  %13818 = vst [vmem:[#allocation26_spill] sm:$0xff] %v11456_v22  ;;  %v11506_v57 = vpop.f32.mrf.mxu0 }
 0x9bd   :  { %v3305_v34 = vmul.f32 %v3271_v59, %v11307_v27  ;;  %v8092_v27 = vld [vmem:[%s13503_s7 + $0x4c] sm:$0xf0] }
 0x9be   :  { %v7329_v12 = vor.u32 %v8092_v27, %v7328_v3 }
 0x9bf   :  { %v3325_v0 = vmul.f32 %v11211_v29, %v3305_v34  ;;  %v11508_v34 = vpop.f32.mrf.mxu1 }
 0x9c0   :  { %3811 = vmatpush.bf16.msra.mxu3 %v7329_v12 }
 0x9c1   :  { %v11459_v61 = vadd.f32 %v11226_v31, %v3325_v0  ;;  %v7418_v0 = vld [vmem:[%s13503_s7 + $0xe8] sm:$0xf0] }
 0x9c3   :  { %13819 = vst [vmem:[#allocation65_spill] sm:$0xff] %v11459_v61  ;;  %v11463_v30 = vpack.c.bf16 %v11459_v61, %v11456_v22 }
 0x9c4   :  { %4006 = vmatpush.bf16.msrb.mxu3 %v7409_v11 }
 0x9c5   :  { %7444 = vmatmul.msk.bf16.gmra.mxu3 %vm146_vm0, %v11463_v30  ;;  %7452 = vmatmul.msk.bf16.gmra.mxu0 %vm146_vm0, %v11463_v30 }
 0x9c6   :  { %7460 = vmatmul.msk.bf16.gmra.mxu1 %vm146_vm0, %v11463_v30  ;;  %7468 = vmatmul.msk.bf16.gmra.mxu2 %vm146_vm0, %v11463_v30 }
 0x9d7   :  { %v3096_v50 = vpop.xlane.xlu1 %3095 }
 0x9d8   :  { %v3114_v20 = vmul.f32 %v3096_v50, %v11039_v53  ;;  %v11545_v50 = vpop.f32.mrf.mxu0 }
 0x9da   :  { %v3130_v10 = vadd.f32 1e-05, %v3114_v20 }
 0x9dc   :  { %8827 = vrsqrt.f32 %v3130_v10  ;;  %vm3278_vm7 = vweird.f32 %v3130_v10 }
 0x9e2   :  { %v8828_v18 = vpop.eup %8827 }
 0x9e3   :  { %v3273_v39 = vmul.f32 %v8828_v18, %v3130_v10  ;;  %vm3279_vm6 = vweird.f32 %v8828_v18  ;;  %v11547_v10 = vpop.f32.mrf.mxu1 }
 0x9e4   :  { %vm3280_vm8 = vmor %vm3278_vm7, %vm3279_vm6 }
 0x9e5   :  { %v3274_v42 = vmul.f32 %v8828_v18, %v3273_v39  ;;  %v11559_v39 = vpop.f32.mrf.mxu2 }
 0x9e7   :  { %v3275_v35 = vmul.f32 0.5, %v3274_v42  ;;  %v11561_v42 = vpop.f32.mrf.mxu0 }
 0x9e9   :  { %v3276_v58 = vsub.f32 1.5, %v3275_v35 }
 0x9eb   :  { %v3277_v14 = vmul.f32 %v8828_v18, %v3276_v58 }
 0x9ed   :  { %v3281_v5 = vsel %vm3280_vm8, %v8828_v18, %v3277_v14  ;;  %v11557_v18 = vpop.f32.mrf.mxu3 }
 0x9ee   :  { %v3306_v63 = vmul.f32 %v3281_v5, %v11335_v49  ;;  %v8103_v49 = vld [vmem:[%s13503_s7 + $0xac] sm:$0xf] }
 0x9ef   :  { %v7421_v27 = vor.u32 %v8103_v49, %v7418_v0  ;;  %v11577_v35 = vpop.f32.mrf.mxu0  ;;  %v7344_v49 = vld [vmem:[%s13503_s7 + $0x20] sm:$0xf] }
 0x9f0   :  { %v3326_v28 = vmul.f32 %v11211_v29, %v3306_v63  ;;  %v8094_v0 = vld [vmem:[%s13503_s7 + $0x5c] sm:$0xf0] }
 0x9f1   :  { %4153 = vmatpush.bf16.msra.mxu2 %v7421_v27  ;;  %v7345_v27 = vor.u32 %v8094_v0, %v7344_v49 }
 0x9f2   :  { %v11524_v16 = vadd.f32 %v11226_v31, %v3326_v28  ;;  %v7354_v28 = vld [vmem:[%s13503_s7 + $0x68] sm:$0xf0] }
 0x9f3   :  { %4007 = vmatpush.bf16.msrb.mxu3 %v7345_v27 }
 0x9f4   :  { %13820 = vst [vmem:[#allocation56_spill] sm:$0xff] %v11524_v16 }
 0xa01   :  { %v3099_v26 = vpop.xlane.xlu2 %3098 }
 0xa02   :  { %v3115_v36 = vmul.f32 %v3099_v26, %v11039_v53  ;;  %v11563_v26 = vpop.f32.mrf.mxu1 }
 0xa04   :  { %v3131_v7 = vadd.f32 1e-05, %v3115_v36  ;;  %v11565_v36 = vpop.f32.mrf.mxu3 }
 0xa06   :  { %8829 = vrsqrt.f32 %v3131_v7  ;;  %vm3288_vm10 = vweird.f32 %v3131_v7 }
 0xa0a   :  { %v11579_v58 = vpop.f32.mrf.mxu1 }
 0xa0c   :  { %v8830_v13 = vpop.eup %8829 }
 0xa0d   :  { %v3283_v15 = vmul.f32 %v8830_v13, %v3131_v7  ;;  %vm3289_vm9 = vweird.f32 %v8830_v13  ;;  %v11567_v7 = vpop.f32.mrf.mxu2 }
 0xa0e   :  { %vm3290_vm11 = vmor %vm3288_vm10, %vm3289_vm9 }
 0xa0f   :  { %v3284_v33 = vmul.f32 %v8830_v13, %v3283_v15  ;;  %v11585_v15 = vpop.f32.mrf.mxu0 }
 0xa11   :  { %v3285_v51 = vmul.f32 0.5, %v3284_v33 }
 0xa12   :  { %v11587_v33 = vpop.f32.mrf.mxu1 }
 0xa13   :  { %v3286_v19 = vsub.f32 1.5, %v3285_v51 }
 0xa15   :  { %v3287_v59 = vmul.f32 %v8830_v13, %v3286_v19  ;;  %v11583_v14 = vpop.f32.mrf.mxu2 }
 0xa17   :  { %v3291_v3 = vsel %vm3290_vm11, %v8830_v13, %v3287_v59  ;;  %v11581_v13 = vpop.f32.mrf.mxu3  ;;  %v11601_v19 = vpop.f32.mrf.mxu0 }
 0xa18   :  { %v3307_v12 = vmul.f32 %v3291_v3, %v11347_v9  ;;  %v7410_v9 = vld [vmem:[%s13503_s7 + $0xe0] sm:$0xf0]  ;;  %v8087_v3 = vld [vmem:[%s13503_s7 + $0x2c] sm:$0xf] }
 0xa19   :  { %v7413_v43 = vor.u32 %v8102_v21, %v7410_v9  ;;  %v7357_v21 = vor.u32 %v8087_v3, %v7354_v28 }
 0xa1a   :  { %v3327_v52 = vmul.f32 %v11211_v29, %v3307_v12  ;;  %v11603_v63 = vpop.f32.mrf.mxu1  ;;  %v8086_v12 = vld [vmem:[%s13503_s7 + $0x24] sm:$0xf] }
 0xa1b   :  { %4055 = vmatpush.bf16.msra.mxu0 %v7413_v43  ;;  %v7352_v43 = vld [vmem:[%s13503_s7 + $0x28] sm:$0xf]  ;;  %4154 = vmatpush.bf16.msra.mxu2 %v7357_v21 }
 0xa1c   :  { %v11527_v60 = vadd.f32 %v11226_v31, %v3327_v52  ;;  %v8111_v31 = vld [vmem:[%s13503_s7 + $0xe4] sm:$0xf0]  ;;  %v7346_v52 = vld [vmem:[%s13503_s7 + $0x60] sm:$0xf0] }
 0xa1d   :  { %v7417_v20 = vor.u32 %v8111_v31, %v7416_v44  ;;  %v11599_v51 = vpop.f32.mrf.mxu2  ;;  %v7349_v9 = vor.u32 %v8086_v12, %v7346_v52  ;;  %v8095_v44 = vld [vmem:[%s13503_s7 + $0x64] sm:$0xf0] }
 0xa1e   :  { %13821 = vst [vmem:[#allocation42_spill] sm:$0xff] %v11527_v60  ;;  %v11537_v29 = vpack.c.bf16 %v11527_v60, %v11524_v16  ;;  %v7353_v31 = vor.u32 %v8095_v44, %v7352_v43 }
 0xa1f   :  { %4104 = vmatpush.bf16.msrb.mxu1 %v7417_v20  ;;  %v11597_v5 = vpop.f32.mrf.mxu3  ;;  %v11609_v59 = vpop.f32.mrf.mxu0  ;;  %4056 = vmatpush.bf16.msra.mxu0 %v7349_v9 }
 0xa20   :  { %7445 = vmatmul.msk.bf16.gmra.mxu3 %vm146_vm0, %v11537_v29  ;;  %7453 = vmatmul.msk.bf16.gmra.mxu0 %vm146_vm0, %v11537_v29  ;;  %13822 = vst [vmem:[#allocation46_spill] sm:$0xff] %v11609_v59 }
 0xa21   :  { %7461 = vmatmul.msk.bf16.gmra.mxu1 %vm146_vm0, %v11537_v29  ;;  %7469 = vmatmul.msk.bf16.gmra.mxu2 %vm146_vm0, %v11537_v29 }
 0xa22   :  { %v11611_v11 = vpop.f32.mrf.mxu1 }
 0xa23   :  { %13823 = vst [vmem:[#allocation31_spill] sm:$0xff] %v11611_v11  ;;  %4105 = vmatpush.bf16.msrb.mxu1 %v7353_v31 }
 0xa25   :  { %v11607_v38 = vpop.f32.mrf.mxu2 }
 0xa27   :  { %v11605_v2 = vpop.f32.mrf.mxu3  ;;  %v11649_v0 = vpop.f32.mrf.mxu0 }
 0xa2a   :  { %v11651_v3 = vpop.f32.mrf.mxu1 }
 0xa2d   :  { %v11647_v49 = vpop.f32.mrf.mxu2 }
 0xa2e   :  { %13825 = vst [vmem:[#allocation39_spill] sm:$0xff] %v11647_v49 }
 0xa2f   :  { %v11645_v20 = vpop.f32.mrf.mxu3  ;;  %v11665_v27 = vpop.f32.mrf.mxu0 }
 0xa30   :  { %7470 = vmatmul.msk.bf16.vlgmr.msra.gmra.mxu3 %vm146_vm0, %v11247_v25  ;;  %7478 = vmatmul.msk.bf16.vlgmr.msrb.gmra.mxu0 %vm146_vm0, %v11247_v25  ;;  %13824 = vst [vmem:[#allocation50_spill] sm:$0xff] %v11645_v20 }
 0xa31   :  { %7486 = vmatmul.msk.bf16.vlgmr.msra.gmra.mxu1 %vm146_vm0, %v11247_v25  ;;  %7494 = vmatmul.msk.bf16.vlgmr.msrb.gmra.mxu2 %vm146_vm0, %v11247_v25  ;;  %13827 = vst [vmem:[#allocation76_spill] sm:$0xff] %v11665_v27 }
 0xa32   :  { %v11667_v52 = vpop.f32.mrf.mxu1  ;;  %4202 = vmatpush.bf16.msra.mxu3 %v7425_v47 }
 0xa33   :  { %13828 = vst [vmem:[#allocation51_spill] sm:$0xff] %v11667_v52 }
 0xa35   :  { %v11655_v12 = vpop.f32.mrf.mxu2 }
 0xa36   :  { %13826 = vst [vmem:[#allocation41_spill] sm:$0xff] %v11655_v12 }
 0xa37   :  { %v11653_v28 = vpop.f32.mrf.mxu3  ;;  %v11673_v43 = vpop.f32.mrf.mxu0 }
 0xa38   :  { %13831 = vst [vmem:[#allocation78_spill] sm:$0xff] %v11673_v43 }
 0xa3a   :  { %v11675_v44 = vpop.f32.mrf.mxu1 }
 0xa3b   :  { %13832 = vst [vmem:[#allocation58_spill] sm:$0xff] %v11675_v44 }
 0xa3d   :  { %v11671_v9 = vpop.f32.mrf.mxu2 }
 0xa3e   :  { %13830 = vst [vmem:[#allocation48_spill] sm:$0xff] %v11671_v9 }
 0xa3f   :  { %v11669_v21 = vpop.f32.mrf.mxu3  ;;  %v11689_v53 = vpop.f32.mrf.mxu0 }
 0xa40   :  { %7471 = vmatmul.msk.bf16.gmra.mxu3 %vm146_vm0, %v11291_v24  ;;  %7479 = vmatmul.msk.bf16.gmra.mxu0 %vm146_vm0, %v11291_v24  ;;  %13829 = vst [vmem:[#allocation36_spill] sm:$0xff] %v11669_v21 }
 0xa41   :  { %7487 = vmatmul.msk.bf16.gmra.mxu1 %vm146_vm0, %v11291_v24  ;;  %7495 = vmatmul.msk.bf16.gmra.mxu2 %vm146_vm0, %v11291_v24  ;;  %13835 = vst [vmem:[#allocation70_spill] sm:$0xff] %v11689_v53 }
 0xa42   :  { %v11691_v16 = vpop.f32.mrf.mxu1 }
 0xa43   :  { %13836 = vst [vmem:[#allocation53_spill] sm:$0xff] %v11691_v16 }
 0xa45   :  { %v11687_v60 = vpop.f32.mrf.mxu2 }
 0xa46   :  { %13834 = vst [vmem:[#allocation45_spill] sm:$0xff] %v11687_v60 }
 0xa47   :  { %v11685_v31 = vpop.f32.mrf.mxu3  ;;  %v11701_v22 = vpop.f32.mrf.mxu0 }
 0xa48   :  { %13833 = vst [vmem:[#allocation29_spill] sm:$0xff] %v11685_v31 }
 0xa49   :  { %13839 = vst [vmem:[#allocation62_spill] sm:$0xff] %v11701_v22 }
 0xa4a   :  { %v11707_v1 = vpop.f32.mrf.mxu1 }
 0xa4b   :  { %13840 = vst [vmem:[#allocation38_spill] sm:$0xff] %v11707_v1 }
 0xa4d   :  { %v11695_v61 = vpop.f32.mrf.mxu2 }
 0xa4e   :  { %13838 = vst [vmem:[#allocation33_spill] sm:$0xff] %v11695_v61  ;;  %v7434_v61 = vld [vmem:[%s13503_s7 + $0xf8] sm:$0xf0] }
 0xa4f   :  { %v11693_v32 = vpop.f32.mrf.mxu3  ;;  %v11713_v55 = vpop.f32.mrf.mxu0 }
 0xa50   :  { %7472 = vmatmul.msk.bf16.gmra.mxu3 %vm146_vm0, %v11323_v4  ;;  %7480 = vmatmul.msk.bf16.gmra.mxu0 %vm146_vm0, %v11323_v4  ;;  %13837 = vst [vmem:[#allocation27_spill] sm:$0xff] %v11693_v32 }
 0xa51   :  { %7488 = vmatmul.msk.bf16.gmra.mxu1 %vm146_vm0, %v11323_v4  ;;  %7496 = vmatmul.msk.bf16.gmra.mxu2 %vm146_vm0, %v11323_v4  ;;  %13843 = vst [vmem:[#allocation63_spill] sm:$0xff] %v11713_v55  ;;  %v8105_v55 = vld [vmem:[%s13503_s7 + $0xbc] sm:$0xf] }
 0xa52   :  { %v11715_v46 = vpop.f32.mrf.mxu1  ;;  %v7437_v47 = vor.u32 %v8105_v55, %v7434_v61  ;;  %v3388_v55 = vld [vmem:[%s13504_s8] sm:$0xff] }
 0xa53   :  { %13844 = vst [vmem:[#allocation40_spill] sm:$0xff] %v11715_v46  ;;  %v11780_v1 = vperm.slane %v3388_v55, 0  ;;  %v11782_v9 = vperm.slane %v3388_v55, 3  ;;  %v11792_v11 = vperm.slane %v3388_v55, 5 }
 0xa54   :  { %4349 = vmatpush.bf16.msrb.mxu2 %v7437_v47 }
 0xa55   :  { %v11711_v8 = vpop.f32.mrf.mxu2 }
 0xa56   :  { %13842 = vst [vmem:[#allocation55_spill] sm:$0xff] %v11711_v8 }
 0xa57   :  { %v11709_v54 = vpop.f32.mrf.mxu3  ;;  %v11735_v62 = vpop.f32.mrf.mxu0 }
 0xa58   :  { %13841 = vst [vmem:[#allocation71_spill] sm:$0xff] %v11709_v54 }
 0xa59   :  { %13847 = vst [vmem:[#allocation32_spill] sm:$0xff] %v11735_v62 }
 0xa5a   :  { %v11737_v46 = vpop.f32.mrf.mxu1 }
 0xa5b   :  { %13848 = vst [vmem:[#allocation28_spill] sm:$0xff] %v11737_v46  ;;  %v7432_v46 = vld [vmem:[%s13503_s7 + $0xb8] sm:$0xf] }
 0xa5d   :  { %v11733_v56 = vpop.f32.mrf.mxu2 }
 0xa5e   :  { %13846 = vst [vmem:[#allocation34_spill] sm:$0xff] %v11733_v56  ;;  %v8104_v56 = vld [vmem:[%s13503_s7 + $0xb4] sm:$0xf] }
 0xa5f   :  { %v11721_v6 = vpop.f32.mrf.mxu3  ;;  %v7429_v16 = vor.u32 %v8104_v56, %v7426_v40  ;;  %v11772_v56 = vperm.slane %v3388_v55, 1 }
 0xa60   :  { %7473 = vmatmul.msk.bf16.gmra.mxu3 %vm146_vm0, %v11364_v23  ;;  %7481 = vmatmul.msk.bf16.gmra.mxu0 %vm146_vm0, %v11364_v23  ;;  %13845 = vst [vmem:[#allocation61_spill] sm:$0xff] %v11721_v6 }
 0xa61   :  { %7489 = vmatmul.msk.bf16.gmra.mxu1 %vm146_vm0, %v11364_v23  ;;  %7497 = vmatmul.msk.bf16.gmra.mxu2 %vm146_vm0, %v11364_v23 }
 0xa62   :  { %4251 = vmatpush.bf16.msrb.mxu0 %v7429_v16 }
 0xa65   :  { %v11750_v41 = vpop.f32.mrf.mxu2 }
 0xa66   :  { %13850 = vst [vmem:[#allocation47_spill] sm:$0xff] %v11750_v41 }
 0xa67   :  { %v11739_v6 = vpop.f32.mrf.mxu3 }
 0xa68   :  { %13849 = vst [vmem:[#allocation66_spill] sm:$0xff] %v11739_v6  ;;  %v8113_v6 = vld [vmem:[%s13503_s7 + $0xf4] sm:$0xf0] }
 0xa69   :  { %v7433_v32 = vor.u32 %v8113_v6, %v7432_v46  ;;  %v11774_v6 = vperm.slane %v3388_v55, 2 }
 0xa6b   :  { %4300 = vmatpush.bf16.msra.mxu1 %v7433_v32 }
 0xa70   :  { %7474 = vmatmul.msk.bf16.gmra.mxu3 %vm146_vm0, %v11388_v45  ;;  %7482 = vmatmul.msk.bf16.gmra.mxu0 %vm146_vm0, %v11388_v45 }
 0xa71   :  { %7490 = vmatmul.msk.bf16.gmra.mxu1 %vm146_vm0, %v11388_v45  ;;  %7498 = vmatmul.msk.bf16.gmra.mxu2 %vm146_vm0, %v11388_v45 }
 0xa80   :  { %7475 = vmatmul.msk.bf16.gmra.mxu3 %vm146_vm0, %v11441_v17  ;;  %7483 = vmatmul.msk.bf16.gmra.mxu0 %vm146_vm0, %v11441_v17 }
 0xa81   :  { %7491 = vmatmul.msk.bf16.gmra.mxu1 %vm146_vm0, %v11441_v17  ;;  %7499 = vmatmul.msk.bf16.gmra.mxu2 %vm146_vm0, %v11441_v17 }
 0xa90   :  { %7476 = vmatmul.msk.bf16.gmra.mxu3 %vm146_vm0, %v11463_v30  ;;  %7484 = vmatmul.msk.bf16.gmra.mxu0 %vm146_vm0, %v11463_v30 }
 0xa91   :  { %7492 = vmatmul.msk.bf16.gmra.mxu1 %vm146_vm0, %v11463_v30  ;;  %7500 = vmatmul.msk.bf16.gmra.mxu2 %vm146_vm0, %v11463_v30 }
 0xa9d   :  { %v3701_v62 = vpop.f32.mrf.mxu0 }
 0xa9e   :  { %v3750_v53 = vpop.f32.mrf.mxu1  ;;  %v3702_v61 = vadd.f32 %v3701_v62, %v11772_v56 }
 0xa9f   :  { %v3751_v16 = vadd.f32 %v3750_v53, %v11774_v6 }
 0xaa0   :  { %7477 = vmatmul.msk.bf16.gmra.mxu3 %vm146_vm0, %v11537_v29  ;;  %7485 = vmatmul.msk.bf16.gmra.mxu0 %vm146_vm0, %v11537_v29  ;;  %v4617_v54 = vmax.f32 %v3702_v61, 0.0 }
 0xaa1   :  { %7493 = vmatmul.msk.bf16.gmra.mxu1 %vm146_vm0, %v11537_v29  ;;  %7501 = vmatmul.msk.bf16.gmra.mxu2 %vm146_vm0, %v11537_v29  ;;  %v4618_v52 = vmax.f32 %v3751_v16, 0.0 }
 0xaa3   :  { %v3652_v46 = vpop.f32.mrf.mxu3 }
 0xaa4   :  { %v3799_v32 = vpop.f32.mrf.mxu2  ;;  %v3653_v27 = vadd.f32 %v3652_v46, %v11780_v1 }
 0xaa5   :  { %v3703_v47 = vpop.f32.mrf.mxu0  ;;  %v3800_v53 = vadd.f32 %v3799_v32, %v11782_v9  ;;  %v11810_v32 = vperm.slane %v3388_v55, 4 }
 0xaa6   :  { %v3704_v40 = vadd.f32 %v3703_v47, %v11772_v56  ;;  %v3752_v41 = vpop.f32.mrf.mxu1 }
 0xaa7   :  { %v3753_v8 = vadd.f32 %v3752_v41, %v11774_v6  ;;  %v4619_v16 = vmax.f32 %v3800_v53, 0.0 }
 0xaa8   :  { %v4633_v22 = vmax.f32 %v3704_v40, 0.0  ;;  %v4616_v40 = vmax.f32 %v3653_v27, 0.0 }
 0xaa9   :  { %v4634_v21 = vmax.f32 %v3753_v8, 0.0 }
 0xaaa   :  { %v11785_v62 = vpack.c.bf16 %v4633_v22, %v4617_v54  ;;  %v11800_v22 = vperm.slane %v3388_v55, 6 }
 0xaab   :  { %v3654_v60 = vpop.f32.mrf.mxu3  ;;  %v11788_v44 = vpack.c.bf16 %v4634_v21, %v4618_v52 }
 0xaac   :  { %13851 = vst [vmem:[#allocation49_spill] sm:$0xff] %v11785_v62  ;;  %v3655_v47 = vadd.f32 %v3654_v60, %v11780_v1  ;;  %v3801_v41 = vpop.f32.mrf.mxu2 }
 0xaad   :  { %13852 = vst [vmem:[#allocation60_spill] sm:$0xff] %v11788_v44  ;;  %v3802_v31 = vadd.f32 %v3801_v41, %v11782_v9  ;;  %v3862_v61 = vpop.f32.mrf.mxu0 }
 0xaae   :  { %v4632_v43 = vmax.f32 %v3655_v47, 0.0  ;;  %v3911_v49 = vpop.f32.mrf.mxu1  ;;  %v3863_v52 = vadd.f32 %v3862_v61, %v11792_v11  ;;  %v11813_v47 = vperm.slane %v3388_v55, 7 }
 0xaaf   :  { %v4635_v8 = vmax.f32 %v3802_v31, 0.0  ;;  %v3912_v31 = vadd.f32 %v3911_v49, %v11800_v22 }
 0xab0   :  { %7502 = vmatmul.msk.bf16.vlgmr.msrb.gmra.mxu3 %vm146_vm0, %v11247_v25  ;;  %7510 = vmatmul.msk.bf16.vlgmr.msra.gmra.mxu0 %vm146_vm0, %v11247_v25  ;;  %v11798_v54 = vpack.c.bf16 %v4632_v43, %v4616_v40  ;;  %v4397_v40 = vmax.f32 %v3863_v52, 0.0 }
 0xab1   :  { %7518 = vmatmul.msk.bf16.vlgmr.msrb.gmra.mxu1 %vm146_vm0, %v11247_v25  ;;  %7526 = vmatmul.msk.bf16.vlgmr.msra.gmra.mxu2 %vm146_vm0, %v11247_v25  ;;  %v11806_v60 = vpack.c.bf16 %v4635_v8, %v4619_v16  ;;  %v4398_v16 = vmax.f32 %v3912_v31, 0.0 }
 0xab2   :  { %13853 = vst [vmem:[#allocation86_spill] sm:$0xff] %v11798_v54 }
 0xab3   :  { %13854 = vst [vmem:[#allocation72_spill] sm:$0xff] %v11806_v60  ;;  %v3813_v27 = vpop.f32.mrf.mxu3 }
 0xab4   :  { %v3960_v21 = vpop.f32.mrf.mxu2  ;;  %v3814_v60 = vadd.f32 %v3813_v27, %v11810_v32 }
 0xab5   :  { %v3864_v46 = vpop.f32.mrf.mxu0  ;;  %v3961_v49 = vadd.f32 %v3960_v21, %v11813_v47 }
 0xab6   :  { %v3865_v43 = vadd.f32 %v3864_v46, %v11792_v11  ;;  %v3913_v53 = vpop.f32.mrf.mxu1 }
 0xab7   :  { %v3914_v41 = vadd.f32 %v3913_v53, %v11800_v22  ;;  %v4396_v53 = vmax.f32 %v3814_v60, 0.0  ;;  %v4399_v31 = vmax.f32 %v3961_v49, 0.0 }
 0xab8   :  { %v4413_v44 = vmax.f32 %v3865_v43, 0.0 }
 0xab9   :  { %v4414_v8 = vmax.f32 %v3914_v41, 0.0 }
 0xaba   :  { %v11817_v61 = vpack.c.bf16 %v4413_v44, %v4397_v40 }
 0xabb   :  { %v11820_v62 = vpack.c.bf16 %v4414_v8, %v4398_v16  ;;  %v3815_v54 = vpop.f32.mrf.mxu3 }
 0xabc   :  { %13855 = vst [vmem:[#allocation68_spill] sm:$0xff] %v11817_v61  ;;  %v3816_v46 = vadd.f32 %v3815_v54, %v11810_v32  ;;  %v3962_v20 = vpop.f32.mrf.mxu2 }
 0xabd   :  { %13856 = vst [vmem:[#allocation83_spill] sm:$0xff] %v11820_v62  ;;  %v3963_v55 = vadd.f32 %v3962_v20, %v11813_v47  ;;  %v3867_v59 = vpop.f32.mrf.mxu0 }
 0xabe   :  { %v4412_v52 = vmax.f32 %v3816_v46, 0.0  ;;  %v3916_v43 = vpop.f32.mrf.mxu1  ;;  %v3868_v54 = vadd.f32 %v3867_v59, %v11792_v11 }
 0xabf   :  { %v4415_v41 = vmax.f32 %v3963_v55, 0.0  ;;  %v3917_v27 = vadd.f32 %v3916_v43, %v11800_v22 }
 0xac0   :  { %v11824_v12 = vpack.c.bf16 %v4412_v52, %v4396_v53  ;;  %7503 = vmatmul.msk.bf16.gmra.mxu3 %vm146_vm0, %v11291_v24  ;;  %7511 = vmatmul.msk.bf16.gmra.mxu0 %vm146_vm0, %v11291_v24  ;;  %v4429_v49 = vmax.f32 %v3868_v54, 0.0 }
 0xac1   :  { %v11830_v44 = vpack.c.bf16 %v4415_v41, %v4399_v31  ;;  %7519 = vmatmul.msk.bf16.gmra.mxu1 %vm146_vm0, %v11291_v24  ;;  %7527 = vmatmul.msk.bf16.gmra.mxu2 %vm146_vm0, %v11291_v24  ;;  %v4430_v55 = vmax.f32 %v3917_v27, 0.0 }
 0xac2   :  { %13857 = vst [vmem:[#allocation84_spill] sm:$0xff] %v11824_v12 }
 0xac3   :  { %13858 = vst [vmem:[#allocation67_spill] sm:$0xff] %v11830_v44  ;;  %v3818_v20 = vpop.f32.mrf.mxu3 }
 0xac4   :  { %v3965_v60 = vpop.f32.mrf.mxu2  ;;  %v3819_v52 = vadd.f32 %v3818_v20, %v11810_v32 }
 0xac5   :  { %v3869_v21 = vpop.f32.mrf.mxu0  ;;  %v3966_v41 = vadd.f32 %v3965_v60, %v11813_v47  ;;  %v8096_v60 = vld [vmem:[%s13503_s7 + $0x6c] sm:$0xf0] }
 0xac6   :  { %v3870_v40 = vadd.f32 %v3869_v21, %v11792_v11  ;;  %v3918_v16 = vpop.f32.mrf.mxu1 }
 0xac7   :  { %v3919_v8 = vadd.f32 %v3918_v16, %v11800_v22  ;;  %v4428_v16 = vmax.f32 %v3819_v52, 0.0  ;;  %v4431_v27 = vmax.f32 %v3966_v41, 0.0 }
 0xac8   :  { %v4445_v46 = vmax.f32 %v3870_v40, 0.0 }
 0xac9   :  { %v4446_v53 = vmax.f32 %v3919_v8, 0.0 }
 0xaca   :  { %v11841_v31 = vpack.c.bf16 %v4445_v46, %v4429_v49 }
 0xacb   :  { %v3820_v59 = vpop.f32.mrf.mxu3  ;;  %v11844_v44 = vpack.c.bf16 %v4446_v53, %v4430_v55 }
 0xacc   :  { %13859 = vst [vmem:[#allocation59_spill] sm:$0xff] %v11841_v31  ;;  %v3821_v43 = vadd.f32 %v3820_v59, %v11810_v32  ;;  %v3967_v62 = vpop.f32.mrf.mxu2 }
 0xacd   :  { %13860 = vst [vmem:[#allocation85_spill] sm:$0xff] %v11844_v44  ;;  %v3968_v21 = vadd.f32 %v3967_v62, %v11813_v47  ;;  %v3872_v61 = vpop.f32.mrf.mxu0  ;;  %v7360_v62 = vld [vmem:[%s13503_s7 + $0x30] sm:$0xf] }
 0xace   :  { %v4444_v54 = vmax.f32 %v3821_v43, 0.0  ;;  %v3921_v40 = vpop.f32.mrf.mxu1  ;;  %v7361_v46 = vor.u32 %v8096_v60, %v7360_v62  ;;  %v3873_v53 = vadd.f32 %v3872_v61, %v11792_v11  ;;  %v7370_v61 = vld [vmem:[%s13503_s7 + $0x78] sm:$0xf0]  ;;  %v8088_v62 = vld [vmem:[%s13503_s7 + $0x34] sm:$0xf] }
 0xacf   :  { %v4447_v8 = vmax.f32 %v3968_v21, 0.0  ;;  %v3922_v41 = vadd.f32 %v3921_v40, %v11800_v22  ;;  %v7362_v60 = vld [vmem:[%s13503_s7 + $0x70] sm:$0xf0] }
 0xad0   :  { %7504 = vmatmul.msk.bf16.gmra.mxu3 %vm146_vm0, %v11323_v4  ;;  %7512 = vmatmul.msk.bf16.gmra.mxu0 %vm146_vm0, %v11323_v4  ;;  %v11852_v20 = vpack.c.bf16 %v4444_v54, %v4428_v16  ;;  %v4461_v54 = vmax.f32 %v3873_v53, 0.0 }
 0xad1   :  { %7520 = vmatmul.msk.bf16.gmra.mxu1 %vm146_vm0, %v11323_v4  ;;  %7528 = vmatmul.msk.bf16.gmra.mxu2 %vm146_vm0, %v11323_v4  ;;  %v11864_v49 = vpack.c.bf16 %v4447_v8, %v4431_v27  ;;  %v4462_v31 = vmax.f32 %v3922_v41, 0.0  ;;  %v8089_v27 = vld [vmem:[%s13503_s7 + $0x3c] sm:$0xf] }
 0xad2   :  { %13861 = vst [vmem:[#allocation54_spill] sm:$0xff] %v11852_v20  ;;  %4203 = vmatpush.bf16.msra.mxu3 %v7361_v46  ;;  %v7373_v8 = vor.u32 %v8089_v27, %v7370_v61  ;;  %v7368_v46 = vld [vmem:[%s13503_s7 + $0x38] sm:$0xf] }
 0xad3   :  { %13862 = vst [vmem:[#allocation80_spill] sm:$0xff] %v11864_v49  ;;  %v3823_v55 = vpop.f32.mrf.mxu3 }
 0xad4   :  { %v3970_v52 = vpop.f32.mrf.mxu2  ;;  %v3824_v40 = vadd.f32 %v3823_v55, %v11810_v32  ;;  %v8097_v55 = vld [vmem:[%s13503_s7 + $0x74] sm:$0xf0]  ;;  %4350 = vmatpush.bf16.msrb.mxu2 %v7373_v8 }
 0xad5   :  { %v3874_v59 = vpop.f32.mrf.mxu0  ;;  %v3971_v41 = vadd.f32 %v3970_v52, %v11813_v47  ;;  %v7369_v61 = vor.u32 %v8097_v55, %v7368_v46 }
 0xad6   :  { %v3875_v43 = vadd.f32 %v3874_v59, %v11792_v11  ;;  %v3923_v21 = vpop.f32.mrf.mxu1 }
 0xad7   :  { %v3924_v16 = vadd.f32 %v3923_v21, %v11800_v22  ;;  %4301 = vmatpush.bf16.msra.mxu1 %v7369_v61 }
 0xad8   :  { %v4477_v44 = vmax.f32 %v3875_v43, 0.0  ;;  %v7365_v43 = vor.u32 %v8088_v62, %v7362_v60  ;;  %v4463_v62 = vmax.f32 %v3971_v41, 0.0 }
 0xad9   :  { %v4478_v20 = vmax.f32 %v3924_v16, 0.0 }
 0xada   :  { %v11886_v53 = vpack.c.bf16 %v4477_v44, %v4461_v54  ;;  %4252 = vmatpush.bf16.msrb.mxu0 %v7365_v43  ;;  %v4460_v44 = vmax.f32 %v3824_v40, 0.0 }
 0xadb   :  { %v3825_v59 = vpop.f32.mrf.mxu3  ;;  %v11892_v21 = vpack.c.bf16 %v4478_v20, %v4462_v31 }
 0xadc   :  { %13863 = vst [vmem:[#allocation75_spill] sm:$0xff] %v11886_v53  ;;  %v3826_v16 = vadd.f32 %v3825_v59, %v11810_v32  ;;  %v3972_v27 = vpop.f32.mrf.mxu2 }
 0xadd   :  { %13864 = vst [vmem:[#allocation81_spill] sm:$0xff] %v11892_v21  ;;  %v3973_v49 = vadd.f32 %v3972_v27, %v11813_v47  ;;  %v3877_v12 = vpop.f32.mrf.mxu0 }
 0xade   :  { %v4476_v54 = vmax.f32 %v3826_v16, 0.0  ;;  %v3926_v52 = vpop.f32.mrf.mxu1  ;;  %v3878_v8 = vadd.f32 %v3877_v12, %v11792_v11 }
 0xadf   :  { %v4479_v60 = vmax.f32 %v3973_v49, 0.0  ;;  %v3927_v46 = vadd.f32 %v3926_v52, %v11800_v22 }
 0xae0   :  { %7505 = vmatmul.msk.bf16.gmra.mxu3 %vm146_vm0, %v11364_v23  ;;  %7513 = vmatmul.msk.bf16.gmra.mxu0 %vm146_vm0, %v11364_v23  ;;  %v11900_v31 = vpack.c.bf16 %v4476_v54, %v4460_v44  ;;  %v4493_v16 = vmax.f32 %v3878_v8, 0.0 }
 0xae1   :  { %7521 = vmatmul.msk.bf16.gmra.mxu1 %vm146_vm0, %v11364_v23  ;;  %7529 = vmatmul.msk.bf16.gmra.mxu2 %vm146_vm0, %v11364_v23  ;;  %v11906_v20 = vpack.c.bf16 %v4479_v60, %v4463_v62  ;;  %v4494_v61 = vmax.f32 %v3927_v46, 0.0 }
 0xae2   :  { %13865 = vst [vmem:[#allocation64_spill] sm:$0xff] %v11900_v31 }
 0xae3   :  { %13866 = vst [vmem:[#allocation74_spill] sm:$0xff] %v11906_v20  ;;  %v3828_v40 = vpop.f32.mrf.mxu3 }
 0xae4   :  { %v3975_v49 = vpop.f32.mrf.mxu2  ;;  %v3829_v54 = vadd.f32 %v3828_v40, %v11810_v32 }
 0xae5   :  { %v3879_v41 = vpop.f32.mrf.mxu0  ;;  %v3976_v60 = vadd.f32 %v3975_v49, %v11813_v47 }
 0xae6   :  { %v3880_v59 = vadd.f32 %v3879_v41, %v11792_v11  ;;  %v3928_v43 = vpop.f32.mrf.mxu1 }
 0xae7   :  { %v3929_v55 = vadd.f32 %v3928_v43, %v11800_v22  ;;  %v4492_v43 = vmax.f32 %v3829_v54, 0.0  ;;  %v4495_v46 = vmax.f32 %v3976_v60, 0.0 }
 0xae8   :  { %v4509_v27 = vmax.f32 %v3880_v59, 0.0 }
 0xae9   :  { %v4510_v44 = vmax.f32 %v3929_v55, 0.0 }
 0xaea   :  { %v11913_v62 = vpack.c.bf16 %v4509_v27, %v4493_v16 }
 0xaeb   :  { %v3830_v12 = vpop.f32.mrf.mxu3  ;;  %v11916_v20 = vpack.c.bf16 %v4510_v44, %v4494_v61 }
 0xaec   :  { %13867 = vst [vmem:[#allocation57_spill] sm:$0xff] %v11913_v62  ;;  %v3831_v52 = vadd.f32 %v3830_v12, %v11810_v32  ;;  %v3977_v21 = vpop.f32.mrf.mxu2 }
 0xaed   :  { %13868 = vst [vmem:[#allocation79_spill] sm:$0xff] %v11916_v20  ;;  %v3978_v41 = vadd.f32 %v3977_v21, %v11813_v47  ;;  %v3882_v53 = vpop.f32.mrf.mxu0 }
 0xaee   :  { %v4508_v8 = vmax.f32 %v3831_v52, 0.0  ;;  %v3931_v59 = vpop.f32.mrf.mxu1  ;;  %v3883_v16 = vadd.f32 %v3882_v53, %v11792_v11 }
 0xaef   :  { %v4511_v55 = vmax.f32 %v3978_v41, 0.0  ;;  %v3932_v61 = vadd.f32 %v3931_v59, %v11800_v22 }
 0xaf0   :  { %7506 = vmatmul.msk.bf16.gmra.mxu3 %vm146_vm0, %v11388_v45  ;;  %7514 = vmatmul.msk.bf16.gmra.mxu0 %vm146_vm0, %v11388_v45  ;;  %v11924_v40 = vpack.c.bf16 %v4508_v8, %v4492_v43  ;;  %v4525_v52 = vmax.f32 %v3883_v16, 0.0 }
 0xaf1   :  { %7522 = vmatmul.msk.bf16.gmra.mxu1 %vm146_vm0, %v11388_v45  ;;  %7530 = vmatmul.msk.bf16.gmra.mxu2 %vm146_vm0, %v11388_v45  ;;  %v11930_v21 = vpack.c.bf16 %v4511_v55, %v4495_v46  ;;  %v4526_v43 = vmax.f32 %v3932_v61, 0.0 }
 0xaf2   :  { %13869 = vst [vmem:[#allocation87_spill] sm:$0xff] %v11924_v40 }
 0xaf3   :  { %13870 = vst [vmem:[#allocation88_spill] sm:$0xff] %v11930_v21  ;;  %v3833_v49 = vpop.f32.mrf.mxu3 }
 0xaf4   :  { %v3980_v27 = vpop.f32.mrf.mxu2  ;;  %v3834_v20 = vadd.f32 %v3833_v49, %v11810_v32 }
 0xaf5   :  { %v3884_v44 = vpop.f32.mrf.mxu0  ;;  %v3981_v55 = vadd.f32 %v3980_v27, %v11813_v47 }
 0xaf6   :  { %v3885_v54 = vadd.f32 %v3884_v44, %v11792_v11  ;;  %v3933_v60 = vpop.f32.mrf.mxu1 }
 0xaf7   :  { %v3934_v12 = vadd.f32 %v3933_v60, %v11800_v22  ;;  %v4524_v60 = vmax.f32 %v3834_v20, 0.0  ;;  %v4527_v61 = vmax.f32 %v3981_v55, 0.0 }
 0xaf8   :  { %v4541_v41 = vmax.f32 %v3885_v54, 0.0 }
 0xaf9   :  { %v4542_v8 = vmax.f32 %v3934_v12, 0.0 }
 0xafa   :  { %v11937_v46 = vpack.c.bf16 %v4541_v41, %v4525_v52 }
 0xafb   :  { %v3835_v53 = vpop.f32.mrf.mxu3  ;;  %v11940_v21 = vpack.c.bf16 %v4542_v8, %v4526_v43 }
 0xafc   :  { %13871 = vst [vmem:[#allocation89_spill] sm:$0xff] %v11937_v46  ;;  %v3836_v59 = vadd.f32 %v3835_v53, %v11810_v32  ;;  %v3982_v62 = vpop.f32.mrf.mxu2 }
 0xafd   :  { %13872 = vst [vmem:[#allocation69_spill] sm:$0xff] %v11940_v21  ;;  %v3983_v44 = vadd.f32 %v3982_v62, %v11813_v47  ;;  %v3887_v40 = vpop.f32.mrf.mxu0 }
 0xafe   :  { %v4540_v16 = vmax.f32 %v3836_v59, 0.0  ;;  %v3936_v54 = vpop.f32.mrf.mxu1  ;;  %v3888_v27 = vadd.f32 %v3887_v40, %v11792_v11 }
 0xaff   :  { %v4543_v12 = vmax.f32 %v3983_v44, 0.0  ;;  %v3937_v41 = vadd.f32 %v3936_v54, %v11800_v22 }
 0xb00   :  { %7507 = vmatmul.msk.bf16.gmra.mxu3 %vm146_vm0, %v11441_v17  ;;  %7515 = vmatmul.msk.bf16.gmra.mxu0 %vm146_vm0, %v11441_v17  ;;  %v11948_v49 = vpack.c.bf16 %v4540_v16, %v4524_v60  ;;  %v4557_v59 = vmax.f32 %v3888_v27, 0.0 }
 0xb01   :  { %7523 = vmatmul.msk.bf16.gmra.mxu1 %vm146_vm0, %v11441_v17  ;;  %7531 = vmatmul.msk.bf16.gmra.mxu2 %vm146_vm0, %v11441_v17  ;;  %v11954_v62 = vpack.c.bf16 %v4543_v12, %v4527_v61  ;;  %v4558_v60 = vmax.f32 %v3937_v41, 0.0 }
 0xb02   :  { %13873 = vst [vmem:[#allocation77_spill] sm:$0xff] %v11948_v49 }
 0xb03   :  { %13874 = vst [vmem:[#allocation5_spill] sm:$0xff] %v11954_v62  ;;  %v3838_v20 = vpop.f32.mrf.mxu3 }
 0xb04   :  { %v3985_v52 = vpop.f32.mrf.mxu2  ;;  %v3839_v21 = vadd.f32 %v3838_v20, %v11810_v32 }
 0xb05   :  { %v3889_v43 = vpop.f32.mrf.mxu0  ;;  %v3986_v12 = vadd.f32 %v3985_v52, %v11813_v47 }
 0xb06   :  { %v3890_v8 = vadd.f32 %v3889_v43, %v11792_v11  ;;  %v3938_v55 = vpop.f32.mrf.mxu1 }
 0xb07   :  { %v3939_v53 = vadd.f32 %v3938_v55, %v11800_v22  ;;  %v4556_v55 = vmax.f32 %v3839_v21, 0.0  ;;  %v4559_v41 = vmax.f32 %v3986_v12, 0.0  ;;  %v8121_v21 = vld [vmem:[%s13505_s9 + $0x38] sm:$0xff] }
 0xb08   :  { %v4573_v44 = vmax.f32 %v3890_v8, 0.0  ;;  %5804 = vmatpush.bf16.msrb.mxu3 %v8121_v21 }
 0xb09   :  { %v4574_v16 = vmax.f32 %v3939_v53, 0.0 }
 0xb0a   :  { %v11961_v61 = vpack.c.bf16 %v4573_v44, %v4557_v59 }
 0xb0b   :  { %v3840_v40 = vpop.f32.mrf.mxu3  ;;  %v11964_v62 = vpack.c.bf16 %v4574_v16, %v4558_v60 }
 0xb0c   :  { %13875 = vst [vmem:[#allocation6_spill] sm:$0xff] %v11961_v61  ;;  %v3841_v54 = vadd.f32 %v3840_v40, %v11810_v32  ;;  %v3987_v46 = vpop.f32.mrf.mxu2 }
 0xb0d   :  { %13876 = vst [vmem:[#allocation7_spill] sm:$0xff] %v11964_v62  ;;  %v3988_v43 = vadd.f32 %v3987_v46, %v11813_v47  ;;  %v3892_v49 = vpop.f32.mrf.mxu0 }
 0xb0e   :  { %v4572_v27 = vmax.f32 %v3841_v54, 0.0  ;;  %v3941_v8 = vpop.f32.mrf.mxu1  ;;  %v3893_v59 = vadd.f32 %v3892_v49, %v11792_v11 }
 0xb0f   :  { %v4575_v53 = vmax.f32 %v3988_v43, 0.0  ;;  %v3942_v60 = vadd.f32 %v3941_v8, %v11800_v22  ;;  %v8145_v8 = vld [vmem:[%s13505_s9 + $0xf8] sm:$0xff] }
 0xb10   :  { %7508 = vmatmul.msk.bf16.gmra.mxu3 %vm146_vm0, %v11463_v30  ;;  %7516 = vmatmul.msk.bf16.gmra.mxu0 %vm146_vm0, %v11463_v30  ;;  %v11972_v20 = vpack.c.bf16 %v4572_v27, %v4556_v55  ;;  %v4589_v43 = vmax.f32 %v3893_v59, 0.0  ;;  %v8137_v59 = vld [vmem:[%s13505_s9 + $0xb8] sm:$0xff] }
 0xb11   :  { %7524 = vmatmul.msk.bf16.gmra.mxu1 %vm146_vm0, %v11463_v30  ;;  %7532 = vmatmul.msk.bf16.gmra.mxu2 %vm146_vm0, %v11463_v30  ;;  %v11981_v46 = vpack.c.bf16 %v4575_v53, %v4559_v41  ;;  %v4590_v27 = vmax.f32 %v3942_v60, 0.0 }
 0xb12   :  { %13877 = vst [vmem:[#allocation8_spill] sm:$0xff] %v11972_v20  ;;  %5951 = vmatpush.bf16.msra.mxu2 %v8145_v8  ;;  %5902 = vmatpush.bf16.msrb.mxu1 %v8137_v59 }
 0xb13   :  { %13878 = vst [vmem:[#allocation9_spill] sm:$0xff] %v11981_v46  ;;  %v3843_v52 = vpop.f32.mrf.mxu3 }
 0xb14   :  { %v3990_v44 = vpop.f32.mrf.mxu2  ;;  %v3844_v41 = vadd.f32 %v3843_v52, %v11810_v32 }
 0xb15   :  { %v3894_v16 = vpop.f32.mrf.mxu0  ;;  %v3991_v21 = vadd.f32 %v3990_v44, %v11813_v47 }
 0xb16   :  { %v3895_v12 = vadd.f32 %v3894_v16, %v11792_v11  ;;  %v3943_v40 = vpop.f32.mrf.mxu1  ;;  %v8129_v16 = vld [vmem:[%s13505_s9 + $0x78] sm:$0xff] }
 0xb17   :  { %v3944_v54 = vadd.f32 %v3943_v40, %v11800_v22  ;;  %5853 = vmatpush.bf16.msra.mxu0 %v8129_v16 }
 0xb18   :  { %v4605_v55 = vmax.f32 %v3895_v12, 0.0 }
 0xb19   :  { %v4606_v62 = vmax.f32 %v3944_v54, 0.0  ;;  %v4588_v54 = vmax.f32 %v3844_v41, 0.0 }
 0xb1a   :  { %v11988_v53 = vpack.c.bf16 %v4605_v55, %v4589_v43 }
 0xb1b   :  { %v3845_v49 = vpop.f32.mrf.mxu3  ;;  %v12000_v60 = vpack.c.bf16 %v4606_v62, %v4590_v27  ;;  %v8120_v27 = vld [vmem:[%s13505_s9 + $0x30] sm:$0xff] }
 0xb1c   :  { %13879 = vst [vmem:[#allocation10_spill] sm:$0xff] %v11988_v53  ;;  %v3846_v52 = vadd.f32 %v3845_v49, %v11810_v32  ;;  %v3992_v12 = vpop.f32.mrf.mxu2  ;;  %v4591_v53 = vmax.f32 %v3991_v21, 0.0  ;;  %5805 = vmatpush.bf16.msrb.mxu3 %v8120_v27 }
 0xb1d   :  { %13880 = vst [vmem:[#allocation12_spill] sm:$0xff] %v12000_v60  ;;  %v3993_v44 = vadd.f32 %v3992_v12, %v11813_v47  ;;  %v3897_v40 = vpop.f32.mrf.mxu0 }
 0xb1e   :  { %v4604_v43 = vmax.f32 %v3846_v52, 0.0  ;;  %v3946_v55 = vpop.f32.mrf.mxu1  ;;  %v3898_v49 = vadd.f32 %v3897_v40, %v11792_v11  ;;  %v8136_v40 = vld [vmem:[%s13505_s9 + $0xb0] sm:$0xff] }
 0xb1f   :  { %v4607_v46 = vmax.f32 %v3993_v44, 0.0  ;;  %v3947_v16 = vadd.f32 %v3946_v55, %v11800_v22  ;;  %5903 = vmatpush.bf16.msrb.mxu1 %v8136_v40 }
 0xb20   :  { %7509 = vmatmul.msk.bf16.gmra.mxu3 %vm146_vm0, %v11537_v29  ;;  %7517 = vmatmul.msk.bf16.gmra.mxu0 %vm146_vm0, %v11537_v29  ;;  %v12008_v62 = vpack.c.bf16 %v4604_v43, %v4588_v54  ;;  %v4621_v54 = vmax.f32 %v3898_v49, 0.0 }
 0xb21   :  { %7525 = vmatmul.msk.bf16.gmra.mxu1 %vm146_vm0, %v11537_v29  ;;  %7533 = vmatmul.msk.bf16.gmra.mxu2 %vm146_vm0, %v11537_v29  ;;  %v12017_v41 = vpack.c.bf16 %v4607_v46, %v4591_v53  ;;  %v4622_v60 = vmax.f32 %v3947_v16, 0.0  ;;  %v8144_v46 = vld [vmem:[%s13505_s9 + $0xf0] sm:$0xff] }
 0xb22   :  { %13881 = vst [vmem:[#allocation13_spill] sm:$0xff] %v12008_v62  ;;  %v8128_v53 = vld [vmem:[%s13505_s9 + $0x70] sm:$0xff]  ;;  %5952 = vmatpush.bf16.msra.mxu2 %v8144_v46 }
 0xb23   :  { %13882 = vst [vmem:[#allocation11_spill] sm:$0xff] %v12017_v41  ;;  %v3848_v21 = vpop.f32.mrf.mxu3  ;;  %5854 = vmatpush.bf16.msra.mxu0 %v8128_v53 }
 0xb24   :  { %v3995_v8 = vpop.f32.mrf.mxu2 }
 0xb25   :  { %v3899_v59 = vpop.f32.mrf.mxu0 }
 0xb26   :  { %v3900_v52 = vadd.f32 %v3899_v59, %v11792_v11  ;;  %v3948_v12 = vpop.f32.mrf.mxu1  ;;  %v3849_v11 = vadd.f32 %v3848_v21, %v11810_v32 }
 0xb27   :  { %v3949_v44 = vadd.f32 %v3948_v12, %v11800_v22  ;;  %v3996_v22 = vadd.f32 %v3995_v8, %v11813_v47  ;;  %v12043_v12 = vld [vmem:[%s13504_s8 + $0x8] sm:$0xff] }
 0xb28   :  { %v4637_v43 = vmax.f32 %v3900_v52, 0.0 }
 0xb29   :  { %v4638_v62 = vmax.f32 %v3949_v44, 0.0  ;;  %v4620_v44 = vmax.f32 %v3849_v11, 0.0 }
 0xb2a   :  { %v12033_v55 = vpack.c.bf16 %v4637_v43, %v4621_v54  ;;  %v4623_v43 = vmax.f32 %v3996_v22, 0.0 }
 0xb2b   :  { %v3850_v27 = vpop.f32.mrf.mxu3  ;;  %v12036_v49 = vpack.c.bf16 %v4638_v62, %v4622_v60  ;;  %v12046_v60 = vperm.slane %v12043_v12, 1  ;;  %v8119_v62 = vld [vmem:[%s13505_s9 + $0x28] sm:$0xff] }
 0xb2c   :  { %13883 = vst [vmem:[#allocation14_spill] sm:$0xff] %v12033_v55  ;;  %v3851_v16 = vadd.f32 %v3850_v27, %v11810_v32  ;;  %v3997_v59 = vpop.f32.mrf.mxu2  ;;  %5806 = vmatpush.bf16.msrb.mxu3 %v8119_v62 }
 0xb2d   :  { %13884 = vst [vmem:[#allocation15_spill] sm:$0xff] %v12036_v49  ;;  %v3998_v52 = vadd.f32 %v3997_v59, %v11813_v47  ;;  %v4058_v21 = vpop.f32.mrf.mxu0  ;;  %v12055_v47 = vperm.slane %v12043_v12, 2  ;;  %v12069_v59 = vperm.slane %v12043_v12, 0 }
 0xb2e   :  { %v4636_v54 = vmax.f32 %v3851_v16, 0.0  ;;  %v4107_v8 = vpop.f32.mrf.mxu1  ;;  %v4059_v11 = vadd.f32 %v4058_v21, %v12046_v60  ;;  %v8143_v21 = vld [vmem:[%s13505_s9 + $0xe8] sm:$0xff] }
 0xb2f   :  { %v4639_v46 = vmax.f32 %v3998_v52, 0.0  ;;  %v4108_v27 = vadd.f32 %v4107_v8, %v12055_v47  ;;  %v8127_v8 = vld [vmem:[%s13505_s9 + $0x68] sm:$0xff]  ;;  %5953 = vmatpush.bf16.msra.mxu2 %v8143_v21 }
 0xb30   :  { %7534 = vmatmul.msk.bf16.vlgmr.msra.gmra.mxu3 %vm146_vm0, %v11247_v25  ;;  %7542 = vmatmul.msk.bf16.vlgmr.msrb.gmra.mxu0 %vm146_vm0, %v11247_v25  ;;  %v12052_v32 = vpack.c.bf16 %v4636_v54, %v4620_v44  ;;  %v12073_v44 = vperm.slane %v12043_v12, 3 }
 0xb31   :  { %7550 = vmatmul.msk.bf16.vlgmr.msra.gmra.mxu1 %vm146_vm0, %v11247_v25  ;;  %7558 = vmatmul.msk.bf16.vlgmr.msrb.gmra.mxu2 %vm146_vm0, %v11247_v25  ;;  %v12064_v53 = vpack.c.bf16 %v4639_v46, %v4623_v43  ;;  %v4401_v43 = vmax.f32 %v4059_v11, 0.0  ;;  %v4402_v62 = vmax.f32 %v4108_v27, 0.0 }
 0xb32   :  { %13885 = vst [vmem:[#allocation16_spill] sm:$0xff] %v12052_v32  ;;  %5855 = vmatpush.bf16.msra.mxu0 %v8127_v8 }
 0xb33   :  { %13886 = vst [vmem:[#allocation17_spill] sm:$0xff] %v12064_v53  ;;  %v4009_v40 = vpop.f32.mrf.mxu3 }
 0xb34   :  { %v4156_v22 = vpop.f32.mrf.mxu2  ;;  %v4010_v49 = vadd.f32 %v4009_v40, %v12069_v59 }
 0xb35   :  { %v4060_v16 = vpop.f32.mrf.mxu0  ;;  %v4157_v11 = vadd.f32 %v4156_v22, %v12073_v44 }
 0xb36   :  { %v4061_v52 = vadd.f32 %v4060_v16, %v12046_v60  ;;  %v4109_v25 = vpop.f32.mrf.mxu1  ;;  %v8135_v16 = vld [vmem:[%s13505_s9 + $0xa8] sm:$0xff]  ;;  %v4400_v61 = vmax.f32 %v4010_v49, 0.0  ;;  %v8118_v49 = vld [vmem:[%s13505_s9 + $0x20] sm:$0xff] }
 0xb37   :  { %v4110_v54 = vadd.f32 %v4109_v25, %v12055_v47  ;;  %5904 = vmatpush.bf16.msrb.mxu1 %v8135_v16  ;;  %v4403_v40 = vmax.f32 %v4157_v11, 0.0  ;;  %5807 = vmatpush.bf16.msrb.mxu3 %v8118_v49 }
 0xb38   :  { %v4417_v46 = vmax.f32 %v4061_v52, 0.0 }
 0xb39   :  { %v4418_v53 = vmax.f32 %v4110_v54, 0.0 }
 0xb3a   :  { %v12086_v55 = vpack.c.bf16 %v4417_v46, %v4401_v43 }
 0xb3b   :  { %v12089_v27 = vpack.c.bf16 %v4418_v53, %v4402_v62  ;;  %v4011_v52 = vpop.f32.mrf.mxu3 }
 0xb3c   :  { %13887 = vst [vmem:[#allocation18_spill] sm:$0xff] %v12086_v55  ;;  %v4012_v25 = vadd.f32 %v4011_v52, %v12069_v59  ;;  %v4158_v54 = vpop.f32.mrf.mxu2 }
 0xb3d   :  { %13888 = vst [vmem:[#allocation19_spill] sm:$0xff] %v12089_v27  ;;  %v4159_v32 = vadd.f32 %v4158_v54, %v12073_v44  ;;  %v4063_v41 = vpop.f32.mrf.mxu0  ;;  %v8142_v54 = vld [vmem:[%s13505_s9 + $0xe0] sm:$0xff] }
 0xb3e   :  { %v4416_v20 = vmax.f32 %v4012_v25, 0.0  ;;  %v4112_v31 = vpop.f32.mrf.mxu1  ;;  %5954 = vmatpush.bf16.msra.mxu2 %v8142_v54 }
 0xb3f   :  { %v4419_v43 = vmax.f32 %v4159_v32, 0.0  ;;  %v4113_v22 = vadd.f32 %v4112_v31, %v12055_v47  ;;  %v8134_v31 = vld [vmem:[%s13505_s9 + $0xa0] sm:$0xff] }
 0xb40   :  { %v12093_v46 = vpack.c.bf16 %v4416_v20, %v4400_v61  ;;  %7535 = vmatmul.msk.bf16.gmra.mxu3 %vm146_vm0, %v11291_v24  ;;  %7543 = vmatmul.msk.bf16.gmra.mxu0 %vm146_vm0, %v11291_v24  ;;  %v4064_v20 = vadd.f32 %v4063_v41, %v12046_v60  ;;  %v8126_v41 = vld [vmem:[%s13505_s9 + $0x60] sm:$0xff] }
 0xb41   :  { %v12099_v53 = vpack.c.bf16 %v4419_v43, %v4403_v40  ;;  %7551 = vmatmul.msk.bf16.gmra.mxu1 %vm146_vm0, %v11291_v24  ;;  %7559 = vmatmul.msk.bf16.gmra.mxu2 %vm146_vm0, %v11291_v24  ;;  %v4434_v24 = vmax.f32 %v4113_v22, 0.0 }
 0xb42   :  { %v4433_v11 = vmax.f32 %v4064_v20, 0.0  ;;  %5856 = vmatpush.bf16.msra.mxu0 %v8126_v41  ;;  %5905 = vmatpush.bf16.msrb.mxu1 %v8134_v31 }
 0xb43   :  { %13889 = vst [vmem:[#allocation20_spill] sm:$0xff] %v12099_v53  ;;  %v4014_v61 = vpop.f32.mrf.mxu3 }
 0xb44   :  { %v4161_v32 = vpop.f32.mrf.mxu2  ;;  %v4015_v40 = vadd.f32 %v4014_v61, %v12069_v59 }
 0xb45   :  { %v4065_v62 = vpop.f32.mrf.mxu0  ;;  %v4162_v49 = vadd.f32 %v4161_v32, %v12073_v44 }
 0xb46   :  { %v4066_v21 = vadd.f32 %v4065_v62, %v12046_v60  ;;  %v4114_v8 = vpop.f32.mrf.mxu1  ;;  %v4432_v53 = vmax.f32 %v4015_v40, 0.0 }
 0xb47   :  { %v4115_v16 = vadd.f32 %v4114_v8, %v12055_v47  ;;  %v4435_v61 = vmax.f32 %v4162_v49, 0.0 }
 0xb48   :  { %v4449_v52 = vmax.f32 %v4066_v21, 0.0 }
 0xb49   :  { %v4450_v25 = vmax.f32 %v4115_v16, 0.0 }
 0xb4a   :  { %v12122_v43 = vpack.c.bf16 %v4449_v52, %v4433_v11  ;;  %v8117_v52 = vld [vmem:[%s13505_s9 + $0x18] sm:$0xff] }
 0xb4b   :  { %v4016_v20 = vpop.f32.mrf.mxu3  ;;  %v12125_v22 = vpack.c.bf16 %v4450_v25, %v4434_v24  ;;  %5808 = vmatpush.bf16.msrb.mxu3 %v8117_v52 }
 0xb4c   :  { %13890 = vst [vmem:[#allocation90_spill] sm:$0xff] %v12122_v43  ;;  %v4017_v62 = vadd.f32 %v4016_v20, %v12069_v59  ;;  %v4163_v21 = vpop.f32.mrf.mxu2 }
 0xb4d   :  { %13891 = vst [vmem:[#allocation91_spill] sm:$0xff] %v12125_v22  ;;  %v4164_v8 = vadd.f32 %v4163_v21, %v12073_v44  ;;  %v4068_v16 = vpop.f32.mrf.mxu0 }
 0xb4e   :  { %v4448_v27 = vmax.f32 %v4017_v62, 0.0  ;;  %v4117_v55 = vpop.f32.mrf.mxu1  ;;  %v4069_v54 = vadd.f32 %v4068_v16, %v12046_v60  ;;  %v8125_v16 = vld [vmem:[%s13505_s9 + $0x58] sm:$0xff] }
 0xb4f   :  { %v4451_v11 = vmax.f32 %v4164_v8, 0.0  ;;  %v8141_v8 = vld [vmem:[%s13505_s9 + $0xd8] sm:$0xff]  ;;  %5857 = vmatpush.bf16.msra.mxu0 %v8125_v16 }
 0xb50   :  { %7536 = vmatmul.msk.bf16.gmra.mxu3 %vm146_vm0, %v11323_v4  ;;  %7544 = vmatmul.msk.bf16.gmra.mxu0 %vm146_vm0, %v11323_v4  ;;  %v12133_v32 = vpack.c.bf16 %v4448_v27, %v4432_v53  ;;  %v4118_v27 = vadd.f32 %v4117_v55, %v12055_v47  ;;  %v8133_v55 = vld [vmem:[%s13505_s9 + $0x98] sm:$0xff] }
 0xb51   :  { %7552 = vmatmul.msk.bf16.gmra.mxu1 %vm146_vm0, %v11323_v4  ;;  %7560 = vmatmul.msk.bf16.gmra.mxu2 %vm146_vm0, %v11323_v4  ;;  %v12142_v24 = vpack.c.bf16 %v4451_v11, %v4435_v61  ;;  %v4465_v4 = vmax.f32 %v4069_v54, 0.0 }
 0xb52   :  { %v4466_v62 = vmax.f32 %v4118_v27, 0.0  ;;  %5955 = vmatpush.bf16.msra.mxu2 %v8141_v8  ;;  %5906 = vmatpush.bf16.msrb.mxu1 %v8133_v55 }
 0xb53   :  { %13892 = vst [vmem:[#allocation92_spill] sm:$0xff] %v12142_v24  ;;  %v4019_v25 = vpop.f32.mrf.mxu3 }
 0xb54   :  { %v4166_v41 = vpop.f32.mrf.mxu2  ;;  %v4020_v61 = vadd.f32 %v4019_v25, %v12069_v59 }
 0xb55   :  { %v4070_v53 = vpop.f32.mrf.mxu0  ;;  %v4167_v52 = vadd.f32 %v4166_v41, %v12073_v44 }
 0xb56   :  { %v4071_v31 = vadd.f32 %v4070_v53, %v12046_v60  ;;  %v4119_v40 = vpop.f32.mrf.mxu1  ;;  %v4464_v24 = vmax.f32 %v4020_v61, 0.0 }
 0xb57   :  { %v4120_v49 = vadd.f32 %v4119_v40, %v12055_v47  ;;  %v4467_v25 = vmax.f32 %v4167_v52, 0.0 }
 0xb58   :  { %v4481_v20 = vmax.f32 %v4071_v31, 0.0 }
 0xb59   :  { %v4482_v21 = vmax.f32 %v4120_v49, 0.0 }
 0xb5a   :  { %v12158_v11 = vpack.c.bf16 %v4481_v20, %v4465_v4  ;;  %v8116_v20 = vld [vmem:[%s13505_s9 + $0x10] sm:$0xff] }
 0xb5b   :  { %v4021_v54 = vpop.f32.mrf.mxu3  ;;  %v12161_v27 = vpack.c.bf16 %v4482_v21, %v4466_v62  ;;  %5809 = vmatpush.bf16.msrb.mxu3 %v8116_v20 }
 0xb5c   :  { %13893 = vst [vmem:[#allocation93_spill] sm:$0xff] %v12158_v11  ;;  %v4022_v53 = vadd.f32 %v4021_v54, %v12069_v59  ;;  %v4168_v31 = vpop.f32.mrf.mxu2 }
 0xb5d   :  { %13894 = vst [vmem:[#allocation94_spill] sm:$0xff] %v12161_v27  ;;  %v4169_v40 = vadd.f32 %v4168_v31, %v12073_v44  ;;  %v4073_v49 = vpop.f32.mrf.mxu0 }
 0xb5e   :  { %v4480_v22 = vmax.f32 %v4022_v53, 0.0  ;;  %v4122_v43 = vpop.f32.mrf.mxu1  ;;  %v4074_v8 = vadd.f32 %v4073_v49, %v12046_v60  ;;  %v8124_v49 = vld [vmem:[%s13505_s9 + $0x50] sm:$0xff] }
 0xb5f   :  { %v4483_v4 = vmax.f32 %v4169_v40, 0.0  ;;  %v8140_v40 = vld [vmem:[%s13505_s9 + $0xd0] sm:$0xff]  ;;  %5858 = vmatpush.bf16.msra.mxu0 %v8124_v49 }
 0xb60   :  { %7537 = vmatmul.msk.bf16.gmra.mxu3 %vm146_vm0, %v11364_v23  ;;  %7545 = vmatmul.msk.bf16.gmra.mxu0 %vm146_vm0, %v11364_v23  ;;  %v12169_v41 = vpack.c.bf16 %v4480_v22, %v4464_v24  ;;  %v4123_v22 = vadd.f32 %v4122_v43, %v12055_v47  ;;  %v8132_v43 = vld [vmem:[%s13505_s9 + $0x90] sm:$0xff] }
 0xb61   :  { %7553 = vmatmul.msk.bf16.gmra.mxu1 %vm146_vm0, %v11364_v23  ;;  %7561 = vmatmul.msk.bf16.gmra.mxu2 %vm146_vm0, %v11364_v23  ;;  %v12178_v62 = vpack.c.bf16 %v4483_v4, %v4467_v25  ;;  %v4497_v23 = vmax.f32 %v4074_v8, 0.0 }
 0xb62   :  { %v4498_v53 = vmax.f32 %v4123_v22, 0.0  ;;  %5956 = vmatpush.bf16.msra.mxu2 %v8140_v40  ;;  %5907 = vmatpush.bf16.msrb.mxu1 %v8132_v43 }
 0xb63   :  { %13895 = vst [vmem:[#allocation95_spill] sm:$0xff] %v12178_v62  ;;  %v4024_v21 = vpop.f32.mrf.mxu3 }
 0xb64   :  { %v4171_v16 = vpop.f32.mrf.mxu2  ;;  %v4025_v25 = vadd.f32 %v4024_v21, %v12069_v59 }
 0xb65   :  { %v4075_v24 = vpop.f32.mrf.mxu0  ;;  %v4172_v20 = vadd.f32 %v4171_v16, %v12073_v44 }
 0xb66   :  { %v4076_v55 = vadd.f32 %v4075_v24, %v12046_v60  ;;  %v4124_v61 = vpop.f32.mrf.mxu1  ;;  %v4496_v62 = vmax.f32 %v4025_v25, 0.0 }
 0xb67   :  { %v4125_v52 = vadd.f32 %v4124_v61, %v12055_v47  ;;  %v4499_v21 = vmax.f32 %v4172_v20, 0.0 }
 0xb68   :  { %v4513_v54 = vmax.f32 %v4076_v55, 0.0 }
 0xb69   :  { %v4514_v31 = vmax.f32 %v4125_v52, 0.0 }
 0xb6a   :  { %v12194_v4 = vpack.c.bf16 %v4513_v54, %v4497_v23  ;;  %v8115_v54 = vld [vmem:[%s13505_s9 + $0x8] sm:$0xff] }
 0xb6b   :  { %v4026_v8 = vpop.f32.mrf.mxu3  ;;  %v12197_v22 = vpack.c.bf16 %v4514_v31, %v4498_v53  ;;  %5810 = vmatpush.bf16.msrb.mxu3 %v8115_v54 }
 0xb6c   :  { %13896 = vst [vmem:[#allocation96_spill] sm:$0xff] %v12194_v4  ;;  %v4027_v24 = vadd.f32 %v4026_v8, %v12069_v59  ;;  %v4173_v55 = vpop.f32.mrf.mxu2 }
 0xb6d   :  { %13897 = vst [vmem:[#allocation97_spill] sm:$0xff] %v12197_v22  ;;  %v4174_v61 = vadd.f32 %v4173_v55, %v12073_v44  ;;  %v4078_v52 = vpop.f32.mrf.mxu0 }
 0xb6e   :  { %v4512_v27 = vmax.f32 %v4027_v24, 0.0  ;;  %v4127_v11 = vpop.f32.mrf.mxu1  ;;  %v4079_v40 = vadd.f32 %v4078_v52, %v12046_v60  ;;  %v8123_v52 = vld [vmem:[%s13505_s9 + $0x48] sm:$0xff] }
 0xb6f   :  { %v4515_v23 = vmax.f32 %v4174_v61, 0.0  ;;  %v8139_v61 = vld [vmem:[%s13505_s9 + $0xc8] sm:$0xff]  ;;  %5859 = vmatpush.bf16.msra.mxu0 %v8123_v52 }
 0xb70   :  { %7538 = vmatmul.msk.bf16.gmra.mxu3 %vm146_vm0, %v11388_v45  ;;  %7546 = vmatmul.msk.bf16.gmra.mxu0 %vm146_vm0, %v11388_v45  ;;  %v12205_v16 = vpack.c.bf16 %v4512_v27, %v4496_v62  ;;  %v4128_v27 = vadd.f32 %v4127_v11, %v12055_v47  ;;  %v8131_v11 = vld [vmem:[%s13505_s9 + $0x88] sm:$0xff] }
 0xb71   :  { %7554 = vmatmul.msk.bf16.gmra.mxu1 %vm146_vm0, %v11388_v45  ;;  %7562 = vmatmul.msk.bf16.gmra.mxu2 %vm146_vm0, %v11388_v45  ;;  %v12214_v53 = vpack.c.bf16 %v4515_v23, %v4499_v21  ;;  %v4529_v45 = vmax.f32 %v4079_v40, 0.0 }
 0xb72   :  { %v4530_v24 = vmax.f32 %v4128_v27, 0.0  ;;  %5957 = vmatpush.bf16.msra.mxu2 %v8139_v61  ;;  %5908 = vmatpush.bf16.msrb.mxu1 %v8131_v11 }
 0xb73   :  { %13898 = vst [vmem:[#allocation98_spill] sm:$0xff] %v12214_v53  ;;  %v4029_v31 = vpop.f32.mrf.mxu3 }
 0xb74   :  { %v4176_v49 = vpop.f32.mrf.mxu2  ;;  %v4030_v21 = vadd.f32 %v4029_v31, %v12069_v59 }
 0xb75   :  { %v4080_v62 = vpop.f32.mrf.mxu0  ;;  %v4177_v54 = vadd.f32 %v4176_v49, %v12073_v44 }
 0xb76   :  { %v4081_v43 = vadd.f32 %v4080_v62, %v12046_v60  ;;  %v4129_v25 = vpop.f32.mrf.mxu1  ;;  %v4528_v53 = vmax.f32 %v4030_v21, 0.0 }
 0xb77   :  { %v4130_v20 = vadd.f32 %v4129_v25, %v12055_v47  ;;  %v4531_v31 = vmax.f32 %v4177_v54, 0.0 }
 0xb78   :  { %v4545_v8 = vmax.f32 %v4081_v43, 0.0 }
 0xb79   :  { %v4546_v55 = vmax.f32 %v4130_v20, 0.0 }
 0xb7a   :  { %v12230_v23 = vpack.c.bf16 %v4545_v8, %v4529_v45  ;;  %v8114_v8 = vld [vmem:[%s13505_s9] sm:$0xff] }
 0xb7b   :  { %v4031_v40 = vpop.f32.mrf.mxu3  ;;  %v12233_v27 = vpack.c.bf16 %v4546_v55, %v4530_v24  ;;  %5811 = vmatpush.bf16.msrb.mxu3 %v8114_v8 }
 0xb7c   :  { %13899 = vst [vmem:[#allocation99_spill] sm:$0xff] %v12230_v23  ;;  %v4032_v62 = vadd.f32 %v4031_v40, %v12069_v59  ;;  %v4178_v43 = vpop.f32.mrf.mxu2 }
 0xb7d   :  { %13900 = vst [vmem:[#allocation100_spill] sm:$0xff] %v12233_v27  ;;  %v4179_v25 = vadd.f32 %v4178_v43, %v12073_v44  ;;  %v4083_v20 = vpop.f32.mrf.mxu0 }
 0xb7e   :  { %v4544_v22 = vmax.f32 %v4032_v62, 0.0  ;;  %v4132_v4 = vpop.f32.mrf.mxu1  ;;  %v4084_v61 = vadd.f32 %v4083_v20, %v12046_v60  ;;  %v8122_v20 = vld [vmem:[%s13505_s9 + $0x40] sm:$0xff] }
 0xb7f   :  { %v4547_v45 = vmax.f32 %v4179_v25, 0.0  ;;  %v8138_v25 = vld [vmem:[%s13505_s9 + $0xc0] sm:$0xff]  ;;  %5860 = vmatpush.bf16.msra.mxu0 %v8122_v20 }
 0xb80   :  { %7539 = vmatmul.msk.bf16.gmra.mxu3 %vm146_vm0, %v11441_v17  ;;  %7547 = vmatmul.msk.bf16.gmra.mxu0 %vm146_vm0, %v11441_v17  ;;  %v12241_v49 = vpack.c.bf16 %v4544_v22, %v4528_v53  ;;  %v4133_v22 = vadd.f32 %v4132_v4, %v12055_v47  ;;  %v8130_v4 = vld [vmem:[%s13505_s9 + $0x80] sm:$0xff] }
 0xb81   :  { %7555 = vmatmul.msk.bf16.gmra.mxu1 %vm146_vm0, %v11441_v17  ;;  %7563 = vmatmul.msk.bf16.gmra.mxu2 %vm146_vm0, %v11441_v17  ;;  %v12250_v24 = vpack.c.bf16 %v4547_v45, %v4531_v31  ;;  %v4561_v17 = vmax.f32 %v4084_v61, 0.0 }
 0xb82   :  { %v4562_v62 = vmax.f32 %v4133_v22, 0.0  ;;  %5958 = vmatpush.bf16.msra.mxu2 %v8138_v25  ;;  %5909 = vmatpush.bf16.msrb.mxu1 %v8130_v4 }
 0xb83   :  { %13901 = vst [vmem:[#allocation101_spill] sm:$0xff] %v12250_v24  ;;  %v4034_v55 = vpop.f32.mrf.mxu3 }
 0xb84   :  { %v4181_v52 = vpop.f32.mrf.mxu2  ;;  %v4035_v31 = vadd.f32 %v4034_v55, %v12069_v59 }
 0xb85   :  { %v4085_v53 = vpop.f32.mrf.mxu0  ;;  %v4182_v8 = vadd.f32 %v4181_v52, %v12073_v44 }
 0xb86   :  { %v4086_v11 = vadd.f32 %v4085_v53, %v12046_v60  ;;  %v4134_v21 = vpop.f32.mrf.mxu1  ;;  %v4560_v24 = vmax.f32 %v4035_v31, 0.0 }
 0xb87   :  { %v4135_v54 = vadd.f32 %v4134_v21, %v12055_v47  ;;  %v4563_v55 = vmax.f32 %v4182_v8, 0.0 }
 0xb88   :  { %v4577_v40 = vmax.f32 %v4086_v11, 0.0 }
 0xb89   :  { %v4578_v43 = vmax.f32 %v4135_v54, 0.0 }
 0xb8a   :  { %v12266_v45 = vpack.c.bf16 %v4577_v40, %v4561_v17  ;;  %v8153_v40 = vld [vmem:[%s13505_s9 + $0x138] sm:$0xff] }
 0xb8b   :  { %v4036_v61 = vpop.f32.mrf.mxu3  ;;  %v12269_v22 = vpack.c.bf16 %v4578_v43, %v4562_v62  ;;  %6000 = vmatpush.bf16.msra.mxu3 %v8153_v40  ;;  %v8161_v40 = vld [vmem:[%s13505_s9 + $0x178] sm:$0xff] }
 0xb8c   :  { %v4037_v53 = vadd.f32 %v4036_v61, %v12069_v59  ;;  %v4183_v11 = vpop.f32.mrf.mxu2  ;;  %6049 = vmatpush.bf16.msrb.mxu0 %v8161_v40 }
 0xb8d   :  { %v4184_v21 = vadd.f32 %v4183_v11, %v12073_v44  ;;  %v4088_v54 = vpop.f32.mrf.mxu0 }
 0xb8e   :  { %v4576_v27 = vmax.f32 %v4037_v53, 0.0  ;;  %v4137_v23 = vpop.f32.mrf.mxu1  ;;  %v4089_v25 = vadd.f32 %v4088_v54, %v12046_v60 }
 0xb8f   :  { %v4579_v17 = vmax.f32 %v4184_v21, 0.0 }
 0xb90   :  { %7540 = vmatmul.msk.bf16.gmra.mxu3 %vm146_vm0, %v11463_v30  ;;  %7548 = vmatmul.msk.bf16.gmra.mxu0 %vm146_vm0, %v11463_v30  ;;  %v12277_v52 = vpack.c.bf16 %v4576_v27, %v4560_v24  ;;  %v4138_v27 = vadd.f32 %v4137_v23, %v12055_v47  ;;  %v8177_v23 = vld [vmem:[%s13505_s9 + $0x1f8] sm:$0xff] }
 0xb91   :  { %7556 = vmatmul.msk.bf16.gmra.mxu1 %vm146_vm0, %v11463_v30  ;;  %7564 = vmatmul.msk.bf16.gmra.mxu2 %vm146_vm0, %v11463_v30  ;;  %v12286_v62 = vpack.c.bf16 %v4579_v17, %v4563_v55  ;;  %v4593_v30 = vmax.f32 %v4089_v25, 0.0  ;;  %v8169_v25 = vld [vmem:[%s13505_s9 + $0x1b8] sm:$0xff] }
 0xb92   :  { %v4594_v53 = vmax.f32 %v4138_v27, 0.0  ;;  %6147 = vmatpush.bf16.msrb.mxu2 %v8177_v23  ;;  %6098 = vmatpush.bf16.msra.mxu1 %v8169_v25 }
 0xb93   :  { %13902 = vst [vmem:[#allocation102_spill] sm:$0xff] %v12286_v62  ;;  %v4039_v43 = vpop.f32.mrf.mxu3 }
 0xb94   :  { %v4186_v20 = vpop.f32.mrf.mxu2  ;;  %v4040_v21 = vadd.f32 %v4039_v43, %v12069_v59 }
 0xb95   :  { %v4090_v24 = vpop.f32.mrf.mxu0  ;;  %v4187_v17 = vadd.f32 %v4186_v20, %v12073_v44 }
 0xb96   :  { %v4091_v4 = vadd.f32 %v4090_v24, %v12046_v60  ;;  %v4139_v31 = vpop.f32.mrf.mxu1 }
 0xb97   :  { %v4140_v8 = vadd.f32 %v4139_v31, %v12055_v47  ;;  %v4592_v31 = vmax.f32 %v4040_v21, 0.0 }
 0xb98   :  { %v4609_v61 = vmax.f32 %v4091_v4, 0.0 }
 0xb99   :  { %v4610_v11 = vmax.f32 %v4140_v8, 0.0 }
 0xb9a   :  { %v12293_v55 = vpack.c.bf16 %v4609_v61, %v4593_v30  ;;  %v4595_v61 = vmax.f32 %v4187_v17, 0.0 }
 0xb9b   :  { %v4041_v54 = vpop.f32.mrf.mxu3  ;;  %v12305_v27 = vpack.c.bf16 %v4610_v11, %v4594_v53  ;;  %v8152_v11 = vld [vmem:[%s13505_s9 + $0x130] sm:$0xff] }
 0xb9c   :  { %13903 = vst [vmem:[#allocation103_spill] sm:$0xff] %v12293_v55  ;;  %v4042_v43 = vadd.f32 %v4041_v54, %v12069_v59  ;;  %v4188_v24 = vpop.f32.mrf.mxu2  ;;  %6001 = vmatpush.bf16.msra.mxu3 %v8152_v11 }
 0xb9d   :  { %13904 = vst [vmem:[#allocation104_spill] sm:$0xff] %v12305_v27  ;;  %v4189_v20 = vadd.f32 %v4188_v24, %v12073_v44  ;;  %v4093_v4 = vpop.f32.mrf.mxu0 }
 0xb9e   :  { %v4608_v8 = vmax.f32 %v4042_v43, 0.0  ;;  %v4142_v30 = vpop.f32.mrf.mxu1  ;;  %v4094_v54 = vadd.f32 %v4093_v4, %v12046_v60  ;;  %v3669_v43 = vadd.f32 %v11545_v50, %v11772_v56  ;;  %v3618_v50 = vadd.f32 %v11519_v48, %v11780_v1  ;;  %v8168_v48 = vld [vmem:[%s13505_s9 + $0x1b0] sm:$0xff] }
 0xb9f   :  { %v4611_v55 = vmax.f32 %v4189_v20, 0.0  ;;  %v4143_v40 = vadd.f32 %v4142_v30, %v12055_v47  ;;  %6099 = vmatpush.bf16.msra.mxu1 %v8168_v48  ;;  %v3674_v48 = vadd.f32 %v11577_v35, %v11772_v56 }
 0xba0   :  { %7541 = vmatmul.msk.bf16.gmra.mxu3 %vm146_vm0, %v11537_v29  ;;  %7549 = vmatmul.msk.bf16.gmra.mxu0 %vm146_vm0, %v11537_v29  ;;  %v12313_v53 = vpack.c.bf16 %v4608_v8, %v4592_v31  ;;  %v3767_v31 = vadd.f32 %v11559_v39, %v11782_v9  ;;  %v3667_v8 = vadd.f32 %v11506_v57, %v11772_v56  ;;  %v4625_v30 = vmax.f32 %v4094_v54, 0.0  ;;  %v8176_v39 = vld [vmem:[%s13505_s9 + $0x1f0] sm:$0xff] }
 0xba1   :  { %7557 = vmatmul.msk.bf16.gmra.mxu1 %vm146_vm0, %v11537_v29  ;;  %7565 = vmatmul.msk.bf16.gmra.mxu2 %vm146_vm0, %v11537_v29  ;;  %v12322_v21 = vpack.c.bf16 %v4611_v55, %v4595_v61  ;;  %v3620_v29 = vadd.f32 %v11557_v18, %v11780_v1  ;;  %v3718_v55 = vadd.f32 %v11547_v10, %v11774_v6  ;;  %v4626_v10 = vmax.f32 %v4143_v40, 0.0  ;;  %v8160_v57 = vld [vmem:[%s13505_s9 + $0x170] sm:$0xff] }
 0xba2   :  { %13905 = vst [vmem:[#allocation105_spill] sm:$0xff] %v12313_v53  ;;  %v3716_v18 = vadd.f32 %v11508_v34, %v11774_v6  ;;  %v4411_v40 = vmax.f32 %v3767_v31, 0.0  ;;  %6148 = vmatpush.bf16.msrb.mxu2 %v8176_v39  ;;  %6050 = vmatpush.bf16.msrb.mxu0 %v8160_v57  ;;  %v4392_v27 = vmax.f32 %v3618_v50, 0.0  ;;  %v12367_v50 = vperm.slane %v12043_v12, 6 }
 0xba3   :  { %13906 = vst [vmem:[#allocation106_spill] sm:$0xff] %v12322_v21  ;;  %v4044_v17 = vpop.f32.mrf.mxu3  ;;  %v4408_v54 = vmax.f32 %v3620_v29, 0.0  ;;  %v4393_v21 = vmax.f32 %v3667_v8, 0.0  ;;  %v12362_v8 = vperm.slane %v12043_v12, 5 }
 0xba4   :  { %v4191_v23 = vpop.f32.mrf.mxu2  ;;  %v4045_v34 = vadd.f32 %v4044_v17, %v12069_v59 }
 0xba5   :  { %v4095_v25 = vpop.f32.mrf.mxu0  ;;  %v4648_v31 = vpack.c.bf16 %v4408_v54, %v4392_v27  ;;  %v12381_v54 = vperm.slane %v12043_v12, 4 }
 0xba6   :  { %v4096_v24 = vadd.f32 %v4095_v25, %v12046_v60  ;;  %v4144_v20 = vpop.f32.mrf.mxu1  ;;  %v3765_v60 = vadd.f32 %v11521_v37, %v11782_v9  ;;  %v4410_v37 = vmax.f32 %v3718_v55, 0.0 }
 0xba7   :  { %v4145_v4 = vadd.f32 %v4144_v20, %v12055_v47  ;;  %v4409_v47 = vmax.f32 %v3669_v43, 0.0  ;;  %v4394_v43 = vmax.f32 %v3716_v18, 0.0 }
 0xba8   :  { %v4641_v61 = vmax.f32 %v4096_v24, 0.0  ;;  %v4192_v24 = vadd.f32 %v4191_v23, %v12073_v44  ;;  %v4395_v29 = vmax.f32 %v3765_v60, 0.0 }
 0xba9   :  { %v4642_v11 = vmax.f32 %v4145_v4, 0.0  ;;  %v4649_v55 = vpack.c.bf16 %v4409_v47, %v4393_v21  ;;  %v4650_v39 = vpack.c.bf16 %v4410_v37, %v4394_v43  ;;  %v3625_v47 = vadd.f32 %v11581_v13, %v11780_v1 }
 0xbaa   :  { %v12354_v25 = vpack.c.bf16 %v4641_v61, %v4625_v30  ;;  %v4624_v61 = vmax.f32 %v4045_v34, 0.0  ;;  %v4651_v57 = vpack.c.bf16 %v4411_v40, %v4395_v29  ;;  %v3723_v40 = vadd.f32 %v11579_v58, %v11774_v6 }
 0xbab   :  { %v4046_v20 = vpop.f32.mrf.mxu3  ;;  %v12357_v4 = vpack.c.bf16 %v4642_v11, %v4626_v10  ;;  %v4627_v10 = vmax.f32 %v4192_v24, 0.0  ;;  %v3772_v24 = vadd.f32 %v11583_v14, %v11782_v9  ;;  %v3672_v13 = vadd.f32 %v11561_v42, %v11772_v56  ;;  %v8159_v42 = vld [vmem:[%s13505_s9 + $0x168] sm:$0xff] }
 0xbac   :  { %13907 = vst [vmem:[#allocation107_spill] sm:$0xff] %v12354_v25  ;;  %v4047_v53 = vadd.f32 %v4046_v20, %v12069_v59  ;;  %v4193_v62 = vpop.f32.mrf.mxu2  ;;  %v3623_v20 = vadd.f32 %v11565_v36, %v11780_v1  ;;  %v3770_v58 = vadd.f32 %v11567_v7, %v11782_v9  ;;  %v8167_v36 = vld [vmem:[%s13505_s9 + $0x1a8] sm:$0xff]  ;;  %v4442_v7 = vmax.f32 %v3723_v40, 0.0  ;;  %6051 = vmatpush.bf16.msrb.mxu0 %v8159_v42 }
 0xbad   :  { %v4194_v17 = vadd.f32 %v4193_v62, %v12073_v44  ;;  %v4254_v30 = vpop.f32.mrf.mxu0  ;;  %v8151_v44 = vld [vmem:[%s13505_s9 + $0x128] sm:$0xff]  ;;  %6100 = vmatpush.bf16.msra.mxu1 %v8167_v36 }
 0xbae   :  { %v4640_v23 = vmax.f32 %v4047_v53, 0.0  ;;  %v4303_v25 = vpop.f32.mrf.mxu1  ;;  %6002 = vmatpush.bf16.msra.mxu3 %v8151_v44  ;;  %v4255_v53 = vadd.f32 %v4254_v30, %v12362_v8  ;;  %v4424_v44 = vmax.f32 %v3623_v20, 0.0 }
 0xbaf   :  { %v4643_v11 = vmax.f32 %v4194_v17, 0.0  ;;  %v4304_v18 = vadd.f32 %v4303_v25, %v12367_v50  ;;  %v12389_v25 = vperm.slane %v12043_v12, 7  ;;  %v3721_v17 = vadd.f32 %v11563_v26, %v11774_v6  ;;  %v8175_v12 = vld [vmem:[%s13505_s9 + $0x1e8] sm:$0xff] }
 0xbb0   :  { %5812 = vmatmul.bf16.vlgmr.msrb.gmra.mxu3 %v4648_v31  ;;  %5861 = vmatmul.bf16.vlgmr.msra.gmra.mxu0 %v4649_v55  ;;  %v12364_v59 = vpack.c.bf16 %v4640_v23, %v4624_v61  ;;  %v4405_v43 = vmax.f32 %v4255_v53, 0.0  ;;  %v4441_v55 = vmax.f32 %v3674_v48, 0.0  ;;  %v4440_v31 = vmax.f32 %v3625_v47, 0.0 }
 0xbb1   :  { %5910 = vmatmul.bf16.vlgmr.msrb.gmra.mxu1 %v4650_v39  ;;  %5959 = vmatmul.bf16.vlgmr.msra.gmra.mxu2 %v4651_v57  ;;  %v12372_v62 = vpack.c.bf16 %v4643_v11, %v4627_v10  ;;  %v4406_v14 = vmax.f32 %v4304_v18, 0.0  ;;  %v4443_v23 = vmax.f32 %v3772_v24, 0.0  ;;  %v4425_v11 = vmax.f32 %v3672_v13, 0.0 }
 0xbb2   :  { %6149 = vmatpush.bf16.msrb.mxu2 %v8175_v12  ;;  %v4427_v48 = vmax.f32 %v3770_v58, 0.0 }
 0xbb3   :  { %v4205_v27 = vpop.f32.mrf.mxu3  ;;  %v4665_v24 = vpack.c.bf16 %v4441_v55, %v4425_v11  ;;  %v3679_v55 = vadd.f32 %v11601_v19, %v11772_v56  ;;  %v3677_v11 = vadd.f32 %v11585_v15, %v11772_v56  ;;  %v3628_v19 = vadd.f32 %v11597_v5, %v11780_v1  ;;  %v8158_v15 = vld [vmem:[%s13505_s9 + $0x160] sm:$0xff] }
 0xbb4   :  { %v4352_v21 = vpop.f32.mrf.mxu2  ;;  %v4206_v26 = vadd.f32 %v4205_v27, %v12381_v54  ;;  %v8166_v5 = vld [vmem:[%s13505_s9 + $0x1a0] sm:$0xff]  ;;  %6052 = vmatpush.bf16.msrb.mxu0 %v8158_v15 }
 0xbb5   :  { %v4256_v60 = vpop.f32.mrf.mxu0  ;;  %v4353_v39 = vadd.f32 %v4352_v21, %v12389_v25  ;;  %v4664_v21 = vpack.c.bf16 %v4440_v31, %v4424_v44  ;;  %v3630_v31 = vadd.f32 %v11605_v2, %v11780_v1  ;;  %v3726_v2 = vadd.f32 %v11587_v33, %v11774_v6  ;;  %6101 = vmatpush.bf16.msra.mxu1 %v8166_v5 }
 0xbb6   :  { %v4257_v34 = vadd.f32 %v4256_v60, %v12362_v8  ;;  %v4305_v37 = vpop.f32.mrf.mxu1  ;;  %v4426_v60 = vmax.f32 %v3721_v17, 0.0  ;;  %v8150_v17 = vld [vmem:[%s13505_s9 + $0x120] sm:$0xff] }
 0xbb7   :  { %v4306_v35 = vadd.f32 %v4305_v37, %v12367_v50  ;;  %6003 = vmatpush.bf16.msra.mxu3 %v8150_v17 }
 0xbb8   :  { %v4421_v29 = vmax.f32 %v4257_v34, 0.0  ;;  %v4404_v34 = vmax.f32 %v4206_v26, 0.0 }
 0xbb9   :  { %v4422_v30 = vmax.f32 %v4306_v35, 0.0  ;;  %v4407_v35 = vmax.f32 %v4353_v39, 0.0  ;;  %v3777_v39 = vadd.f32 %v11607_v38, %v11782_v9  ;;  %v8174_v38 = vld [vmem:[%s13505_s9 + $0x1e0] sm:$0xff] }
 0xbba   :  { %v12410_v61 = vpack.c.bf16 %v4421_v29, %v4405_v43  ;;  %v4666_v29 = vpack.c.bf16 %v4442_v7, %v4426_v60  ;;  %6150 = vmatpush.bf16.msrb.mxu2 %v8174_v38  ;;  %v3635_v38 = vadd.f32 %v11653_v28, %v11780_v1  ;;  %v13911_v28 = vld [vmem:[#allocation31_spill] sm:$0xff] }
 0xbbb   :  { %v12413_v57 = vpack.c.bf16 %v4422_v30, %v4406_v14  ;;  %v4207_v10 = vpop.f32.mrf.mxu3  ;;  %v4667_v14 = vpack.c.bf16 %v4443_v23, %v4427_v48  ;;  %v3728_v23 = vadd.f32 %v11603_v63, %v11774_v6  ;;  %v4473_v48 = vmax.f32 %v3679_v55, 0.0 }
 0xbbc   :  { %v4208_v53 = vadd.f32 %v4207_v10, %v12381_v54  ;;  %v4354_v18 = vpop.f32.mrf.mxu2 }
 0xbbd   :  { %v4355_v27 = vadd.f32 %v4354_v18, %v12389_v25  ;;  %v4259_v47 = vpop.f32.mrf.mxu0  ;;  %v3775_v18 = vadd.f32 %v11599_v51, %v11782_v9  ;;  %v4474_v51 = vmax.f32 %v3728_v23, 0.0 }
 0xbbe   :  { %v4420_v37 = vmax.f32 %v4208_v53, 0.0  ;;  %v4308_v40 = vpop.f32.mrf.mxu1  ;;  %v4260_v30 = vadd.f32 %v4259_v47, %v12362_v8 }
 0xbbf   :  { %v4423_v43 = vmax.f32 %v4355_v27, 0.0  ;;  %v4309_v42 = vadd.f32 %v4308_v40, %v12367_v50  ;;  %v4472_v27 = vmax.f32 %v3630_v31, 0.0  ;;  %v4459_v17 = vmax.f32 %v3775_v18, 0.0 }
 0xbc0   :  { %v12417_v13 = vpack.c.bf16 %v4420_v37, %v4404_v34  ;;  %5817 = vmatmul.bf16.gmra.mxu3 %v4664_v21  ;;  %5866 = vmatmul.bf16.gmra.mxu0 %v4665_v24  ;;  %v4437_v44 = vmax.f32 %v4260_v30, 0.0  ;;  %v4475_v34 = vmax.f32 %v3777_v39, 0.0  ;;  %v4457_v24 = vmax.f32 %v3677_v11, 0.0  ;;  %v8149_v11 = vld [vmem:[%s13505_s9 + $0x118] sm:$0xff] }
 0xbc1   :  { %v12419_v20 = vpack.c.bf16 %v4423_v43, %v4407_v35  ;;  %5915 = vmatmul.bf16.gmra.mxu1 %v4666_v29  ;;  %5964 = vmatmul.bf16.gmra.mxu2 %v4667_v14  ;;  %v4438_v63 = vmax.f32 %v4309_v42, 0.0  ;;  %v4456_v35 = vmax.f32 %v3628_v19, 0.0  ;;  %v4458_v14 = vmax.f32 %v3726_v2, 0.0 }
 0xbc2   :  { %v4681_v31 = vpack.c.bf16 %v4473_v48, %v4457_v24  ;;  %v4683_v39 = vpack.c.bf16 %v4475_v34, %v4459_v17  ;;  %6004 = vmatpush.bf16.msra.mxu3 %v8149_v11  ;;  %v3733_v48 = vadd.f32 %v11651_v3, %v11774_v6  ;;  %v13909_v34 = vld [vmem:[#allocation46_spill] sm:$0xff] }
 0xbc3   :  { %v4210_v58 = vpop.f32.mrf.mxu3  ;;  %v4682_v23 = vpack.c.bf16 %v4474_v51, %v4458_v14 }
 0xbc4   :  { %v4357_v12 = vpop.f32.mrf.mxu2  ;;  %v4211_v33 = vadd.f32 %v4210_v58, %v12381_v54 }
 0xbc5   :  { %v4261_v36 = vpop.f32.mrf.mxu0  ;;  %v4358_v37 = vadd.f32 %v4357_v12, %v12389_v25  ;;  %v4680_v12 = vpack.c.bf16 %v4472_v27, %v4456_v35  ;;  %v13908_v27 = vld [vmem:[#allocation41_spill] sm:$0xff] }
 0xbc6   :  { %v4262_v26 = vadd.f32 %v4261_v36, %v12362_v8  ;;  %v4310_v7 = vpop.f32.mrf.mxu1  ;;  %v4436_v42 = vmax.f32 %v4211_v33, 0.0  ;;  %v3782_v33 = vadd.f32 %v13908_v27, %v11782_v9 }
 0xbc7   :  { %v4311_v10 = vadd.f32 %v4310_v7, %v12367_v50 }
 0xbc8   :  { %v4453_v53 = vmax.f32 %v4262_v26, 0.0  ;;  %v4439_v26 = vmax.f32 %v4358_v37, 0.0  ;;  %v3682_v37 = vadd.f32 %v13909_v34, %v11772_v56 }
 0xbc9   :  { %v4454_v60 = vmax.f32 %v4311_v10, 0.0 }
 0xbca   :  { %v12454_v47 = vpack.c.bf16 %v4453_v53, %v4437_v44 }
 0xbcb   :  { %v4212_v40 = vpop.f32.mrf.mxu3  ;;  %v12457_v21 = vpack.c.bf16 %v4454_v60, %v4438_v63  ;;  %v3684_v60 = vadd.f32 %v11649_v0, %v11772_v56 }
 0xbcc   :  { %v4213_v43 = vadd.f32 %v4212_v40, %v12381_v54  ;;  %v4359_v29 = vpop.f32.mrf.mxu2  ;;  %v13910_v40 = vld [vmem:[#allocation50_spill] sm:$0xff] }
 0xbcd   :  { %v4360_v58 = vadd.f32 %v4359_v29, %v12389_v25  ;;  %v4264_v30 = vpop.f32.mrf.mxu0  ;;  %v3633_v0 = vadd.f32 %v13910_v40, %v11780_v1  ;;  %v13912_v29 = vld [vmem:[#allocation39_spill] sm:$0xff] }
 0xbce   :  { %v4452_v36 = vmax.f32 %v4213_v43, 0.0  ;;  %v4313_v55 = vpop.f32.mrf.mxu1  ;;  %v4265_v53 = vadd.f32 %v4264_v30, %v12362_v8  ;;  %v3731_v43 = vadd.f32 %v13911_v28, %v11774_v6  ;;  %v3780_v14 = vadd.f32 %v13912_v29, %v11782_v9  ;;  %v8157_v30 = vld [vmem:[%s13505_s9 + $0x158] sm:$0xff] }
 0xbcf   :  { %v4455_v7 = vmax.f32 %v4360_v58, 0.0  ;;  %v4314_v18 = vadd.f32 %v4313_v55, %v12367_v50  ;;  %v8173_v58 = vld [vmem:[%s13505_s9 + $0x1d8] sm:$0xff]  ;;  %v4504_v55 = vmax.f32 %v3635_v38, 0.0  ;;  %6053 = vmatpush.bf16.msrb.mxu0 %v8157_v30 }
 0xbd0   :  { %5822 = vmatmul.bf16.gmra.mxu3 %v4680_v12  ;;  %5871 = vmatmul.bf16.gmra.mxu0 %v4681_v31  ;;  %v12461_v10 = vpack.c.bf16 %v4452_v36, %v4436_v42  ;;  %v4469_v24 = vmax.f32 %v4265_v53, 0.0  ;;  %v8165_v42 = vld [vmem:[%s13505_s9 + $0x198] sm:$0xff]  ;;  %v4505_v36 = vmax.f32 %v3684_v60, 0.0  ;;  %v4489_v53 = vmax.f32 %v3682_v37, 0.0 }
 0xbd1   :  { %5920 = vmatmul.bf16.gmra.mxu1 %v4682_v23  ;;  %5969 = vmatmul.bf16.gmra.mxu2 %v4683_v39  ;;  %v12466_v19 = vpack.c.bf16 %v4455_v7, %v4439_v26  ;;  %v4470_v3 = vmax.f32 %v4314_v18, 0.0  ;;  %v4506_v26 = vmax.f32 %v3733_v48, 0.0  ;;  %v4507_v7 = vmax.f32 %v3782_v33, 0.0 }
 0xbd2   :  { %6151 = vmatpush.bf16.msrb.mxu2 %v8173_v58  ;;  %v4488_v18 = vmax.f32 %v3633_v0, 0.0  ;;  %6102 = vmatpush.bf16.msra.mxu1 %v8165_v42  ;;  %v4490_v60 = vmax.f32 %v3731_v43, 0.0  ;;  %v4491_v38 = vmax.f32 %v3780_v14, 0.0  ;;  %v8148_v0 = vld [vmem:[%s13505_s9 + $0x110] sm:$0xff]  ;;  %v13913_v58 = vld [vmem:[#allocation78_spill] sm:$0xff]  ;;  %v13914_v42 = vld [vmem:[#allocation29_spill] sm:$0xff] }
 0xbd3   :  { %v4215_v44 = vpop.f32.mrf.mxu3  ;;  %6005 = vmatpush.bf16.msra.mxu3 %v8148_v0  ;;  %v3689_v30 = vadd.f32 %v13913_v58, %v11772_v56 }
 0xbd4   :  { %v4362_v2 = vpop.f32.mrf.mxu2  ;;  %v4216_v12 = vadd.f32 %v4215_v44, %v12381_v54 }
 0xbd5   :  { %v4266_v63 = vpop.f32.mrf.mxu0  ;;  %v4363_v23 = vadd.f32 %v4362_v2, %v12389_v25  ;;  %v4696_v2 = vpack.c.bf16 %v4504_v55, %v4488_v18  ;;  %v13917_v18 = vld [vmem:[#allocation76_spill] sm:$0xff] }
 0xbd6   :  { %v4267_v15 = vadd.f32 %v4266_v63, %v12362_v8  ;;  %v4315_v5 = vpop.f32.mrf.mxu1  ;;  %v4468_v48 = vmax.f32 %v4216_v12, 0.0 }
 0xbd7   :  { %v4316_v51 = vadd.f32 %v4315_v5, %v12367_v50  ;;  %v4471_v34 = vmax.f32 %v4363_v23, 0.0  ;;  %v13916_v23 = vld [vmem:[#allocation45_spill] sm:$0xff] }
 0xbd8   :  { %v4485_v35 = vmax.f32 %v4267_v15, 0.0 }
 0xbd9   :  { %v4486_v17 = vmax.f32 %v4316_v51, 0.0  ;;  %v4697_v51 = vpack.c.bf16 %v4505_v36, %v4489_v53  ;;  %v3640_v36 = vadd.f32 %v13914_v42, %v11780_v1 }
 0xbda   :  { %v12498_v31 = vpack.c.bf16 %v4485_v35, %v4469_v24  ;;  %v4698_v24 = vpack.c.bf16 %v4506_v26, %v4490_v60  ;;  %v4699_v35 = vpack.c.bf16 %v4507_v7, %v4491_v38  ;;  %v13915_v26 = vld [vmem:[#allocation58_spill] sm:$0xff] }
 0xbdb   :  { %v4217_v39 = vpop.f32.mrf.mxu3  ;;  %v12501_v11 = vpack.c.bf16 %v4486_v17, %v4470_v3  ;;  %v3738_v7 = vadd.f32 %v13915_v26, %v11774_v6  ;;  %v4536_v0 = vmax.f32 %v3640_v36, 0.0 }
 0xbdc   :  { %v4218_v63 = vadd.f32 %v4217_v39, %v12381_v54  ;;  %v4364_v15 = vpop.f32.mrf.mxu2  ;;  %v3787_v39 = vadd.f32 %v13916_v23, %v11782_v9 }
 0xbdd   :  { %v4365_v44 = vadd.f32 %v4364_v15, %v12389_v25  ;;  %v4269_v5 = vpop.f32.mrf.mxu0  ;;  %v13918_v15 = vld [vmem:[#allocation36_spill] sm:$0xff] }
 0xbde   :  { %v4484_v27 = vmax.f32 %v4218_v63, 0.0  ;;  %v4318_v33 = vpop.f32.mrf.mxu1  ;;  %v4270_v29 = vadd.f32 %v4269_v5, %v12362_v8  ;;  %v3687_v63 = vadd.f32 %v13917_v18, %v11772_v56  ;;  %v3638_v60 = vadd.f32 %v13918_v15, %v11780_v1  ;;  %v13919_v5 = vld [vmem:[#allocation51_spill] sm:$0xff] }
 0xbdf   :  { %v4487_v40 = vmax.f32 %v4365_v44, 0.0  ;;  %v4319_v3 = vadd.f32 %v4318_v33, %v12367_v50  ;;  %v4539_v58 = vmax.f32 %v3787_v39, 0.0 }
 0xbe0   :  { %5827 = vmatmul.bf16.gmra.mxu3 %v4696_v2  ;;  %5876 = vmatmul.bf16.gmra.mxu0 %v4697_v51  ;;  %v12505_v37 = vpack.c.bf16 %v4484_v27, %v4468_v48  ;;  %v4501_v38 = vmax.f32 %v4270_v29, 0.0  ;;  %v3736_v48 = vadd.f32 %v13919_v5, %v11774_v6  ;;  %v13920_v27 = vld [vmem:[#allocation48_spill] sm:$0xff]  ;;  %v4521_v26 = vmax.f32 %v3687_v63, 0.0 }
 0xbe1   :  { %5925 = vmatmul.bf16.gmra.mxu1 %v4698_v24  ;;  %5974 = vmatmul.bf16.gmra.mxu2 %v4699_v35  ;;  %v12510_v28 = vpack.c.bf16 %v4487_v40, %v4471_v34  ;;  %v3785_v33 = vadd.f32 %v13920_v27, %v11782_v9  ;;  %v4502_v2 = vmax.f32 %v4319_v3, 0.0  ;;  %v8172_v34 = vld [vmem:[%s13505_s9 + $0x1d0] sm:$0xff]  ;;  %v4537_v35 = vmax.f32 %v3689_v30, 0.0 }
 0xbe2   :  { %v8156_v40 = vld [vmem:[%s13505_s9 + $0x150] sm:$0xff]  ;;  %v4538_v3 = vmax.f32 %v3738_v7, 0.0  ;;  %6152 = vmatpush.bf16.msrb.mxu2 %v8172_v34  ;;  %v4520_v23 = vmax.f32 %v3638_v60, 0.0  ;;  %v4522_v30 = vmax.f32 %v3736_v48, 0.0  ;;  %v8147_v60 = vld [vmem:[%s13505_s9 + $0x108] sm:$0xff] }
 0xbe3   :  { %v4220_v43 = vpop.f32.mrf.mxu3  ;;  %v8164_v24 = vld [vmem:[%s13505_s9 + $0x190] sm:$0xff]  ;;  %6054 = vmatpush.bf16.msrb.mxu0 %v8156_v40  ;;  %v4523_v36 = vmax.f32 %v3785_v33, 0.0  ;;  %6006 = vmatpush.bf16.msra.mxu3 %v8147_v60  ;;  %v8171_v60 = vld [vmem:[%s13505_s9 + $0x1c8] sm:$0xff] }
 0xbe4   :  { %v4367_v14 = vpop.f32.mrf.mxu2  ;;  %v4221_v29 = vadd.f32 %v4220_v43, %v12381_v54  ;;  %6103 = vmatpush.bf16.msra.mxu1 %v8164_v24 }
 0xbe5   :  { %v4271_v17 = vpop.f32.mrf.mxu0  ;;  %v4368_v42 = vadd.f32 %v4367_v14, %v12389_v25  ;;  %v4712_v14 = vpack.c.bf16 %v4536_v0, %v4520_v23  ;;  %v13922_v0 = vld [vmem:[#allocation62_spill] sm:$0xff] }
 0xbe6   :  { %v4272_v55 = vadd.f32 %v4271_v17, %v12362_v8  ;;  %v4320_v12 = vpop.f32.mrf.mxu1  ;;  %v4500_v7 = vmax.f32 %v4221_v29, 0.0  ;;  %v3694_v29 = vadd.f32 %v13922_v0, %v11772_v56  ;;  %6153 = vmatpush.bf16.msrb.mxu2 %v8171_v60 }
 0xbe7   :  { %v4321_v53 = vadd.f32 %v4320_v12, %v12367_v50  ;;  %v4503_v5 = vmax.f32 %v4368_v42, 0.0 }
 0xbe8   :  { %v4517_v44 = vmax.f32 %v4272_v55, 0.0  ;;  %v4569_v0 = vmax.f32 %v3694_v29, 0.0 }
 0xbe9   :  { %v4518_v51 = vmax.f32 %v4321_v53, 0.0 }
 0xbea   :  { %v12542_v17 = vpack.c.bf16 %v4517_v44, %v4501_v38  ;;  %v4713_v44 = vpack.c.bf16 %v4537_v35, %v4521_v26  ;;  %v13924_v26 = vld [vmem:[#allocation38_spill] sm:$0xff] }
 0xbeb   :  { %v4222_v55 = vpop.f32.mrf.mxu3  ;;  %v12545_v12 = vpack.c.bf16 %v4518_v51, %v4502_v2  ;;  %v4714_v2 = vpack.c.bf16 %v4538_v3, %v4522_v30  ;;  %v4715_v51 = vpack.c.bf16 %v4539_v58, %v4523_v36  ;;  %v13923_v3 = vld [vmem:[#allocation71_spill] sm:$0xff]  ;;  %v3743_v23 = vadd.f32 %v13924_v26, %v11774_v6  ;;  %v13926_v36 = vld [vmem:[#allocation70_spill] sm:$0xff] }
 0xbec   :  { %v4223_v53 = vadd.f32 %v4222_v55, %v12381_v54  ;;  %v4369_v18 = vpop.f32.mrf.mxu2  ;;  %v3645_v58 = vadd.f32 %v13923_v3, %v11780_v1 }
 0xbed   :  { %v4370_v43 = vadd.f32 %v4369_v18, %v12389_v25  ;;  %v4274_v15 = vpop.f32.mrf.mxu0 }
 0xbee   :  { %v4516_v39 = vmax.f32 %v4223_v53, 0.0  ;;  %v4323_v38 = vpop.f32.mrf.mxu1  ;;  %v4275_v34 = vadd.f32 %v4274_v15, %v12362_v8  ;;  %v13925_v53 = vld [vmem:[#allocation55_spill] sm:$0xff]  ;;  %v4568_v3 = vmax.f32 %v3645_v58, 0.0 }
 0xbef   :  { %v4519_v27 = vmax.f32 %v4370_v43, 0.0  ;;  %v4324_v24 = vadd.f32 %v4323_v38, %v12367_v50  ;;  %v3792_v18 = vadd.f32 %v13925_v53, %v11782_v9  ;;  %v3692_v43 = vadd.f32 %v13926_v36, %v11772_v56  ;;  %v13927_v15 = vld [vmem:[#allocation27_spill] sm:$0xff] }
 0xbf0   :  { %5832 = vmatmul.bf16.gmra.mxu3 %v4712_v14  ;;  %5881 = vmatmul.bf16.gmra.mxu0 %v4713_v44  ;;  %v12549_v63 = vpack.c.bf16 %v4516_v39, %v4500_v7  ;;  %v3643_v7 = vadd.f32 %v13927_v15, %v11780_v1  ;;  %v4533_v39 = vmax.f32 %v4275_v34, 0.0  ;;  %v13928_v14 = vld [vmem:[#allocation53_spill] sm:$0xff]  ;;  %v8163_v34 = vld [vmem:[%s13505_s9 + $0x188] sm:$0xff] }
 0xbf1   :  { %5930 = vmatmul.bf16.gmra.mxu1 %v4714_v2  ;;  %5979 = vmatmul.bf16.gmra.mxu2 %v4715_v51  ;;  %v12554_v48 = vpack.c.bf16 %v4519_v27, %v4503_v5  ;;  %v3741_v44 = vadd.f32 %v13928_v14, %v11774_v6  ;;  %v13929_v5 = vld [vmem:[#allocation33_spill] sm:$0xff]  ;;  %v4534_v2 = vmax.f32 %v4324_v24, 0.0  ;;  %v4570_v24 = vmax.f32 %v3743_v23, 0.0 }
 0xbf2   :  { %v3790_v27 = vadd.f32 %v13929_v5, %v11782_v9  ;;  %v4571_v26 = vmax.f32 %v3792_v18, 0.0  ;;  %v4553_v15 = vmax.f32 %v3692_v43, 0.0  ;;  %v4552_v14 = vmax.f32 %v3643_v7, 0.0  ;;  %6104 = vmatpush.bf16.msra.mxu1 %v8163_v34 }
 0xbf3   :  { %13921 = vst [vmem:[#allocation41_spill] sm:$0xff] %v12554_v48  ;;  %v4225_v33 = vpop.f32.mrf.mxu3  ;;  %v4554_v29 = vmax.f32 %v3741_v44, 0.0 }
 0xbf4   :  { %v4372_v40 = vpop.f32.mrf.mxu2  ;;  %v4555_v58 = vmax.f32 %v3790_v27, 0.0 }
 0xbf5   :  { %v4276_v35 = vpop.f32.mrf.mxu0  ;;  %v4373_v53 = vadd.f32 %v4372_v40, %v12389_v25  ;;  %v4728_v40 = vpack.c.bf16 %v4568_v3, %v4552_v14 }
 0xbf6   :  { %v4277_v42 = vadd.f32 %v4276_v35, %v12362_v8  ;;  %v4325_v55 = vpop.f32.mrf.mxu1  ;;  %v8155_v35 = vld [vmem:[%s13505_s9 + $0x148] sm:$0xff] }
 0xbf7   :  { %v4326_v30 = vadd.f32 %v4325_v55, %v12367_v50  ;;  %6055 = vmatpush.bf16.msrb.mxu0 %v8155_v35  ;;  %v4535_v60 = vmax.f32 %v4373_v53, 0.0 }
 0xbf8   :  { %v4549_v38 = vmax.f32 %v4277_v42, 0.0  ;;  %v4226_v42 = vadd.f32 %v4225_v33, %v12381_v54 }
 0xbf9   :  { %v4550_v51 = vmax.f32 %v4326_v30, 0.0 }
 0xbfa   :  { %v12586_v55 = vpack.c.bf16 %v4549_v38, %v4533_v39  ;;  %v4532_v23 = vmax.f32 %v4226_v42, 0.0  ;;  %v13931_v42 = vld [vmem:[#allocation32_spill] sm:$0xff] }
 0xbfb   :  { %v4227_v30 = vpop.f32.mrf.mxu3  ;;  %v12589_v36 = vpack.c.bf16 %v4550_v51, %v4534_v2  ;;  %v4730_v2 = vpack.c.bf16 %v4570_v24, %v4554_v29  ;;  %v4731_v51 = vpack.c.bf16 %v4571_v26, %v4555_v58  ;;  %v13932_v24 = vld [vmem:[#allocation66_spill] sm:$0xff] }
 0xbfc   :  { %13930 = vst [vmem:[#allocation46_spill] sm:$0xff] %v12586_v55  ;;  %v4228_v5 = vadd.f32 %v4227_v30, %v12381_v54  ;;  %v4374_v48 = vpop.f32.mrf.mxu2  ;;  %v4729_v55 = vpack.c.bf16 %v4569_v0, %v4553_v15  ;;  %v3650_v26 = vadd.f32 %v13932_v24, %v11780_v1  ;;  %v13933_v15 = vld [vmem:[#allocation28_spill] sm:$0xff] }
 0xbfd   :  { %v4375_v33 = vadd.f32 %v4374_v48, %v12389_v25  ;;  %v4279_v39 = vpop.f32.mrf.mxu0  ;;  %v8146_v48 = vld [vmem:[%s13505_s9 + $0x100] sm:$0xff]  ;;  %v3748_v14 = vadd.f32 %v13933_v15, %v11774_v6 }
 0xbfe   :  { %v4548_v18 = vmax.f32 %v4228_v5, 0.0  ;;  %v4328_v38 = vpop.f32.mrf.mxu1  ;;  %6007 = vmatpush.bf16.msra.mxu3 %v8146_v48  ;;  %v4280_v27 = vadd.f32 %v4279_v39, %v12362_v8  ;;  %v13934_v5 = vld [vmem:[#allocation47_spill] sm:$0xff]  ;;  %v4600_v24 = vmax.f32 %v3650_v26, 0.0 }
 0xbff   :  { %v4551_v35 = vmax.f32 %v4375_v33, 0.0  ;;  %v4329_v0 = vadd.f32 %v4328_v38, %v12367_v50  ;;  %v3797_v29 = vadd.f32 %v13934_v5, %v11782_v9  ;;  %v13935_v33 = vld [vmem:[#allocation63_spill] sm:$0xff] }
 0xc00   :  { %5837 = vmatmul.bf16.gmra.mxu3 %v4728_v40  ;;  %5886 = vmatmul.bf16.gmra.mxu0 %v4729_v55  ;;  %v12593_v43 = vpack.c.bf16 %v4548_v18, %v4532_v23  ;;  %v3699_v55 = vadd.f32 %v13931_v42, %v11772_v56  ;;  %v3697_v39 = vadd.f32 %v13935_v33, %v11772_v56  ;;  %v13936_v23 = vld [vmem:[#allocation61_spill] sm:$0xff]  ;;  %v4565_v38 = vmax.f32 %v4280_v27, 0.0 }
 0xc01   :  { %5935 = vmatmul.bf16.gmra.mxu1 %v4730_v2  ;;  %5984 = vmatmul.bf16.gmra.mxu2 %v4731_v51  ;;  %v12598_v7 = vpack.c.bf16 %v4551_v35, %v4535_v60  ;;  %v3648_v18 = vadd.f32 %v13936_v23, %v11780_v1  ;;  %v13937_v60 = vld [vmem:[#allocation40_spill] sm:$0xff]  ;;  %v13938_v2 = vld [vmem:[#allocation34_spill] sm:$0xff]  ;;  %v4566_v48 = vmax.f32 %v4329_v0, 0.0  ;;  %v8170_v42 = vld [vmem:[%s13505_s9 + $0x1c0] sm:$0xff]  ;;  %v4603_v0 = vmax.f32 %v3797_v29, 0.0 }
 0xc02   :  { %v3746_v35 = vadd.f32 %v13937_v60, %v11774_v6  ;;  %v3795_v51 = vadd.f32 %v13938_v2, %v11782_v9  ;;  %v8154_v56 = vld [vmem:[%s13505_s9 + $0x140] sm:$0xff]  ;;  %v4601_v27 = vmax.f32 %v3699_v55, 0.0  ;;  %v4602_v9 = vmax.f32 %v3748_v14, 0.0  ;;  %6154 = vmatpush.bf16.msrb.mxu2 %v8170_v42 }
 0xc03   :  { %v4230_v44 = vpop.f32.mrf.mxu3  ;;  %v8162_v1 = vld [vmem:[%s13505_s9 + $0x180] sm:$0xff]  ;;  %6056 = vmatpush.bf16.msrb.mxu0 %v8154_v56  ;;  %v4584_v33 = vmax.f32 %v3648_v18, 0.0  ;;  %v8185_v18 = vld [vmem:[%s13505_s9 + $0x238] sm:$0xff] }
 0xc04   :  { %v4377_v34 = vpop.f32.mrf.mxu2  ;;  %v4231_v6 = vadd.f32 %v4230_v44, %v12381_v54  ;;  %6105 = vmatpush.bf16.msra.mxu1 %v8162_v1  ;;  %v4586_v55 = vmax.f32 %v3746_v35, 0.0  ;;  %v4587_v26 = vmax.f32 %v3795_v51, 0.0  ;;  %6196 = vmatpush.bf16.msrb.mxu3 %v8185_v18 }
 0xc05   :  { %v4281_v3 = vpop.f32.mrf.mxu0 }
 0xc06   :  { %v4282_v53 = vadd.f32 %v4281_v3, %v12362_v8  ;;  %v4330_v30 = vpop.f32.mrf.mxu1  ;;  %v4564_v14 = vmax.f32 %v4231_v6, 0.0 }
 0xc07   :  { %v4331_v58 = vadd.f32 %v4330_v30, %v12367_v50  ;;  %v4378_v30 = vadd.f32 %v4377_v34, %v12389_v25  ;;  %v4744_v34 = vpack.c.bf16 %v4600_v24, %v4584_v33 }
 0xc08   :  { %v4581_v40 = vmax.f32 %v4282_v53, 0.0 }
 0xc09   :  { %v4582_v3 = vmax.f32 %v4331_v58, 0.0  ;;  %v4585_v58 = vmax.f32 %v3697_v39, 0.0  ;;  %v4567_v42 = vmax.f32 %v4378_v30, 0.0 }
 0xc0a   :  { %v12630_v53 = vpack.c.bf16 %v4581_v40, %v4565_v38 }
 0xc0b   :  { %v4232_v15 = vpop.f32.mrf.mxu3  ;;  %v12633_v5 = vpack.c.bf16 %v4582_v3, %v4566_v48  ;;  %v4745_v2 = vpack.c.bf16 %v4601_v27, %v4585_v58  ;;  %v4746_v48 = vpack.c.bf16 %v4602_v9, %v4586_v55  ;;  %v4747_v3 = vpack.c.bf16 %v4603_v0, %v4587_v26  ;;  %v8209_v55 = vld [vmem:[%s13505_s9 + $0x2f8] sm:$0xff] }
 0xc0c   :  { %v4233_v23 = vadd.f32 %v4232_v15, %v12381_v54  ;;  %v4379_v60 = vpop.f32.mrf.mxu2  ;;  %v8193_v26 = vld [vmem:[%s13505_s9 + $0x278] sm:$0xff]  ;;  %6343 = vmatpush.bf16.msra.mxu2 %v8209_v55 }
 0xc0d   :  { %v4380_v44 = vadd.f32 %v4379_v60, %v12389_v25  ;;  %v4284_v38 = vpop.f32.mrf.mxu0  ;;  %6245 = vmatpush.bf16.msra.mxu0 %v8193_v26 }
 0xc0e   :  { %v4580_v29 = vmax.f32 %v4233_v23, 0.0  ;;  %v4333_v40 = vpop.f32.mrf.mxu1  ;;  %v4285_v1 = vadd.f32 %v4284_v38, %v12362_v8 }
 0xc0f   :  { %v4583_v56 = vmax.f32 %v4380_v44, 0.0  ;;  %v4334_v24 = vadd.f32 %v4333_v40, %v12367_v50  ;;  %v8201_v44 = vld [vmem:[%s13505_s9 + $0x2b8] sm:$0xff] }
 0xc10   :  { %5842 = vmatmul.bf16.gmra.mxu3 %v4744_v34  ;;  %5891 = vmatmul.bf16.gmra.mxu0 %v4745_v2  ;;  %v12637_v39 = vpack.c.bf16 %v4580_v29, %v4564_v14  ;;  %v4597_v15 = vmax.f32 %v4285_v1, 0.0 }
 0xc11   :  { %5940 = vmatmul.bf16.gmra.mxu1 %v4746_v48  ;;  %5989 = vmatmul.bf16.gmra.mxu2 %v4747_v3  ;;  %v12642_v35 = vpack.c.bf16 %v4583_v56, %v4567_v42  ;;  %v4598_v33 = vmax.f32 %v4334_v24, 0.0  ;;  %v13942_v24 = vld [vmem:[#allocation86_spill] sm:$0xff] }
 0xc12   :  { %6294 = vmatpush.bf16.msrb.mxu1 %v8201_v44 }
 0xc13   :  { %13939 = vst [vmem:[#allocation50_spill] sm:$0xff] %v12642_v35  ;;  %v4235_v51 = vpop.f32.mrf.mxu3 }
 0xc14   :  { %v4382_v27 = vpop.f32.mrf.mxu2  ;;  %v4236_v60 = vadd.f32 %v4235_v51, %v12381_v54 }
 0xc15   :  { %v4286_v6 = vpop.f32.mrf.mxu0  ;;  %v4383_v14 = vadd.f32 %v4382_v27, %v12389_v25  ;;  %v13943_v27 = vld [vmem:[#allocation49_spill] sm:$0xff] }
 0xc16   :  { %v4287_v9 = vadd.f32 %v4286_v6, %v12362_v8  ;;  %v4335_v0 = vpop.f32.mrf.mxu1  ;;  %v4596_v48 = vmax.f32 %v4236_v60, 0.0 }
 0xc17   :  { %v4336_v30 = vadd.f32 %v4335_v0, %v12367_v50  ;;  %v4599_v51 = vmax.f32 %v4383_v14, 0.0  ;;  %v13946_v0 = vld [vmem:[#allocation72_spill] sm:$0xff] }
 0xc18   :  { %v4613_v58 = vmax.f32 %v4287_v9, 0.0  ;;  %v13945_v9 = vld [vmem:[#allocation60_spill] sm:$0xff] }
 0xc19   :  { %v4614_v23 = vmax.f32 %v4336_v30, 0.0 }
 0xc1a   :  { %v12658_v38 = vpack.c.bf16 %v4613_v58, %v4597_v15  ;;  %v8184_v15 = vld [vmem:[%s13505_s9 + $0x230] sm:$0xff] }
 0xc1b   :  { %v4237_v29 = vpop.f32.mrf.mxu3  ;;  %v12661_v40 = vpack.c.bf16 %v4614_v23, %v4598_v33  ;;  %6197 = vmatpush.bf16.msrb.mxu3 %v8184_v15 }
 0xc1c   :  { %13940 = vst [vmem:[#allocation31_spill] sm:$0xff] %v12658_v38  ;;  %v4238_v34 = vadd.f32 %v4237_v29, %v12381_v54  ;;  %v4384_v2 = vpop.f32.mrf.mxu2  ;;  %v13983_v38 = vld [vmem:[#allocation17_spill] sm:$0xff] }
 0xc1d   :  { %13941 = vst [vmem:[#allocation39_spill] sm:$0xff] %v12661_v40  ;;  %v4385_v42 = vadd.f32 %v4384_v2, %v12389_v25  ;;  %v4289_v56 = vpop.f32.mrf.mxu0 }
 0xc1e   :  { %v4612_v3 = vmax.f32 %v4238_v34, 0.0  ;;  %v4338_v18 = vpop.f32.mrf.mxu1  ;;  %v4290_v33 = vadd.f32 %v4289_v56, %v12362_v8  ;;  %v8208_v56 = vld [vmem:[%s13505_s9 + $0x2f0] sm:$0xff] }
 0xc1f   :  { %v4615_v1 = vmax.f32 %v4385_v42, 0.0  ;;  %v4339_v60 = vadd.f32 %v4338_v18, %v12367_v50  ;;  %6344 = vmatpush.bf16.msra.mxu2 %v8208_v56 }
 0xc20   :  { %5847 = vmatmul.bf16.gmra.mxu3 %v13942_v24  ;;  %5896 = vmatmul.bf16.gmra.mxu0 %v13943_v27  ;;  %v12667_v6 = vpack.c.bf16 %v4612_v3, %v4596_v48  ;;  %v4629_v29 = vmax.f32 %v4290_v33, 0.0  ;;  %v8192_v3 = vld [vmem:[%s13505_s9 + $0x270] sm:$0xff] }
 0xc21   :  { %5945 = vmatmul.bf16.gmra.mxu1 %v13945_v9  ;;  %5994 = vmatmul.bf16.gmra.mxu2 %v13946_v0  ;;  %v12671_v30 = vpack.c.bf16 %v4615_v1, %v4599_v51  ;;  %v4630_v2 = vmax.f32 %v4339_v60, 0.0 }
 0xc22   :  { %13944 = vst [vmem:[#allocation78_spill] sm:$0xff] %v12667_v6  ;;  %6246 = vmatpush.bf16.msra.mxu0 %v8192_v3 }
 0xc23   :  { %13947 = vst [vmem:[#allocation29_spill] sm:$0xff] %v12671_v30  ;;  %v4240_v58 = vpop.f32.mrf.mxu3  ;;  %v13979_v30 = vld [vmem:[#allocation11_spill] sm:$0xff] }
 0xc24   :  { %v4387_v23 = vpop.f32.mrf.mxu2  ;;  %v4241_v48 = vadd.f32 %v4240_v58, %v12381_v54 }
 0xc25   :  { %v4291_v55 = vpop.f32.mrf.mxu0 }
 0xc26   :  { %v4292_v26 = vadd.f32 %v4291_v55, %v12362_v8  ;;  %v4340_v44 = vpop.f32.mrf.mxu1  ;;  %v8200_v8 = vld [vmem:[%s13505_s9 + $0x2b0] sm:$0xff]  ;;  %v4628_v15 = vmax.f32 %v4241_v48, 0.0 }
 0xc27   :  { %v4341_v14 = vadd.f32 %v4340_v44, %v12367_v50  ;;  %v4388_v50 = vadd.f32 %v4387_v23, %v12389_v25  ;;  %6295 = vmatpush.bf16.msrb.mxu1 %v8200_v8  ;;  %v13951_v23 = vld [vmem:[#allocation68_spill] sm:$0xff] }
 0xc28   :  { %v4645_v34 = vmax.f32 %v4292_v26, 0.0  ;;  %v13950_v26 = vld [vmem:[#allocation84_spill] sm:$0xff] }
 0xc29   :  { %v4646_v42 = vmax.f32 %v4341_v14, 0.0  ;;  %v4631_v60 = vmax.f32 %v4388_v50, 0.0  ;;  %v13953_v14 = vld [vmem:[#allocation83_spill] sm:$0xff] }
 0xc2a   :  { %v12690_v18 = vpack.c.bf16 %v4645_v34, %v4629_v29  ;;  %v8183_v34 = vld [vmem:[%s13505_s9 + $0x228] sm:$0xff] }
 0xc2b   :  { %v4242_v51 = vpop.f32.mrf.mxu3  ;;  %v12693_v1 = vpack.c.bf16 %v4646_v42, %v4630_v2  ;;  %6198 = vmatpush.bf16.msrb.mxu3 %v8183_v34  ;;  %v13959_v34 = vld [vmem:[#allocation80_spill] sm:$0xff] }
 0xc2c   :  { %13948 = vst [vmem:[#allocation58_spill] sm:$0xff] %v12690_v18  ;;  %v4243_v24 = vadd.f32 %v4242_v51, %v12381_v54  ;;  %v4389_v27 = vpop.f32.mrf.mxu2  ;;  %v12702_v54 = vld [vmem:[%s13506_s10] ss:$0 sm:$0xff] }
 0xc2d   :  { %13949 = vst [vmem:[#allocation45_spill] sm:$0xff] %v12693_v1  ;;  %v4390_v9 = vadd.f32 %v4389_v27, %v12389_v25  ;;  %v5862_v0 = vpop.f32.mrf.mxu0  ;;  %v13954_v25 = vld [vmem:[#allocation67_spill] sm:$0xff]  ;;  %v8191_v27 = vld [vmem:[%s13505_s9 + $0x268] sm:$0xff]  ;;  %v13975_v18 = vld [vmem:[#allocation9_spill] sm:$0xff] }
 0xc2e   :  { %v4644_v58 = vmax.f32 %v4243_v24, 0.0  ;;  %v5911_v33 = vpop.f32.mrf.mxu1  ;;  %v8207_v24 = vld [vmem:[%s13505_s9 + $0x2e8] sm:$0xff]  ;;  %6247 = vmatpush.bf16.msra.mxu0 %v8191_v27 }
 0xc2f   :  { %v4647_v55 = vmax.f32 %v4390_v9, 0.0  ;;  %v8199_v9 = vld [vmem:[%s13505_s9 + $0x2a8] sm:$0xff]  ;;  %6345 = vmatpush.bf16.msra.mxu2 %v8207_v24 }
 0xc30   :  { %6008 = vmatmul.bf16.vlgmr.msra.gmra.mxu3 %v13950_v26  ;;  %6057 = vmatmul.bf16.vlgmr.msrb.gmra.mxu0 %v13951_v23  ;;  %v12704_v44 = vpack.c.bf16 %v4644_v58, %v4628_v15  ;;  %v13956_v23 = vld [vmem:[#allocation54_spill] sm:$0xff] }
 0xc31   :  { %6106 = vmatmul.bf16.vlgmr.msra.gmra.mxu1 %v13953_v14  ;;  %6155 = vmatmul.bf16.vlgmr.msrb.gmra.mxu2 %v13954_v25  ;;  %v12708_v29 = vpack.c.bf16 %v4647_v55, %v4631_v60  ;;  %v13957_v14 = vld [vmem:[#allocation59_spill] sm:$0xff]  ;;  %v13958_v25 = vld [vmem:[#allocation85_spill] sm:$0xff] }
 0xc32   :  { %13952 = vst [vmem:[#allocation76_spill] sm:$0xff] %v12704_v44  ;;  %6296 = vmatpush.bf16.msrb.mxu1 %v8199_v9 }
 0xc33   :  { %13955 = vst [vmem:[#allocation36_spill] sm:$0xff] %v12708_v29  ;;  %v5813_v2 = vpop.f32.mrf.mxu3  ;;  %v13971_v29 = vld [vmem:[#allocation5_spill] sm:$0xff] }
 0xc34   :  { %v5814_v42 = vadd.f32 %v12702_v54, %v5813_v2  ;;  %v5960_v48 = vpop.f32.mrf.mxu2 }
 0xc35   :  { %v5864_v56 = vpop.f32.mrf.mxu0 }
 0xc36   :  { %v5863_v3 = vadd.f32 %v5862_v0, %v5814_v42  ;;  %v5913_v8 = vpop.f32.mrf.mxu1  ;;  %v8182_v42 = vld [vmem:[%s13505_s9 + $0x220] sm:$0xff] }
 0xc37   :  { %6199 = vmatpush.bf16.msrb.mxu3 %v8182_v42  ;;  %v13961_v42 = vld [vmem:[#allocation75_spill] sm:$0xff] }
 0xc38   :  { %v5912_v50 = vadd.f32 %v5911_v33, %v5863_v3 }
 0xc3a   :  { %v12714_v51 = vadd.f32 %v5960_v48, %v5912_v50 }
 0xc3b   :  { %v5815_v15 = vpop.f32.mrf.mxu3 }
 0xc3c   :  { %v5816_v58 = vadd.f32 %v12702_v54, %v5815_v15  ;;  %v5962_v0 = vpop.f32.mrf.mxu2  ;;  %v8206_v15 = vld [vmem:[%s13505_s9 + $0x2e0] sm:$0xff] }
 0xc3d   :  { %v5867_v33 = vpop.f32.mrf.mxu0  ;;  %6346 = vmatpush.bf16.msra.mxu2 %v8206_v15 }
 0xc3e   :  { %v5865_v60 = vadd.f32 %v5864_v56, %v5816_v58  ;;  %v5916_v55 = vpop.f32.mrf.mxu1  ;;  %v8190_v58 = vld [vmem:[%s13505_s9 + $0x260] sm:$0xff] }
 0xc3f   :  { %6248 = vmatpush.bf16.msra.mxu0 %v8190_v58 }
 0xc40   :  { %v5914_v26 = vadd.f32 %v5913_v8, %v5865_v60  ;;  %6013 = vmatmul.bf16.gmra.mxu3 %v13956_v23  ;;  %6062 = vmatmul.bf16.gmra.mxu0 %v13957_v14 }
 0xc41   :  { %6111 = vmatmul.bf16.gmra.mxu1 %v13958_v25  ;;  %6160 = vmatmul.bf16.gmra.mxu2 %v13959_v34  ;;  %v13960_v34 = vld [vmem:[#allocation64_spill] sm:$0xff] }
 0xc42   :  { %v12730_v2 = vadd.f32 %v5962_v0, %v5914_v26  ;;  %v8198_v0 = vld [vmem:[%s13505_s9 + $0x2a0] sm:$0xff] }
 0xc43   :  { %v5818_v48 = vpop.f32.mrf.mxu3  ;;  %6297 = vmatpush.bf16.msrb.mxu1 %v8198_v0 }
 0xc44   :  { %v5819_v3 = vadd.f32 %v12702_v54, %v5818_v48  ;;  %v5965_v56 = vpop.f32.mrf.mxu2  ;;  %v13962_v48 = vld [vmem:[#allocation81_spill] sm:$0xff] }
 0xc45   :  { %v5869_v8 = vpop.f32.mrf.mxu0 }
 0xc46   :  { %v5868_v50 = vadd.f32 %v5867_v33, %v5819_v3  ;;  %v5918_v24 = vpop.f32.mrf.mxu1  ;;  %v13963_v3 = vld [vmem:[#allocation74_spill] sm:$0xff] }
 0xc48   :  { %v5917_v27 = vadd.f32 %v5916_v55, %v5868_v50  ;;  %v8181_v50 = vld [vmem:[%s13505_s9 + $0x218] sm:$0xff] }
 0xc49   :  { %6200 = vmatpush.bf16.msrb.mxu3 %v8181_v50 }
 0xc4a   :  { %v12736_v9 = vadd.f32 %v5965_v56, %v5917_v27 }
 0xc4b   :  { %v5820_v60 = vpop.f32.mrf.mxu3 }
 0xc4c   :  { %v5821_v26 = vadd.f32 %v12702_v54, %v5820_v60  ;;  %v5967_v33 = vpop.f32.mrf.mxu2 }
 0xc4d   :  { %v5872_v55 = vpop.f32.mrf.mxu0 }
 0xc4e   :  { %v5870_v23 = vadd.f32 %v5869_v8, %v5821_v26  ;;  %v5921_v14 = vpop.f32.mrf.mxu1 }
 0xc50   :  { %v5919_v25 = vadd.f32 %v5918_v24, %v5870_v23  ;;  %6018 = vmatmul.bf16.gmra.mxu3 %v13960_v34  ;;  %6067 = vmatmul.bf16.gmra.mxu0 %v13961_v42  ;;  %v8189_v23 = vld [vmem:[%s13505_s9 + $0x258] sm:$0xff] }
 0xc51   :  { %6116 = vmatmul.bf16.gmra.mxu1 %v13962_v48  ;;  %6165 = vmatmul.bf16.gmra.mxu2 %v13963_v3 }
 0xc52   :  { %v12752_v56 = vadd.f32 %v5967_v33, %v5919_v25  ;;  %v8205_v33 = vld [vmem:[%s13505_s9 + $0x2d8] sm:$0xff]  ;;  %6249 = vmatpush.bf16.msra.mxu0 %v8189_v23 }
 0xc53   :  { %v5823_v27 = vpop.f32.mrf.mxu3  ;;  %v8197_v25 = vld [vmem:[%s13505_s9 + $0x298] sm:$0xff]  ;;  %6347 = vmatpush.bf16.msra.mxu2 %v8205_v33  ;;  %v8180_v33 = vld [vmem:[%s13505_s9 + $0x210] sm:$0xff] }
 0xc54   :  { %v5824_v15 = vadd.f32 %v12702_v54, %v5823_v27  ;;  %v5970_v8 = vpop.f32.mrf.mxu2  ;;  %6298 = vmatpush.bf16.msrb.mxu1 %v8197_v25  ;;  %v13964_v27 = vld [vmem:[#allocation87_spill] sm:$0xff]  ;;  %6201 = vmatpush.bf16.msrb.mxu3 %v8180_v33 }
 0xc55   :  { %v5874_v24 = vpop.f32.mrf.mxu0 }
 0xc56   :  { %v5873_v58 = vadd.f32 %v5872_v55, %v5824_v15  ;;  %v5923_v0 = vpop.f32.mrf.mxu1  ;;  %v13965_v15 = vld [vmem:[#allocation57_spill] sm:$0xff] }
 0xc58   :  { %v5922_v60 = vadd.f32 %v5921_v14, %v5873_v58  ;;  %v13967_v58 = vld [vmem:[#allocation88_spill] sm:$0xff] }
 0xc5a   :  { %v12758_v26 = vadd.f32 %v5970_v8, %v5922_v60  ;;  %v13966_v8 = vld [vmem:[#allocation79_spill] sm:$0xff] }
 0xc5b   :  { %v5825_v34 = vpop.f32.mrf.mxu3 }
 0xc5c   :  { %v5826_v42 = vadd.f32 %v12702_v54, %v5825_v34  ;;  %v5972_v55 = vpop.f32.mrf.mxu2 }
 0xc5d   :  { %v5877_v14 = vpop.f32.mrf.mxu0 }
 0xc5e   :  { %v5875_v48 = vadd.f32 %v5874_v24, %v5826_v42  ;;  %v5926_v3 = vpop.f32.mrf.mxu1 }
 0xc60   :  { %v5924_v50 = vadd.f32 %v5923_v0, %v5875_v48  ;;  %6023 = vmatmul.bf16.gmra.mxu3 %v13964_v27  ;;  %6072 = vmatmul.bf16.gmra.mxu0 %v13965_v15  ;;  %v8196_v15 = vld [vmem:[%s13505_s9 + $0x290] sm:$0xff] }
 0xc61   :  { %6121 = vmatmul.bf16.gmra.mxu1 %v13966_v8  ;;  %6170 = vmatmul.bf16.gmra.mxu2 %v13967_v58 }
 0xc62   :  { %v12774_v60 = vadd.f32 %v5972_v55, %v5924_v50  ;;  %v8204_v55 = vld [vmem:[%s13505_s9 + $0x2d0] sm:$0xff]  ;;  %6299 = vmatpush.bf16.msrb.mxu1 %v8196_v15 }
 0xc63   :  { %v5828_v23 = vpop.f32.mrf.mxu3  ;;  %v8188_v50 = vld [vmem:[%s13505_s9 + $0x250] sm:$0xff]  ;;  %6348 = vmatpush.bf16.msra.mxu2 %v8204_v55  ;;  %v8179_v55 = vld [vmem:[%s13505_s9 + $0x208] sm:$0xff] }
 0xc64   :  { %v5829_v25 = vadd.f32 %v12702_v54, %v5828_v23  ;;  %v5975_v24 = vpop.f32.mrf.mxu2  ;;  %6250 = vmatpush.bf16.msra.mxu0 %v8188_v50  ;;  %6202 = vmatpush.bf16.msrb.mxu3 %v8179_v55 }
 0xc65   :  { %v5879_v0 = vpop.f32.mrf.mxu0 }
 0xc66   :  { %v5878_v34 = vadd.f32 %v5877_v14, %v5829_v25  ;;  %v5928_v42 = vpop.f32.mrf.mxu1 }
 0xc68   :  { %v5927_v48 = vadd.f32 %v5926_v3, %v5878_v34  ;;  %v13969_v34 = vld [vmem:[#allocation89_spill] sm:$0xff] }
 0xc6a   :  { %v12780_v27 = vadd.f32 %v5975_v24, %v5927_v48  ;;  %v13968_v24 = vld [vmem:[#allocation77_spill] sm:$0xff] }
 0xc6b   :  { %v5830_v8 = vpop.f32.mrf.mxu3  ;;  %v13970_v48 = vld [vmem:[#allocation69_spill] sm:$0xff] }
 0xc6c   :  { %v5831_v58 = vadd.f32 %v12702_v54, %v5830_v8  ;;  %v5977_v14 = vpop.f32.mrf.mxu2 }
 0xc6d   :  { %v5882_v3 = vpop.f32.mrf.mxu0 }
 0xc6e   :  { %v5880_v33 = vadd.f32 %v5879_v0, %v5831_v58  ;;  %v5931_v23 = vpop.f32.mrf.mxu1 }
 0xc70   :  { %v5929_v25 = vadd.f32 %v5928_v42, %v5880_v33  ;;  %6028 = vmatmul.bf16.gmra.mxu3 %v13968_v24  ;;  %6077 = vmatmul.bf16.gmra.mxu0 %v13969_v34 }
 0xc71   :  { %6126 = vmatmul.bf16.gmra.mxu1 %v13970_v48  ;;  %6175 = vmatmul.bf16.gmra.mxu2 %v13971_v29  ;;  %v8203_v29 = vld [vmem:[%s13505_s9 + $0x2c8] sm:$0xff] }
 0xc72   :  { %v12796_v1 = vadd.f32 %v5977_v14, %v5929_v25  ;;  %v8187_v14 = vld [vmem:[%s13505_s9 + $0x248] sm:$0xff]  ;;  %6349 = vmatpush.bf16.msra.mxu2 %v8203_v29  ;;  %v8178_v29 = vld [vmem:[%s13505_s9 + $0x200] sm:$0xff] }
 0xc73   :  { %v5833_v50 = vpop.f32.mrf.mxu3  ;;  %v8195_v25 = vld [vmem:[%s13505_s9 + $0x288] sm:$0xff]  ;;  %6251 = vmatpush.bf16.msra.mxu0 %v8187_v14  ;;  %6203 = vmatpush.bf16.msrb.mxu3 %v8178_v29 }
 0xc74   :  { %v5834_v15 = vadd.f32 %v12702_v54, %v5833_v50  ;;  %v5980_v0 = vpop.f32.mrf.mxu2  ;;  %6300 = vmatpush.bf16.msrb.mxu1 %v8195_v25 }
 0xc75   :  { %v5884_v42 = vpop.f32.mrf.mxu0 }
 0xc76   :  { %v5883_v8 = vadd.f32 %v5882_v3, %v5834_v15  ;;  %v5933_v58 = vpop.f32.mrf.mxu1 }
 0xc78   :  { %v5932_v33 = vadd.f32 %v5931_v23, %v5883_v8  ;;  %v13973_v8 = vld [vmem:[#allocation6_spill] sm:$0xff] }
 0xc7a   :  { %v12802_v24 = vadd.f32 %v5980_v0, %v5932_v33  ;;  %v13972_v0 = vld [vmem:[#allocation8_spill] sm:$0xff]  ;;  %v13974_v33 = vld [vmem:[#allocation7_spill] sm:$0xff] }
 0xc7b   :  { %v5835_v34 = vpop.f32.mrf.mxu3 }
 0xc7c   :  { %v5836_v48 = vadd.f32 %v12702_v54, %v5835_v34  ;;  %v5982_v3 = vpop.f32.mrf.mxu2 }
 0xc7d   :  { %v5887_v23 = vpop.f32.mrf.mxu0 }
 0xc7e   :  { %v5885_v55 = vadd.f32 %v5884_v42, %v5836_v48  ;;  %v5936_v50 = vpop.f32.mrf.mxu1 }
 0xc80   :  { %v5934_v15 = vadd.f32 %v5933_v58, %v5885_v55  ;;  %6033 = vmatmul.bf16.gmra.mxu3 %v13972_v0  ;;  %6082 = vmatmul.bf16.gmra.mxu0 %v13973_v8 }
 0xc81   :  { %6131 = vmatmul.bf16.gmra.mxu1 %v13974_v33  ;;  %6180 = vmatmul.bf16.gmra.mxu2 %v13975_v18  ;;  %v8202_v18 = vld [vmem:[%s13505_s9 + $0x2c0] sm:$0xff] }
 0xc82   :  { %v12818_v44 = vadd.f32 %v5982_v3, %v5934_v15  ;;  %v8186_v3 = vld [vmem:[%s13505_s9 + $0x240] sm:$0xff]  ;;  %6350 = vmatpush.bf16.msra.mxu2 %v8202_v18  ;;  %v8217_v18 = vld [vmem:[%s13505_s9 + $0x338] sm:$0xff] }
 0xc83   :  { %v5838_v14 = vpop.f32.mrf.mxu3  ;;  %v8194_v15 = vld [vmem:[%s13505_s9 + $0x280] sm:$0xff]  ;;  %6252 = vmatpush.bf16.msra.mxu0 %v8186_v3  ;;  %6392 = vmatpush.bf16.msra.mxu3 %v8217_v18 }
 0xc84   :  { %v5839_v25 = vadd.f32 %v12702_v54, %v5838_v14  ;;  %v5985_v42 = vpop.f32.mrf.mxu2  ;;  %6301 = vmatpush.bf16.msrb.mxu1 %v8194_v15 }
 0xc85   :  { %v5889_v58 = vpop.f32.mrf.mxu0 }
 0xc86   :  { %v5888_v34 = vadd.f32 %v5887_v23, %v5839_v25  ;;  %v5938_v48 = vpop.f32.mrf.mxu1 }
 0xc88   :  { %v5937_v55 = vadd.f32 %v5936_v50, %v5888_v34  ;;  %v13977_v34 = vld [vmem:[#allocation10_spill] sm:$0xff] }
 0xc8a   :  { %v12824_v0 = vadd.f32 %v5985_v42, %v5937_v55  ;;  %v13976_v42 = vld [vmem:[#allocation13_spill] sm:$0xff]  ;;  %v13978_v55 = vld [vmem:[#allocation12_spill] sm:$0xff] }
 0xc8b   :  { %v5840_v8 = vpop.f32.mrf.mxu3 }
 0xc8c   :  { %v5841_v33 = vadd.f32 %v12702_v54, %v5840_v8  ;;  %v5987_v23 = vpop.f32.mrf.mxu2 }
 0xc8d   :  { %v5892_v50 = vpop.f32.mrf.mxu0 }
 0xc8e   :  { %v5890_v29 = vadd.f32 %v5889_v58, %v5841_v33  ;;  %v5941_v14 = vpop.f32.mrf.mxu1 }
 0xc90   :  { %v5939_v25 = vadd.f32 %v5938_v48, %v5890_v29  ;;  %6038 = vmatmul.bf16.gmra.mxu3 %v13976_v42  ;;  %6087 = vmatmul.bf16.gmra.mxu0 %v13977_v34 }
 0xc91   :  { %6136 = vmatmul.bf16.gmra.mxu1 %v13978_v55  ;;  %6185 = vmatmul.bf16.gmra.mxu2 %v13979_v30  ;;  %v8241_v30 = vld [vmem:[%s13505_s9 + $0x3f8] sm:$0xff] }
 0xc92   :  { %v12840_v40 = vadd.f32 %v5987_v23, %v5939_v25  ;;  %v8225_v23 = vld [vmem:[%s13505_s9 + $0x378] sm:$0xff]  ;;  %6539 = vmatpush.bf16.msrb.mxu2 %v8241_v30  ;;  %v8216_v30 = vld [vmem:[%s13505_s9 + $0x330] sm:$0xff] }
 0xc93   :  { %v5843_v3 = vpop.f32.mrf.mxu3  ;;  %v8233_v25 = vld [vmem:[%s13505_s9 + $0x3b8] sm:$0xff]  ;;  %6441 = vmatpush.bf16.msrb.mxu0 %v8225_v23  ;;  %6393 = vmatpush.bf16.msra.mxu3 %v8216_v30 }
 0xc94   :  { %v5844_v15 = vadd.f32 %v12702_v54, %v5843_v3  ;;  %v5990_v58 = vpop.f32.mrf.mxu2  ;;  %6490 = vmatpush.bf16.msra.mxu1 %v8233_v25 }
 0xc95   :  { %v5894_v48 = vpop.f32.mrf.mxu0 }
 0xc96   :  { %v5893_v8 = vadd.f32 %v5892_v50, %v5844_v15  ;;  %v5943_v33 = vpop.f32.mrf.mxu1 }
 0xc98   :  { %v5942_v29 = vadd.f32 %v5941_v14, %v5893_v8  ;;  %v13981_v8 = vld [vmem:[#allocation14_spill] sm:$0xff] }
 0xc9a   :  { %v12846_v42 = vadd.f32 %v5990_v58, %v5942_v29  ;;  %v13980_v58 = vld [vmem:[#allocation16_spill] sm:$0xff]  ;;  %v13982_v29 = vld [vmem:[#allocation15_spill] sm:$0xff] }
 0xc9b   :  { %v5845_v34 = vpop.f32.mrf.mxu3 }
 0xc9c   :  { %v5846_v55 = vadd.f32 %v12702_v54, %v5845_v34  ;;  %v5992_v50 = vpop.f32.mrf.mxu2 }
 0xc9d   :  { %v5897_v14 = vpop.f32.mrf.mxu0 }
 0xc9e   :  { %v5895_v18 = vadd.f32 %v5894_v48, %v5846_v55  ;;  %v5946_v3 = vpop.f32.mrf.mxu1 }
 0xca0   :  { %v5944_v15 = vadd.f32 %v5943_v33, %v5895_v18  ;;  %6043 = vmatmul.bf16.gmra.mxu3 %v13980_v58  ;;  %6092 = vmatmul.bf16.gmra.mxu0 %v13981_v8 }
 0xca1   :  { %6141 = vmatmul.bf16.gmra.mxu1 %v13982_v29  ;;  %6190 = vmatmul.bf16.gmra.mxu2 %v13983_v38  ;;  %v8240_v38 = vld [vmem:[%s13505_s9 + $0x3f0] sm:$0xff] }
 0xca2   :  { %v12862_v6 = vadd.f32 %v5992_v50, %v5944_v15  ;;  %v8224_v50 = vld [vmem:[%s13505_s9 + $0x370] sm:$0xff]  ;;  %6540 = vmatpush.bf16.msrb.mxu2 %v8240_v38 }
 0xca3   :  { %v5848_v23 = vpop.f32.mrf.mxu3  ;;  %v8232_v15 = vld [vmem:[%s13505_s9 + $0x3b0] sm:$0xff]  ;;  %6442 = vmatpush.bf16.msrb.mxu0 %v8224_v50 }
 0xca4   :  { %v5849_v25 = vadd.f32 %v12702_v54, %v5848_v23  ;;  %v5995_v48 = vpop.f32.mrf.mxu2  ;;  %6491 = vmatpush.bf16.msra.mxu1 %v8232_v15 }
 0xca5   :  { %v5899_v33 = vpop.f32.mrf.mxu0 }
 0xca6   :  { %v5898_v34 = vadd.f32 %v5897_v14, %v5849_v25  ;;  %v5948_v55 = vpop.f32.mrf.mxu1 }
 0xca8   :  { %v5947_v18 = vadd.f32 %v5946_v3, %v5898_v34  ;;  %v13985_v34 = vld [vmem:[#allocation19_spill] sm:$0xff] }
 0xcaa   :  { %v12868_v58 = vadd.f32 %v5995_v48, %v5947_v18  ;;  %v13984_v48 = vld [vmem:[#allocation18_spill] sm:$0xff]  ;;  %v13986_v18 = vld [vmem:[#allocation20_spill] sm:$0xff] }
 0xcab   :  { %v5850_v8 = vpop.f32.mrf.mxu3 }
 0xcac   :  { %v5851_v29 = vadd.f32 %v12702_v54, %v5850_v8  ;;  %v5997_v14 = vpop.f32.mrf.mxu2  ;;  %v8215_v54 = vld [vmem:[%s13505_s9 + $0x328] sm:$0xff] }
 0xcad   :  { %v6058_v3 = vpop.f32.mrf.mxu0  ;;  %6394 = vmatpush.bf16.msra.mxu3 %v8215_v54 }
 0xcae   :  { %v5900_v30 = vadd.f32 %v5899_v33, %v5851_v29  ;;  %v6107_v23 = vpop.f32.mrf.mxu1 }
 0xcb0   :  { %v5949_v25 = vadd.f32 %v5948_v55, %v5900_v30  ;;  %6204 = vmatmul.bf16.vlgmr.msrb.gmra.mxu3 %v12093_v46  ;;  %6253 = vmatmul.bf16.vlgmr.msra.gmra.mxu0 %v13984_v48  ;;  %v8223_v30 = vld [vmem:[%s13505_s9 + $0x368] sm:$0xff] }
 0xcb1   :  { %6302 = vmatmul.bf16.vlgmr.msrb.gmra.mxu1 %v13985_v34  ;;  %6351 = vmatmul.bf16.vlgmr.msra.gmra.mxu2 %v13986_v18 }
 0xcb2   :  { %v12884_v35 = vadd.f32 %v5997_v14, %v5949_v25  ;;  %v8239_v14 = vld [vmem:[%s13505_s9 + $0x3e8] sm:$0xff]  ;;  %6443 = vmatpush.bf16.msrb.mxu0 %v8223_v30 }
 0xcb3   :  { %v6009_v38 = vpop.f32.mrf.mxu3  ;;  %6541 = vmatpush.bf16.msrb.mxu2 %v8239_v14 }
 0xcb4   :  { %v6010_v50 = vadd.f32 %v6009_v38, %v12714_v51  ;;  %v6156_v33 = vpop.f32.mrf.mxu2  ;;  %v8231_v51 = vld [vmem:[%s13505_s9 + $0x3a8] sm:$0xff] }
 0xcb5   :  { %v6060_v55 = vpop.f32.mrf.mxu0  ;;  %6492 = vmatpush.bf16.msra.mxu1 %v8231_v51  ;;  %v13987_v38 = vld [vmem:[#allocation90_spill] sm:$0xff] }
 0xcb6   :  { %v6059_v15 = vadd.f32 %v6058_v3, %v6010_v50  ;;  %v6109_v46 = vpop.f32.mrf.mxu1  ;;  %v13988_v50 = vld [vmem:[#allocation91_spill] sm:$0xff] }
 0xcb8   :  { %v6108_v8 = vadd.f32 %v6107_v23, %v6059_v15 }
 0xcba   :  { %v12890_v29 = vadd.f32 %v6156_v33, %v6108_v8  ;;  %v13989_v33 = vld [vmem:[#allocation92_spill] sm:$0xff] }
 0xcbb   :  { %v6011_v25 = vpop.f32.mrf.mxu3 }
 0xcbc   :  { %v6012_v48 = vadd.f32 %v6011_v25, %v12730_v2  ;;  %v6158_v3 = vpop.f32.mrf.mxu2  ;;  %v8214_v2 = vld [vmem:[%s13505_s9 + $0x320] sm:$0xff] }
 0xcbd   :  { %v6063_v23 = vpop.f32.mrf.mxu0  ;;  %6395 = vmatpush.bf16.msra.mxu3 %v8214_v2  ;;  %v13990_v2 = vld [vmem:[#allocation93_spill] sm:$0xff] }
 0xcbe   :  { %v6061_v34 = vadd.f32 %v6060_v55, %v6012_v48  ;;  %v6112_v18 = vpop.f32.mrf.mxu1  ;;  %v8238_v48 = vld [vmem:[%s13505_s9 + $0x3e0] sm:$0xff] }
 0xcbf   :  { %6542 = vmatpush.bf16.msrb.mxu2 %v8238_v48 }
 0xcc0   :  { %v6110_v54 = vadd.f32 %v6109_v46, %v6061_v34  ;;  %6209 = vmatmul.bf16.gmra.mxu3 %v12133_v32  ;;  %6258 = vmatmul.bf16.gmra.mxu0 %v13987_v38 }
 0xcc1   :  { %6307 = vmatmul.bf16.gmra.mxu1 %v13988_v50  ;;  %6356 = vmatmul.bf16.gmra.mxu2 %v13989_v33 }
 0xcc2   :  { %v12906_v15 = vadd.f32 %v6158_v3, %v6110_v54  ;;  %v8222_v3 = vld [vmem:[%s13505_s9 + $0x360] sm:$0xff] }
 0xcc3   :  { %v6014_v8 = vpop.f32.mrf.mxu3  ;;  %6444 = vmatpush.bf16.msrb.mxu0 %v8222_v3 }
 0xcc4   :  { %v6015_v14 = vadd.f32 %v6014_v8, %v12736_v9  ;;  %v6161_v55 = vpop.f32.mrf.mxu2  ;;  %v8230_v9 = vld [vmem:[%s13505_s9 + $0x3a0] sm:$0xff]  ;;  %v13991_v8 = vld [vmem:[#allocation94_spill] sm:$0xff] }
 0xcc5   :  { %v6065_v46 = vpop.f32.mrf.mxu0  ;;  %6493 = vmatpush.bf16.msra.mxu1 %v8230_v9 }
 0xcc6   :  { %v6064_v30 = vadd.f32 %v6063_v23, %v6015_v14  ;;  %v6114_v32 = vpop.f32.mrf.mxu1  ;;  %v13992_v14 = vld [vmem:[#allocation95_spill] sm:$0xff] }
 0xcc8   :  { %v6113_v51 = vadd.f32 %v6112_v18, %v6064_v30 }
 0xcca   :  { %v12912_v25 = vadd.f32 %v6161_v55, %v6113_v51 }
 0xccb   :  { %v6016_v34 = vpop.f32.mrf.mxu3 }
 0xccc   :  { %v6017_v54 = vadd.f32 %v6016_v34, %v12752_v56  ;;  %v6163_v23 = vpop.f32.mrf.mxu2  ;;  %v8213_v56 = vld [vmem:[%s13505_s9 + $0x318] sm:$0xff] }
 0xccd   :  { %v6068_v18 = vpop.f32.mrf.mxu0  ;;  %6396 = vmatpush.bf16.msra.mxu3 %v8213_v56  ;;  %v8237_v34 = vld [vmem:[%s13505_s9 + $0x3d8] sm:$0xff]  ;;  %v13994_v56 = vld [vmem:[#allocation97_spill] sm:$0xff] }
 0xcce   :  { %v6066_v38 = vadd.f32 %v6065_v46, %v6017_v54  ;;  %v6117_v50 = vpop.f32.mrf.mxu1  ;;  %v8221_v54 = vld [vmem:[%s13505_s9 + $0x358] sm:$0xff]  ;;  %6543 = vmatpush.bf16.msrb.mxu2 %v8237_v34 }
 0xccf   :  { %6445 = vmatpush.bf16.msrb.mxu0 %v8221_v54 }
 0xcd0   :  { %v6115_v33 = vadd.f32 %v6114_v32, %v6066_v38  ;;  %6214 = vmatmul.bf16.gmra.mxu3 %v12169_v41  ;;  %6263 = vmatmul.bf16.gmra.mxu0 %v13990_v2 }
 0xcd1   :  { %6312 = vmatmul.bf16.gmra.mxu1 %v13991_v8  ;;  %6361 = vmatmul.bf16.gmra.mxu2 %v13992_v14  ;;  %v13993_v14 = vld [vmem:[#allocation96_spill] sm:$0xff] }
 0xcd2   :  { %v12928_v55 = vadd.f32 %v6163_v23, %v6115_v33 }
 0xcd3   :  { %v6019_v30 = vpop.f32.mrf.mxu3 }
 0xcd4   :  { %v6020_v51 = vadd.f32 %v6019_v30, %v12758_v26  ;;  %v6166_v46 = vpop.f32.mrf.mxu2  ;;  %v8229_v26 = vld [vmem:[%s13505_s9 + $0x398] sm:$0xff]  ;;  %v13995_v30 = vld [vmem:[#allocation98_spill] sm:$0xff] }
 0xcd5   :  { %v6070_v32 = vpop.f32.mrf.mxu0  ;;  %6494 = vmatpush.bf16.msra.mxu1 %v8229_v26  ;;  %v8236_v26 = vld [vmem:[%s13505_s9 + $0x3d0] sm:$0xff] }
 0xcd6   :  { %v6069_v48 = vadd.f32 %v6068_v18, %v6020_v51  ;;  %v6119_v41 = vpop.f32.mrf.mxu1  ;;  %6544 = vmatpush.bf16.msrb.mxu2 %v8236_v26 }
 0xcd8   :  { %v6118_v3 = vadd.f32 %v6117_v50, %v6069_v48 }
 0xcda   :  { %v12934_v9 = vadd.f32 %v6166_v46, %v6118_v3 }
 0xcdb   :  { %v6021_v23 = vpop.f32.mrf.mxu3 }
 0xcdc   :  { %v6022_v38 = vadd.f32 %v6021_v23, %v12774_v60  ;;  %v6168_v18 = vpop.f32.mrf.mxu2  ;;  %v8212_v60 = vld [vmem:[%s13505_s9 + $0x310] sm:$0xff] }
 0xcdd   :  { %v6073_v50 = vpop.f32.mrf.mxu0  ;;  %6397 = vmatpush.bf16.msra.mxu3 %v8212_v60  ;;  %v8220_v23 = vld [vmem:[%s13505_s9 + $0x350] sm:$0xff]  ;;  %v13998_v60 = vld [vmem:[#allocation101_spill] sm:$0xff] }
 0xcde   :  { %v6071_v33 = vadd.f32 %v6070_v32, %v6022_v38  ;;  %v6122_v2 = vpop.f32.mrf.mxu1  ;;  %6446 = vmatpush.bf16.msrb.mxu0 %v8220_v23  ;;  %v8235_v23 = vld [vmem:[%s13505_s9 + $0x3c8] sm:$0xff] }
 0xcdf   :  { %6545 = vmatpush.bf16.msrb.mxu2 %v8235_v23 }
 0xce0   :  { %v6120_v8 = vadd.f32 %v6119_v41, %v6071_v33  ;;  %6219 = vmatmul.bf16.gmra.mxu3 %v12205_v16  ;;  %6268 = vmatmul.bf16.gmra.mxu0 %v13993_v14 }
 0xce1   :  { %6317 = vmatmul.bf16.gmra.mxu1 %v13994_v56  ;;  %6366 = vmatmul.bf16.gmra.mxu2 %v13995_v30  ;;  %v13996_v56 = vld [vmem:[#allocation99_spill] sm:$0xff]  ;;  %v13997_v30 = vld [vmem:[#allocation100_spill] sm:$0xff] }
 0xce2   :  { %v12950_v51 = vadd.f32 %v6168_v18, %v6120_v8 }
 0xce3   :  { %v6024_v46 = vpop.f32.mrf.mxu3 }
 0xce4   :  { %v6025_v48 = vadd.f32 %v6024_v46, %v12780_v27  ;;  %v6171_v32 = vpop.f32.mrf.mxu2  ;;  %v8228_v27 = vld [vmem:[%s13505_s9 + $0x390] sm:$0xff] }
 0xce5   :  { %v6075_v41 = vpop.f32.mrf.mxu0  ;;  %6495 = vmatpush.bf16.msra.mxu1 %v8228_v27  ;;  %v8219_v27 = vld [vmem:[%s13505_s9 + $0x348] sm:$0xff] }
 0xce6   :  { %v6074_v3 = vadd.f32 %v6073_v50, %v6025_v48  ;;  %v6124_v16 = vpop.f32.mrf.mxu1  ;;  %6447 = vmatpush.bf16.msrb.mxu0 %v8219_v27 }
 0xce8   :  { %v6123_v34 = vadd.f32 %v6122_v2, %v6074_v3 }
 0xcea   :  { %v12956_v54 = vadd.f32 %v6171_v32, %v6123_v34 }
 0xceb   :  { %v6026_v38 = vpop.f32.mrf.mxu3 }
 0xcec   :  { %v6027_v18 = vadd.f32 %v6026_v38, %v12796_v1  ;;  %v6173_v50 = vpop.f32.mrf.mxu2  ;;  %v8211_v1 = vld [vmem:[%s13505_s9 + $0x308] sm:$0xff] }
 0xced   :  { %v6078_v33 = vpop.f32.mrf.mxu0  ;;  %6398 = vmatpush.bf16.msra.mxu3 %v8211_v1 }
 0xcee   :  { %v6076_v2 = vadd.f32 %v6075_v41, %v6027_v18  ;;  %v6127_v8 = vpop.f32.mrf.mxu1 }
 0xcf0   :  { %v6125_v14 = vadd.f32 %v6124_v16, %v6076_v2  ;;  %6224 = vmatmul.bf16.gmra.mxu3 %v12241_v49  ;;  %6273 = vmatmul.bf16.gmra.mxu0 %v13996_v56  ;;  %v13999_v56 = vld [vmem:[#allocation102_spill] sm:$0xff] }
 0xcf1   :  { %6322 = vmatmul.bf16.gmra.mxu1 %v13997_v30  ;;  %6371 = vmatmul.bf16.gmra.mxu2 %v13998_v60 }
 0xcf2   :  { %v12972_v46 = vadd.f32 %v6173_v50, %v6125_v14 }
 0xcf3   :  { %v6029_v48 = vpop.f32.mrf.mxu3 }
 0xcf4   :  { %v6030_v32 = vadd.f32 %v6029_v48, %v12802_v24  ;;  %v6176_v41 = vpop.f32.mrf.mxu2  ;;  %v8227_v24 = vld [vmem:[%s13505_s9 + $0x388] sm:$0xff] }
 0xcf5   :  { %v6080_v3 = vpop.f32.mrf.mxu0  ;;  %6496 = vmatpush.bf16.msra.mxu1 %v8227_v24 }
 0xcf6   :  { %v6079_v16 = vadd.f32 %v6078_v33, %v6030_v32  ;;  %v6129_v49 = vpop.f32.mrf.mxu1 }
 0xcf8   :  { %v6128_v34 = vadd.f32 %v6127_v8, %v6079_v16  ;;  %v8218_v16 = vld [vmem:[%s13505_s9 + $0x340] sm:$0xff] }
 0xcf9   :  { %6448 = vmatpush.bf16.msrb.mxu0 %v8218_v16 }
 0xcfa   :  { %v12978_v26 = vadd.f32 %v6176_v41, %v6128_v34 }
 0xcfb   :  { %v6031_v38 = vpop.f32.mrf.mxu3 }
 0xcfc   :  { %v6032_v18 = vadd.f32 %v6031_v38, %v12818_v44  ;;  %v6178_v50 = vpop.f32.mrf.mxu2  ;;  %v8210_v44 = vld [vmem:[%s13505_s9 + $0x300] sm:$0xff] }
 0xcfd   :  { %v6083_v33 = vpop.f32.mrf.mxu0  ;;  %6399 = vmatpush.bf16.msra.mxu3 %v8210_v44 }
 0xcfe   :  { %v6081_v2 = vadd.f32 %v6080_v3, %v6032_v18  ;;  %v6132_v8 = vpop.f32.mrf.mxu1 }
 0xd00   :  { %v6130_v14 = vadd.f32 %v6129_v49, %v6081_v2  ;;  %6229 = vmatmul.bf16.gmra.mxu3 %v12277_v52  ;;  %6278 = vmatmul.bf16.gmra.mxu0 %v12266_v45  ;;  %v14002_v2 = vld [vmem:[#allocation104_spill] sm:$0xff] }
 0xd01   :  { %6327 = vmatmul.bf16.gmra.mxu1 %v12269_v22  ;;  %6376 = vmatmul.bf16.gmra.mxu2 %v13999_v56  ;;  %v8234_v22 = vld [vmem:[%s13505_s9 + $0x3c0] sm:$0xff] }
 0xd02   :  { %v12994_v30 = vadd.f32 %v6178_v50, %v6130_v14  ;;  %6546 = vmatpush.bf16.msrb.mxu2 %v8234_v22  ;;  %v14000_v50 = vld [vmem:[#allocation105_spill] sm:$0xff] }
 0xd03   :  { %v6034_v60 = vpop.f32.mrf.mxu3 }
 0xd04   :  { %v6035_v1 = vadd.f32 %v6034_v60, %v12824_v0  ;;  %v6181_v48 = vpop.f32.mrf.mxu2  ;;  %v8226_v0 = vld [vmem:[%s13505_s9 + $0x380] sm:$0xff] }
 0xd05   :  { %v6085_v32 = vpop.f32.mrf.mxu0  ;;  %6497 = vmatpush.bf16.msra.mxu1 %v8226_v0 }
 0xd06   :  { %v6084_v41 = vadd.f32 %v6083_v33, %v6035_v1  ;;  %v6134_v52 = vpop.f32.mrf.mxu1  ;;  %v14001_v33 = vld [vmem:[#allocation103_spill] sm:$0xff] }
 0xd08   :  { %v6133_v3 = vadd.f32 %v6132_v8, %v6084_v41  ;;  %v14003_v8 = vld [vmem:[#allocation106_spill] sm:$0xff] }
 0xd0a   :  { %v13000_v45 = vadd.f32 %v6181_v48, %v6133_v3 }
 0xd0b   :  { %v6036_v49 = vpop.f32.mrf.mxu3 }
 0xd0c   :  { %v6037_v34 = vadd.f32 %v6036_v49, %v12840_v40  ;;  %v6183_v23 = vpop.f32.mrf.mxu2 }
 0xd0d   :  { %v6088_v27 = vpop.f32.mrf.mxu0 }
 0xd0e   :  { %v6086_v24 = vadd.f32 %v6085_v32, %v6037_v34  ;;  %v6137_v38 = vpop.f32.mrf.mxu1 }
 0xd10   :  { %v6135_v18 = vadd.f32 %v6134_v52, %v6086_v24  ;;  %6234 = vmatmul.bf16.gmra.mxu3 %v14000_v50  ;;  %6283 = vmatmul.bf16.gmra.mxu0 %v14001_v33 }
 0xd11   :  { %6332 = vmatmul.bf16.gmra.mxu1 %v14002_v2  ;;  %6381 = vmatmul.bf16.gmra.mxu2 %v14003_v8 }
 0xd12   :  { %v13016_v14 = vadd.f32 %v6183_v23, %v6135_v18  ;;  %v14004_v23 = vld [vmem:[#allocation107_spill] sm:$0xff] }
 0xd13   :  { %v6039_v56 = vpop.f32.mrf.mxu3 }
 0xd14   :  { %v6040_v40 = vadd.f32 %v6039_v56, %v12846_v42  ;;  %v6186_v44 = vpop.f32.mrf.mxu2 }
 0xd15   :  { %v6090_v60 = vpop.f32.mrf.mxu0 }
 0xd16   :  { %v6089_v1 = vadd.f32 %v6088_v27, %v6040_v40  ;;  %v6139_v48 = vpop.f32.mrf.mxu1 }
 0xd18   :  { %v6138_v32 = vadd.f32 %v6137_v38, %v6089_v1 }
 0xd1a   :  { %v13019_v41 = vadd.f32 %v6186_v44, %v6138_v32 }
 0xd1b   :  { %v6041_v52 = vpop.f32.mrf.mxu3 }
 0xd1c   :  { %v6042_v3 = vadd.f32 %v6041_v52, %v12862_v6  ;;  %v6188_v22 = vpop.f32.mrf.mxu2 }
 0xd1d   :  { %v6093_v16 = vpop.f32.mrf.mxu0 }
 0xd1e   :  { %v6091_v0 = vadd.f32 %v6090_v60, %v6042_v3  ;;  %v6142_v49 = vpop.f32.mrf.mxu1 }
 0xd20   :  { %v6140_v34 = vadd.f32 %v6139_v48, %v6091_v0  ;;  %6239 = vmatmul.bf16.gmra.mxu3 %v12364_v59  ;;  %6288 = vmatmul.bf16.gmra.mxu0 %v14004_v23 }
 0xd21   :  { %6337 = vmatmul.bf16.gmra.mxu1 %v12357_v4  ;;  %6386 = vmatmul.bf16.gmra.mxu2 %v12372_v62 }
 0xd22   :  { %v13026_v42 = vadd.f32 %v6188_v22, %v6140_v34 }
 0xd23   :  { %v6044_v27 = vpop.f32.mrf.mxu3 }
 0xd24   :  { %v6045_v24 = vadd.f32 %v6044_v27, %v12868_v58  ;;  %v6191_v38 = vpop.f32.mrf.mxu2 }
 0xd25   :  { %v6095_v6 = vpop.f32.mrf.mxu0 }
 0xd26   :  { %v6094_v18 = vadd.f32 %v6093_v16, %v6045_v24  ;;  %v6144_v50 = vpop.f32.mrf.mxu1 }
 0xd28   :  { %v6143_v33 = vadd.f32 %v6142_v49, %v6094_v18 }
 0xd2a   :  { %v13029_v2 = vadd.f32 %v6191_v38, %v6143_v33 }
 0xd2b   :  { %v6046_v8 = vpop.f32.mrf.mxu3 }
 0xd2c   :  { %v6047_v59 = vadd.f32 %v6046_v8, %v12884_v35  ;;  %v6193_v56 = vpop.f32.mrf.mxu2 }
 0xd2d   :  { %v6254_v40 = vpop.f32.mrf.mxu0 }
 0xd2e   :  { %v6096_v4 = vadd.f32 %v6095_v6, %v6047_v59  ;;  %v6303_v44 = vpop.f32.mrf.mxu1 }
 0xd30   :  { %v6145_v62 = vadd.f32 %v6144_v50, %v6096_v4  ;;  %6400 = vmatmul.bf16.vlgmr.msra.gmra.mxu3 %v12417_v13  ;;  %6449 = vmatmul.bf16.vlgmr.msrb.gmra.mxu0 %v12410_v61 }
 0xd31   :  { %6498 = vmatmul.bf16.vlgmr.msra.gmra.mxu1 %v12413_v57  ;;  %6547 = vmatmul.bf16.vlgmr.msrb.gmra.mxu2 %v12419_v20 }
 0xd32   :  { %v13036_v58 = vadd.f32 %v6193_v56, %v6145_v62 }
 0xd33   :  { %v6205_v60 = vpop.f32.mrf.mxu3 }
 0xd34   :  { %v6206_v1 = vadd.f32 %v6205_v60, %v12890_v29  ;;  %v6352_v48 = vpop.f32.mrf.mxu2 }
 0xd35   :  { %v6256_v35 = vpop.f32.mrf.mxu0 }
 0xd36   :  { %v6255_v32 = vadd.f32 %v6254_v40, %v6206_v1  ;;  %v6305_v52 = vpop.f32.mrf.mxu1 }
 0xd38   :  { %v6304_v3 = vadd.f32 %v6303_v44, %v6255_v32 }
 0xd3a   :  { %v13039_v22 = vadd.f32 %v6352_v48, %v6304_v3 }
 0xd3b   :  { %v6207_v16 = vpop.f32.mrf.mxu3 }
 0xd3c   :  { %v6208_v13 = vadd.f32 %v6207_v16, %v12906_v15  ;;  %v6354_v61 = vpop.f32.mrf.mxu2 }
 0xd3d   :  { %v6259_v0 = vpop.f32.mrf.mxu0 }
 0xd3e   :  { %v6257_v57 = vadd.f32 %v6256_v35, %v6208_v13  ;;  %v6308_v49 = vpop.f32.mrf.mxu1 }
 0xd40   :  { %v6306_v20 = vadd.f32 %v6305_v52, %v6257_v57  ;;  %6405 = vmatmul.bf16.gmra.mxu3 %v12461_v10  ;;  %6454 = vmatmul.bf16.gmra.mxu0 %v12454_v47 }
 0xd41   :  { %6503 = vmatmul.bf16.gmra.mxu1 %v12457_v21  ;;  %6552 = vmatmul.bf16.gmra.mxu2 %v12466_v19 }
 0xd42   :  { %v13046_v29 = vadd.f32 %v6354_v61, %v6306_v20 }
 0xd43   :  { %v6210_v34 = vpop.f32.mrf.mxu3 }
 0xd44   :  { %v6211_v23 = vadd.f32 %v6210_v34, %v12912_v25  ;;  %v6357_v27 = vpop.f32.mrf.mxu2 }
 0xd45   :  { %v6261_v15 = vpop.f32.mrf.mxu0 }
 0xd46   :  { %v6260_v24 = vadd.f32 %v6259_v0, %v6211_v23  ;;  %v6310_v38 = vpop.f32.mrf.mxu1 }
 0xd48   :  { %v6309_v6 = vadd.f32 %v6308_v49, %v6260_v24 }
 0xd4a   :  { %v13049_v18 = vadd.f32 %v6357_v27, %v6309_v6  ;;  %v14006_v27 = vld [vmem:[#allocation46_spill] sm:$0xff] }
 0xd4b   :  { %v6212_v50 = vpop.f32.mrf.mxu3 }
 0xd4c   :  { %v6213_v10 = vadd.f32 %v6212_v50, %v12928_v55  ;;  %v6359_v47 = vpop.f32.mrf.mxu2 }
 0xd4d   :  { %v6264_v33 = vpop.f32.mrf.mxu0 }
 0xd4e   :  { %v6262_v21 = vadd.f32 %v6261_v15, %v6213_v10  ;;  %v6313_v8 = vpop.f32.mrf.mxu1 }
 0xd50   :  { %v6311_v19 = vadd.f32 %v6310_v38, %v6262_v21  ;;  %6410 = vmatmul.bf16.gmra.mxu3 %v12505_v37  ;;  %6459 = vmatmul.bf16.gmra.mxu0 %v12498_v31 }
 0xd51   :  { %6508 = vmatmul.bf16.gmra.mxu1 %v12501_v11  ;;  %6557 = vmatmul.bf16.gmra.mxu2 %v12510_v28 }
 0xd52   :  { %v13056_v25 = vadd.f32 %v6359_v47, %v6311_v19 }
 0xd53   :  { %v6215_v59 = vpop.f32.mrf.mxu3 }
 0xd54   :  { %v6216_v56 = vadd.f32 %v6215_v59, %v12934_v9  ;;  %v6362_v40 = vpop.f32.mrf.mxu2  ;;  %v14005_v9 = vld [vmem:[#allocation41_spill] sm:$0xff] }
 0xd55   :  { %v6266_v55 = vpop.f32.mrf.mxu0 }
 0xd56   :  { %v6265_v4 = vadd.f32 %v6264_v33, %v6216_v56  ;;  %v6315_v44 = vpop.f32.mrf.mxu1 }
 0xd58   :  { %v6314_v62 = vadd.f32 %v6313_v8, %v6265_v4 }
 0xd5a   :  { %v13059_v60 = vadd.f32 %v6362_v40, %v6314_v62 }
 0xd5b   :  { %v6217_v1 = vpop.f32.mrf.mxu3 }
 0xd5c   :  { %v6218_v37 = vadd.f32 %v6217_v1, %v12950_v51  ;;  %v6364_v31 = vpop.f32.mrf.mxu2 }
 0xd5d   :  { %v6269_v48 = vpop.f32.mrf.mxu0 }
 0xd5e   :  { %v6267_v11 = vadd.f32 %v6266_v55, %v6218_v37  ;;  %v6318_v35 = vpop.f32.mrf.mxu1 }
 0xd60   :  { %v6316_v28 = vadd.f32 %v6315_v44, %v6267_v11  ;;  %6415 = vmatmul.bf16.gmra.mxu3 %v12549_v63  ;;  %6464 = vmatmul.bf16.gmra.mxu0 %v12542_v17 }
 0xd61   :  { %6513 = vmatmul.bf16.gmra.mxu1 %v12545_v12  ;;  %6562 = vmatmul.bf16.gmra.mxu2 %v14005_v9  ;;  %v14011_v9 = vld [vmem:[#allocation29_spill] sm:$0xff] }
 0xd62   :  { %v13066_v32 = vadd.f32 %v6364_v31, %v6316_v28  ;;  %v14009_v28 = vld [vmem:[#allocation31_spill] sm:$0xff] }
 0xd63   :  { %v6220_v52 = vpop.f32.mrf.mxu3 }
 0xd64   :  { %v6221_v3 = vadd.f32 %v6220_v52, %v12956_v54  ;;  %v6367_v16 = vpop.f32.mrf.mxu2 }
 0xd65   :  { %v6271_v51 = vpop.f32.mrf.mxu0 }
 0xd66   :  { %v6270_v13 = vadd.f32 %v6269_v48, %v6221_v3  ;;  %v6320_v61 = vpop.f32.mrf.mxu1 }
 0xd68   :  { %v6319_v0 = vadd.f32 %v6318_v35, %v6270_v13  ;;  %v14008_v35 = vld [vmem:[#allocation78_spill] sm:$0xff] }
 0xd6a   :  { %v13069_v57 = vadd.f32 %v6367_v16, %v6319_v0 }
 0xd6b   :  { %v6222_v49 = vpop.f32.mrf.mxu3 }
 0xd6c   :  { %v6223_v63 = vadd.f32 %v6222_v49, %v12972_v46  ;;  %v6369_v17 = vpop.f32.mrf.mxu2 }
 0xd6d   :  { %v6274_v20 = vpop.f32.mrf.mxu0 }
 0xd6e   :  { %v6272_v12 = vadd.f32 %v6271_v51, %v6223_v63  ;;  %v6323_v34 = vpop.f32.mrf.mxu1 }
 0xd70   :  { %v6321_v23 = vadd.f32 %v6320_v61, %v6272_v12  ;;  %6420 = vmatmul.bf16.gmra.mxu3 %v12593_v43  ;;  %6469 = vmatmul.bf16.gmra.mxu0 %v14006_v27 }
 0xd71   :  { %6518 = vmatmul.bf16.gmra.mxu1 %v12589_v36  ;;  %6567 = vmatmul.bf16.gmra.mxu2 %v12598_v7 }
 0xd72   :  { %v13076_v54 = vadd.f32 %v6369_v17, %v6321_v23 }
 0xd73   :  { %v6225_v15 = vpop.f32.mrf.mxu3 }
 0xd74   :  { %v6226_v24 = vadd.f32 %v6225_v15, %v12978_v26  ;;  %v6372_v38 = vpop.f32.mrf.mxu2  ;;  %v14007_v26 = vld [vmem:[#allocation50_spill] sm:$0xff]  ;;  %v14012_v15 = vld [vmem:[#allocation76_spill] sm:$0xff] }
 0xd75   :  { %v6276_v46 = vpop.f32.mrf.mxu0 }
 0xd76   :  { %v6275_v6 = vadd.f32 %v6274_v20, %v6226_v24  ;;  %v6325_v50 = vpop.f32.mrf.mxu1  ;;  %v14013_v24 = vld [vmem:[#allocation58_spill] sm:$0xff] }
 0xd78   :  { %v6324_v10 = vadd.f32 %v6323_v34, %v6275_v6 }
 0xd7a   :  { %v13079_v47 = vadd.f32 %v6372_v38, %v6324_v10  ;;  %v14015_v38 = vld [vmem:[#allocation36_spill] sm:$0xff] }
 0xd7b   :  { %v6227_v33 = vpop.f32.mrf.mxu3 }
 0xd7c   :  { %v6228_v43 = vadd.f32 %v6227_v33, %v12994_v30  ;;  %v6374_v21 = vpop.f32.mrf.mxu2 }
 0xd7d   :  { %v6279_v8 = vpop.f32.mrf.mxu0 }
 0xd7e   :  { %v6277_v36 = vadd.f32 %v6276_v46, %v6228_v43  ;;  %v6328_v19 = vpop.f32.mrf.mxu1 }
 0xd80   :  { %v6326_v7 = vadd.f32 %v6325_v50, %v6277_v36  ;;  %6425 = vmatmul.bf16.gmra.mxu3 %v12637_v39  ;;  %6474 = vmatmul.bf16.gmra.mxu0 %v12630_v53 }
 0xd81   :  { %6523 = vmatmul.bf16.gmra.mxu1 %v12633_v5  ;;  %6572 = vmatmul.bf16.gmra.mxu2 %v14007_v26 }
 0xd82   :  { %v13086_v59 = vadd.f32 %v6374_v21, %v6326_v7 }
 0xd83   :  { %v6230_v56 = vpop.f32.mrf.mxu3 }
 0xd84   :  { %v6231_v40 = vadd.f32 %v6230_v56, %v13000_v45  ;;  %v6377_v55 = vpop.f32.mrf.mxu2  ;;  %v14010_v45 = vld [vmem:[#allocation39_spill] sm:$0xff] }
 0xd85   :  { %v6281_v30 = vpop.f32.mrf.mxu0 }
 0xd86   :  { %v6280_v4 = vadd.f32 %v6279_v8, %v6231_v40  ;;  %v6330_v44 = vpop.f32.mrf.mxu1 }
 0xd88   :  { %v6329_v62 = vadd.f32 %v6328_v19, %v6280_v4 }
 0xd8a   :  { %v13089_v1 = vadd.f32 %v6377_v55, %v6329_v62 }
 0xd8b   :  { %v6232_v37 = vpop.f32.mrf.mxu3 }
 0xd8c   :  { %v6233_v39 = vadd.f32 %v6232_v37, %v13016_v14  ;;  %v6379_v53 = vpop.f32.mrf.mxu2 }
 0xd8d   :  { %v6284_v31 = vpop.f32.mrf.mxu0 }
 0xd8e   :  { %v6282_v5 = vadd.f32 %v6281_v30, %v6233_v39  ;;  %v6333_v48 = vpop.f32.mrf.mxu1 }
 0xd90   :  { %v6331_v11 = vadd.f32 %v6330_v44, %v6282_v5  ;;  %6430 = vmatmul.bf16.gmra.mxu3 %v14008_v35  ;;  %6479 = vmatmul.bf16.gmra.mxu0 %v14009_v28 }
 0xd91   :  { %6528 = vmatmul.bf16.gmra.mxu1 %v14010_v45  ;;  %6577 = vmatmul.bf16.gmra.mxu2 %v14011_v9 }
 0xd92   :  { %v13096_v52 = vadd.f32 %v6379_v53, %v6331_v11 }
 0xd93   :  { %v6235_v3 = vpop.f32.mrf.mxu3 }
 0xd94   :  { %v6236_v16 = vadd.f32 %v6235_v3, %v13019_v41  ;;  %v6382_v51 = vpop.f32.mrf.mxu2  ;;  %v14014_v41 = vld [vmem:[#allocation45_spill] sm:$0xff] }
 0xd95   :  { %v6286_v14 = vpop.f32.mrf.mxu0 }
 0xd96   :  { %v6285_v13 = vadd.f32 %v6284_v31, %v6236_v16  ;;  %v6335_v61 = vpop.f32.mrf.mxu1 }
 0xd98   :  { %v6334_v0 = vadd.f32 %v6333_v48, %v6285_v13  ;;  %v14016_v48 = vld [vmem:[#allocation43_spill] sm:$0xff] }
 0xd9a   :  { %v13099_v49 = vadd.f32 %v6382_v51, %v6334_v0 }
 0xd9b   :  { %v6237_v63 = vpop.f32.mrf.mxu3 }
 0xd9c   :  { %v6238_v17 = vadd.f32 %v6237_v63, %v13026_v42  ;;  %v6384_v20 = vpop.f32.mrf.mxu2 }
 0xd9d   :  { %v6289_v12 = vpop.f32.mrf.mxu0 }
 0xd9e   :  { %v6287_v34 = vadd.f32 %v6286_v14, %v6238_v17  ;;  %v6338_v23 = vpop.f32.mrf.mxu1  ;;  %v14017_v14 = vld [vmem:[#allocation21_spill] sm:$0xff] }
 0xda0   :  { %v6336_v27 = vadd.f32 %v6335_v61, %v6287_v34  ;;  %6435 = vmatmul.bf16.gmra.mxu3 %v14012_v15  ;;  %6484 = vmatmul.bf16.gmra.mxu0 %v14013_v24 }
 0xda1   :  { %6533 = vmatmul.bf16.gmra.mxu1 %v14014_v41  ;;  %6582 = vmatmul.bf16.gmra.mxu2 %v14015_v38 }
 0xda2   :  { %v13106_v46 = vadd.f32 %v6384_v20, %v6336_v27  ;;  %v14018_v27 = vld [vmem:[#allocation82_spill] sm:$0xff] }
 0xda3   :  { %v6240_v6 = vpop.f32.mrf.mxu3 }
 0xda4   :  { %v6241_v50 = vadd.f32 %v6240_v6, %v13029_v2  ;;  %v6387_v10 = vpop.f32.mrf.mxu2 }
 0xda5   :  { %v6291_v42 = vpop.f32.mrf.mxu0 }
 0xda6   :  { %v6290_v33 = vadd.f32 %v6289_v12, %v6241_v50  ;;  %v6340_v43 = vpop.f32.mrf.mxu1 }
 0xda8   :  { %v6339_v21 = vadd.f32 %v6338_v23, %v6290_v33 }
 0xdaa   :  { %v13109_v8 = vadd.f32 %v6387_v10, %v6339_v21 }
 0xdab   :  { %v6242_v36 = vpop.f32.mrf.mxu3 }
 0xdac   :  { %v6243_v19 = vadd.f32 %v6242_v36, %v13036_v58  ;;  %v6389_v7 = vpop.f32.mrf.mxu2 }
 0xdad   :  { %v6450_v26 = vpop.f32.mrf.mxu0 }
 0xdae   :  { %v6292_v56 = vadd.f32 %v6291_v42, %v6243_v19  ;;  %v6499_v40 = vpop.f32.mrf.mxu1 }
 0xdb0   :  { %v6341_v55 = vadd.f32 %v6340_v43, %v6292_v56  ;;  %v14019_v43 = vld [vmem:[#allocation52_spill] sm:$0xff] }
 0xdb2   :  { %v13112_v30 = vadd.f32 %v6389_v7, %v6341_v55 }
 0xdb3   :  { %v6401_v4 = vpop.f32.mrf.mxu3 }
 0xdb4   :  { %v6402_v2 = vadd.f32 %v6401_v4, %v13039_v22  ;;  %v6548_v44 = vpop.f32.mrf.mxu2 }
 0xdb5   :  { %v6452_v62 = vpop.f32.mrf.mxu0 }
 0xdb6   :  { %v6451_v37 = vadd.f32 %v6450_v26, %v6402_v2  ;;  %v6501_v39 = vpop.f32.mrf.mxu1  ;;  %v14020_v2 = vld [vmem:[#allocation23_spill] sm:$0xff] }
 0xdb8   :  { %v6500_v53 = vadd.f32 %v6499_v40, %v6451_v37 }
 0xdba   :  { %v6549_v31 = vadd.f32 %v6548_v44, %v6500_v53 }
 0xdbb   :  { %v6403_v5 = vpop.f32.mrf.mxu3 }
 0xdbc   :  { %v13116_v11 = vadd.f32 %v6549_v31, %v14016_v48  ;;  %v6404_v58 = vadd.f32 %v6403_v5, %v13046_v29  ;;  %v6550_v35 = vpop.f32.mrf.mxu2 }
 0xdbd   :  { %v6455_v28 = vpop.f32.mrf.mxu0 }
 0xdbe   :  { %v6453_v45 = vadd.f32 %v6452_v62, %v6404_v58  ;;  %v6504_v9 = vpop.f32.mrf.mxu1  ;;  %v6604_v3 = vsel %vm146_vm0, %v13116_v11, 0.0 }
 0xdbf   :  { %6605 = vadd.xlane.f32.xlu0 %v6604_v3 }
 0xdc0   :  { %v6502_v22 = vadd.f32 %v6501_v39, %v6453_v45 }
 0xdc2   :  { %v6551_v16 = vadd.f32 %v6550_v35, %v6502_v22 }
 0xdc3   :  { %v6406_v51 = vpop.f32.mrf.mxu3 }
 0xdc4   :  { %v13122_v13 = vadd.f32 %v6551_v16, %v14017_v14  ;;  %v6407_v61 = vadd.f32 %v6406_v51, %v13049_v18  ;;  %v6553_v0 = vpop.f32.mrf.mxu2 }
 0xdc5   :  { %v6457_v63 = vpop.f32.mrf.mxu0 }
 0xdc6   :  { %v6456_v17 = vadd.f32 %v6455_v28, %v6407_v61  ;;  %v6506_v29 = vpop.f32.mrf.mxu1  ;;  %v6607_v20 = vsel %vm146_vm0, %v13122_v13, 0.0 }
 0xdc7   :  { %6608 = vadd.xlane.f32.xlu2 %v6607_v20 }
 0xdc8   :  { %v6505_v12 = vadd.f32 %v6504_v9, %v6456_v17 }
 0xdca   :  { %v6554_v34 = vadd.f32 %v6553_v0, %v6505_v12 }
 0xdcb   :  { %v6408_v23 = vpop.f32.mrf.mxu3 }
 0xdcc   :  { %v13128_v15 = vadd.f32 %v6554_v34, %v14018_v27  ;;  %v6409_v24 = vadd.f32 %v6408_v23, %v13056_v25  ;;  %v6555_v41 = vpop.f32.mrf.mxu2 }
 0xdcd   :  { %v6460_v38 = vpop.f32.mrf.mxu0 }
 0xdce   :  { %v6458_v6 = vadd.f32 %v6457_v63, %v6409_v24  ;;  %v6509_v18 = vpop.f32.mrf.mxu1  ;;  %v6610_v50 = vsel %vm146_vm0, %v13128_v15, 0.0 }
 0xdcf   :  { %6611 = vadd.xlane.f32.xlu1 %v6610_v50  ;;  %v14022_v50 = vld [vmem:[#allocation37_spill] sm:$0xff] }
 0xdd0   :  { %v6507_v10 = vadd.f32 %v6506_v29, %v6458_v6  ;;  %v14021_v29 = vld [vmem:[#allocation22_spill] sm:$0xff] }
 0xdd2   :  { %v6556_v42 = vadd.f32 %v6555_v41, %v6507_v10 }
 0xdd3   :  { %v6411_v33 = vpop.f32.mrf.mxu3 }
 0xdd4   :  { %v13134_v21 = vadd.f32 %v6556_v42, %v14019_v43  ;;  %v6412_v36 = vadd.f32 %v6411_v33, %v13059_v60  ;;  %v6558_v19 = vpop.f32.mrf.mxu2 }
 0xdd5   :  { %v6462_v7 = vpop.f32.mrf.mxu0 }
 0xdd6   :  { %v6461_v26 = vadd.f32 %v6460_v38, %v6412_v36  ;;  %v13137_v25 = vpop.f32.mrf.mxu1  ;;  %v6613_v56 = vsel %vm146_vm0, %v13134_v21, 0.0 }
 0xdd7   :  { %6614 = vadd.xlane.f32.xlu0 %v6613_v56 }
 0xdd8   :  { %v6510_v40 = vadd.f32 %v6509_v18, %v6461_v26 }
 0xdda   :  { %v6559_v55 = vadd.f32 %v6558_v19, %v6510_v40 }
 0xddb   :  { %v6413_v4 = vpop.f32.mrf.mxu3 }
 0xddc   :  { %v13142_v44 = vadd.f32 %v6559_v55, %v14020_v2  ;;  %v13144_v62 = vpop.f32.mrf.mxu2  ;;  %v6414_v40 = vadd.f32 %v6413_v4, %v13066_v32  ;;  %v14023_v55 = vld [vmem:[#allocation25_spill] sm:$0xff] }
 0xddd   :  { %v6465_v37 = vpop.f32.mrf.mxu0 }
 0xdde   :  { %v6514_v39 = vpop.f32.mrf.mxu1  ;;  %v6616_v60 = vsel %vm146_vm0, %v13142_v44, 0.0 }
 0xddf   :  { %6617 = vadd.xlane.f32.xlu2 %v6616_v60  ;;  %v14024_v60 = vld [vmem:[#allocation35_spill] sm:$0xff] }
 0xde3   :  { %v6416_v53 = vpop.f32.mrf.mxu3 }
 0xde4   :  { %v6563_v31 = vpop.f32.mrf.mxu2  ;;  %v6417_v0 = vadd.f32 %v6416_v53, %v13069_v57 }
 0xde5   :  { %v13148_v5 = vpop.f32.mrf.mxu0 }
 0xde6   :  { %v13150_v48 = vpop.f32.mrf.mxu1  ;;  %v6466_v27 = vadd.f32 %v6465_v37, %v6417_v0 }
 0xde8   :  { %v6515_v6 = vadd.f32 %v6514_v39, %v6466_v27 }
 0xdea   :  { %v6564_v43 = vadd.f32 %v6563_v31, %v6515_v6 }
 0xdeb   :  { %v13152_v58 = vpop.f32.mrf.mxu3 }
 0xdec   :  { %v13154_v35 = vpop.f32.mrf.mxu2  ;;  %v13172_v2 = vadd.f32 %v6564_v43, %v14023_v55 }
 0xded   :  { %v6470_v28 = vpop.f32.mrf.mxu0 }
 0xdee   :  { %v6519_v45 = vpop.f32.mrf.mxu1 }
 0xdf3   :  { %v6421_v9 = vpop.f32.mrf.mxu3 }
 0xdf4   :  { %v6422_v3 = vadd.f32 %v6421_v9, %v13079_v47  ;;  %v6568_v22 = vpop.f32.mrf.mxu2 }
 0xdf5   :  { %v6472_v16 = vpop.f32.mrf.mxu0 }
 0xdf6   :  { %v6471_v51 = vadd.f32 %v6470_v28, %v6422_v3  ;;  %v6521_v14 = vpop.f32.mrf.mxu1  ;;  %v6463_v28 = vadd.f32 %v6462_v7, %v6414_v40  ;;  %v6622_v3 = vsel %vm146_vm0, %v13172_v2, 0.0 }
 0xdf8   :  { %v6520_v61 = vadd.f32 %v6519_v45, %v6471_v51 }
 0xdfa   :  { %v6569_v63 = vadd.f32 %v6568_v22, %v6520_v61  ;;  %v14025_v61 = vld [vmem:[#allocation30_spill] sm:$0xff] }
 0xdfb   :  { %v6423_v17 = vpop.f32.mrf.mxu3 }
 0xdfc   :  { %v13159_v20 = vadd.f32 %v6569_v63, %v14021_v29  ;;  %v6424_v12 = vadd.f32 %v6423_v17, %v13086_v59  ;;  %v6570_v34 = vpop.f32.mrf.mxu2 }
 0xdfd   :  { %v6475_v23 = vpop.f32.mrf.mxu0 }
 0xdfe   :  { %v6473_v24 = vadd.f32 %v6472_v16, %v6424_v12  ;;  %v6524_v41 = vpop.f32.mrf.mxu1  ;;  %v6628_v47 = vsel %vm146_vm0, %v13159_v20, 0.0  ;;  %v6512_v16 = vadd.f32 %v13137_v25, %v6463_v28  ;;  %v6419_v25 = vadd.f32 %v13152_v58, %v13076_v54 }
 0xdff   :  { %6629 = vadd.xlane.f32.xlu1 %v6628_v47 }
 0xe00   :  { %v6522_v38 = vadd.f32 %v6521_v14, %v6473_v24  ;;  %v6561_v63 = vadd.f32 %v13144_v62, %v6512_v16 }
 0xe02   :  { %v6571_v18 = vadd.f32 %v6570_v34, %v6522_v38 }
 0xe03   :  { %v6426_v57 = vpop.f32.mrf.mxu3 }
 0xe04   :  { %v13165_v10 = vadd.f32 %v6571_v18, %v14022_v50  ;;  %v6427_v42 = vadd.f32 %v6426_v57, %v13089_v1  ;;  %v6573_v33 = vpop.f32.mrf.mxu2  ;;  %v6468_v18 = vadd.f32 %v13148_v5, %v6419_v25 }
 0xe05   :  { %v6477_v59 = vpop.f32.mrf.mxu0 }
 0xe06   :  { %v6476_v36 = vadd.f32 %v6475_v23, %v6427_v42  ;;  %v6631_v19 = vsel %vm146_vm0, %v13165_v10, 0.0  ;;  %v6526_v26 = vpop.f32.mrf.mxu1  ;;  %v14026_v23 = vld [vmem:[#allocation24_spill] sm:$0xff]  ;;  %v6517_v58 = vadd.f32 %v13150_v48, %v6468_v18 }
 0xe07   :  { %6632 = vadd.xlane.f32.xlu0 %v6631_v19  ;;  %v13191_v27 = vadd.f32 %v6561_v63, %v14026_v23 }
 0xe08   :  { %v6525_v56 = vadd.f32 %v6524_v41, %v6476_v36  ;;  %v14028_v36 = vld [vmem:[#allocation65_spill] sm:$0xff] }
 0xe09   :  { %v6619_v50 = vsel %vm146_vm0, %v13191_v27, 0.0 }
 0xe0a   :  { %v6574_v37 = vadd.f32 %v6573_v33, %v6525_v56 }
 0xe0b   :  { %v6428_v39 = vpop.f32.mrf.mxu3 }
 0xe0c   :  { %v13175_v53 = vadd.f32 %v6574_v37, %v14024_v60  ;;  %v6429_v1 = vadd.f32 %v6428_v39, %v13096_v52  ;;  %v6575_v31 = vpop.f32.mrf.mxu2  ;;  %v14029_v39 = vld [vmem:[#allocation44_spill] sm:$0xff] }
 0xe0d   :  { %v6480_v32 = vpop.f32.mrf.mxu0 }
 0xe0e   :  { %v6478_v45 = vadd.f32 %v6477_v59, %v6429_v1  ;;  %v6634_v9 = vsel %vm146_vm0, %v13175_v53, 0.0  ;;  %v6529_v22 = vpop.f32.mrf.mxu1 }
 0xe0f   :  { %6635 = vadd.xlane.f32.xlu2 %v6634_v9  ;;  %6623 = vadd.xlane.f32.xlu0 %v6622_v3 }
 0xe10   :  { %v6527_v4 = vadd.f32 %v6526_v26, %v6478_v45  ;;  %v6566_v26 = vadd.f32 %v13154_v35, %v6517_v58 }
 0xe12   :  { %v6576_v51 = vadd.f32 %v6575_v31, %v6527_v4  ;;  %v13213_v48 = vadd.f32 %v6566_v26, %v14029_v39  ;;  %v14030_v31 = vld [vmem:[#allocation56_spill] sm:$0xff] }
 0xe13   :  { %v6431_v14 = vpop.f32.mrf.mxu3 }
 0xe14   :  { %v13184_v52 = vadd.f32 %v6576_v51, %v14025_v61  ;;  %v6432_v7 = vadd.f32 %v6431_v14, %v13099_v49  ;;  %v6578_v0 = vpop.f32.mrf.mxu2  ;;  %v14027_v49 = vld [vmem:[#allocation26_spill] sm:$0xff]  ;;  %v6625_v35 = vsel %vm146_vm0, %v13213_v48, 0.0  ;;  %v14031_v14 = vld [vmem:[#allocation73_spill] sm:$0xff] }
 0xe15   :  { %v6482_v34 = vpop.f32.mrf.mxu0 }
 0xe16   :  { %v6481_v17 = vadd.f32 %v6480_v32, %v6432_v7  ;;  %v6637_v29 = vsel %vm146_vm0, %v13184_v52, 0.0  ;;  %v6531_v41 = vpop.f32.mrf.mxu1  ;;  %v14032_v7 = vld [vmem:[#allocation42_spill] sm:$0xff] }
 0xe17   :  { %6638 = vadd.xlane.f32.xlu1 %v6637_v29 }
 0xe18   :  { %v6530_v12 = vadd.f32 %v6529_v22, %v6481_v17 }
 0xe1a   :  { %v6579_v24 = vadd.f32 %v6578_v0, %v6530_v12 }
 0xe1b   :  { %v6433_v47 = vpop.f32.mrf.mxu3 }
 0xe1c   :  { %v13196_v38 = vadd.f32 %v6579_v24, %v14027_v49  ;;  %v6434_v62 = vadd.f32 %v6433_v47, %v13106_v46  ;;  %v6580_v6 = vpop.f32.mrf.mxu2 }
 0xe1d   :  { %v6485_v59 = vpop.f32.mrf.mxu0 }
 0xe1e   :  { %v6483_v57 = vadd.f32 %v6482_v34, %v6434_v62  ;;  %v6640_v42 = vsel %vm146_vm0, %v13196_v38, 0.0  ;;  %v6534_v19 = vpop.f32.mrf.mxu1 }
 0xe1f   :  { %6620 = vadd.xlane.f32.xlu1 %v6619_v50  ;;  %6641 = vadd.xlane.f32.xlu0 %v6640_v42 }
 0xe20   :  { %v6532_v54 = vadd.f32 %v6531_v41, %v6483_v57 }
 0xe22   :  { %v6581_v33 = vadd.f32 %v6580_v6, %v6532_v54 }
 0xe23   :  { %v6436_v43 = vpop.f32.mrf.mxu3 }
 0xe24   :  { %v13206_v46 = vadd.f32 %v6581_v33, %v14028_v36  ;;  %v6437_v5 = vadd.f32 %v6436_v43, %v13109_v8  ;;  %v6583_v55 = vpop.f32.mrf.mxu2 }
 0xe25   :  { %v6487_v45 = vpop.f32.mrf.mxu0 }
 0xe26   :  { %v6486_v56 = vadd.f32 %v6485_v59, %v6437_v5  ;;  %v6643_v40 = vsel %vm146_vm0, %v13206_v46, 0.0  ;;  %v6536_v32 = vpop.f32.mrf.mxu1 }
 0xe27   :  { %6644 = vadd.xlane.f32.xlu2 %v6643_v40 }
 0xe28   :  { %v6535_v37 = vadd.f32 %v6534_v19, %v6486_v56 }
 0xe2a   :  { %v6584_v60 = vadd.f32 %v6583_v55, %v6535_v37 }
 0xe2b   :  { %v6438_v1 = vpop.f32.mrf.mxu3 }
 0xe2c   :  { %v13216_v28 = vadd.f32 %v6584_v60, %v14030_v31  ;;  %v6439_v8 = vadd.f32 %v6438_v1, %v13112_v30  ;;  %v6585_v22 = vpop.f32.mrf.mxu2 }
 0xe2e   :  { %v6488_v9 = vadd.f32 %v6487_v45, %v6439_v8  ;;  %v6646_v3 = vsel %vm146_vm0, %v13216_v28, 0.0 }
 0xe2f   :  { %6626 = vadd.xlane.f32.xlu2 %v6625_v35  ;;  %6647 = vadd.xlane.f32.xlu1 %v6646_v3 }
 0xe30   :  { %v6537_v4 = vadd.f32 %v6536_v32, %v6488_v9 }
 0xe32   :  { %v6586_v16 = vadd.f32 %v6585_v22, %v6537_v4  ;;  %v6606_v51 = vpop.xlane.xlu0 %6605 }
 0xe33   :  { %v6652_v61 = vmul.f32 %v6606_v51, %v14031_v14 }
 0xe34   :  { %v13225_v0 = vadd.f32 %v6586_v16, %v14032_v7 }
 0xe35   :  { %v13228_v30 = vsub.f32 %v13116_v11, %v6652_v61 }
 0xe36   :  { %v6649_v63 = vsel %vm146_vm0, %v13225_v0, 0.0 }
 0xe37   :  { %6650 = vadd.xlane.f32.xlu0 %v6649_v63  ;;  %v6684_v17 = vmul.f32 %v13228_v30, %v13228_v30 }
 0xe39   :  { %v6700_v29 = vsel %vm146_vm0, %v6684_v17, 0.0 }
 0xe3a   :  { %v6609_v12 = vpop.xlane.xlu2 %6608  ;;  %6701 = vadd.xlane.f32.xlu1 %v6700_v29 }
 0xe3b   :  { %v6653_v34 = vmul.f32 %v6609_v12, %v14031_v14 }
 0xe3d   :  { %v13237_v23 = vsub.f32 %v13122_v13, %v6653_v34 }
 0xe3f   :  { %v6685_v11 = vmul.f32 %v13237_v23, %v13237_v23 }
 0xe41   :  { %v6703_v25 = vsel %vm146_vm0, %v6685_v11, 0.0 }
 0xe42   :  { %v6612_v24 = vpop.xlane.xlu1 %6611  ;;  %6704 = vadd.xlane.f32.xlu0 %v6703_v25 }
 0xe43   :  { %v6654_v41 = vmul.f32 %v6612_v24, %v14031_v14 }
 0xe45   :  { %v13244_v47 = vsub.f32 %v13128_v15, %v6654_v41 }
 0xe47   :  { %v6686_v49 = vmul.f32 %v13244_v47, %v13244_v47 }
 0xe49   :  { %v6706_v62 = vsel %vm146_vm0, %v6686_v49, 0.0 }
 0xe4a   :  { %6707 = vadd.xlane.f32.xlu2 %v6706_v62  ;;  %v6615_v13 = vpop.xlane.xlu0 %6614 }
 0xe4b   :  { %v6655_v6 = vmul.f32 %v6615_v13, %v14031_v14 }
 0xe4d   :  { %v13251_v18 = vsub.f32 %v13134_v21, %v6655_v6 }
 0xe4f   :  { %v6687_v57 = vmul.f32 %v13251_v18, %v13251_v18 }
 0xe51   :  { %v6709_v50 = vsel %vm146_vm0, %v6687_v57, 0.0 }
 0xe52   :  { %v6618_v42 = vpop.xlane.xlu2 %6617  ;;  %6710 = vadd.xlane.f32.xlu1 %v6709_v50 }
 0xe53   :  { %v6656_v15 = vmul.f32 %v6618_v42, %v14031_v14 }
 0xe55   :  { %v13258_v54 = vsub.f32 %v13142_v44, %v6656_v15 }
 0xe57   :  { %v6688_v58 = vmul.f32 %v13258_v54, %v13258_v54 }
 0xe59   :  { %v6712_v33 = vsel %vm146_vm0, %v6688_v58, 0.0 }
 0xe5a   :  { %6713 = vadd.xlane.f32.xlu0 %v6712_v33 }
 0xe72   :  { %v6630_v19 = vpop.xlane.xlu1 %6629 }
 0xe73   :  { %v6660_v8 = vmul.f32 %v6630_v19, %v14031_v14 }
 0xe75   :  { %v13292_v32 = vsub.f32 %v13159_v20, %v6660_v8 }
 0xe77   :  { %v6692_v51 = vmul.f32 %v13292_v32, %v13292_v32 }
 0xe7a   :  { %v6633_v21 = vpop.xlane.xlu0 %6632 }
 0xe7b   :  { %v6661_v59 = vmul.f32 %v6633_v21, %v14031_v14 }
 0xe7d   :  { %v13265_v43 = vsub.f32 %v13165_v10, %v6661_v59 }
 0xe7f   :  { %v6693_v36 = vmul.f32 %v13265_v43, %v13265_v43 }
 0xe81   :  { %v6727_v5 = vsel %vm146_vm0, %v6693_v36, 0.0 }
 0xe82   :  { %v6636_v44 = vpop.xlane.xlu2 %6635  ;;  %6728 = vadd.xlane.f32.xlu1 %v6727_v5  ;;  %v6624_v10 = vpop.xlane.xlu0 %6623 }
 0xe83   :  { %v6662_v26 = vmul.f32 %v6636_v44, %v14031_v14  ;;  %v6658_v45 = vmul.f32 %v6624_v10, %v14031_v14 }
 0xe85   :  { %v13272_v56 = vsub.f32 %v13175_v53, %v6662_v26  ;;  %v13295_v4 = vsub.f32 %v13172_v2, %v6658_v45  ;;  %v6724_v2 = vsel %vm146_vm0, %v6692_v51, 0.0 }
 0xe87   :  { %v6694_v40 = vmul.f32 %v13272_v56, %v13272_v56  ;;  %v6690_v61 = vmul.f32 %v13295_v4, %v13295_v4 }
 0xe89   :  { %v6730_v55 = vsel %vm146_vm0, %v6694_v40, 0.0  ;;  %v6718_v7 = vsel %vm146_vm0, %v6690_v61, 0.0 }
 0xe8a   :  { %v6639_v37 = vpop.xlane.xlu1 %6638  ;;  %6731 = vadd.xlane.f32.xlu0 %v6730_v55 }
 0xe92   :  { %v6621_v39 = vpop.xlane.xlu1 %6620  ;;  %v6642_v60 = vpop.xlane.xlu0 %6641 }
 0xe93   :  { %v6657_v1 = vmul.f32 %v6621_v39, %v14031_v14  ;;  %v6664_v31 = vmul.f32 %v6642_v60, %v14031_v14 }
 0xe95   :  { %v13282_v53 = vsub.f32 %v13191_v27, %v6657_v1  ;;  %v13285_v9 = vsub.f32 %v13196_v38, %v6664_v31  ;;  %v6663_v38 = vmul.f32 %v6639_v37, %v14031_v14 }
 0xe97   :  { %v6689_v35 = vmul.f32 %v13282_v53, %v13282_v53  ;;  %v6696_v3 = vmul.f32 %v13285_v9, %v13285_v9  ;;  %v13305_v20 = vsub.f32 %v13184_v52, %v6663_v38 }
 0xe99   :  { %v6715_v22 = vsel %vm146_vm0, %v6689_v35, 0.0  ;;  %v6736_v27 = vsel %vm146_vm0, %v6696_v3, 0.0  ;;  %v6695_v11 = vmul.f32 %v13305_v20, %v13305_v20 }
 0xe9a   :  { %6716 = vadd.xlane.f32.xlu2 %v6715_v22  ;;  %v6645_v16 = vpop.xlane.xlu2 %6644  ;;  %6737 = vadd.xlane.f32.xlu1 %v6736_v27 }
 0xe9b   :  { %v6665_v12 = vmul.f32 %v6645_v16, %v14031_v14  ;;  %v6733_v41 = vsel %vm146_vm0, %v6695_v11, 0.0 }
 0xe9d   :  { %v13320_v24 = vsub.f32 %v13206_v46, %v6665_v12 }
 0xe9f   :  { %v6697_v46 = vmul.f32 %v13320_v24, %v13320_v24 }
 0xea1   :  { %v6739_v58 = vsel %vm146_vm0, %v6697_v46, 0.0 }
 0xea2   :  { %6725 = vadd.xlane.f32.xlu2 %v6724_v2  ;;  %v6627_v63 = vpop.xlane.xlu2 %6626  ;;  %6719 = vadd.xlane.f32.xlu1 %v6718_v7  ;;  %v6648_v29 = vpop.xlane.xlu1 %6647 }
 0xea3   :  { %v6659_v17 = vmul.f32 %v6627_v63, %v14031_v14  ;;  %v6666_v52 = vmul.f32 %v6648_v29, %v14031_v14  ;;  %v13349_v29 = vld [vmem:[%s13507_s11] ss:$0 sm:$0xff] }
 0xea5   :  { %v13312_v34 = vsub.f32 %v13213_v48, %v6659_v17  ;;  %v13325_v62 = vsub.f32 %v13216_v28, %v6666_v52 }
 0xea7   :  { %v6691_v25 = vmul.f32 %v13312_v34, %v13312_v34  ;;  %v6698_v42 = vmul.f32 %v13325_v62, %v13325_v62 }
 0xea9   :  { %v6721_v49 = vsel %vm146_vm0, %v6691_v25, 0.0 }
 0xeaa   :  { %6734 = vadd.xlane.f32.xlu2 %v6733_v41  ;;  %6722 = vadd.xlane.f32.xlu0 %v6721_v49  ;;  %v6651_v48 = vpop.xlane.xlu0 %6650  ;;  %v13355_v41 = vld [vmem:[%s13508_s12] ss:$0 sm:$0xff] }
 0xeab   :  { %v6667_v13 = vmul.f32 %v6651_v48, %v14031_v14 }
 0xead   :  { %v13329_v6 = vsub.f32 %v13225_v0, %v6667_v13  ;;  %v6702_v57 = vpop.xlane.xlu1 %6701  ;;  %v6742_v0 = vsel %vm146_vm0, %v6698_v42, 0.0 }
 0xeae   :  { %v6748_v50 = vmul.f32 %v6702_v57, %v14031_v14 }
 0xeaf   :  { %v6699_v28 = vmul.f32 %v13329_v6, %v13329_v6 }
 0xeb0   :  { %v6764_v15 = vadd.f32 1e-05, %v6748_v50 }
 0xeb1   :  { %v6745_v33 = vsel %vm146_vm0, %v6699_v28, 0.0 }
 0xeb2   :  { %8831 = vrsqrt.f32 %v6764_v15  ;;  %6740 = vadd.xlane.f32.xlu0 %v6739_v58  ;;  %6746 = vadd.xlane.f32.xlu1 %v6745_v33  ;;  %vm6786_vm12 = vweird.f32 %v6764_v15 }
 0xeb3   :  { %6743 = vadd.xlane.f32.xlu2 %v6742_v0 }
 0xeb5   :  { %v6705_v21 = vpop.xlane.xlu0 %6704 }
 0xeb6   :  { %v6749_v59 = vmul.f32 %v6705_v21, %v14031_v14 }
 0xeb8   :  { %v8832_v36 = vpop.eup %8831  ;;  %v6765_v5 = vadd.f32 1e-05, %v6749_v59 }
 0xeb9   :  { %v6781_v19 = vmul.f32 %v8832_v36, %v6764_v15  ;;  %vm6787_vm0 = vweird.f32 %v8832_v36 }
 0xeba   :  { %8833 = vrsqrt.f32 %v6765_v5  ;;  %vm6788_vm13 = vmor %vm6786_vm12, %vm6787_vm0  ;;  %vm6796_vm15 = vweird.f32 %v6765_v5 }
 0xebb   :  { %v6782_v40 = vmul.f32 %v8832_v36, %v6781_v19 }
 0xebd   :  { %v6708_v44 = vpop.xlane.xlu2 %6707  ;;  %v6783_v37 = vmul.f32 0.5, %v6782_v40 }
 0xebe   :  { %v6750_v26 = vmul.f32 %v6708_v44, %v14031_v14 }
 0xebf   :  { %v6784_v31 = vsub.f32 1.5, %v6783_v37 }
 0xec0   :  { %v8834_v55 = vpop.eup %8833  ;;  %v6766_v10 = vadd.f32 1e-05, %v6750_v26 }
 0xec1   :  { %v6791_v39 = vmul.f32 %v8834_v55, %v6765_v5  ;;  %v6785_v3 = vmul.f32 %v8832_v36, %v6784_v31  ;;  %vm6797_vm14 = vweird.f32 %v8834_v55 }
 0xec2   :  { %8835 = vrsqrt.f32 %v6766_v10  ;;  %vm6798_vm1 = vmor %vm6796_vm15, %vm6797_vm14  ;;  %vm6806_vm4 = vweird.f32 %v6766_v10 }
 0xec3   :  { %v6792_v8 = vmul.f32 %v8834_v55, %v6791_v39  ;;  %v6789_v51 = vsel %vm6788_vm13, %v8832_v36, %v6785_v3 }
 0xec4   :  { %v6940_v17 = vmul.f32 %v6789_v51, %v13228_v30 }
 0xec5   :  { %v6711_v60 = vpop.xlane.xlu1 %6710  ;;  %v6793_v22 = vmul.f32 0.5, %v6792_v8 }
 0xec6   :  { %v6751_v1 = vmul.f32 %v6711_v60, %v14031_v14  ;;  %v6960_v25 = vmul.f32 %v13349_v29, %v6940_v17 }
 0xec7   :  { %v6794_v61 = vsub.f32 1.5, %v6793_v22 }
 0xec8   :  { %v8836_v45 = vpop.eup %8835  ;;  %v6767_v35 = vadd.f32 1e-05, %v6751_v1  ;;  %v6980_v57 = vadd.f32 %v13355_v41, %v6960_v25 }
 0xec9   :  { %v6801_v27 = vmul.f32 %v8836_v45, %v6766_v10  ;;  %v6795_v12 = vmul.f32 %v8834_v55, %v6794_v61  ;;  %vm6807_vm3 = vweird.f32 %v8836_v45 }
 0xeca   :  { %8837 = vrsqrt.f32 %v6767_v35  ;;  %vm6808_vm5 = vmor %vm6806_vm4, %vm6807_vm3  ;;  %vm6816_vm7 = vweird.f32 %v6767_v35 }
 0xecb   :  { %v6802_v2 = vmul.f32 %v8836_v45, %v6801_v27  ;;  %v6799_v49 = vsel %vm6798_vm1, %v8834_v55, %v6795_v12 }
 0xecc   :  { %v6941_v46 = vmul.f32 %v6799_v49, %v13237_v23 }
 0xecd   :  { %v6714_v16 = vpop.xlane.xlu0 %6713  ;;  %v6803_v11 = vmul.f32 0.5, %v6802_v2 }
 0xece   :  { %v6752_v38 = vmul.f32 %v6714_v16, %v14031_v14  ;;  %v6961_v15 = vmul.f32 %v13349_v29, %v6941_v46 }
 0xecf   :  { %v6804_v30 = vsub.f32 1.5, %v6803_v11 }
 0xed0   :  { %v8838_v7 = vpop.eup %8837  ;;  %v6768_v63 = vadd.f32 1e-05, %v6752_v38  ;;  %v6981_v21 = vadd.f32 %v13355_v41, %v6961_v15 }
 0xed1   :  { %v6811_v52 = vmul.f32 %v8838_v7, %v6767_v35  ;;  %v6805_v50 = vmul.f32 %v8836_v45, %v6804_v30  ;;  %vm6817_vm6 = vweird.f32 %v8838_v7 }
 0xed2   :  { %8839 = vrsqrt.f32 %v6768_v63  ;;  %vm6818_vm8 = vmor %vm6816_vm7, %vm6817_vm6  ;;  %vm6826_vm10 = vweird.f32 %v6768_v63 }
 0xed3   :  { %v6812_v48 = vmul.f32 %v8838_v7, %v6811_v52  ;;  %v6809_v58 = vsel %vm6808_vm5, %v8836_v45, %v6805_v50 }
 0xed4   :  { %v6942_v59 = vmul.f32 %v6809_v58, %v13244_v47 }
 0xed5   :  { %v6813_v42 = vmul.f32 0.5, %v6812_v48 }
 0xed6   :  { %v6962_v23 = vmul.f32 %v13349_v29, %v6942_v59 }
 0xed7   :  { %v6814_v33 = vsub.f32 1.5, %v6813_v42 }
 0xed8   :  { %v8840_v13 = vpop.eup %8839  ;;  %v6982_v26 = vadd.f32 %v13355_v41, %v6962_v23 }
 0xed9   :  { %v6821_v28 = vmul.f32 %v8840_v13, %v6768_v63  ;;  %v6815_v36 = vmul.f32 %v8838_v7, %v6814_v33  ;;  %vm6827_vm9 = vweird.f32 %v8840_v13 }
 0xeda   :  { %vm6828_vm11 = vmor %vm6826_vm10, %vm6827_vm9 }
 0xedb   :  { %v6822_v0 = vmul.f32 %v8840_v13, %v6821_v28  ;;  %v6819_v19 = vsel %vm6818_vm8, %v8838_v7, %v6815_v36 }
 0xedc   :  { %6996 = vxpose.xlu2.b32.start [1/8] (short) (narrow) %v6980_v57, 32  ;;  %v6943_v40 = vmul.f32 %v6819_v19, %v13251_v18 }
 0xedd   :  { %v6823_v5 = vmul.f32 0.5, %v6822_v0 }
 0xede   :  { %v6963_v47 = vmul.f32 %v13349_v29, %v6943_v40 }
 0xedf   :  { %v6824_v44 = vsub.f32 1.5, %v6823_v5 }
 0xee0   :  { %v6983_v37 = vadd.f32 %v13355_v41, %v6963_v47 }
 0xee1   :  { %v6825_v55 = vmul.f32 %v8840_v13, %v6824_v44 }
 0xee3   :  { %v6829_v10 = vsel %vm6828_vm11, %v8840_v13, %v6825_v55 }
 0xee4   :  { %6997 = vxpose.xlu2.b32.cont [2/8] (short) (narrow) %v6981_v21, 32  ;;  %v6944_v39 = vmul.f32 %v6829_v10, %v13258_v54 }
 0xee6   :  { %v6964_v60 = vmul.f32 %v13349_v29, %v6944_v39 }
 0xee8   :  { %v6984_v1 = vadd.f32 %v13355_v41, %v6964_v60 }
 0xeec   :  { %6998 = vxpose.xlu2.b32.cont [3/8] (short) (narrow) %v6982_v26, 32 }
 0xef4   :  { %6999 = vxpose.xlu2.b32.cont [4/8] (short) (narrow) %v6983_v37, 32 }
 0xef5   :  { %v6729_v31 = vpop.xlane.xlu1 %6728 }
 0xef6   :  { %v6757_v18 = vmul.f32 %v6729_v31, %v14031_v14 }
 0xef8   :  { %v13371_v8 = vadd.f32 1e-05, %v6757_v18 }
 0xefa   :  { %8841 = vrsqrt.f32 %v13371_v8  ;;  %vm6876_vm15 = vweird.f32 %v13371_v8 }
 0xefc   :  { %7000 = vxpose.xlu2.b32.cont [5/8] (short) (narrow) %v6984_v1, 32 }
 0xefd   :  { %v6732_v45 = vpop.xlane.xlu0 %6731 }
 0xefe   :  { %v6758_v54 = vmul.f32 %v6732_v45, %v14031_v14 }
 0xf00   :  { %v13376_v16 = vpop.eup %8841  ;;  %v13378_v38 = vadd.f32 1e-05, %v6758_v54 }
 0xf01   :  { %v6871_v63 = vmul.f32 %v13376_v16, %v13371_v8  ;;  %vm6877_vm14 = vweird.f32 %v13376_v16 }
 0xf02   :  { %vm13416_vm4 = vmor %vm6876_vm15, %vm6877_vm14 }
 0xf03   :  { %v6872_v25 = vmul.f32 %v13376_v16, %v6871_v63 }
 0xf05   :  { %v6873_v28 = vmul.f32 0.5, %v6872_v25 }
 0xf07   :  { %v6874_v44 = vsub.f32 1.5, %v6873_v28 }
 0xf09   :  { %v6875_v31 = vmul.f32 %v13376_v16, %v6874_v44 }
 0xf0d   :  { %v6717_v35 = vpop.xlane.xlu2 %6716  ;;  %v6738_v3 = vpop.xlane.xlu1 %6737 }
 0xf0e   :  { %v6753_v22 = vmul.f32 %v6717_v35, %v14031_v14  ;;  %v6760_v46 = vmul.f32 %v6738_v3, %v14031_v14 }
 0xf10   :  { %v6769_v27 = vadd.f32 1e-05, %v6753_v22  ;;  %v13400_v23 = vadd.f32 1e-05, %v6760_v46 }
 0xf12   :  { %8843 = vrsqrt.f32 %v6769_v27  ;;  %vm6836_vm12 = vweird.f32 %v6769_v27 }
 0xf13   :  { %8845 = vrsqrt.f32 %v13378_v38 }
 0xf15   :  { %v6726_v51 = vpop.xlane.xlu2 %6725  ;;  %v6720_v61 = vpop.xlane.xlu1 %6719 }
 0xf16   :  { %v6756_v2 = vmul.f32 %v6726_v51, %v14031_v14  ;;  %v6754_v7 = vmul.f32 %v6720_v61, %v14031_v14 }
 0xf18   :  { %v8844_v17 = vpop.eup %8843  ;;  %v6772_v12 = vadd.f32 1e-05, %v6756_v2  ;;  %v13385_v11 = vadd.f32 1e-05, %v6754_v7  ;;  %v6879_v7 = vsel %vm13416_vm4, %v13376_v16, %v6875_v31  ;;  %vm6906_vm4 = vweird.f32 %v13400_v23 }
 0xf19   :  { %v6831_v52 = vmul.f32 %v8844_v17, %v6769_v27  ;;  %v13389_v57 = vpop.eup %8845  ;;  %vm6837_vm0 = vweird.f32 %v8844_v17 }
 0xf1a   :  { %8847 = vrsqrt.f32 %v6772_v12  ;;  %v6881_v59 = vmul.f32 %v13389_v57, %v13378_v38  ;;  %vm6838_vm13 = vmor %vm6836_vm12, %vm6837_vm0  ;;  %vm6866_vm5 = vweird.f32 %v6772_v12  ;;  %vm6846_vm7 = vweird.f32 %v13385_v11 }
 0xf1b   :  { %v6832_v49 = vmul.f32 %v8844_v17, %v6831_v52  ;;  %8849 = vrsqrt.f32 %v13385_v11  ;;  %vm6887_vm10 = vweird.f32 %v13389_v57  ;;  %vm6886_vm0 = vweird.f32 %v13378_v38 }
 0xf1c   :  { %v6882_v10 = vmul.f32 %v13389_v57, %v6881_v59 }
 0xf1d   :  { %v6833_v30 = vmul.f32 0.5, %v6832_v49  ;;  %v6735_v48 = vpop.xlane.xlu2 %6734  ;;  %v6723_v13 = vpop.xlane.xlu0 %6722 }
 0xf1e   :  { %v6759_v50 = vmul.f32 %v6735_v48, %v14031_v14  ;;  %v6755_v42 = vmul.f32 %v6723_v13, %v14031_v14  ;;  %v6883_v27 = vmul.f32 0.5, %v6882_v10 }
 0xf1f   :  { %v6834_v15 = vsub.f32 1.5, %v6833_v30 }
 0xf20   :  { %v8848_v58 = vpop.eup %8847  ;;  %v13394_v33 = vadd.f32 1e-05, %v6759_v50  ;;  %v13396_v0 = vadd.f32 1e-05, %v6755_v42  ;;  %v6949_v50 = vmul.f32 %v6879_v7, %v13265_v43 }
 0xf21   :  { %v8850_v21 = vpop.eup %8849  ;;  %v6835_v36 = vmul.f32 %v8844_v17, %v6834_v15  ;;  %v6861_v5 = vmul.f32 %v8848_v58, %v6772_v12  ;;  %vm6867_vm1 = vweird.f32 %v8848_v58 }
 0xf22   :  { %v6841_v19 = vmul.f32 %v8850_v21, %v13385_v11  ;;  %8851 = vrsqrt.f32 %v13394_v33  ;;  %vm6847_vm3 = vweird.f32 %v8850_v21  ;;  %vm6868_vm6 = vmor %vm6866_vm5, %vm6867_vm1  ;;  %v6884_v11 = vsub.f32 1.5, %v6883_v27 }
 0xf23   :  { %v6839_v26 = vsel %vm6838_vm13, %v8844_v17, %v6835_v36  ;;  %v6862_v40 = vmul.f32 %v8848_v58, %v6861_v5  ;;  %8853 = vrsqrt.f32 %v13396_v0  ;;  %vm6848_vm8 = vmor %vm6846_vm7, %vm6847_vm3  ;;  %vm6856_vm11 = vweird.f32 %v13396_v0 }
 0xf24   :  { %v6842_v55 = vmul.f32 %v8850_v21, %v6841_v19  ;;  %v6945_v47 = vmul.f32 %v6839_v26, %v13282_v53  ;;  %8855 = vrsqrt.f32 %v13400_v23  ;;  %v6969_v36 = vmul.f32 %v13349_v29, %v6949_v50  ;;  %vm6888_vm13 = vmor %vm6886_vm0, %vm6887_vm10 }
 0xf25   :  { %v6863_v37 = vmul.f32 0.5, %v6862_v40  ;;  %v6741_v39 = vpop.xlane.xlu0 %6740  ;;  %vm6896_vm15 = vweird.f32 %v13394_v33 }
 0xf26   :  { %v6843_v60 = vmul.f32 0.5, %v6842_v55  ;;  %v6965_v1 = vmul.f32 %v13349_v29, %v6945_v47  ;;  %v6761_v35 = vmul.f32 %v6741_v39, %v14031_v14  ;;  %v6744_v30 = vpop.xlane.xlu2 %6743  ;;  %v6747_v55 = vpop.xlane.xlu1 %6746 }
 0xf27   :  { %v6864_v18 = vsub.f32 1.5, %v6863_v37 }
 0xf28   :  { %v13412_v45 = vpop.eup %8851  ;;  %v6844_v53 = vsub.f32 1.5, %v6843_v60  ;;  %v6985_v3 = vadd.f32 %v13355_v41, %v6965_v1  ;;  %v13431_v49 = vadd.f32 1e-05, %v6761_v35  ;;  %v6763_v60 = vmul.f32 %v6747_v55, %v14031_v14 }
 0xf29   :  { %v8854_v22 = vpop.eup %8853  ;;  %v6865_v51 = vmul.f32 %v8848_v58, %v6864_v18  ;;  %v6891_v8 = vmul.f32 %v13412_v45, %v13394_v33  ;;  %vm6897_vm14 = vweird.f32 %v13412_v45 }
 0xf2a   :  { %v6845_v61 = vmul.f32 %v8850_v21, %v6844_v53  ;;  %v6851_v2 = vmul.f32 %v8854_v22, %v13396_v0  ;;  %7001 = vxpose.xlu2.b32.cont [6/8] (short) (narrow) %v6985_v3, 32  ;;  %v13428_v17 = vpop.eup %8855  ;;  %vm6857_vm9 = vweird.f32 %v8854_v22  ;;  %8857 = vrsqrt.f32 %v13431_v49  ;;  %vm6898_vm1 = vmor %vm6896_vm15, %vm6897_vm14 }
 0xf2b   :  { %v6869_v63 = vsel %vm6868_vm6, %v8848_v58, %v6865_v51  ;;  %v6892_v48 = vmul.f32 %v13412_v45, %v6891_v8  ;;  %v6901_v42 = vmul.f32 %v13428_v17, %v13400_v23  ;;  %vm6858_vm12 = vmor %vm6856_vm11, %vm6857_vm9  ;;  %v6989_v0 = vadd.f32 %v13355_v41, %v6969_v36 }
 0xf2c   :  { %v6948_v12 = vmul.f32 %v6869_v63, %v13292_v32  ;;  %v6849_v52 = vsel %vm6848_vm8, %v8850_v21, %v6845_v61  ;;  %v6852_v25 = vmul.f32 %v8854_v22, %v6851_v2  ;;  %v6762_v32 = vmul.f32 %v6744_v30, %v14031_v14 }
 0xf2d   :  { %v6946_v13 = vmul.f32 %v6849_v52, %v13295_v4  ;;  %v6885_v4 = vmul.f32 %v13389_v57, %v6884_v11  ;;  %v6893_v21 = vmul.f32 0.5, %v6892_v48  ;;  %v6902_v5 = vmul.f32 %v13428_v17, %v6901_v42 }
 0xf2e   :  { %v6853_v46 = vmul.f32 0.5, %v6852_v25  ;;  %v6968_v16 = vmul.f32 %v13349_v29, %v6948_v12  ;;  %v6778_v44 = vadd.f32 1e-05, %v6762_v32  ;;  %vm6907_vm3 = vweird.f32 %v13428_v17 }
 0xf2f   :  { %v6966_v28 = vmul.f32 %v13349_v29, %v6946_v13  ;;  %v6889_v26 = vsel %vm6888_vm13, %v13389_v57, %v6885_v4  ;;  %v6894_v40 = vsub.f32 1.5, %v6893_v21  ;;  %v6903_v39 = vmul.f32 0.5, %v6902_v5  ;;  %vm6908_vm5 = vmor %vm6906_vm4, %vm6907_vm3 }
 0xf30   :  { %v6854_v15 = vsub.f32 1.5, %v6853_v46  ;;  %v6988_v58 = vadd.f32 %v13355_v41, %v6968_v16  ;;  %v8858_v10 = vpop.eup %8857  ;;  %v6950_v37 = vmul.f32 %v6889_v26, %v13272_v56  ;;  %8859 = vrsqrt.f32 %v6778_v44 }
 0xf31   :  { %v6986_v43 = vadd.f32 %v13355_v41, %v6966_v28  ;;  %v6895_v1 = vmul.f32 %v13412_v45, %v6894_v40  ;;  %v6911_v57 = vmul.f32 %v8858_v10, %v13431_v49  ;;  %v6904_v18 = vsub.f32 1.5, %v6903_v39 }
 0xf32   :  { %v6855_v59 = vmul.f32 %v8854_v22, %v6854_v15  ;;  %7028 = vxpose.xlu0.b32.start [1/8] (short) (narrow) %v6988_v58, 32  ;;  %v6970_v56 = vmul.f32 %v13349_v29, %v6950_v37  ;;  %vm6917_vm6 = vweird.f32 %v8858_v10  ;;  %vm6916_vm7 = vweird.f32 %v13431_v49 }
 0xf33   :  { %7002 = vxpose.xlu2.b32.cont [7/8] (short) (narrow) %v6986_v43, 32  ;;  %v6899_v53 = vsel %vm6898_vm1, %v13412_v45, %v6895_v1  ;;  %v6912_v14 = vmul.f32 %v8858_v10, %v6911_v57  ;;  %v6905_v54 = vmul.f32 %v13428_v17, %v6904_v18  ;;  %vm6918_vm8 = vmor %vm6916_vm7, %vm6917_vm6  ;;  %vm6926_vm10 = vweird.f32 %v6778_v44 }
 0xf34   :  { %v6859_v19 = vsel %vm6858_vm12, %v8854_v22, %v6855_v59  ;;  %v6951_v3 = vmul.f32 %v6899_v53, %v13305_v20  ;;  %v6990_v22 = vadd.f32 %v13355_v41, %v6970_v56 }
 0xf35   :  { %v6947_v47 = vmul.f32 %v6859_v19, %v13312_v34  ;;  %v6779_v34 = vadd.f32 1e-05, %v6763_v60  ;;  %v6913_v33 = vmul.f32 0.5, %v6912_v14  ;;  %v6909_v45 = vsel %vm6908_vm5, %v13428_v17, %v6905_v54 }
 0xf36   :  { %v8860_v35 = vpop.eup %8859  ;;  %v6971_v51 = vmul.f32 %v13349_v29, %v6951_v3  ;;  %v6952_v2 = vmul.f32 %v6909_v45, %v13285_v9 }
 0xf37   :  { %v6967_v38 = vmul.f32 %v13349_v29, %v6947_v47  ;;  %8861 = vrsqrt.f32 %v6779_v34  ;;  %v6921_v27 = vmul.f32 %v8860_v35, %v6778_v44  ;;  %v6914_v8 = vsub.f32 1.5, %v6913_v33 }
 0xf38   :  { %v6991_v7 = vadd.f32 %v13355_v41, %v6971_v51  ;;  %v6972_v23 = vmul.f32 %v13349_v29, %v6952_v2  ;;  %vm6927_vm9 = vweird.f32 %v8860_v35  ;;  %vm6936_vm12 = vweird.f32 %v6779_v34 }
 0xf39   :  { %v6987_v31 = vadd.f32 %v13355_v41, %v6967_v38  ;;  %v6922_v61 = vmul.f32 %v8860_v35, %v6921_v27  ;;  %v6915_v63 = vmul.f32 %v8858_v10, %v6914_v8  ;;  %vm6928_vm11 = vmor %vm6926_vm10, %vm6927_vm9 }
 0xf3a   :  { %7029 = vxpose.xlu0.b32.cont [2/8] (short) (narrow) %v6989_v0, 32  ;;  %v6992_v48 = vadd.f32 %v13355_v41, %v6972_v23 }
 0xf3b   :  { %7003 = vxpose.xlu2.b32.end [8/8] (short) (narrow) %v6987_v31, 32  ;;  %v6923_v12 = vmul.f32 0.5, %v6922_v61  ;;  %v6919_v25 = vsel %vm6918_vm8, %v8858_v10, %v6915_v63 }
 0xf3c   :  { %v6953_v11 = vmul.f32 %v6919_v25, %v13320_v24 }
 0xf3d   :  { %v8862_v20 = vpop.eup %8861  ;;  %v6924_v30 = vsub.f32 1.5, %v6923_v12 }
 0xf3e   :  { %v6931_v52 = vmul.f32 %v8862_v20, %v6779_v34  ;;  %v6973_v46 = vmul.f32 %v13349_v29, %v6953_v11  ;;  %vm6937_vm0 = vweird.f32 %v8862_v20 }
 0xf3f   :  { %v6925_v9 = vmul.f32 %v8860_v35, %v6924_v30  ;;  %vm6938_vm13 = vmor %vm6936_vm12, %vm6937_vm0 }
 0xf40   :  { %v6932_v17 = vmul.f32 %v8862_v20, %v6931_v52  ;;  %v6993_v42 = vadd.f32 %v13355_v41, %v6973_v46 }
 0xf41   :  { %v6929_v16 = vsel %vm6928_vm11, %v8860_v35, %v6925_v9 }
 0xf42   :  { %7030 = vxpose.xlu0.b32.cont [3/8] (short) (narrow) %v6990_v22, 32  ;;  %v6933_v13 = vmul.f32 0.5, %v6932_v17  ;;  %v6954_v50 = vmul.f32 %v6929_v16, %v13325_v62 }
 0xf44   :  { %v6934_v49 = vsub.f32 1.5, %v6933_v13  ;;  %v6974_v24 = vmul.f32 %v13349_v29, %v6954_v50 }
 0xf46   :  { %v6935_v32 = vmul.f32 %v8862_v20, %v6934_v49  ;;  %v6994_v58 = vadd.f32 %v13355_v41, %v6974_v24 }
 0xf48   :  { %v6939_v28 = vsel %vm6938_vm13, %v8862_v20, %v6935_v32 }
 0xf49   :  { %v6955_v15 = vmul.f32 %v6939_v28, %v13329_v6 }
 0xf4a   :  { %7031 = vxpose.xlu0.b32.cont [4/8] (short) (narrow) %v6991_v7, 32 }
 0xf4b   :  { %v6975_v4 = vmul.f32 %v13349_v29, %v6955_v15 }
 0xf4d   :  { %v6995_v21 = vadd.f32 %v13355_v41, %v6975_v4 }
 0xf52   :  { %7032 = vxpose.xlu0.b32.cont [5/8] (short) (narrow) %v6992_v48, 32 }
 0xf5a   :  { %7033 = vxpose.xlu0.b32.cont [6/8] (short) (narrow) %v6993_v42, 32 }
 0xf62   :  { %7034 = vxpose.xlu0.b32.cont [7/8] (short) (narrow) %v6994_v58, 32 }
 0xf6a   :  { %7035 = vxpose.xlu0.b32.end [8/8] (short) (narrow) %v6995_v21, 32 }
 0xf9c   :  { %v7012_v62 = vpop.trf.xlu2 }
 0xf9d   :  { %7060 = vst.msk [vmem:[#allocation2] sm:$0xff] %vm1173_vm2, %v7012_v62 }
 0xfa4   :  { %v7013_v43 = vpop.trf.xlu2 }
 0xfa5   :  { %7061 = vst.msk [vmem:[#allocation2 + $0x8] sm:$0xff] %vm1173_vm2, %v7013_v43 }
 0xfac   :  { %v7014_v59 = vpop.trf.xlu2 }
 0xfad   :  { %7062 = vst.msk [vmem:[#allocation2 + $0x10] sm:$0xff] %vm1173_vm2, %v7014_v59 }
 0xfb4   :  { %v7015_v36 = vpop.trf.xlu2 }
 0xfb5   :  { %7063 = vst.msk [vmem:[#allocation2 + $0x18] sm:$0xff] %vm1173_vm2, %v7015_v36 }
 0xfd6   :  { %v7044_v6 = vpop.trf.xlu0 }
 0xfd7   :  { %7064 = vst.msk [vmem:[#allocation2 + $0x20] sm:$0xff] %vm1173_vm2, %v7044_v6 }
 0xfde   :  { %v7045_v5 = vpop.trf.xlu0 }
 0xfdf   :  { %7065 = vst.msk [vmem:[#allocation2 + $0x28] sm:$0xff] %vm1173_vm2, %v7045_v5 }
 0xfe6   :  { %v7046_v29 = vpop.trf.xlu0 }
 0xfe7   :  { %7066 = vst.msk [vmem:[#allocation2 + $0x30] sm:$0xff] %vm1173_vm2, %v7046_v29 }
 0xfee   :  { %v7047_v41 = vpop.trf.xlu0 }
 0xfef   :  { %7067 = vst.msk [vmem:[#allocation2 + $0x38] sm:$0xff] %vm1173_vm2, %v7047_v41 }
 0xff0   :  { %7080 = dma.vmem_to_hbm [thread:$0]  %s7073_s1, 1024, %s7075_s27, [#allocation3], %s8899_s28, %s8899_s28, %s8894_s15  }
 0xff1   :  { %8887 = dma.done.wait [#allocation3], 1024  }
 0xff2   :  { %8888 = vsyncadd [#allocation3], 4294966272 }
 0xff3   :  { %7085 = vsyncpa [#allocation3], 1 }

</bundles_post_ra>
